<compile_context>
chip_gen: v7x
topology: tpu7x:2x2x1
jax: 0.10.0
libtpu: 0.0.40
codegen_flags: <defaults>
</compile_context>

<pallas_src>
import functools

import jax
import jax.numpy as jnp
from jax.experimental import pallas as pl
from jax.experimental.pallas import tpu as pltpu


def _fused_regression_kernel(x_ref, w_ref, b_ref, mask_ref, o_ref, act_ref, *,
                             n_layers, Wp, L, G, n_out_pad):
    """All conv layers for the whole (batch-folded) input, resident in VMEM.

    x_ref:    (C, G+L+G)         bf16  input (halo, margins, pad lanes pre-zeroed)
    w_ref:    (n_layers*9, C, C) bf16  per-tap weights, (c_out, c_in) order
    b_ref:    (n_layers, C, 1)   f32   biases
    mask_ref: (1, L)             f32   1.0 at interior pixels, 0.0 at halo/pad
    o_ref:    (n_out_pad, L)     f32   last-layer output (real channels first)
    act_ref:  (C, G+L+G)         bf16  activation scratch (margin-padded)
    """
    C = x_ref.shape[0]
    T = act_ref.shape[1]
    mask = mask_ref[...]                                   # (1, L)

    # Margins are only ever read (by halo outputs that are masked anyway);
    # zero them once so stale VMEM (possible NaN/Inf) can never propagate.
    act_ref[:, :G] = jnp.zeros((C, G), act_ref.dtype)
    act_ref[:, G + L:] = jnp.zeros((C, T - G - L), act_ref.dtype)

    for layer in range(n_layers):                          # static unroll (5)
        src = x_ref if layer == 0 else act_ref
        acc = None
        for k in range(9):                                 # static unroll (9 taps)
            dy, dx = k // 3 - 1, k % 3 - 1
            off = dy * Wp + dx                             # tap's flat lane offset
            shifted = src[:, G + off:G + off + L]          # (C, L) static slice read
            part = jnp.dot(w_ref[layer * 9 + k], shifted,  # (C,C) x (C,L) on the MXU
                           preferred_element_type=jnp.float32)
            acc = part if acc is None else acc + part
        acc = acc + b_ref[layer]                           # (C,1) lane-broadcast bias

        if layer < n_layers - 1:
            # Fused ReLU, then re-zero halo & lane-pad positions so the zero
            # halo keeps providing 'same' padding for the next layer.
            act_ref[:, G:G + L] = (jnp.maximum(acc, 0.0) * mask).astype(act_ref.dtype)
        else:
            o_ref[...] = acc[:n_out_pad, :]


def regression_model(x_nchw, params):
    """RegressionModel forward. Input NCHW (PyTorch convention) -> (B, H, W, 4)."""
    B, c_in, H, W = x_nchw.shape
    n_layers = len(params)
    n_out = params[-1][0].shape[-1]                            # 4
    C = max(max(w.shape[2], w.shape[3]) for w, _ in params)    # uniform channel width
    n_out_pad = max(8, ((n_out + 7) // 8) * 8)
    Hp, Wp = H + 2, W + 2
    S = Hp * Wp                    # padded pixels per image
    NS = B * S                     # batch folded into the lane (spatial) axis
    L = pl.cdiv(NS, 128) * 128     # lane-dense width (multiple of 128)
    G = 128                        # aligned read margin for the 3x3 lane-offset taps
    T = L + 2 * G

    # ---- one-time packing (plain XLA ops) ----
    # NCHW -> zero-pad channels to C and spatial by 1 -> (C, B*Hp*Wp), placed at
    # lane offset G inside a (C, T) buffer (zero margins / zero lane padding).
    xp = jnp.pad(x_nchw.astype(jnp.float32),
                 ((0, 0), (0, C - c_in), (1, 1), (1, 1)))             # (B, C, Hp, Wp)
    xp = jnp.transpose(xp, (1, 0, 2, 3)).reshape(C, NS)
    xp = jnp.pad(xp, ((0, 0), (G, T - G - NS))).astype(jnp.bfloat16)  # (C, T)

    # Weights: HWIO (3,3,cin,cout) -> 9 taps of (c_out, c_in), zero-padded to
    # (C, C); all layers stacked so they are DMA'd once and stay VMEM-resident.
    ws, bs = [], []
    for w, b in params:
        _, _, cin, cout = w.shape
        wt = jnp.transpose(w, (0, 1, 3, 2)).reshape(9, cout, cin)     # tap-major
        ws.append(jnp.zeros((9, C, C), jnp.float32).at[:, :cout, :cin].set(wt))
        bs.append(jnp.zeros((C,), jnp.float32).at[:cout].set(b))
    w_all = jnp.concatenate(ws, axis=0).astype(jnp.bfloat16)          # (L*9, C, C)
    b_all = jnp.stack(bs)[:, :, None]                                 # (L, C, 1) f32

    # 0/1 mask over the flattened (B, Hp, Wp) axis: 1 at interior pixels only.
    m2d = jnp.zeros((Hp, Wp), jnp.float32).at[1:H + 1, 1:W + 1].set(1.0)
    mask = jnp.pad(jnp.tile(m2d.reshape(-1), B), (0, L - NS)).reshape(1, L)

    kernel = functools.partial(_fused_regression_kernel, n_layers=n_layers,
                               Wp=Wp, L=L, G=G, n_out_pad=n_out_pad)
    vmem = pl.BlockSpec(memory_space=pltpu.MemorySpace.VMEM)

    # Single gridless call: no grid loop at all (batch folded into lanes).
    # TODO(synk): on v7x (2 TCs) a core_map / CORE_PARALLEL split of the lane
    # axis could engage the second core for larger feature maps; at 16x16 the
    # whole batch is one tiny step, so it is not worth it here.
    out = pl.pallas_call(
        kernel,
        out_shape=jax.ShapeDtypeStruct((n_out_pad, L), jnp.float32),
        in_specs=[vmem, vmem, vmem, vmem],
        out_specs=vmem,
        scratch_shapes=[pltpu.VMEM((C, T), jnp.bfloat16)],
    )(xp, w_all, b_all, mask)

    # Keep real output channels & interior pixels -> (B, H, W, n_out), matching
    # the PyTorch module's final permute(0, 2, 3, 1).
    out = out[:n_out, :NS].reshape(n_out, B, Hp, Wp)[:, :, 1:H + 1, 1:W + 1]
    return jnp.transpose(out, (1, 2, 3, 0))


def init_params(key, num_features_in, feature_size):
    """Deterministic PyTorch-Conv2d-style uniform init for the 5 conv layers."""
    layer_dims = [(num_features_in, feature_size)] + \
                 [(feature_size, feature_size)] * 3 + [(feature_size, 4)]
    params = []
    for cin, cout in layer_dims:
        key, kw, kb = jax.random.split(key, 3)
        bound = (cin * 9) ** -0.5
        w = jax.random.uniform(kw, (3, 3, cin, cout), jnp.float32, -bound, bound)
        b = jax.random.uniform(kb, (cout,), jnp.float32, -bound, bound)
        params.append((w, b))
    return params


def _reference(x_nchw, params):
    """Pure-JAX f32 reference matching the PyTorch module (incl. final permute)."""
    x = jnp.transpose(x_nchw, (0, 2, 3, 1))
    n = len(params)
    for i, (w, b) in enumerate(params):
        x = jax.lax.conv_general_dilated(
            x, w, window_strides=(1, 1), padding="SAME",
            dimension_numbers=("NHWC", "HWIO", "NHWC")) + b
        if i < n - 1:
            x = jnp.maximum(x, 0.0)
    return x


if __name__ == "__main__":
    # Small shapes consistent with the module: batch=2, num_features_in=4,
    # spatial=16x16, feature_size=32.
    key = jax.random.PRNGKey(0)
    key, kx = jax.random.split(key)
    B, C_IN, H, W = 2, 4, 16, 16
    FEATURE_SIZE = 32

    x = jax.random.normal(kx, (B, C_IN, H, W), jnp.float32)   # NCHW like PyTorch
    params = init_params(key, C_IN, FEATURE_SIZE)

    out = jax.jit(regression_model)(x, params)
    out = jax.block_until_ready(out)
    assert out.shape == (B, H, W, 4), out.shape

    # Correctness vs a pure-JAX f32 reference (bf16 storage -> loose tolerance).
    ref = _reference(x, params)
    err = float(jnp.max(jnp.abs(out - ref)))
    assert err < 2e-2, f"max abs err {err}"

    print("KERNEL_OK")
</pallas_src>

<mosaic_0001>
module attributes {stable_mosaic.version = 11 : i64} {
  func.func @_fused_regression_kernel(%arg0: memref<32x1024xbf16, #tpu.memory_space<vmem>>, %arg1: memref<45x32x32xbf16, #tpu.memory_space<vmem>>, %arg2: memref<5x32x1xf32, #tpu.memory_space<vmem>>, %arg3: memref<1x768xf32, #tpu.memory_space<vmem>>, %arg4: memref<8x768xf32, #tpu.memory_space<vmem>>, %arg5: memref<32x1024xbf16, #tpu.memory_space<vmem>>) attributes {dimension_semantics = [], scalar_prefetch = 0 : i64, scratch_operands = 1 : i64, tpu.core_type = #tpu.core_type<tc>} {
    %c0 = arith.constant 0 : index
    %c0_0 = arith.constant 0 : index
    %0 = vector.load %arg3[%c0, %c0_0] : memref<1x768xf32, #tpu.memory_space<vmem>>, vector<1x768xf32>
    %cst = arith.constant 0.000000e+00 : bf16
    %1 = vector.broadcast %cst : bf16 to vector<32x128xbf16>
    %c0_1 = arith.constant 0 : index
    %c0_2 = arith.constant 0 : index
    %2 = vector.load %arg5[%c0_1, %c0_2] : memref<32x1024xbf16, #tpu.memory_space<vmem>>, vector<32x128xbf16>
    tpu.vector_store %arg5[%c0_1, %c0_2], %1 {strides = array<i32>} : memref<32x1024xbf16, #tpu.memory_space<vmem>>, vector<32x128xbf16>,
    %cst_3 = arith.constant 0.000000e+00 : bf16
    %3 = vector.broadcast %cst_3 : bf16 to vector<32x128xbf16>
    %c0_4 = arith.constant 0 : index
    %c896 = arith.constant 896 : index
    %4 = vector.load %arg5[%c0_4, %c896] : memref<32x1024xbf16, #tpu.memory_space<vmem>>, vector<32x128xbf16>
    tpu.vector_store %arg5[%c0_4, %c896], %3 {strides = array<i32>} : memref<32x1024xbf16, #tpu.memory_space<vmem>>, vector<32x128xbf16>,
    %c0_5 = arith.constant 0 : index
    %c109 = arith.constant 109 : index
    %5 = vector.load %arg0[%c0_5, %c109] : memref<32x1024xbf16, #tpu.memory_space<vmem>>, vector<32x768xbf16>
    %c0_6 = arith.constant 0 : index
    %c0_7 = arith.constant 0 : index
    %c0_8 = arith.constant 0 : index
    %6 = vector.load %arg1[%c0_6, %c0_7, %c0_8] : memref<45x32x32xbf16, #tpu.memory_space<vmem>>, vector<1x32x32xbf16>
    %7 = vector.shape_cast %6 : vector<1x32x32xbf16> to vector<32x32xbf16>
    %cst_9 = arith.constant dense<0.000000e+00> : vector<32x768xf32>
    %8 = tpu.matmul %7, %5, %cst_9 {dimension_numbers = #tpu.dot_dimension_numbers<[1], [0], [0], [1], [0, 0, 1, 1], [], []>} : vector<32x32xbf16>, vector<32x768xbf16>, vector<32x768xf32> -> vector<32x768xf32>
    %c0_10 = arith.constant 0 : index
    %c110 = arith.constant 110 : index
    %9 = vector.load %arg0[%c0_10, %c110] : memref<32x1024xbf16, #tpu.memory_space<vmem>>, vector<32x768xbf16>
    %c1 = arith.constant 1 : index
    %c0_11 = arith.constant 0 : index
    %c0_12 = arith.constant 0 : index
    %10 = vector.load %arg1[%c1, %c0_11, %c0_12] : memref<45x32x32xbf16, #tpu.memory_space<vmem>>, vector<1x32x32xbf16>
    %11 = vector.shape_cast %10 : vector<1x32x32xbf16> to vector<32x32xbf16>
    %cst_13 = arith.constant dense<0.000000e+00> : vector<32x768xf32>
    %12 = tpu.matmul %11, %9, %cst_13 {dimension_numbers = #tpu.dot_dimension_numbers<[1], [0], [0], [1], [0, 0, 1, 1], [], []>} : vector<32x32xbf16>, vector<32x768xbf16>, vector<32x768xf32> -> vector<32x768xf32>
    %13 = arith.addf %8, %12 : vector<32x768xf32>
    %c0_14 = arith.constant 0 : index
    %c111 = arith.constant 111 : index
    %14 = vector.load %arg0[%c0_14, %c111] : memref<32x1024xbf16, #tpu.memory_space<vmem>>, vector<32x768xbf16>
    %c2 = arith.constant 2 : index
    %c0_15 = arith.constant 0 : index
    %c0_16 = arith.constant 0 : index
    %15 = vector.load %arg1[%c2, %c0_15, %c0_16] : memref<45x32x32xbf16, #tpu.memory_space<vmem>>, vector<1x32x32xbf16>
    %16 = vector.shape_cast %15 : vector<1x32x32xbf16> to vector<32x32xbf16>
    %cst_17 = arith.constant dense<0.000000e+00> : vector<32x768xf32>
    %17 = tpu.matmul %16, %14, %cst_17 {dimension_numbers = #tpu.dot_dimension_numbers<[1], [0], [0], [1], [0, 0, 1, 1], [], []>} : vector<32x32xbf16>, vector<32x768xbf16>, vector<32x768xf32> -> vector<32x768xf32>
    %18 = arith.addf %13, %17 : vector<32x768xf32>
    %c0_18 = arith.constant 0 : index
    %c127 = arith.constant 127 : index
    %19 = vector.load %arg0[%c0_18, %c127] : memref<32x1024xbf16, #tpu.memory_space<vmem>>, vector<32x768xbf16>
    %c3 = arith.constant 3 : index
    %c0_19 = arith.constant 0 : index
    %c0_20 = arith.constant 0 : index
    %20 = vector.load %arg1[%c3, %c0_19, %c0_20] : memref<45x32x32xbf16, #tpu.memory_space<vmem>>, vector<1x32x32xbf16>
    %21 = vector.shape_cast %20 : vector<1x32x32xbf16> to vector<32x32xbf16>
    %cst_21 = arith.constant dense<0.000000e+00> : vector<32x768xf32>
    %22 = tpu.matmul %21, %19, %cst_21 {dimension_numbers = #tpu.dot_dimension_numbers<[1], [0], [0], [1], [0, 0, 1, 1], [], []>} : vector<32x32xbf16>, vector<32x768xbf16>, vector<32x768xf32> -> vector<32x768xf32>
    %23 = arith.addf %18, %22 : vector<32x768xf32>
    %c0_22 = arith.constant 0 : index
    %c128 = arith.constant 128 : index
    %24 = vector.load %arg0[%c0_22, %c128] : memref<32x1024xbf16, #tpu.memory_space<vmem>>, vector<32x768xbf16>
    %c4 = arith.constant 4 : index
    %c0_23 = arith.constant 0 : index
    %c0_24 = arith.constant 0 : index
    %25 = vector.load %arg1[%c4, %c0_23, %c0_24] : memref<45x32x32xbf16, #tpu.memory_space<vmem>>, vector<1x32x32xbf16>
    %26 = vector.shape_cast %25 : vector<1x32x32xbf16> to vector<32x32xbf16>
    %cst_25 = arith.constant dense<0.000000e+00> : vector<32x768xf32>
    %27 = tpu.matmul %26, %24, %cst_25 {dimension_numbers = #tpu.dot_dimension_numbers<[1], [0], [0], [1], [0, 0, 1, 1], [], []>} : vector<32x32xbf16>, vector<32x768xbf16>, vector<32x768xf32> -> vector<32x768xf32>
    %28 = arith.addf %23, %27 : vector<32x768xf32>
    %c0_26 = arith.constant 0 : index
    %c129 = arith.constant 129 : index
    %29 = vector.load %arg0[%c0_26, %c129] : memref<32x1024xbf16, #tpu.memory_space<vmem>>, vector<32x768xbf16>
    %c5 = arith.constant 5 : index
    %c0_27 = arith.constant 0 : index
    %c0_28 = arith.constant 0 : index
    %30 = vector.load %arg1[%c5, %c0_27, %c0_28] : memref<45x32x32xbf16, #tpu.memory_space<vmem>>, vector<1x32x32xbf16>
    %31 = vector.shape_cast %30 : vector<1x32x32xbf16> to vector<32x32xbf16>
    %cst_29 = arith.constant dense<0.000000e+00> : vector<32x768xf32>
    %32 = tpu.matmul %31, %29, %cst_29 {dimension_numbers = #tpu.dot_dimension_numbers<[1], [0], [0], [1], [0, 0, 1, 1], [], []>} : vector<32x32xbf16>, vector<32x768xbf16>, vector<32x768xf32> -> vector<32x768xf32>
    %33 = arith.addf %28, %32 : vector<32x768xf32>
    %c0_30 = arith.constant 0 : index
    %c145 = arith.constant 145 : index
    %34 = vector.load %arg0[%c0_30, %c145] : memref<32x1024xbf16, #tpu.memory_space<vmem>>, vector<32x768xbf16>
    %c6 = arith.constant 6 : index
    %c0_31 = arith.constant 0 : index
    %c0_32 = arith.constant 0 : index
    %35 = vector.load %arg1[%c6, %c0_31, %c0_32] : memref<45x32x32xbf16, #tpu.memory_space<vmem>>, vector<1x32x32xbf16>
    %36 = vector.shape_cast %35 : vector<1x32x32xbf16> to vector<32x32xbf16>
    %cst_33 = arith.constant dense<0.000000e+00> : vector<32x768xf32>
    %37 = tpu.matmul %36, %34, %cst_33 {dimension_numbers = #tpu.dot_dimension_numbers<[1], [0], [0], [1], [0, 0, 1, 1], [], []>} : vector<32x32xbf16>, vector<32x768xbf16>, vector<32x768xf32> -> vector<32x768xf32>
    %38 = arith.addf %33, %37 : vector<32x768xf32>
    %c0_34 = arith.constant 0 : index
    %c146 = arith.constant 146 : index
    %39 = vector.load %arg0[%c0_34, %c146] : memref<32x1024xbf16, #tpu.memory_space<vmem>>, vector<32x768xbf16>
    %c7 = arith.constant 7 : index
    %c0_35 = arith.constant 0 : index
    %c0_36 = arith.constant 0 : index
    %40 = vector.load %arg1[%c7, %c0_35, %c0_36] : memref<45x32x32xbf16, #tpu.memory_space<vmem>>, vector<1x32x32xbf16>
    %41 = vector.shape_cast %40 : vector<1x32x32xbf16> to vector<32x32xbf16>
    %cst_37 = arith.constant dense<0.000000e+00> : vector<32x768xf32>
    %42 = tpu.matmul %41, %39, %cst_37 {dimension_numbers = #tpu.dot_dimension_numbers<[1], [0], [0], [1], [0, 0, 1, 1], [], []>} : vector<32x32xbf16>, vector<32x768xbf16>, vector<32x768xf32> -> vector<32x768xf32>
    %43 = arith.addf %38, %42 : vector<32x768xf32>
    %c0_38 = arith.constant 0 : index
    %c147 = arith.constant 147 : index
    %44 = vector.load %arg0[%c0_38, %c147] : memref<32x1024xbf16, #tpu.memory_space<vmem>>, vector<32x768xbf16>
    %c8 = arith.constant 8 : index
    %c0_39 = arith.constant 0 : index
    %c0_40 = arith.constant 0 : index
    %45 = vector.load %arg1[%c8, %c0_39, %c0_40] : memref<45x32x32xbf16, #tpu.memory_space<vmem>>, vector<1x32x32xbf16>
    %46 = vector.shape_cast %45 : vector<1x32x32xbf16> to vector<32x32xbf16>
    %cst_41 = arith.constant dense<0.000000e+00> : vector<32x768xf32>
    %47 = tpu.matmul %46, %44, %cst_41 {dimension_numbers = #tpu.dot_dimension_numbers<[1], [0], [0], [1], [0, 0, 1, 1], [], []>} : vector<32x32xbf16>, vector<32x768xbf16>, vector<32x768xf32> -> vector<32x768xf32>
    %48 = arith.addf %43, %47 : vector<32x768xf32>
    %c0_42 = arith.constant 0 : index
    %c0_43 = arith.constant 0 : index
    %c0_44 = arith.constant 0 : index
    %49 = vector.load %arg2[%c0_42, %c0_43, %c0_44] : memref<5x32x1xf32, #tpu.memory_space<vmem>>, vector<1x32x1xf32>
    %50 = vector.shape_cast %49 : vector<1x32x1xf32> to vector<32x1xf32>
    %51 = vector.broadcast %50 : vector<32x1xf32> to vector<32x768xf32>
    %52 = arith.addf %48, %51 : vector<32x768xf32>
    %cst_45 = arith.constant 0.000000e+00 : f32
    %53 = vector.broadcast %cst_45 : f32 to vector<32x768xf32>
    %54 = arith.maximumf %52, %53 : vector<32x768xf32>
    %55 = vector.broadcast %0 : vector<1x768xf32> to vector<32x768xf32>
    %56 = arith.mulf %54, %55 : vector<32x768xf32>
    %57 = arith.truncf %56 : vector<32x768xf32> to vector<32x768xbf16>
    %c0_46 = arith.constant 0 : index
    %c128_47 = arith.constant 128 : index
    %58 = vector.load %arg5[%c0_46, %c128_47] : memref<32x1024xbf16, #tpu.memory_space<vmem>>, vector<32x768xbf16>
    tpu.vector_store %arg5[%c0_46, %c128_47], %57 {strides = array<i32>} : memref<32x1024xbf16, #tpu.memory_space<vmem>>, vector<32x768xbf16>,
    %c0_48 = arith.constant 0 : index
    %c109_49 = arith.constant 109 : index
    %59 = vector.load %arg5[%c0_48, %c109_49] : memref<32x1024xbf16, #tpu.memory_space<vmem>>, vector<32x768xbf16>
    %c9 = arith.constant 9 : index
    %c0_50 = arith.constant 0 : index
    %c0_51 = arith.constant 0 : index
    %60 = vector.load %arg1[%c9, %c0_50, %c0_51] : memref<45x32x32xbf16, #tpu.memory_space<vmem>>, vector<1x32x32xbf16>
    %61 = vector.shape_cast %60 : vector<1x32x32xbf16> to vector<32x32xbf16>
    %cst_52 = arith.constant dense<0.000000e+00> : vector<32x768xf32>
    %62 = tpu.matmul %61, %59, %cst_52 {dimension_numbers = #tpu.dot_dimension_numbers<[1], [0], [0], [1], [0, 0, 1, 1], [], []>} : vector<32x32xbf16>, vector<32x768xbf16>, vector<32x768xf32> -> vector<32x768xf32>
    %c0_53 = arith.constant 0 : index
    %c110_54 = arith.constant 110 : index
    %63 = vector.load %arg5[%c0_53, %c110_54] : memref<32x1024xbf16, #tpu.memory_space<vmem>>, vector<32x768xbf16>
    %c10 = arith.constant 10 : index
    %c0_55 = arith.constant 0 : index
    %c0_56 = arith.constant 0 : index
    %64 = vector.load %arg1[%c10, %c0_55, %c0_56] : memref<45x32x32xbf16, #tpu.memory_space<vmem>>, vector<1x32x32xbf16>
    %65 = vector.shape_cast %64 : vector<1x32x32xbf16> to vector<32x32xbf16>
    %cst_57 = arith.constant dense<0.000000e+00> : vector<32x768xf32>
    %66 = tpu.matmul %65, %63, %cst_57 {dimension_numbers = #tpu.dot_dimension_numbers<[1], [0], [0], [1], [0, 0, 1, 1], [], []>} : vector<32x32xbf16>, vector<32x768xbf16>, vector<32x768xf32> -> vector<32x768xf32>
    %67 = arith.addf %62, %66 : vector<32x768xf32>
    %c0_58 = arith.constant 0 : index
    %c111_59 = arith.constant 111 : index
    %68 = vector.load %arg5[%c0_58, %c111_59] : memref<32x1024xbf16, #tpu.memory_space<vmem>>, vector<32x768xbf16>
    %c11 = arith.constant 11 : index
    %c0_60 = arith.constant 0 : index
    %c0_61 = arith.constant 0 : index
    %69 = vector.load %arg1[%c11, %c0_60, %c0_61] : memref<45x32x32xbf16, #tpu.memory_space<vmem>>, vector<1x32x32xbf16>
    %70 = vector.shape_cast %69 : vector<1x32x32xbf16> to vector<32x32xbf16>
    %cst_62 = arith.constant dense<0.000000e+00> : vector<32x768xf32>
    %71 = tpu.matmul %70, %68, %cst_62 {dimension_numbers = #tpu.dot_dimension_numbers<[1], [0], [0], [1], [0, 0, 1, 1], [], []>} : vector<32x32xbf16>, vector<32x768xbf16>, vector<32x768xf32> -> vector<32x768xf32>
    %72 = arith.addf %67, %71 : vector<32x768xf32>
    %c0_63 = arith.constant 0 : index
    %c127_64 = arith.constant 127 : index
    %73 = vector.load %arg5[%c0_63, %c127_64] : memref<32x1024xbf16, #tpu.memory_space<vmem>>, vector<32x768xbf16>
    %c12 = arith.constant 12 : index
    %c0_65 = arith.constant 0 : index
    %c0_66 = arith.constant 0 : index
    %74 = vector.load %arg1[%c12, %c0_65, %c0_66] : memref<45x32x32xbf16, #tpu.memory_space<vmem>>, vector<1x32x32xbf16>
    %75 = vector.shape_cast %74 : vector<1x32x32xbf16> to vector<32x32xbf16>
    %cst_67 = arith.constant dense<0.000000e+00> : vector<32x768xf32>
    %76 = tpu.matmul %75, %73, %cst_67 {dimension_numbers = #tpu.dot_dimension_numbers<[1], [0], [0], [1], [0, 0, 1, 1], [], []>} : vector<32x32xbf16>, vector<32x768xbf16>, vector<32x768xf32> -> vector<32x768xf32>
    %77 = arith.addf %72, %76 : vector<32x768xf32>
    %c0_68 = arith.constant 0 : index
    %c128_69 = arith.constant 128 : index
    %78 = vector.load %arg5[%c0_68, %c128_69] : memref<32x1024xbf16, #tpu.memory_space<vmem>>, vector<32x768xbf16>
    %c13 = arith.constant 13 : index
    %c0_70 = arith.constant 0 : index
    %c0_71 = arith.constant 0 : index
    %79 = vector.load %arg1[%c13, %c0_70, %c0_71] : memref<45x32x32xbf16, #tpu.memory_space<vmem>>, vector<1x32x32xbf16>
    %80 = vector.shape_cast %79 : vector<1x32x32xbf16> to vector<32x32xbf16>
    %cst_72 = arith.constant dense<0.000000e+00> : vector<32x768xf32>
    %81 = tpu.matmul %80, %78, %cst_72 {dimension_numbers = #tpu.dot_dimension_numbers<[1], [0], [0], [1], [0, 0, 1, 1], [], []>} : vector<32x32xbf16>, vector<32x768xbf16>, vector<32x768xf32> -> vector<32x768xf32>
    %82 = arith.addf %77, %81 : vector<32x768xf32>
    %c0_73 = arith.constant 0 : index
    %c129_74 = arith.constant 129 : index
    %83 = vector.load %arg5[%c0_73, %c129_74] : memref<32x1024xbf16, #tpu.memory_space<vmem>>, vector<32x768xbf16>
    %c14 = arith.constant 14 : index
    %c0_75 = arith.constant 0 : index
    %c0_76 = arith.constant 0 : index
    %84 = vector.load %arg1[%c14, %c0_75, %c0_76] : memref<45x32x32xbf16, #tpu.memory_space<vmem>>, vector<1x32x32xbf16>
    %85 = vector.shape_cast %84 : vector<1x32x32xbf16> to vector<32x32xbf16>
    %cst_77 = arith.constant dense<0.000000e+00> : vector<32x768xf32>
    %86 = tpu.matmul %85, %83, %cst_77 {dimension_numbers = #tpu.dot_dimension_numbers<[1], [0], [0], [1], [0, 0, 1, 1], [], []>} : vector<32x32xbf16>, vector<32x768xbf16>, vector<32x768xf32> -> vector<32x768xf32>
    %87 = arith.addf %82, %86 : vector<32x768xf32>
    %c0_78 = arith.constant 0 : index
    %c145_79 = arith.constant 145 : index
    %88 = vector.load %arg5[%c0_78, %c145_79] : memref<32x1024xbf16, #tpu.memory_space<vmem>>, vector<32x768xbf16>
    %c15 = arith.constant 15 : index
    %c0_80 = arith.constant 0 : index
    %c0_81 = arith.constant 0 : index
    %89 = vector.load %arg1[%c15, %c0_80, %c0_81] : memref<45x32x32xbf16, #tpu.memory_space<vmem>>, vector<1x32x32xbf16>
    %90 = vector.shape_cast %89 : vector<1x32x32xbf16> to vector<32x32xbf16>
    %cst_82 = arith.constant dense<0.000000e+00> : vector<32x768xf32>
    %91 = tpu.matmul %90, %88, %cst_82 {dimension_numbers = #tpu.dot_dimension_numbers<[1], [0], [0], [1], [0, 0, 1, 1], [], []>} : vector<32x32xbf16>, vector<32x768xbf16>, vector<32x768xf32> -> vector<32x768xf32>
    %92 = arith.addf %87, %91 : vector<32x768xf32>
    %c0_83 = arith.constant 0 : index
    %c146_84 = arith.constant 146 : index
    %93 = vector.load %arg5[%c0_83, %c146_84] : memref<32x1024xbf16, #tpu.memory_space<vmem>>, vector<32x768xbf16>
    %c16 = arith.constant 16 : index
    %c0_85 = arith.constant 0 : index
    %c0_86 = arith.constant 0 : index
    %94 = vector.load %arg1[%c16, %c0_85, %c0_86] : memref<45x32x32xbf16, #tpu.memory_space<vmem>>, vector<1x32x32xbf16>
    %95 = vector.shape_cast %94 : vector<1x32x32xbf16> to vector<32x32xbf16>
    %cst_87 = arith.constant dense<0.000000e+00> : vector<32x768xf32>
    %96 = tpu.matmul %95, %93, %cst_87 {dimension_numbers = #tpu.dot_dimension_numbers<[1], [0], [0], [1], [0, 0, 1, 1], [], []>} : vector<32x32xbf16>, vector<32x768xbf16>, vector<32x768xf32> -> vector<32x768xf32>
    %97 = arith.addf %92, %96 : vector<32x768xf32>
    %c0_88 = arith.constant 0 : index
    %c147_89 = arith.constant 147 : index
    %98 = vector.load %arg5[%c0_88, %c147_89] : memref<32x1024xbf16, #tpu.memory_space<vmem>>, vector<32x768xbf16>
    %c17 = arith.constant 17 : index
    %c0_90 = arith.constant 0 : index
    %c0_91 = arith.constant 0 : index
    %99 = vector.load %arg1[%c17, %c0_90, %c0_91] : memref<45x32x32xbf16, #tpu.memory_space<vmem>>, vector<1x32x32xbf16>
    %100 = vector.shape_cast %99 : vector<1x32x32xbf16> to vector<32x32xbf16>
    %cst_92 = arith.constant dense<0.000000e+00> : vector<32x768xf32>
    %101 = tpu.matmul %100, %98, %cst_92 {dimension_numbers = #tpu.dot_dimension_numbers<[1], [0], [0], [1], [0, 0, 1, 1], [], []>} : vector<32x32xbf16>, vector<32x768xbf16>, vector<32x768xf32> -> vector<32x768xf32>
    %102 = arith.addf %97, %101 : vector<32x768xf32>
    %c1_93 = arith.constant 1 : index
    %c0_94 = arith.constant 0 : index
    %c0_95 = arith.constant 0 : index
    %103 = vector.load %arg2[%c1_93, %c0_94, %c0_95] : memref<5x32x1xf32, #tpu.memory_space<vmem>>, vector<1x32x1xf32>
    %104 = vector.shape_cast %103 : vector<1x32x1xf32> to vector<32x1xf32>
    %105 = vector.broadcast %104 : vector<32x1xf32> to vector<32x768xf32>
    %106 = arith.addf %102, %105 : vector<32x768xf32>
    %cst_96 = arith.constant 0.000000e+00 : f32
    %107 = vector.broadcast %cst_96 : f32 to vector<32x768xf32>
    %108 = arith.maximumf %106, %107 : vector<32x768xf32>
    %109 = vector.broadcast %0 : vector<1x768xf32> to vector<32x768xf32>
    %110 = arith.mulf %108, %109 : vector<32x768xf32>
    %111 = arith.truncf %110 : vector<32x768xf32> to vector<32x768xbf16>
    %c0_97 = arith.constant 0 : index
    %c128_98 = arith.constant 128 : index
    %112 = vector.load %arg5[%c0_97, %c128_98] : memref<32x1024xbf16, #tpu.memory_space<vmem>>, vector<32x768xbf16>
    tpu.vector_store %arg5[%c0_97, %c128_98], %111 {strides = array<i32>} : memref<32x1024xbf16, #tpu.memory_space<vmem>>, vector<32x768xbf16>,
    %c0_99 = arith.constant 0 : index
    %c109_100 = arith.constant 109 : index
    %113 = vector.load %arg5[%c0_99, %c109_100] : memref<32x1024xbf16, #tpu.memory_space<vmem>>, vector<32x768xbf16>
    %c18 = arith.constant 18 : index
    %c0_101 = arith.constant 0 : index
    %c0_102 = arith.constant 0 : index
    %114 = vector.load %arg1[%c18, %c0_101, %c0_102] : memref<45x32x32xbf16, #tpu.memory_space<vmem>>, vector<1x32x32xbf16>
    %115 = vector.shape_cast %114 : vector<1x32x32xbf16> to vector<32x32xbf16>
    %cst_103 = arith.constant dense<0.000000e+00> : vector<32x768xf32>
    %116 = tpu.matmul %115, %113, %cst_103 {dimension_numbers = #tpu.dot_dimension_numbers<[1], [0], [0], [1], [0, 0, 1, 1], [], []>} : vector<32x32xbf16>, vector<32x768xbf16>, vector<32x768xf32> -> vector<32x768xf32>
    %c0_104 = arith.constant 0 : index
    %c110_105 = arith.constant 110 : index
    %117 = vector.load %arg5[%c0_104, %c110_105] : memref<32x1024xbf16, #tpu.memory_space<vmem>>, vector<32x768xbf16>
    %c19 = arith.constant 19 : index
    %c0_106 = arith.constant 0 : index
    %c0_107 = arith.constant 0 : index
    %118 = vector.load %arg1[%c19, %c0_106, %c0_107] : memref<45x32x32xbf16, #tpu.memory_space<vmem>>, vector<1x32x32xbf16>
    %119 = vector.shape_cast %118 : vector<1x32x32xbf16> to vector<32x32xbf16>
    %cst_108 = arith.constant dense<0.000000e+00> : vector<32x768xf32>
    %120 = tpu.matmul %119, %117, %cst_108 {dimension_numbers = #tpu.dot_dimension_numbers<[1], [0], [0], [1], [0, 0, 1, 1], [], []>} : vector<32x32xbf16>, vector<32x768xbf16>, vector<32x768xf32> -> vector<32x768xf32>
    %121 = arith.addf %116, %120 : vector<32x768xf32>
    %c0_109 = arith.constant 0 : index
    %c111_110 = arith.constant 111 : index
    %122 = vector.load %arg5[%c0_109, %c111_110] : memref<32x1024xbf16, #tpu.memory_space<vmem>>, vector<32x768xbf16>
    %c20 = arith.constant 20 : index
    %c0_111 = arith.constant 0 : index
    %c0_112 = arith.constant 0 : index
    %123 = vector.load %arg1[%c20, %c0_111, %c0_112] : memref<45x32x32xbf16, #tpu.memory_space<vmem>>, vector<1x32x32xbf16>
    %124 = vector.shape_cast %123 : vector<1x32x32xbf16> to vector<32x32xbf16>
    %cst_113 = arith.constant dense<0.000000e+00> : vector<32x768xf32>
    %125 = tpu.matmul %124, %122, %cst_113 {dimension_numbers = #tpu.dot_dimension_numbers<[1], [0], [0], [1], [0, 0, 1, 1], [], []>} : vector<32x32xbf16>, vector<32x768xbf16>, vector<32x768xf32> -> vector<32x768xf32>
    %126 = arith.addf %121, %125 : vector<32x768xf32>
    %c0_114 = arith.constant 0 : index
    %c127_115 = arith.constant 127 : index
    %127 = vector.load %arg5[%c0_114, %c127_115] : memref<32x1024xbf16, #tpu.memory_space<vmem>>, vector<32x768xbf16>
    %c21 = arith.constant 21 : index
    %c0_116 = arith.constant 0 : index
    %c0_117 = arith.constant 0 : index
    %128 = vector.load %arg1[%c21, %c0_116, %c0_117] : memref<45x32x32xbf16, #tpu.memory_space<vmem>>, vector<1x32x32xbf16>
    %129 = vector.shape_cast %128 : vector<1x32x32xbf16> to vector<32x32xbf16>
    %cst_118 = arith.constant dense<0.000000e+00> : vector<32x768xf32>
    %130 = tpu.matmul %129, %127, %cst_118 {dimension_numbers = #tpu.dot_dimension_numbers<[1], [0], [0], [1], [0, 0, 1, 1], [], []>} : vector<32x32xbf16>, vector<32x768xbf16>, vector<32x768xf32> -> vector<32x768xf32>
    %131 = arith.addf %126, %130 : vector<32x768xf32>
    %c0_119 = arith.constant 0 : index
    %c128_120 = arith.constant 128 : index
    %132 = vector.load %arg5[%c0_119, %c128_120] : memref<32x1024xbf16, #tpu.memory_space<vmem>>, vector<32x768xbf16>
    %c22 = arith.constant 22 : index
    %c0_121 = arith.constant 0 : index
    %c0_122 = arith.constant 0 : index
    %133 = vector.load %arg1[%c22, %c0_121, %c0_122] : memref<45x32x32xbf16, #tpu.memory_space<vmem>>, vector<1x32x32xbf16>
    %134 = vector.shape_cast %133 : vector<1x32x32xbf16> to vector<32x32xbf16>
    %cst_123 = arith.constant dense<0.000000e+00> : vector<32x768xf32>
    %135 = tpu.matmul %134, %132, %cst_123 {dimension_numbers = #tpu.dot_dimension_numbers<[1], [0], [0], [1], [0, 0, 1, 1], [], []>} : vector<32x32xbf16>, vector<32x768xbf16>, vector<32x768xf32> -> vector<32x768xf32>
    %136 = arith.addf %131, %135 : vector<32x768xf32>
    %c0_124 = arith.constant 0 : index
    %c129_125 = arith.constant 129 : index
    %137 = vector.load %arg5[%c0_124, %c129_125] : memref<32x1024xbf16, #tpu.memory_space<vmem>>, vector<32x768xbf16>
    %c23 = arith.constant 23 : index
    %c0_126 = arith.constant 0 : index
    %c0_127 = arith.constant 0 : index
    %138 = vector.load %arg1[%c23, %c0_126, %c0_127] : memref<45x32x32xbf16, #tpu.memory_space<vmem>>, vector<1x32x32xbf16>
    %139 = vector.shape_cast %138 : vector<1x32x32xbf16> to vector<32x32xbf16>
    %cst_128 = arith.constant dense<0.000000e+00> : vector<32x768xf32>
    %140 = tpu.matmul %139, %137, %cst_128 {dimension_numbers = #tpu.dot_dimension_numbers<[1], [0], [0], [1], [0, 0, 1, 1], [], []>} : vector<32x32xbf16>, vector<32x768xbf16>, vector<32x768xf32> -> vector<32x768xf32>
    %141 = arith.addf %136, %140 : vector<32x768xf32>
    %c0_129 = arith.constant 0 : index
    %c145_130 = arith.constant 145 : index
    %142 = vector.load %arg5[%c0_129, %c145_130] : memref<32x1024xbf16, #tpu.memory_space<vmem>>, vector<32x768xbf16>
    %c24 = arith.constant 24 : index
    %c0_131 = arith.constant 0 : index
    %c0_132 = arith.constant 0 : index
    %143 = vector.load %arg1[%c24, %c0_131, %c0_132] : memref<45x32x32xbf16, #tpu.memory_space<vmem>>, vector<1x32x32xbf16>
    %144 = vector.shape_cast %143 : vector<1x32x32xbf16> to vector<32x32xbf16>
    %cst_133 = arith.constant dense<0.000000e+00> : vector<32x768xf32>
    %145 = tpu.matmul %144, %142, %cst_133 {dimension_numbers = #tpu.dot_dimension_numbers<[1], [0], [0], [1], [0, 0, 1, 1], [], []>} : vector<32x32xbf16>, vector<32x768xbf16>, vector<32x768xf32> -> vector<32x768xf32>
    %146 = arith.addf %141, %145 : vector<32x768xf32>
    %c0_134 = arith.constant 0 : index
    %c146_135 = arith.constant 146 : index
    %147 = vector.load %arg5[%c0_134, %c146_135] : memref<32x1024xbf16, #tpu.memory_space<vmem>>, vector<32x768xbf16>
    %c25 = arith.constant 25 : index
    %c0_136 = arith.constant 0 : index
    %c0_137 = arith.constant 0 : index
    %148 = vector.load %arg1[%c25, %c0_136, %c0_137] : memref<45x32x32xbf16, #tpu.memory_space<vmem>>, vector<1x32x32xbf16>
    %149 = vector.shape_cast %148 : vector<1x32x32xbf16> to vector<32x32xbf16>
    %cst_138 = arith.constant dense<0.000000e+00> : vector<32x768xf32>
    %150 = tpu.matmul %149, %147, %cst_138 {dimension_numbers = #tpu.dot_dimension_numbers<[1], [0], [0], [1], [0, 0, 1, 1], [], []>} : vector<32x32xbf16>, vector<32x768xbf16>, vector<32x768xf32> -> vector<32x768xf32>
    %151 = arith.addf %146, %150 : vector<32x768xf32>
    %c0_139 = arith.constant 0 : index
    %c147_140 = arith.constant 147 : index
    %152 = vector.load %arg5[%c0_139, %c147_140] : memref<32x1024xbf16, #tpu.memory_space<vmem>>, vector<32x768xbf16>
    %c26 = arith.constant 26 : index
    %c0_141 = arith.constant 0 : index
    %c0_142 = arith.constant 0 : index
    %153 = vector.load %arg1[%c26, %c0_141, %c0_142] : memref<45x32x32xbf16, #tpu.memory_space<vmem>>, vector<1x32x32xbf16>
    %154 = vector.shape_cast %153 : vector<1x32x32xbf16> to vector<32x32xbf16>
    %cst_143 = arith.constant dense<0.000000e+00> : vector<32x768xf32>
    %155 = tpu.matmul %154, %152, %cst_143 {dimension_numbers = #tpu.dot_dimension_numbers<[1], [0], [0], [1], [0, 0, 1, 1], [], []>} : vector<32x32xbf16>, vector<32x768xbf16>, vector<32x768xf32> -> vector<32x768xf32>
    %156 = arith.addf %151, %155 : vector<32x768xf32>
    %c2_144 = arith.constant 2 : index
    %c0_145 = arith.constant 0 : index
    %c0_146 = arith.constant 0 : index
    %157 = vector.load %arg2[%c2_144, %c0_145, %c0_146] : memref<5x32x1xf32, #tpu.memory_space<vmem>>, vector<1x32x1xf32>
    %158 = vector.shape_cast %157 : vector<1x32x1xf32> to vector<32x1xf32>
    %159 = vector.broadcast %158 : vector<32x1xf32> to vector<32x768xf32>
    %160 = arith.addf %156, %159 : vector<32x768xf32>
    %cst_147 = arith.constant 0.000000e+00 : f32
    %161 = vector.broadcast %cst_147 : f32 to vector<32x768xf32>
    %162 = arith.maximumf %160, %161 : vector<32x768xf32>
    %163 = vector.broadcast %0 : vector<1x768xf32> to vector<32x768xf32>
    %164 = arith.mulf %162, %163 : vector<32x768xf32>
    %165 = arith.truncf %164 : vector<32x768xf32> to vector<32x768xbf16>
    %c0_148 = arith.constant 0 : index
    %c128_149 = arith.constant 128 : index
    %166 = vector.load %arg5[%c0_148, %c128_149] : memref<32x1024xbf16, #tpu.memory_space<vmem>>, vector<32x768xbf16>
    tpu.vector_store %arg5[%c0_148, %c128_149], %165 {strides = array<i32>} : memref<32x1024xbf16, #tpu.memory_space<vmem>>, vector<32x768xbf16>,
    %c0_150 = arith.constant 0 : index
    %c109_151 = arith.constant 109 : index
    %167 = vector.load %arg5[%c0_150, %c109_151] : memref<32x1024xbf16, #tpu.memory_space<vmem>>, vector<32x768xbf16>
    %c27 = arith.constant 27 : index
    %c0_152 = arith.constant 0 : index
    %c0_153 = arith.constant 0 : index
    %168 = vector.load %arg1[%c27, %c0_152, %c0_153] : memref<45x32x32xbf16, #tpu.memory_space<vmem>>, vector<1x32x32xbf16>
    %169 = vector.shape_cast %168 : vector<1x32x32xbf16> to vector<32x32xbf16>
    %cst_154 = arith.constant dense<0.000000e+00> : vector<32x768xf32>
    %170 = tpu.matmul %169, %167, %cst_154 {dimension_numbers = #tpu.dot_dimension_numbers<[1], [0], [0], [1], [0, 0, 1, 1], [], []>} : vector<32x32xbf16>, vector<32x768xbf16>, vector<32x768xf32> -> vector<32x768xf32>
    %c0_155 = arith.constant 0 : index
    %c110_156 = arith.constant 110 : index
    %171 = vector.load %arg5[%c0_155, %c110_156] : memref<32x1024xbf16, #tpu.memory_space<vmem>>, vector<32x768xbf16>
    %c28 = arith.constant 28 : index
    %c0_157 = arith.constant 0 : index
    %c0_158 = arith.constant 0 : index
    %172 = vector.load %arg1[%c28, %c0_157, %c0_158] : memref<45x32x32xbf16, #tpu.memory_space<vmem>>, vector<1x32x32xbf16>
    %173 = vector.shape_cast %172 : vector<1x32x32xbf16> to vector<32x32xbf16>
    %cst_159 = arith.constant dense<0.000000e+00> : vector<32x768xf32>
    %174 = tpu.matmul %173, %171, %cst_159 {dimension_numbers = #tpu.dot_dimension_numbers<[1], [0], [0], [1], [0, 0, 1, 1], [], []>} : vector<32x32xbf16>, vector<32x768xbf16>, vector<32x768xf32> -> vector<32x768xf32>
    %175 = arith.addf %170, %174 : vector<32x768xf32>
    %c0_160 = arith.constant 0 : index
    %c111_161 = arith.constant 111 : index
    %176 = vector.load %arg5[%c0_160, %c111_161] : memref<32x1024xbf16, #tpu.memory_space<vmem>>, vector<32x768xbf16>
    %c29 = arith.constant 29 : index
    %c0_162 = arith.constant 0 : index
    %c0_163 = arith.constant 0 : index
    %177 = vector.load %arg1[%c29, %c0_162, %c0_163] : memref<45x32x32xbf16, #tpu.memory_space<vmem>>, vector<1x32x32xbf16>
    %178 = vector.shape_cast %177 : vector<1x32x32xbf16> to vector<32x32xbf16>
    %cst_164 = arith.constant dense<0.000000e+00> : vector<32x768xf32>
    %179 = tpu.matmul %178, %176, %cst_164 {dimension_numbers = #tpu.dot_dimension_numbers<[1], [0], [0], [1], [0, 0, 1, 1], [], []>} : vector<32x32xbf16>, vector<32x768xbf16>, vector<32x768xf32> -> vector<32x768xf32>
    %180 = arith.addf %175, %179 : vector<32x768xf32>
    %c0_165 = arith.constant 0 : index
    %c127_166 = arith.constant 127 : index
    %181 = vector.load %arg5[%c0_165, %c127_166] : memref<32x1024xbf16, #tpu.memory_space<vmem>>, vector<32x768xbf16>
    %c30 = arith.constant 30 : index
    %c0_167 = arith.constant 0 : index
    %c0_168 = arith.constant 0 : index
    %182 = vector.load %arg1[%c30, %c0_167, %c0_168] : memref<45x32x32xbf16, #tpu.memory_space<vmem>>, vector<1x32x32xbf16>
    %183 = vector.shape_cast %182 : vector<1x32x32xbf16> to vector<32x32xbf16>
    %cst_169 = arith.constant dense<0.000000e+00> : vector<32x768xf32>
    %184 = tpu.matmul %183, %181, %cst_169 {dimension_numbers = #tpu.dot_dimension_numbers<[1], [0], [0], [1], [0, 0, 1, 1], [], []>} : vector<32x32xbf16>, vector<32x768xbf16>, vector<32x768xf32> -> vector<32x768xf32>
    %185 = arith.addf %180, %184 : vector<32x768xf32>
    %c0_170 = arith.constant 0 : index
    %c128_171 = arith.constant 128 : index
    %186 = vector.load %arg5[%c0_170, %c128_171] : memref<32x1024xbf16, #tpu.memory_space<vmem>>, vector<32x768xbf16>
    %c31 = arith.constant 31 : index
    %c0_172 = arith.constant 0 : index
    %c0_173 = arith.constant 0 : index
    %187 = vector.load %arg1[%c31, %c0_172, %c0_173] : memref<45x32x32xbf16, #tpu.memory_space<vmem>>, vector<1x32x32xbf16>
    %188 = vector.shape_cast %187 : vector<1x32x32xbf16> to vector<32x32xbf16>
    %cst_174 = arith.constant dense<0.000000e+00> : vector<32x768xf32>
    %189 = tpu.matmul %188, %186, %cst_174 {dimension_numbers = #tpu.dot_dimension_numbers<[1], [0], [0], [1], [0, 0, 1, 1], [], []>} : vector<32x32xbf16>, vector<32x768xbf16>, vector<32x768xf32> -> vector<32x768xf32>
    %190 = arith.addf %185, %189 : vector<32x768xf32>
    %c0_175 = arith.constant 0 : index
    %c129_176 = arith.constant 129 : index
    %191 = vector.load %arg5[%c0_175, %c129_176] : memref<32x1024xbf16, #tpu.memory_space<vmem>>, vector<32x768xbf16>
    %c32 = arith.constant 32 : index
    %c0_177 = arith.constant 0 : index
    %c0_178 = arith.constant 0 : index
    %192 = vector.load %arg1[%c32, %c0_177, %c0_178] : memref<45x32x32xbf16, #tpu.memory_space<vmem>>, vector<1x32x32xbf16>
    %193 = vector.shape_cast %192 : vector<1x32x32xbf16> to vector<32x32xbf16>
    %cst_179 = arith.constant dense<0.000000e+00> : vector<32x768xf32>
    %194 = tpu.matmul %193, %191, %cst_179 {dimension_numbers = #tpu.dot_dimension_numbers<[1], [0], [0], [1], [0, 0, 1, 1], [], []>} : vector<32x32xbf16>, vector<32x768xbf16>, vector<32x768xf32> -> vector<32x768xf32>
    %195 = arith.addf %190, %194 : vector<32x768xf32>
    %c0_180 = arith.constant 0 : index
    %c145_181 = arith.constant 145 : index
    %196 = vector.load %arg5[%c0_180, %c145_181] : memref<32x1024xbf16, #tpu.memory_space<vmem>>, vector<32x768xbf16>
    %c33 = arith.constant 33 : index
    %c0_182 = arith.constant 0 : index
    %c0_183 = arith.constant 0 : index
    %197 = vector.load %arg1[%c33, %c0_182, %c0_183] : memref<45x32x32xbf16, #tpu.memory_space<vmem>>, vector<1x32x32xbf16>
    %198 = vector.shape_cast %197 : vector<1x32x32xbf16> to vector<32x32xbf16>
    %cst_184 = arith.constant dense<0.000000e+00> : vector<32x768xf32>
    %199 = tpu.matmul %198, %196, %cst_184 {dimension_numbers = #tpu.dot_dimension_numbers<[1], [0], [0], [1], [0, 0, 1, 1], [], []>} : vector<32x32xbf16>, vector<32x768xbf16>, vector<32x768xf32> -> vector<32x768xf32>
    %200 = arith.addf %195, %199 : vector<32x768xf32>
    %c0_185 = arith.constant 0 : index
    %c146_186 = arith.constant 146 : index
    %201 = vector.load %arg5[%c0_185, %c146_186] : memref<32x1024xbf16, #tpu.memory_space<vmem>>, vector<32x768xbf16>
    %c34 = arith.constant 34 : index
    %c0_187 = arith.constant 0 : index
    %c0_188 = arith.constant 0 : index
    %202 = vector.load %arg1[%c34, %c0_187, %c0_188] : memref<45x32x32xbf16, #tpu.memory_space<vmem>>, vector<1x32x32xbf16>
    %203 = vector.shape_cast %202 : vector<1x32x32xbf16> to vector<32x32xbf16>
    %cst_189 = arith.constant dense<0.000000e+00> : vector<32x768xf32>
    %204 = tpu.matmul %203, %201, %cst_189 {dimension_numbers = #tpu.dot_dimension_numbers<[1], [0], [0], [1], [0, 0, 1, 1], [], []>} : vector<32x32xbf16>, vector<32x768xbf16>, vector<32x768xf32> -> vector<32x768xf32>
    %205 = arith.addf %200, %204 : vector<32x768xf32>
    %c0_190 = arith.constant 0 : index
    %c147_191 = arith.constant 147 : index
    %206 = vector.load %arg5[%c0_190, %c147_191] : memref<32x1024xbf16, #tpu.memory_space<vmem>>, vector<32x768xbf16>
    %c35 = arith.constant 35 : index
    %c0_192 = arith.constant 0 : index
    %c0_193 = arith.constant 0 : index
    %207 = vector.load %arg1[%c35, %c0_192, %c0_193] : memref<45x32x32xbf16, #tpu.memory_space<vmem>>, vector<1x32x32xbf16>
    %208 = vector.shape_cast %207 : vector<1x32x32xbf16> to vector<32x32xbf16>
    %cst_194 = arith.constant dense<0.000000e+00> : vector<32x768xf32>
    %209 = tpu.matmul %208, %206, %cst_194 {dimension_numbers = #tpu.dot_dimension_numbers<[1], [0], [0], [1], [0, 0, 1, 1], [], []>} : vector<32x32xbf16>, vector<32x768xbf16>, vector<32x768xf32> -> vector<32x768xf32>
    %210 = arith.addf %205, %209 : vector<32x768xf32>
    %c3_195 = arith.constant 3 : index
    %c0_196 = arith.constant 0 : index
    %c0_197 = arith.constant 0 : index
    %211 = vector.load %arg2[%c3_195, %c0_196, %c0_197] : memref<5x32x1xf32, #tpu.memory_space<vmem>>, vector<1x32x1xf32>
    %212 = vector.shape_cast %211 : vector<1x32x1xf32> to vector<32x1xf32>
    %213 = vector.broadcast %212 : vector<32x1xf32> to vector<32x768xf32>
    %214 = arith.addf %210, %213 : vector<32x768xf32>
    %cst_198 = arith.constant 0.000000e+00 : f32
    %215 = vector.broadcast %cst_198 : f32 to vector<32x768xf32>
    %216 = arith.maximumf %214, %215 : vector<32x768xf32>
    %217 = vector.broadcast %0 : vector<1x768xf32> to vector<32x768xf32>
    %218 = arith.mulf %216, %217 : vector<32x768xf32>
    %219 = arith.truncf %218 : vector<32x768xf32> to vector<32x768xbf16>
    %c0_199 = arith.constant 0 : index
    %c128_200 = arith.constant 128 : index
    %220 = vector.load %arg5[%c0_199, %c128_200] : memref<32x1024xbf16, #tpu.memory_space<vmem>>, vector<32x768xbf16>
    tpu.vector_store %arg5[%c0_199, %c128_200], %219 {strides = array<i32>} : memref<32x1024xbf16, #tpu.memory_space<vmem>>, vector<32x768xbf16>,
    %c0_201 = arith.constant 0 : index
    %c109_202 = arith.constant 109 : index
    %221 = vector.load %arg5[%c0_201, %c109_202] : memref<32x1024xbf16, #tpu.memory_space<vmem>>, vector<32x768xbf16>
    %c36 = arith.constant 36 : index
    %c0_203 = arith.constant 0 : index
    %c0_204 = arith.constant 0 : index
    %222 = vector.load %arg1[%c36, %c0_203, %c0_204] : memref<45x32x32xbf16, #tpu.memory_space<vmem>>, vector<1x32x32xbf16>
    %223 = vector.shape_cast %222 : vector<1x32x32xbf16> to vector<32x32xbf16>
    %cst_205 = arith.constant dense<0.000000e+00> : vector<32x768xf32>
    %224 = tpu.matmul %223, %221, %cst_205 {dimension_numbers = #tpu.dot_dimension_numbers<[1], [0], [0], [1], [0, 0, 1, 1], [], []>} : vector<32x32xbf16>, vector<32x768xbf16>, vector<32x768xf32> -> vector<32x768xf32>
    %c0_206 = arith.constant 0 : index
    %c110_207 = arith.constant 110 : index
    %225 = vector.load %arg5[%c0_206, %c110_207] : memref<32x1024xbf16, #tpu.memory_space<vmem>>, vector<32x768xbf16>
    %c37 = arith.constant 37 : index
    %c0_208 = arith.constant 0 : index
    %c0_209 = arith.constant 0 : index
    %226 = vector.load %arg1[%c37, %c0_208, %c0_209] : memref<45x32x32xbf16, #tpu.memory_space<vmem>>, vector<1x32x32xbf16>
    %227 = vector.shape_cast %226 : vector<1x32x32xbf16> to vector<32x32xbf16>
    %cst_210 = arith.constant dense<0.000000e+00> : vector<32x768xf32>
    %228 = tpu.matmul %227, %225, %cst_210 {dimension_numbers = #tpu.dot_dimension_numbers<[1], [0], [0], [1], [0, 0, 1, 1], [], []>} : vector<32x32xbf16>, vector<32x768xbf16>, vector<32x768xf32> -> vector<32x768xf32>
    %229 = arith.addf %224, %228 : vector<32x768xf32>
    %c0_211 = arith.constant 0 : index
    %c111_212 = arith.constant 111 : index
    %230 = vector.load %arg5[%c0_211, %c111_212] : memref<32x1024xbf16, #tpu.memory_space<vmem>>, vector<32x768xbf16>
    %c38 = arith.constant 38 : index
    %c0_213 = arith.constant 0 : index
    %c0_214 = arith.constant 0 : index
    %231 = vector.load %arg1[%c38, %c0_213, %c0_214] : memref<45x32x32xbf16, #tpu.memory_space<vmem>>, vector<1x32x32xbf16>
    %232 = vector.shape_cast %231 : vector<1x32x32xbf16> to vector<32x32xbf16>
    %cst_215 = arith.constant dense<0.000000e+00> : vector<32x768xf32>
    %233 = tpu.matmul %232, %230, %cst_215 {dimension_numbers = #tpu.dot_dimension_numbers<[1], [0], [0], [1], [0, 0, 1, 1], [], []>} : vector<32x32xbf16>, vector<32x768xbf16>, vector<32x768xf32> -> vector<32x768xf32>
    %234 = arith.addf %229, %233 : vector<32x768xf32>
    %c0_216 = arith.constant 0 : index
    %c127_217 = arith.constant 127 : index
    %235 = vector.load %arg5[%c0_216, %c127_217] : memref<32x1024xbf16, #tpu.memory_space<vmem>>, vector<32x768xbf16>
    %c39 = arith.constant 39 : index
    %c0_218 = arith.constant 0 : index
    %c0_219 = arith.constant 0 : index
    %236 = vector.load %arg1[%c39, %c0_218, %c0_219] : memref<45x32x32xbf16, #tpu.memory_space<vmem>>, vector<1x32x32xbf16>
    %237 = vector.shape_cast %236 : vector<1x32x32xbf16> to vector<32x32xbf16>
    %cst_220 = arith.constant dense<0.000000e+00> : vector<32x768xf32>
    %238 = tpu.matmul %237, %235, %cst_220 {dimension_numbers = #tpu.dot_dimension_numbers<[1], [0], [0], [1], [0, 0, 1, 1], [], []>} : vector<32x32xbf16>, vector<32x768xbf16>, vector<32x768xf32> -> vector<32x768xf32>
    %239 = arith.addf %234, %238 : vector<32x768xf32>
    %c0_221 = arith.constant 0 : index
    %c128_222 = arith.constant 128 : index
    %240 = vector.load %arg5[%c0_221, %c128_222] : memref<32x1024xbf16, #tpu.memory_space<vmem>>, vector<32x768xbf16>
    %c40 = arith.constant 40 : index
    %c0_223 = arith.constant 0 : index
    %c0_224 = arith.constant 0 : index
    %241 = vector.load %arg1[%c40, %c0_223, %c0_224] : memref<45x32x32xbf16, #tpu.memory_space<vmem>>, vector<1x32x32xbf16>
    %242 = vector.shape_cast %241 : vector<1x32x32xbf16> to vector<32x32xbf16>
    %cst_225 = arith.constant dense<0.000000e+00> : vector<32x768xf32>
    %243 = tpu.matmul %242, %240, %cst_225 {dimension_numbers = #tpu.dot_dimension_numbers<[1], [0], [0], [1], [0, 0, 1, 1], [], []>} : vector<32x32xbf16>, vector<32x768xbf16>, vector<32x768xf32> -> vector<32x768xf32>
    %244 = arith.addf %239, %243 : vector<32x768xf32>
    %c0_226 = arith.constant 0 : index
    %c129_227 = arith.constant 129 : index
    %245 = vector.load %arg5[%c0_226, %c129_227] : memref<32x1024xbf16, #tpu.memory_space<vmem>>, vector<32x768xbf16>
    %c41 = arith.constant 41 : index
    %c0_228 = arith.constant 0 : index
    %c0_229 = arith.constant 0 : index
    %246 = vector.load %arg1[%c41, %c0_228, %c0_229] : memref<45x32x32xbf16, #tpu.memory_space<vmem>>, vector<1x32x32xbf16>
    %247 = vector.shape_cast %246 : vector<1x32x32xbf16> to vector<32x32xbf16>
    %cst_230 = arith.constant dense<0.000000e+00> : vector<32x768xf32>
    %248 = tpu.matmul %247, %245, %cst_230 {dimension_numbers = #tpu.dot_dimension_numbers<[1], [0], [0], [1], [0, 0, 1, 1], [], []>} : vector<32x32xbf16>, vector<32x768xbf16>, vector<32x768xf32> -> vector<32x768xf32>
    %249 = arith.addf %244, %248 : vector<32x768xf32>
    %c0_231 = arith.constant 0 : index
    %c145_232 = arith.constant 145 : index
    %250 = vector.load %arg5[%c0_231, %c145_232] : memref<32x1024xbf16, #tpu.memory_space<vmem>>, vector<32x768xbf16>
    %c42 = arith.constant 42 : index
    %c0_233 = arith.constant 0 : index
    %c0_234 = arith.constant 0 : index
    %251 = vector.load %arg1[%c42, %c0_233, %c0_234] : memref<45x32x32xbf16, #tpu.memory_space<vmem>>, vector<1x32x32xbf16>
    %252 = vector.shape_cast %251 : vector<1x32x32xbf16> to vector<32x32xbf16>
    %cst_235 = arith.constant dense<0.000000e+00> : vector<32x768xf32>
    %253 = tpu.matmul %252, %250, %cst_235 {dimension_numbers = #tpu.dot_dimension_numbers<[1], [0], [0], [1], [0, 0, 1, 1], [], []>} : vector<32x32xbf16>, vector<32x768xbf16>, vector<32x768xf32> -> vector<32x768xf32>
    %254 = arith.addf %249, %253 : vector<32x768xf32>
    %c0_236 = arith.constant 0 : index
    %c146_237 = arith.constant 146 : index
    %255 = vector.load %arg5[%c0_236, %c146_237] : memref<32x1024xbf16, #tpu.memory_space<vmem>>, vector<32x768xbf16>
    %c43 = arith.constant 43 : index
    %c0_238 = arith.constant 0 : index
    %c0_239 = arith.constant 0 : index
    %256 = vector.load %arg1[%c43, %c0_238, %c0_239] : memref<45x32x32xbf16, #tpu.memory_space<vmem>>, vector<1x32x32xbf16>
    %257 = vector.shape_cast %256 : vector<1x32x32xbf16> to vector<32x32xbf16>
    %cst_240 = arith.constant dense<0.000000e+00> : vector<32x768xf32>
    %258 = tpu.matmul %257, %255, %cst_240 {dimension_numbers = #tpu.dot_dimension_numbers<[1], [0], [0], [1], [0, 0, 1, 1], [], []>} : vector<32x32xbf16>, vector<32x768xbf16>, vector<32x768xf32> -> vector<32x768xf32>
    %259 = arith.addf %254, %258 : vector<32x768xf32>
    %c0_241 = arith.constant 0 : index
    %c147_242 = arith.constant 147 : index
    %260 = vector.load %arg5[%c0_241, %c147_242] : memref<32x1024xbf16, #tpu.memory_space<vmem>>, vector<32x768xbf16>
    %c44 = arith.constant 44 : index
    %c0_243 = arith.constant 0 : index
    %c0_244 = arith.constant 0 : index
    %261 = vector.load %arg1[%c44, %c0_243, %c0_244] : memref<45x32x32xbf16, #tpu.memory_space<vmem>>, vector<1x32x32xbf16>
    %262 = vector.shape_cast %261 : vector<1x32x32xbf16> to vector<32x32xbf16>
    %cst_245 = arith.constant dense<0.000000e+00> : vector<32x768xf32>
    %263 = tpu.matmul %262, %260, %cst_245 {dimension_numbers = #tpu.dot_dimension_numbers<[1], [0], [0], [1], [0, 0, 1, 1], [], []>} : vector<32x32xbf16>, vector<32x768xbf16>, vector<32x768xf32> -> vector<32x768xf32>
    %264 = arith.addf %259, %263 : vector<32x768xf32>
    %c4_246 = arith.constant 4 : index
    %c0_247 = arith.constant 0 : index
    %c0_248 = arith.constant 0 : index
    %265 = vector.load %arg2[%c4_246, %c0_247, %c0_248] : memref<5x32x1xf32, #tpu.memory_space<vmem>>, vector<1x32x1xf32>
    %266 = vector.shape_cast %265 : vector<1x32x1xf32> to vector<32x1xf32>
    %267 = vector.broadcast %266 : vector<32x1xf32> to vector<32x768xf32>
    %268 = arith.addf %264, %267 : vector<32x768xf32>
    %269 = vector.extract_strided_slice %268 {offsets = [0, 0], sizes = [8, 768], strides = [1, 1]} : vector<32x768xf32> to vector<8x768xf32>
    %c0_249 = arith.constant 0 : index
    %c0_250 = arith.constant 0 : index
    %270 = vector.load %arg4[%c0_249, %c0_250] : memref<8x768xf32, #tpu.memory_space<vmem>>, vector<8x768xf32>
    tpu.vector_store %arg4[%c0_249, %c0_250], %269 {strides = array<i32>} : memref<8x768xf32, #tpu.memory_space<vmem>>, vector<8x768xf32>,
    return
  }
}

</mosaic_0001>

<bundles_post_ra>
// kernel: tile.5
= control target key start
LH: loop header
LB: loop body
LE: loop exit
PB: predicated region body
PF: predicated region fallthrough
CT: control target
= control target key end

     0   :  { %vm9_vm0 = vcmask 15360   ;;  %vm22_vm1 = vcmask 31744   ;;  %s173_s14 = smov 126   ;;  %s174_s15 = smov 108   ;;  %vm3_vm2 = vcmask 146432   ;;  %vm13_vm3 = vcmask 130048   ;;  %s263_s0 = inlined_call_operand.vmem [shape: f32[18,18], index: 0, kind: input, shape index: {}]   ;;  %s264_s1 = inlined_call_operand.vmem [shape: f32[324], index: 1, kind: output, shape index: {}]  }
   0x1   :  { %v137_v0 = vld [vmem:[%s263_s0 + $0x7] sm:$0x1]   ;;  %v141_v3 = vld [vmem:[%s263_s0 + $0x6] sm:$0x1]   ;;  %v139_v4 = vld [vmem:[%s263_s0 + $0xe] sm:$0x1]  }
   0x2   :  { %v138_v1 = vld [vmem:[%s263_s0 + $0x7] sm:$0x1]   ;;  %34 = vrot.lane.b32.xlu1 %v141_v3, %s174_s15  ;;  %v140_v5 = vld [vmem:[%s263_s0 + $0xe] sm:$0x1]   ;;  %v142_v7 = vld [vmem:[%s263_s0 + $0xd] sm:$0x1]  }
   0x3   :  { %v10_v2 = vsel %vm9_vm0, %v138_v1, %v137_v0  ;;  %v23_v6 = vsel %vm22_vm1, %v140_v5, %v139_v4  ;;  %s175_s20 = smov 124   ;;  %s176_s21 = smov 106   ;;  %v143_v8 = vld [vmem:[%s263_s0 + $0x5] sm:$0x1]   ;;  %v144_v9 = vld [vmem:[%s263_s0 + $0xc] sm:$0x1]  }
   0x4   :  { %11 = vrot.lane.b32.xlu0 %v10_v2, %s173_s14  ;;  %s177_s26 = smov 90   ;;  %s178_s27 = smov 88   ;;  %v2_v10 = vld [vmem:[%s263_s0] sm:$0x1]   ;;  %v145_v11 = vld [vmem:[%s263_s0 + $0x4] sm:$0x1]  }
   0x5   :  { %v146_v12 = vld [vmem:[%s263_s0 + $0xb] sm:$0x1]   ;;  %4 = vst.msk [vmem:[#allocation0] sm:$0x1] %vm3_vm2, %v2_v10   ;;  %s179_s5 = smov 72   ;;  %s180_s6 = smov 70  }
   0x6   :  { %40 = vrot.lane.b32.xlu1 %v142_v7, %s176_s21  ;;  %v147_v13 = vld [vmem:[%s263_s0 + $0x3] sm:$0x1]   ;;  %v148_v14 = vld [vmem:[%s263_s0 + $0xa] sm:$0x1]   ;;  %s181_s11 = smov 54   ;;  %s182_s12 = smov 52  }
   0x7   :  { %v149_v15 = vld [vmem:[%s263_s0 + $0x11] sm:$0x1]   ;;  %v150_v16 = vld [vmem:[%s263_s0 + $0x2] sm:$0x1]   ;;  %s183_s17 = smov 50   ;;  %s184_s18 = smov 36  }
   0x8   :  { %24 = vrot.lane.b32.xlu0 %v23_v6, %s175_s20  ;;  %v151_v17 = vld [vmem:[%s263_s0 + $0x9] sm:$0x1]   ;;  %v152_v18 = vld [vmem:[%s263_s0 + $0x10] sm:$0x1]   ;;  %s185_s23 = smov 34   ;;  %s186_s24 = smov 32  }
   0x9   :  { %v153_v19 = vld [vmem:[%s263_s0 + $0x1] sm:$0x1]   ;;  %v154_v20 = vld [vmem:[%s263_s0 + $0x8] sm:$0x1]   ;;  %s187_s29 = smov 18   ;;  %s188_s30 = smov 16  }
   0xa   :  { %53 = vrot.lane.b32.xlu1 %v144_v9, %s178_s27  ;;  %v155_v21 = vld [vmem:[%s263_s0 + $0xf] sm:$0x1]   ;;  %s189_s0 = smov 14   ;;  %vm16_vm4 = vcmask 1048560   ;;  %vm36_vm5 = vcmask 1032032   ;;  %vm26_vm6 = vcmask 113664  }
   0xb   :  { %vm29_vm7 = vcmask 1048544   ;;  %vm42_vm8 = vcmask 1015632   ;;  %vm49_vm9 = vcmask 884432   ;;  %vm55_vm10 = vcmask 868032  }
   0xc   :  { %47 = vrot.lane.b32.xlu0 %v143_v8, %s177_s26  ;;  %vm62_vm11 = vcmask 736832   ;;  %vm68_vm12 = vcmask 720432   ;;  %vm75_vm13 = vcmask 589232   ;;  %vm81_vm14 = vcmask 572832  }
   0xd   :  { %vm88_vm15 = vcmask 556432   ;;  %vm95_vm0 = vcmask 441632   ;;  %vm101_vm1 = vcmask 425232   ;;  %vm108_vm2 = vcmask 408832  }
   0xe   :  { %66 = vrot.lane.b32.xlu1 %v146_v12, %s180_s6 }
  0x10   :  { %60 = vrot.lane.b32.xlu0 %v145_v11, %s179_s5 }
  0x12   :  { %79 = vrot.lane.b32.xlu1 %v148_v14, %s182_s12 }
  0x14   :  { %73 = vrot.lane.b32.xlu0 %v147_v13, %s181_s11 }
  0x16   :  { %93 = vrot.lane.b32.xlu1 %v150_v16, %s184_s18 }
  0x18   :  { %86 = vrot.lane.b32.xlu0 %v149_v15, %s183_s17 }
  0x1a   :  { %106 = vrot.lane.b32.xlu1 %v152_v18, %s186_s24 }
  0x1c   :  { %99 = vrot.lane.b32.xlu0 %v151_v17, %s185_s23 }
  0x1e   :  { %119 = vrot.lane.b32.xlu1 %v154_v20, %s188_s30 }
  0x20   :  { %113 = vrot.lane.b32.xlu0 %v153_v19, %s187_s29 }
  0x24   :  { %126 = vrot.lane.b32.xlu0 %v155_v21, %s189_s0 }
  0x74   :  { %v35_v23 = vpop.permute.xlu1 %34  }
  0x76   :  { %v12_v22 = vpop.permute.xlu0 %11  }
  0x77   :  { %15 = vst.msk [vmem:[#allocation0 + $0x1] sm:$0x1] %vm13_vm3, %v12_v22   ;;  %vm115_vm3 = vcmask 294032  }
  0x78   :  { %17 = vst.msk [vmem:[#allocation0] sm:$0x1] %vm16_vm4, %v12_v22   ;;  %v41_v25 = vpop.permute.xlu1 %40   ;;  %vm121_vm4 = vcmask 277632  }
  0x79   :  { %37 = vst.msk [vmem:[#allocation0] sm:$0x1] %vm36_vm5, %v35_v23   ;;  %vm128_vm5 = vcmask 261232  }
  0x7a   :  { %v25_v24 = vpop.permute.xlu0 %24  }
  0x7b   :  { %28 = vst.msk [vmem:[#allocation0 + $0x2] sm:$0x1] %vm26_vm6, %v25_v24  }
  0x7c   :  { %31 = vst.msk [vmem:[#allocation0 + $0x1] sm:$0x1] %vm29_vm7, %v25_v24   ;;  %v54_v27 = vpop.permute.xlu1 %53  }
  0x7d   :  { %44 = vst.msk [vmem:[#allocation0 + $0x1] sm:$0x1] %vm42_vm8, %v41_v25  }
  0x7e   :  { %v48_v26 = vpop.permute.xlu0 %47   ;;  %57 = vst.msk [vmem:[#allocation0 + $0x1] sm:$0x1] %vm55_vm10, %v54_v27  }
  0x7f   :  { %50 = vst.msk [vmem:[#allocation0] sm:$0x1] %vm49_vm9, %v48_v26  }
  0x80   :  { %v67_v29 = vpop.permute.xlu1 %66  }
  0x81   :  { %70 = vst.msk [vmem:[#allocation0 + $0x1] sm:$0x1] %vm68_vm12, %v67_v29  }
  0x82   :  { %v61_v28 = vpop.permute.xlu0 %60  }
  0x83   :  { %63 = vst.msk [vmem:[#allocation0] sm:$0x1] %vm62_vm11, %v61_v28  }
  0x84   :  { %v80_v31 = vpop.permute.xlu1 %79  }
  0x85   :  { %83 = vst.msk [vmem:[#allocation0 + $0x1] sm:$0x1] %vm81_vm14, %v80_v31  }
  0x86   :  { %v74_v30 = vpop.permute.xlu0 %73  }
  0x87   :  { %76 = vst.msk [vmem:[#allocation0] sm:$0x1] %vm75_vm13, %v74_v30  }
  0x88   :  { %v94_v33 = vpop.permute.xlu1 %93  }
  0x89   :  { %96 = vst.msk [vmem:[#allocation0] sm:$0x1] %vm95_vm0, %v94_v33  }
  0x8a   :  { %v87_v32 = vpop.permute.xlu0 %86  }
  0x8b   :  { %90 = vst.msk [vmem:[#allocation0 + $0x2] sm:$0x1] %vm88_vm15, %v87_v32  }
  0x8c   :  { %v107_v35 = vpop.permute.xlu1 %106  }
  0x8d   :  { %110 = vst.msk [vmem:[#allocation0 + $0x2] sm:$0x1] %vm108_vm2, %v107_v35  }
  0x8e   :  { %v100_v34 = vpop.permute.xlu0 %99  }
  0x8f   :  { %103 = vst.msk [vmem:[#allocation0 + $0x1] sm:$0x1] %vm101_vm1, %v100_v34  }
  0x90   :  { %v120_v37 = vpop.permute.xlu1 %119  }
  0x91   :  { %123 = vst.msk [vmem:[#allocation0 + $0x1] sm:$0x1] %vm121_vm4, %v120_v37  }
  0x92   :  { %v114_v36 = vpop.permute.xlu0 %113  }
  0x93   :  { %116 = vst.msk [vmem:[#allocation0] sm:$0x1] %vm115_vm3, %v114_v36  }
  0x96   :  { %v127_v38 = vpop.permute.xlu0 %126  }
  0x97   :  { %130 = vst.msk [vmem:[#allocation0 + $0x2] sm:$0x1] %vm128_vm5, %v127_v38  }
  0x9e   :  { %v134_v39 = vld [vmem:[#allocation0] sm:$0xf] }
  0x9f   :  { %136 = vst [vmem:[%s264_s1] sm:$0xf] %v134_v39 }

// kernel: tile.6
= control target key start
LH: loop header
LB: loop body
LE: loop exit
PB: predicated region body
PF: predicated region fallthrough
CT: control target
= control target key end

     0   :  { %s46_s0 = inlined_call_operand.vmem [shape: f32[324], index: 0, kind: input, shape index: {}]   ;;  %s47_s1 = inlined_call_operand.vmem [shape: f32[2,324], index: 1, kind: output, shape index: {}]  }
   0x1   :  { %v4_v0 = vld [vmem:[%s46_s0] ss:$0 sm:$0xff]  ;;  %v14_v1 = vld [vmem:[%s46_s0 + $0x1] ss:$0 sm:$0xff]  ;;  %v16_v2 = vld [vmem:[%s46_s0 + $0x2] ss:$0 sm:$0xff] }
   0x2   :  { %5 = vst [vmem:[%s47_s1] sm:$0x3] %v4_v0  ;;  %15 = vst [vmem:[%s47_s1 + $0x2] sm:$0x3] %v14_v1 }
   0x3   :  { %17 = vst [vmem:[%s47_s1 + $0x4] sm:$0x3] %v16_v2 }

// kernel: tile.7
= control target key start
LH: loop header
LB: loop body
LE: loop exit
PB: predicated region body
PF: predicated region fallthrough
CT: control target
= control target key end

     0   :  { %vm27_vm0 = vcmask 490496   ;;  %vm17_vm1 = vcmask 556032   ;;  %s38_s12 = smov 3  ;;  %s53_s13 = smov 68   ;;  %vm31_vm2 = vcmask 64512   ;;  %vm34_vm3 = vcmask 1048096   ;;  %s90_s0 = inlined_call_operand.vmem [shape: f32[2,324], index: 0, kind: input, shape index: {}]   ;;  %s91_s1 = inlined_call_operand.vmem [shape: f32[648], index: 1, kind: output, shape index: {}]  }
   0x1   :  { %v46_v0 = vld [vmem:[%s90_s0 + $0x4] sm:$0x3]  ;;  %v47_v1 = vld [vmem:[%s90_s0 + $0x2] sm:$0x3]  ;;  %v13_v2 = vld [vmem:[%s90_s0] sm:$0x3] }
   0x2   :  { %8 = vst [vmem:[#allocation0 + $0x10] sm:$0x3] %v46_v0  ;;  %12 = vst [vmem:[#allocation0 + $0x8] sm:$0x3] %v47_v1  ;;  %s20_s0 = smov 3 }
   0x3   :  { %14 = vst [vmem:[#allocation0] sm:$0x3] %v13_v2 }
   0x9   :  { %v24_v3 = vld [vmem:[#allocation0 + $0x11] sm:$0x1]   ;;  %v16_v7 = vld [vmem:[#allocation0 + $0x10] sm:$0x1]  }
   0xa   :  { %v26_v4 = vld [vmem:[#allocation0 + $0x1] ss:$8 sm:$0x7]   ;;  %v21_v6 = vld [vmem:[#allocation0] ss:$8 sm:%s20_s0]  }
   0xb   :  { %v28_v5 = vsel %vm27_vm0, %v26_v4, %v24_v3  ;;  %22 = vst [vmem:[%s91_s1] sm:$0x3] %v21_v6   ;;  %48 = vst.msk [vmem:[%s91_s1 + $0x2] sm:$0x1] %vm17_vm1, %v16_v7   ;;  %v39_v8 = vld [vmem:[#allocation0 + $0x1] ss:$8 sm:%s38_s12]  }
   0xc   :  { %29 = vrot.lane.b32.xlu0 %v28_v5, %s53_s13 }
  0x10   :  { %40 = vrot.lane.b32.xlu0 %v39_v8, %s53_s13 }
  0x7e   :  { %v30_v9 = vpop.permute.xlu0 %29  }
  0x7f   :  { %49 = vst.msk [vmem:[%s91_s1 + $0x5] sm:$0x1] %vm31_vm2, %v30_v9  }
  0x80   :  { %50 = vst.msk [vmem:[%s91_s1 + $0x2] sm:$0x7] %vm34_vm3, %v30_v9  }
  0x82   :  { %v41_v10 = vpop.permute.xlu0 %40  }
  0x83   :  { %51 = vst.msk [vmem:[%s91_s1 + $0x3] sm:$0x3] %vm17_vm1, %v41_v10  }

// kernel: regression_model.1
= control target key start
LH: loop header
LB: loop body
LE: loop exit
PB: predicated region body
PF: predicated region fallthrough
CT: control target
= control target key end

     0   :  { %s13221_s5 = smov 18   ;;  %v13222_v14 = vmov 0   ;;  %s13223_s22 = smov 19   ;;  %vm144_vm0 = vcmask 146432   ;;  %vm169_vm1 = vcmask 261120   ;;  %vm373_vm2 = vcmask 154624   ;;  %s16795_s0 = inlined_call_operand.vmem [shape: bf16[32,1024], index: 0, kind: input, shape index: {}]   ;;  %s16796_s1 = inlined_call_operand.vmem [shape: bf16[45,32,32], index: 1, kind: input, shape index: {}]   ;;  %s16797_s2 = inlined_call_operand.vmem [shape: f32[5,32,1], index: 2, kind: input, shape index: {}]   ;;  %s16798_s3 = inlined_call_operand.vmem [shape: f32[1,768], index: 3, kind: input, shape index: {}]   ;;  %s16799_s4 = inlined_call_operand.vmem [shape: f32[8,768], index: 4, kind: output, shape index: {}]  }
   0x1   :  { %v23_v0 = vld [vmem:[%s16795_s0] sm:$0xff]  ;;  %v24_v2 = vld [vmem:[%s16795_s0 + $0x8] sm:$0xff]  ;;  %208 = vmatprep.mubr.bf16.mxu0 %v13222_v14  ;;  %218 = vmatprep.mubr.bf16.mxu1 %v13222_v14  ;;  %v25_v17 = vld [vmem:[%s16795_s0 + $0x10] sm:$0xff]  ;;  %s13224_s6 = smov 17   ;;  %s13225_s7 = smov 1   ;;  %vm606_vm3 = vcmask 138240  }
   0x2   :  { %v27_v1 = vld [vmem:[%s16795_s0 + $0x20] sm:$0xff]  ;;  %v28_v5 = vld [vmem:[%s16795_s0 + $0x28] sm:$0xff]  ;;  %v29_v18 = vld [vmem:[%s16795_s0 + $0x30] sm:$0xff]  ;;  %13114 = vset.pattern.permute.xlu0 %v13222_v14  ;;  %13115 = vset.pattern.permute.xlu1 %v13222_v14  ;;  %s13226_s12 = smov 127   ;;  %s13227_s15 = smov 111   ;;  %vm863_vm4 = vcmask 7168  }
   0x3   :  { %v13264_v3 = vcombine.high %v23_v0, %v27_v1  ;;  %v13266_v4 = vcombine.low %v23_v0, %v27_v1  ;;  %v31_v6 = vld [vmem:[%s16795_s0 + $0x40] sm:$0xff]  ;;  %v32_v8 = vld [vmem:[%s16795_s0 + $0x48] sm:$0xff]  ;;  %v13283_v10 = vcombine.high %v24_v2, %v28_v5  ;;  %v13289_v11 = vcombine.low %v24_v2, %v28_v5  ;;  %v26_v19 = vld [vmem:[%s16795_s0 + $0x18] sm:$0xf]  ;;  %s13228_s20 = smov 110   ;;  %s13229_s26 = smov 109  }
   0x4   :  { %v35_v7 = vld [vmem:[%s16795_s0 + $0x60] sm:$0xff]  ;;  %v36_v9 = vld [vmem:[%s16795_s0 + $0x68] sm:$0xff]  ;;  %v30_v20 = vld [vmem:[%s16795_s0 + $0x38] sm:$0xf]  ;;  %v11755_v22 = vcombine.high %v25_v17, %v29_v18  ;;  %v11754_v26 = vcombine.low %v25_v17, %v29_v18  ;;  %vm1470_vm5 = vcmask 1039360   ;;  %vm1727_vm6 = vcmask 908288  }
   0x5   :  { %118 = vrot.lane.b32.xlu0 %v13264_v3, %s13221_s5  ;;  %116 = vrot.lane.b32.xlu1 %v13266_v4, %s13221_s5  ;;  %v13291_v12 = vcombine.high %v31_v6, %v35_v7  ;;  %v13293_v13 = vcombine.high %v32_v8, %v36_v9  ;;  %v13301_v15 = vcombine.low %v32_v8, %v36_v9  ;;  %v33_v21 = vld [vmem:[%s16795_s0 + $0x50] sm:$0xff]  ;;  %v34_v25 = vld [vmem:[%s16795_s0 + $0x58] sm:$0xf]  ;;  %vm1984_vm7 = vcmask 900096  }
   0x6   :  { %v13303_v16 = vcombine.low %v31_v6, %v35_v7  ;;  %v11756_v23 = vcombine.low %v26_v19, %v30_v20  ;;  %v37_v24 = vld [vmem:[%s16795_s0 + $0x70] sm:$0xff]  ;;  %v38_v28 = vld [vmem:[%s16795_s0 + $0x78] sm:$0xf]  ;;  %v1353_v37 = vld [vmem:[%s16795_s0 + $0x4] sm:$0xff]  ;;  %vm2241_vm8 = vcmask 891904  }
   0x7   :  { %v11762_v27 = vcombine.high %v33_v21, %v37_v24  ;;  %v11763_v29 = vcombine.low %v34_v25, %v38_v28  ;;  %v11761_v30 = vcombine.low %v33_v21, %v37_v24  ;;  %v1354_v31 = vld [vmem:[%s16795_s0 + $0xc] sm:$0xff]  ;;  %v1357_v38 = vld [vmem:[%s16795_s0 + $0x24] sm:$0xff]  ;;  %v1356_v46 = vld [vmem:[%s16795_s0 + $0x1c] sm:$0xf] }
   0x8   :  { %v1358_v32 = vld [vmem:[%s16795_s0 + $0x2c] sm:$0xff]  ;;  %v13423_v40 = vcombine.high %v1353_v37, %v1357_v38  ;;  %v13429_v41 = vcombine.low %v1353_v37, %v1357_v38  ;;  %v1361_v42 = vld [vmem:[%s16795_s0 + $0x44] sm:$0xff]  ;;  %v1360_v48 = vld [vmem:[%s16795_s0 + $0x3c] sm:$0xf] }
   0x9   :  { %120 = vrot.lane.b32.xlu0 %v13289_v11, %s13221_s5  ;;  %132 = vrot.lane.b32.xlu1 %v13291_v12, %s13221_s5  ;;  %v13359_v33 = vcombine.high %v1354_v31, %v1358_v32  ;;  %v1362_v34 = vld [vmem:[%s16795_s0 + $0x4c] sm:$0xff]  ;;  %v13421_v39 = vcombine.low %v1354_v31, %v1358_v32  ;;  %v1365_v43 = vld [vmem:[%s16795_s0 + $0x64] sm:$0xff]  ;;  %v13465_v51 = vcombine.low %v1356_v46, %v1360_v48 }
   0xa   :  { %v1366_v35 = vld [vmem:[%s16795_s0 + $0x6c] sm:$0xff]  ;;  %v13443_v45 = vcombine.high %v1361_v42, %v1365_v43  ;;  %v13452_v47 = vcombine.low %v1361_v42, %v1365_v43  ;;  %v1355_v49 = vld [vmem:[%s16795_s0 + $0x14] sm:$0xff]  ;;  %v1364_v57 = vld [vmem:[%s16795_s0 + $0x5c] sm:$0xf] }
   0xb   :  { %v13371_v36 = vcombine.high %v1362_v34, %v1366_v35  ;;  %v13439_v44 = vcombine.low %v1362_v34, %v1366_v35  ;;  %v1359_v50 = vld [vmem:[%s16795_s0 + $0x34] sm:$0xff]  ;;  %v1368_v58 = vld [vmem:[%s16795_s0 + $0x7c] sm:$0xf]  ;;  %v13583_v34 = vld [vmem:[%s16796_s1] sm:$0xff]  }
   0xc   :  { %v13469_v52 = vcombine.high %v1355_v49, %v1359_v50  ;;  %v13483_v59 = vcombine.low %v1355_v49, %v1359_v50  ;;  %v1363_v61 = vld [vmem:[%s16795_s0 + $0x54] sm:$0xff]  ;;  %v13496_v0 = vcombine.low %v1364_v57, %v1368_v58  ;;  %v13608_v49 = vld [vmem:[%s16796_s1 + $0x8] sm:$0xff]  }
   0xd   :  { %134 = vrot.lane.b32.xlu0 %v13301_v15, %s13221_s5  ;;  %130 = vrot.lane.b32.xlu1 %v13303_v16, %s13221_s5  ;;  %v1367_v62 = vld [vmem:[%s16795_s0 + $0x74] sm:$0xff] }
   0xe   :  { %v13510_v6 = vld [vmem:[%s16796_s1 + $0x10] sm:$0xff]   ;;  %v13516_v9 = vcombine.low %v1363_v61, %v1367_v62 }
  0x11   :  { %126 = vrot.lane.b32.xlu0 %v11755_v22, %s13221_s5  ;;  %128 = vrot.lane.b32.xlu1 %v11756_v23, %s13221_s5 }
  0x15   :  { %124 = vrot.lane.b32.xlu0 %v11754_v26, %s13221_s5  ;;  %140 = vrot.lane.b32.xlu1 %v11762_v27, %s13221_s5 }
  0x19   :  { %142 = vrot.lane.b32.xlu0 %v11763_v29, %s13221_s5  ;;  %138 = vrot.lane.b32.xlu1 %v11761_v30, %s13221_s5 }
  0x1d   :  { %347 = vrot.lane.b32.xlu0 %v13264_v3, %s13223_s22  ;;  %349 = vrot.lane.b32.xlu1 %v13289_v11, %s13223_s22 }
  0x21   :  { %345 = vrot.lane.b32.xlu0 %v13266_v4, %s13223_s22  ;;  %361 = vrot.lane.b32.xlu1 %v13291_v12, %s13223_s22 }
  0x25   :  { %363 = vrot.lane.b32.xlu0 %v13301_v15, %s13223_s22  ;;  %359 = vrot.lane.b32.xlu1 %v13303_v16, %s13223_s22 }
  0x29   :  { %355 = vrot.lane.b32.xlu0 %v11755_v22, %s13223_s22  ;;  %357 = vrot.lane.b32.xlu1 %v11756_v23, %s13223_s22 }
  0x2d   :  { %353 = vrot.lane.b32.xlu0 %v11754_v26, %s13223_s22  ;;  %369 = vrot.lane.b32.xlu1 %v11762_v27, %s13223_s22 }
  0x31   :  { %371 = vrot.lane.b32.xlu0 %v11763_v29, %s13223_s22  ;;  %367 = vrot.lane.b32.xlu1 %v11761_v30, %s13223_s22 }
  0x35   :  { %580 = vrot.lane.b32.xlu0 %v13264_v3, %s13224_s6  ;;  %582 = vrot.lane.b32.xlu1 %v13289_v11, %s13224_s6 }
  0x39   :  { %578 = vrot.lane.b32.xlu0 %v13266_v4, %s13224_s6  ;;  %594 = vrot.lane.b32.xlu1 %v13291_v12, %s13224_s6 }
  0x3d   :  { %596 = vrot.lane.b32.xlu0 %v13301_v15, %s13224_s6  ;;  %592 = vrot.lane.b32.xlu1 %v13303_v16, %s13224_s6 }
  0x41   :  { %588 = vrot.lane.b32.xlu0 %v11755_v22, %s13224_s6  ;;  %590 = vrot.lane.b32.xlu1 %v11756_v23, %s13224_s6 }
  0x45   :  { %586 = vrot.lane.b32.xlu0 %v11754_v26, %s13224_s6  ;;  %602 = vrot.lane.b32.xlu1 %v11762_v27, %s13224_s6 }
  0x49   :  { %604 = vrot.lane.b32.xlu0 %v11763_v29, %s13224_s6  ;;  %600 = vrot.lane.b32.xlu1 %v11761_v30, %s13224_s6 }
  0x4d   :  { %837 = vrot.lane.b32.xlu0 %v13264_v3, %s13225_s7  ;;  %839 = vrot.lane.b32.xlu1 %v13289_v11, %s13225_s7  ;;  %v13502_v3 = vcombine.high %v1363_v61, %v1367_v62 }
  0x51   :  { %835 = vrot.lane.b32.xlu0 %v13266_v4, %s13225_s7  ;;  %851 = vrot.lane.b32.xlu1 %v13291_v12, %s13225_s7  ;;  %v13524_v12 = vld [vmem:[%s16796_s1 + $0x18] sm:$0xff]  }
  0x55   :  { %853 = vrot.lane.b32.xlu0 %v13301_v15, %s13225_s7  ;;  %849 = vrot.lane.b32.xlu1 %v13303_v16, %s13225_s7 }
  0x59   :  { %845 = vrot.lane.b32.xlu0 %v11755_v22, %s13225_s7  ;;  %847 = vrot.lane.b32.xlu1 %v11756_v23, %s13225_s7 }
  0x5d   :  { %843 = vrot.lane.b32.xlu0 %v11754_v26, %s13225_s7  ;;  %859 = vrot.lane.b32.xlu1 %v11762_v27, %s13225_s7 }
  0x61   :  { %861 = vrot.lane.b32.xlu0 %v11763_v29, %s13225_s7  ;;  %857 = vrot.lane.b32.xlu1 %v11761_v30, %s13225_s7 }
  0x65   :  { %122 = vrot.lane.b32.xlu0 %v13283_v10, %s13221_s5  ;;  %136 = vrot.lane.b32.xlu1 %v13293_v13, %s13221_s5 }
  0x69   :  { %1446 = vrot.lane.b32.xlu1 %v13421_v39, %s13226_s12  ;;  %1444 = vrot.lane.b32.xlu0 %v13423_v40, %s13226_s12 }
  0x6d   :  { %351 = vrot.lane.b32.xlu1 %v13283_v10, %s13223_s22  ;;  %1442 = vrot.lane.b32.xlu0 %v13429_v41, %s13226_s12 }
  0x71   :  { %1460 = vrot.lane.b32.xlu1 %v13439_v44, %s13226_s12  ;;  %1458 = vrot.lane.b32.xlu0 %v13443_v45, %s13226_s12 }
  0x75   :  { %365 = vrot.lane.b32.xlu1 %v13293_v13, %s13223_s22  ;;  %1456 = vrot.lane.b32.xlu0 %v13452_v47, %s13226_s12 }
  0x77   :  { %v119_v53 = vpop.permute.xlu0 %118  ;;  %v117_v54 = vpop.permute.xlu1 %116 }
  0x78   :  { %v145_v63 = vsel %vm144_vm0, %v117_v54, %v119_v53 }
  0x79   :  { %1454 = vrot.lane.b32.xlu1 %v13465_v51, %s13226_s12  ;;  %1452 = vrot.lane.b32.xlu0 %v13469_v52, %s13226_s12 }
  0x7b   :  { %v13475_v55 = vpop.permute.xlu0 %120  ;;  %v133_v56 = vpop.permute.xlu1 %132 }
  0x7c   :  { %v146_v60 = vsel %vm144_vm0, %v119_v53, %v13475_v55 }
  0x7d   :  { %176 = vmatprep.subr.bf16.mxu0 %v146_v60  ;;  %12333 = vmatprep.subr.bf16.mxu1 %v146_v60 }
  0x7e   :  { %584 = vrot.lane.b32.xlu1 %v13283_v10, %s13224_s6  ;;  %177 = vmatpush1.bf16.msra.mxu0 %v145_v63 }
  0x7f   :  { %12335 = vmatpush1.bf16.msra.mxu1 %v145_v63  ;;  %v13498_v1 = vpop.permute.xlu0 %134  ;;  %v131_v2 = vpop.permute.xlu1 %130  ;;  %1450 = vrot.lane.b32.xlu0 %v13483_v59, %s13226_s12 }
  0x80   :  { %v152_v4 = vsel %vm144_vm0, %v133_v56, %v13498_v1  ;;  %v151_v5 = vsel %vm144_vm0, %v131_v2, %v133_v56 }
  0x81   :  { %178 = vmatprep.subr.bf16.mxu0 %v152_v4  ;;  %12334 = vmatprep.subr.bf16.mxu1 %v152_v4 }
  0x82   :  { %1468 = vrot.lane.b32.xlu1 %v13496_v0, %s13226_s12  ;;  %179 = vmatpush1.bf16.msra.mxu0 %v151_v5 }
  0x83   :  { %12336 = vmatpush1.bf16.msra.mxu1 %v151_v5  ;;  %v127_v7 = vpop.permute.xlu0 %126  ;;  %v129_v8 = vpop.permute.xlu1 %128  ;;  %1466 = vrot.lane.b32.xlu0 %v13502_v3, %s13226_s12 }
  0x84   :  { %v150_v11 = vsel %vm144_vm0, %v127_v7, %v129_v8 }
  0x85   :  { %282 = vmatprep.subr.bf16.mxu0 %v150_v11  ;;  %11764 = vmatmul.mubr.msk.bf16.vlgmr.msra.gmra.mrb[0].mxu0 %vm169_vm1, %v13510_v6 }
  0x86   :  { %598 = vrot.lane.b32.xlu1 %v13293_v13, %s13224_s6  ;;  %314 = vmatprep.mubr.bf16.mxu0 %v13222_v14 }
  0x87   :  { %v13529_v15 = vpop.permute.xlu0 %124  ;;  %v141_v16 = vpop.permute.xlu1 %140  ;;  %1464 = vrot.lane.b32.xlu0 %v13516_v9, %s13226_s12  ;;  %11765 = vmatmul.mubr.msk.bf16.vlgmr.msra.gmra.mrb[0].mxu1 %vm169_vm1, %v13524_v12 }
  0x88   :  { %v149_v17 = vsel %vm144_vm0, %v13529_v15, %v127_v7  ;;  %261 = vmatprep.mubr.bf16.mxu1 %v13222_v14 }
  0x89   :  { %283 = vmatpush1.bf16.msra.mxu0 %v149_v17  ;;  %v13661_v17 = vld [vmem:[%s16796_s1 + $0x20] sm:$0xff]  }
  0x8a   :  { %1703 = vrot.lane.b32.xlu1 %v13421_v39, %s13227_s15 }
  0x8b   :  { %v143_v18 = vpop.permute.xlu0 %142  ;;  %v13540_v19 = vpop.permute.xlu1 %138  ;;  %1701 = vrot.lane.b32.xlu0 %v13423_v40, %s13227_s15 }
  0x8c   :  { %v156_v20 = vsel %vm144_vm0, %v141_v16, %v143_v18  ;;  %v155_v21 = vsel %vm144_vm0, %v13540_v19, %v141_v16 }
  0x8d   :  { %284 = vmatprep.subr.bf16.mxu0 %v156_v20 }
  0x8e   :  { %841 = vrot.lane.b32.xlu1 %v13283_v10, %s13225_s7  ;;  %285 = vmatpush1.bf16.msra.mxu0 %v155_v21 }
  0x8f   :  { %v348_v22 = vpop.permute.xlu0 %347  ;;  %v13549_v23 = vpop.permute.xlu1 %349  ;;  %1699 = vrot.lane.b32.xlu0 %v13429_v41, %s13227_s15 }
  0x90   :  { %v375_v24 = vsel %vm373_vm2, %v348_v22, %v13549_v23 }
  0x91   :  { %11768 = vmatmul.mubr.msk.bf16.vlgmr.msra.gmra.mrb[4].mxu0 %vm169_vm1, %v13510_v6  ;;  %404 = vmatprep.subr.bf16.mxu0 %v375_v24 }
  0x92   :  { %1717 = vrot.lane.b32.xlu1 %v13439_v44, %s13227_s15  ;;  %324 = vmatprep.mubr.bf16.mxu0 %v13222_v14 }
  0x93   :  { %v346_v10 = vpop.permute.xlu0 %345  ;;  %v362_v25 = vpop.permute.xlu1 %361  ;;  %1715 = vrot.lane.b32.xlu0 %v13443_v45, %s13227_s15 }
  0x94   :  { %v374_v26 = vsel %vm373_vm2, %v346_v10, %v348_v22 }
  0x95   :  { %405 = vmatpush1.bf16.msra.mxu0 %v374_v26 }
  0x96   :  { %855 = vrot.lane.b32.xlu1 %v13293_v13, %s13225_s7 }
  0x97   :  { %v13565_v27 = vpop.permute.xlu0 %363  ;;  %v360_v28 = vpop.permute.xlu1 %359  ;;  %1713 = vrot.lane.b32.xlu0 %v13452_v47, %s13227_s15 }
  0x98   :  { %v380_v29 = vsel %vm373_vm2, %v360_v28, %v362_v25  ;;  %v381_v30 = vsel %vm373_vm2, %v362_v25, %v13565_v27  ;;  %v13686_v28 = vld [vmem:[%s16796_s1 + $0x28] sm:$0xff]  }
  0x99   :  { %11769 = vmatmul.mubr.msk.bf16.gmra.mrb[8].mxu0 %vm169_vm1, %v13524_v12  ;;  %406 = vmatprep.subr.bf16.mxu0 %v381_v30 }
  0x9a   :  { %1711 = vrot.lane.b32.xlu1 %v13465_v51, %s13227_s15  ;;  %407 = vmatpush1.bf16.msra.mxu0 %v380_v29 }
  0x9b   :  { %v356_v13 = vpop.permute.xlu0 %355  ;;  %v358_v31 = vpop.permute.xlu1 %357  ;;  %436 = vmatprep.mubr.bf16.mxu0 %v13222_v14  ;;  %1709 = vrot.lane.b32.xlu0 %v13469_v52, %s13227_s15 }
  0x9c   :  { %v379_v32 = vsel %vm373_vm2, %v356_v13, %v358_v31 }
  0x9d   :  { %510 = vmatprep.subr.bf16.mxu0 %v379_v32 }
  0x9e   :  { %1723 = vrot.lane.b32.xlu1 %v13502_v3, %s13227_s15 }
  0x9f   :  { %v13587_v35 = vpop.permute.xlu0 %353  ;;  %v370_v37 = vpop.permute.xlu1 %369  ;;  %1707 = vrot.lane.b32.xlu0 %v13483_v59, %s13227_s15 }
  0xa0   :  { %v378_v38 = vsel %vm373_vm2, %v13587_v35, %v356_v13 }
  0xa1   :  { %11772 = vmatmul.mubr.msk.bf16.vlgmr.msra.gmra.mrb[0].mxu0 %vm169_vm1, %v13583_v34 }
  0xa2   :  { %1721 = vrot.lane.b32.xlu1 %v13516_v9, %s13227_s15  ;;  %511 = vmatpush1.bf16.msra.mxu0 %v378_v38 }
  0xa3   :  { %v372_v42 = vpop.permute.xlu0 %371  ;;  %v13597_v43 = vpop.permute.xlu1 %367  ;;  %446 = vmatprep.mubr.bf16.mxu0 %v13222_v14  ;;  %1725 = vrot.lane.b32.xlu0 %v13496_v0, %s13227_s15 }
  0xa4   :  { %v385_v46 = vsel %vm373_vm2, %v370_v37, %v372_v42  ;;  %v384_v48 = vsel %vm373_vm2, %v13597_v43, %v370_v37 }
  0xa5   :  { %512 = vmatprep.subr.bf16.mxu0 %v385_v46 }
  0xa6   :  { %1960 = vrot.lane.b32.xlu1 %v13421_v39, %s13228_s20  ;;  %513 = vmatpush1.bf16.msra.mxu0 %v384_v48 }
  0xa7   :  { %v581_v50 = vpop.permute.xlu0 %580  ;;  %v13612_v53 = vpop.permute.xlu1 %582  ;;  %1958 = vrot.lane.b32.xlu0 %v13423_v40, %s13228_s20 }
  0xa8   :  { %v608_v54 = vsel %vm606_vm3, %v581_v50, %v13612_v53 }
  0xa9   :  { %11773 = vmatmul.mubr.msk.bf16.gmra.mrb[12].mxu0 %vm169_vm1, %v13608_v49  ;;  %637 = vmatprep.subr.bf16.mxu0 %v608_v54 }
  0xaa   :  { %1448 = vrot.lane.b32.xlu1 %v13359_v33, %s13226_s12  ;;  %542 = vmatprep.mubr.bf16.mxu0 %v13222_v14 }
  0xab   :  { %v579_v56 = vpop.permute.xlu0 %578  ;;  %v595_v57 = vpop.permute.xlu1 %594  ;;  %1956 = vrot.lane.b32.xlu0 %v13429_v41, %s13228_s20 }
  0xac   :  { %v607_v58 = vsel %vm606_vm3, %v579_v56, %v581_v50 }
  0xae   :  { %1974 = vrot.lane.b32.xlu1 %v13439_v44, %s13228_s20 }
  0xaf   :  { %v13628_v60 = vpop.permute.xlu0 %596  ;;  %v593_v61 = vpop.permute.xlu1 %592  ;;  %1972 = vrot.lane.b32.xlu0 %v13443_v45, %s13228_s20 }
  0xb0   :  { %v614_v62 = vsel %vm606_vm3, %v595_v57, %v13628_v60  ;;  %v613_v63 = vsel %vm606_vm3, %v593_v61, %v595_v57 }
  0xb1   :  { %11776 = vmatmul.mubr.msk.bf16.vlgmr.msra.gmra.mrb[4].mxu0 %vm169_vm1, %v13583_v34 }
  0xb2   :  { %1462 = vrot.lane.b32.xlu1 %v13371_v36, %s13226_s12  ;;  %638 = vmatpush1.bf16.msra.mxu0 %v607_v58 }
  0xb3   :  { %v589_v2 = vpop.permute.xlu0 %588  ;;  %v591_v4 = vpop.permute.xlu1 %590  ;;  %552 = vmatprep.mubr.bf16.mxu0 %v13222_v14  ;;  %639 = vmatprep.subr.bf16.mxu0 %v614_v62 }
  0xb4   :  { %1970 = vrot.lane.b32.xlu0 %v13452_v47, %s13228_s20  ;;  %v612_v5 = vsel %vm606_vm3, %v589_v2, %v591_v4 }
  0xb6   :  { %640 = vmatpush1.bf16.msra.mxu0 %v613_v63  ;;  %1968 = vrot.lane.b32.xlu1 %v13465_v51, %s13228_s20 }
  0xb7   :  { %v13645_v7 = vpop.permute.xlu0 %586  ;;  %v603_v8 = vpop.permute.xlu1 %602  ;;  %743 = vmatprep.subr.bf16.mxu0 %v612_v5 }
  0xb8   :  { %1966 = vrot.lane.b32.xlu0 %v13469_v52, %s13228_s20  ;;  %v611_v21 = vsel %vm606_vm3, %v13645_v7, %v589_v2 }
  0xb9   :  { %11777 = vmatmul.mubr.msk.bf16.gmra.mrb[8].mxu0 %vm169_vm1, %v13608_v49 }
  0xba   :  { %1705 = vrot.lane.b32.xlu1 %v13359_v33, %s13227_s15  ;;  %669 = vmatprep.mubr.bf16.mxu0 %v13222_v14 }
  0xbb   :  { %v605_v11 = vpop.permute.xlu0 %604  ;;  %v13654_v16 = vpop.permute.xlu1 %600 }
  0xbc   :  { %1964 = vrot.lane.b32.xlu0 %v13483_v59, %s13228_s20  ;;  %v618_v22 = vsel %vm606_vm3, %v603_v8, %v605_v11  ;;  %v617_v25 = vsel %vm606_vm3, %v13654_v16, %v603_v8 }
  0xbe   :  { %1982 = vrot.lane.b32.xlu1 %v13496_v0, %s13228_s20 }
  0xbf   :  { %v838_v18 = vpop.permute.xlu0 %837  ;;  %v13665_v20 = vpop.permute.xlu1 %839 }
  0xc0   :  { %1980 = vrot.lane.b32.xlu0 %v13502_v3, %s13228_s20  ;;  %v865_v26 = vsel %vm863_vm4, %v838_v18, %v13665_v20 }
  0xc1   :  { %11784 = vmatmul.mubr.msk.bf16.vlgmr.msra.gmra.mrb[0].mxu0 %vm169_vm1, %v13661_v17 }
  0xc2   :  { %744 = vmatpush1.bf16.msra.mxu0 %v611_v21  ;;  %1719 = vrot.lane.b32.xlu1 %v13371_v36, %s13227_s15 }
  0xc3   :  { %v836_v24 = vpop.permute.xlu0 %835  ;;  %v852_v10 = vpop.permute.xlu1 %851  ;;  %679 = vmatprep.mubr.bf16.mxu0 %v13222_v14  ;;  %745 = vmatprep.subr.bf16.mxu0 %v618_v22 }
  0xc4   :  { %1978 = vrot.lane.b32.xlu0 %v13516_v9, %s13228_s20  ;;  %v864_v32 = vsel %vm863_vm4, %v836_v24, %v838_v18 }
  0xc6   :  { %746 = vmatpush1.bf16.msra.mxu0 %v617_v25  ;;  %2217 = vrot.lane.b32.xlu1 %v13421_v39, %s13229_s26 }
  0xc7   :  { %v13690_v29 = vpop.permute.xlu0 %853  ;;  %v850_v30 = vpop.permute.xlu1 %849  ;;  %894 = vmatprep.subr.bf16.mxu0 %v865_v26 }
  0xc8   :  { %2215 = vrot.lane.b32.xlu0 %v13423_v40, %s13229_s26  ;;  %v871_v42 = vsel %vm863_vm4, %v852_v10, %v13690_v29  ;;  %v870_v46 = vsel %vm863_vm4, %v850_v30, %v852_v10 }
  0xc9   :  { %11785 = vmatmul.mubr.msk.bf16.gmra.mrb[12].mxu0 %vm169_vm1, %v13686_v28 }
  0xca   :  { %775 = vmatprep.mubr.bf16.mxu0 %v13222_v14  ;;  %1962 = vrot.lane.b32.xlu1 %v13359_v33, %s13228_s20 }
  0xcb   :  { %v846_v13 = vpop.permute.xlu0 %845  ;;  %v848_v31 = vpop.permute.xlu1 %847 }
  0xcc   :  { %2213 = vrot.lane.b32.xlu0 %v13429_v41, %s13229_s26  ;;  %v869_v54 = vsel %vm863_vm4, %v846_v13, %v848_v31  ;;  %v13865_v31 = vld [vmem:[%s16796_s1 + $0x48] sm:$0xff]  }
  0xce   :  { %2231 = vrot.lane.b32.xlu1 %v13439_v44, %s13229_s26 }
  0xcf   :  { %v13704_v37 = vpop.permute.xlu0 %843  ;;  %v860_v38 = vpop.permute.xlu1 %859 }
  0xd0   :  { %2229 = vrot.lane.b32.xlu0 %v13443_v45, %s13229_s26 }
  0xd1   :  { %11788 = vmatmul.mubr.msk.bf16.vlgmr.msra.gmra.mrb[4].mxu0 %vm169_vm1, %v13661_v17 }
  0xd2   :  { %895 = vmatpush1.bf16.msra.mxu0 %v864_v32  ;;  %785 = vmatprep.mubr.bf16.mxu0 %v13222_v14 }
  0xd3   :  { %v862_v48 = vpop.permute.xlu0 %861  ;;  %v13714_v50 = vpop.permute.xlu1 %857  ;;  %1976 = vrot.lane.b32.xlu1 %v13371_v36, %s13228_s20  ;;  %896 = vmatprep.subr.bf16.mxu0 %v871_v42 }
  0xd4   :  { %2227 = vrot.lane.b32.xlu0 %v13452_v47, %s13229_s26  ;;  %v875_v11 = vsel %vm863_vm4, %v860_v38, %v862_v48 }
  0xd6   :  { %897 = vmatpush1.bf16.msra.mxu0 %v870_v46 }
  0xd7   :  { %v123_v56 = vpop.permute.xlu0 %122  ;;  %v137_v57 = vpop.permute.xlu1 %136  ;;  %1000 = vmatprep.subr.bf16.mxu0 %v869_v54  ;;  %2221 = vrot.lane.b32.xlu1 %v13483_v59, %s13229_s26 }
  0xd8   :  { %v148_v58 = vsel %vm144_vm0, %v123_v56, %v13529_v15  ;;  %v147_v61 = vsel %vm144_vm0, %v13475_v55, %v123_v56  ;;  %2219 = vrot.lane.b32.xlu0 %v13359_v33, %s13229_s26  ;;  %v154_v62 = vsel %vm144_vm0, %v137_v57, %v13540_v19  ;;  %v153_v15 = vsel %vm144_vm0, %v13498_v1, %v137_v57  ;;  %v13747_v19 = vld [vmem:[%s16796_s1 + $0x30] sm:$0xff]  }
  0xd9   :  { %229 = vmatprep.subr.bf16.mxu1 %v148_v58  ;;  %11789 = vmatmul.mubr.msk.bf16.gmra.mrb[8].mxu0 %vm169_vm1, %v13686_v28  ;;  %v868_v1 = vsel %vm863_vm4, %v13704_v37, %v846_v13 }
  0xda   :  { %230 = vmatpush1.bf16.msra.mxu1 %v147_v61  ;;  %926 = vmatprep.mubr.bf16.mxu0 %v13222_v14 }
  0xdb   :  { %231 = vmatprep.subr.bf16.mxu1 %v154_v62  ;;  %v13734_v63 = vpop.permute.xlu1 %1446  ;;  %2235 = vrot.lane.b32.xlu1 %v13516_v9, %s13229_s26  ;;  %v13738_v55 = vpop.permute.xlu0 %1444  ;;  %v2457_v62 = vld [vmem:[%s16797_s2 + $0x10] sm:$0xff] }
  0xdc   :  { %2233 = vrot.lane.b32.xlu0 %v13371_v36, %s13229_s26 }
  0xde   :  { %232 = vmatpush1.bf16.msra.mxu1 %v153_v15  ;;  %v13141_v15 = vld [vmem:[%s16796_s1 + $0x50] sm:$0xff]  }
  0xdf   :  { %v352_v2 = vpop.permute.xlu1 %351  ;;  %v13749_v4 = vpop.permute.xlu0 %1442  ;;  %2225 = vrot.lane.b32.xlu1 %v13465_v51, %s13229_s26 }
  0xe0   :  { %v377_v5 = vsel %vm373_vm2, %v352_v2, %v13587_v35  ;;  %v376_v8 = vsel %vm373_vm2, %v13549_v23, %v352_v2  ;;  %2223 = vrot.lane.b32.xlu0 %v13469_v52, %s13229_s26  ;;  %v13781_v35 = vld [vmem:[%s16796_s1 + $0x38] sm:$0xff]  }
  0xe1   :  { %11766 = vmatmul.mubr.msk.bf16.vlgmr.msra.gmra.mrb[4].mxu1 %vm169_vm1, %v13510_v6  ;;  %457 = vmatprep.subr.bf16.mxu1 %v377_v5  ;;  %v874_v6 = vsel %vm863_vm4, %v13714_v50, %v860_v38 }
  0xe2   :  { %11796 = vmatmul.mubr.msk.bf16.vlgmr.msra.gmra.mrb[0].mxu0 %vm169_vm1, %v13747_v19  ;;  %458 = vmatpush1.bf16.msra.mxu1 %v376_v8 }
  0xe3   :  { %1001 = vmatpush1.bf16.msra.mxu0 %v868_v1  ;;  %v13766_v51 = vpop.permute.xlu1 %1460  ;;  %271 = vmatprep.mubr.bf16.mxu1 %v13222_v14  ;;  %v13769_v23 = vpop.permute.xlu0 %1458 }
  0xe4   :  { %936 = vmatprep.mubr.bf16.mxu0 %v13222_v14  ;;  %1002 = vmatprep.subr.bf16.mxu0 %v875_v11  ;;  %v1478_v42 = vsel %vm1470_vm5, %v13769_v23, %v13766_v51 }
  0xe5   :  { %2237 = vrot.lane.b32.xlu0 %v13502_v3, %s13229_s26  ;;  %2239 = vrot.lane.b32.xlu1 %v13496_v0, %s13229_s26 }
  0xe7   :  { %v366_v18 = vpop.permute.xlu1 %365  ;;  %1003 = vmatpush1.bf16.msra.mxu0 %v874_v6  ;;  %v13783_v21 = vpop.permute.xlu0 %1456 }
  0xe8   :  { %v383_v22 = vsel %vm373_vm2, %v366_v18, %v13597_v43  ;;  %v382_v24 = vsel %vm373_vm2, %v13565_v27, %v366_v18  ;;  %1170 = vmatprep.subr.bf16.mxu0 %v13423_v40 }
  0xe9   :  { %11767 = vmatmul.mubr.msk.bf16.gmra.mrb[8].mxu1 %vm169_vm1, %v13524_v12  ;;  %459 = vmatprep.subr.bf16.mxu1 %v383_v22 }
  0xea   :  { %11797 = vmatmul.mubr.msk.bf16.gmra.mrb[12].mxu0 %vm169_vm1, %v13781_v35  ;;  %460 = vmatpush1.bf16.msra.mxu1 %v382_v24 }
  0xeb   :  { %v13794_v0 = vpop.permute.xlu1 %1454  ;;  %489 = vmatprep.mubr.bf16.mxu1 %v13222_v14  ;;  %1032 = vmatprep.mubr.bf16.mxu0 %v13222_v14  ;;  %v13798_v43 = vpop.permute.xlu0 %1452 }
  0xf0   :  { %v585_v10 = vpop.permute.xlu1 %584 }
  0xf1   :  { %11774 = vmatmul.mubr.msk.bf16.vlgmr.msra.gmra.mrb[4].mxu1 %vm169_vm1, %v13583_v34  ;;  %v610_v40 = vsel %vm606_vm3, %v585_v10, %v13645_v7  ;;  %v609_v12 = vsel %vm606_vm3, %v13612_v53, %v585_v10  ;;  %v13806_v27 = vpop.permute.xlu0 %1450 }
  0xf2   :  { %690 = vmatprep.subr.bf16.mxu1 %v610_v40  ;;  %11800 = vmatmul.mubr.msk.bf16.vlgmr.msra.gmra.mrb[4].mxu0 %vm169_vm1, %v13747_v19  ;;  %v1475_v2 = vsel %vm1470_vm5, %v13806_v27, %v13798_v43 }
  0xf3   :  { %691 = vmatpush1.bf16.msra.mxu1 %v609_v12  ;;  %1171 = vmatpush1.bf16.msra.mxu0 %v13429_v41 }
  0xf4   :  { %v13811_v25 = vpop.permute.xlu1 %1468  ;;  %499 = vmatprep.mubr.bf16.mxu1 %v13222_v14  ;;  %1042 = vmatprep.mubr.bf16.mxu0 %v13222_v14 }
  0xf5   :  { %1172 = vmatprep.subr.bf16.mxu0 %v13443_v45  ;;  %v13816_v34 = vpop.permute.xlu0 %1466 }
  0xf6   :  { %v1482_v5 = vsel %vm1470_vm5, %v13816_v34, %v13811_v25 }
  0xf7   :  { %1173 = vmatpush1.bf16.msra.mxu0 %v13452_v47 }
  0xf8   :  { %v599_v53 = vpop.permute.xlu1 %598  ;;  %1276 = vmatprep.subr.bf16.mxu0 %v13469_v52  ;;  %v13839_v52 = vld [vmem:[%s16796_s1 + $0x40] sm:$0xff]  }
  0xf9   :  { %11775 = vmatmul.mubr.msk.bf16.gmra.mrb[8].mxu1 %vm169_vm1, %v13608_v49  ;;  %v616_v41 = vsel %vm606_vm3, %v599_v53, %v13654_v16  ;;  %v615_v7 = vsel %vm606_vm3, %v13628_v60, %v599_v53  ;;  %v13826_v26 = vpop.permute.xlu0 %1464 }
  0xfa   :  { %692 = vmatprep.subr.bf16.mxu1 %v616_v41  ;;  %11801 = vmatmul.mubr.msk.bf16.gmra.mrb[8].mxu0 %vm169_vm1, %v13781_v35 }
  0xfb   :  { %693 = vmatpush1.bf16.msra.mxu1 %v615_v7  ;;  %722 = vmatprep.mubr.bf16.mxu1 %v13222_v14 }
  0xfc   :  { %v13831_v45 = vpop.permute.xlu1 %1703  ;;  %1202 = vmatprep.mubr.bf16.mxu0 %v13222_v14 }
  0xfd   :  { %v13834_v47 = vpop.permute.xlu0 %1701 }
  0xfe   :  { %v1729_v6 = vsel %vm1727_vm6, %v13834_v47, %v13831_v45 }
 0x100   :  { %v842_v49 = vpop.permute.xlu1 %841 }
 0x101   :  { %11786 = vmatmul.mubr.msk.bf16.vlgmr.msra.gmra.mrb[4].mxu1 %vm169_vm1, %v13661_v17  ;;  %v867_v60 = vsel %vm863_vm4, %v842_v49, %v13704_v37  ;;  %v866_v16 = vsel %vm863_vm4, %v13665_v20, %v842_v49  ;;  %v13847_v30 = vpop.permute.xlu0 %1699  ;;  %v1472_v17 = vsel %vm1470_vm5, %v13738_v55, %v13734_v63  ;;  %v13143_v49 = vld [vmem:[%s16796_s1 + $0x60] sm:$0xff]  }
 0x102   :  { %947 = vmatprep.subr.bf16.mxu1 %v867_v60  ;;  %11820 = vmatmul.mubr.msk.bf16.vlgmr.msra.gmra.mrb[0].mxu0 %vm169_vm1, %v13839_v52  ;;  %v1728_v10 = vsel %vm1727_vm6, %v13847_v30, %v13834_v47 }
 0x103   :  { %948 = vmatpush1.bf16.msra.mxu1 %v866_v16  ;;  %1277 = vmatpush1.bf16.msra.mxu0 %v13483_v59 }
 0x104   :  { %v13852_v13 = vpop.permute.xlu1 %1717  ;;  %732 = vmatprep.mubr.bf16.mxu1 %v13222_v14  ;;  %1212 = vmatprep.mubr.bf16.mxu0 %v13222_v14 }
 0x105   :  { %1278 = vmatprep.subr.bf16.mxu0 %v13502_v3  ;;  %v13860_v20 = vpop.permute.xlu0 %1715 }
 0x106   :  { %v1735_v12 = vsel %vm1727_vm6, %v13860_v20, %v13852_v13 }
 0x107   :  { %1279 = vmatpush1.bf16.msra.mxu0 %v13516_v9 }
 0x108   :  { %v856_v59 = vpop.permute.xlu1 %855  ;;  %1501 = vmatprep.subr.bf16.mxu0 %v1472_v17 }
 0x109   :  { %11787 = vmatmul.mubr.msk.bf16.gmra.mrb[8].mxu1 %vm169_vm1, %v13686_v28  ;;  %v873_v3 = vsel %vm863_vm4, %v856_v59, %v13714_v50  ;;  %v872_v32 = vsel %vm863_vm4, %v13690_v29, %v856_v59  ;;  %v13874_v37 = vpop.permute.xlu0 %1713  ;;  %v1471_v29 = vsel %vm1470_vm5, %v13749_v4, %v13738_v55  ;;  %v1476_v50 = vsel %vm1470_vm5, %v13798_v43, %v13794_v0  ;;  %v2458_v55 = vld [vmem:[%s16797_s2 + $0x18] sm:$0xff] }
 0x10a   :  { %949 = vmatprep.subr.bf16.mxu1 %v873_v3  ;;  %11821 = vmatmul.mubr.msk.bf16.gmra.mrb[12].mxu0 %vm169_vm1, %v13865_v31  ;;  %v1734_v25 = vsel %vm1727_vm6, %v13874_v37, %v13860_v20  ;;  %v13144_v3 = vld [vmem:[%s16796_s1 + $0x68] sm:$0xff]  }
 0x10b   :  { %950 = vmatpush1.bf16.msra.mxu1 %v872_v32  ;;  %979 = vmatprep.mubr.bf16.mxu1 %v13222_v14 }
 0x10c   :  { %v13879_v9 = vpop.permute.xlu1 %1711  ;;  %1308 = vmatprep.mubr.bf16.mxu0 %v13222_v14  ;;  %1223 = vmatprep.subr.bf16.mxu1 %v13359_v33  ;;  %v1477_v33 = vsel %vm1470_vm5, %v13783_v21, %v13769_v23 }
 0x10d   :  { %v13883_v28 = vpop.permute.xlu0 %1709 }
 0x10e   :  { %v1733_v7 = vsel %vm1727_vm6, %v13883_v28, %v13879_v9 }
 0x110   :  { %v13888_v38 = vpop.permute.xlu1 %1723 }
 0x111   :  { %11798 = vmatmul.mubr.msk.bf16.vlgmr.msra.gmra.mrb[4].mxu1 %vm169_vm1, %v13747_v19  ;;  %v13895_v46 = vpop.permute.xlu0 %1707 }
 0x112   :  { %11824 = vmatmul.mubr.msk.bf16.vlgmr.msra.gmra.mrb[4].mxu0 %vm169_vm1, %v13839_v52  ;;  %989 = vmatprep.mubr.bf16.mxu1 %v13222_v14  ;;  %v1732_v30 = vsel %vm1727_vm6, %v13895_v46, %v13883_v28 }
 0x113   :  { %1502 = vmatpush1.bf16.msra.mxu0 %v1471_v29  ;;  %1318 = vmatprep.mubr.bf16.mxu0 %v13222_v14 }
 0x114   :  { %v13904_v48 = vpop.permute.xlu1 %1721  ;;  %1224 = vmatpush1.bf16.msra.mxu1 %v13421_v39  ;;  %1503 = vmatprep.subr.bf16.mxu0 %v1478_v42  ;;  %v2456_v39 = vld [vmem:[%s16797_s2 + $0x8] sm:$0xff] }
 0x115   :  { %1225 = vmatprep.subr.bf16.mxu1 %v13371_v36  ;;  %v13911_v54 = vpop.permute.xlu0 %1725  ;;  %v2455_v36 = vld [vmem:[%s16797_s2] sm:$0xff]  ;;  %2466 = vperm.xlu1 %13115, %v2456_v39   ;;  %v1738_v59 = vsel %vm1727_vm6, %v13904_v48, %v13888_v38 }
 0x116   :  { %2461 = vperm.xlu0 %13114, %v2455_v36   ;;  %v1739_v17 = vsel %vm1727_vm6, %v13888_v38, %v13911_v54 }
 0x117   :  { %1504 = vmatpush1.bf16.msra.mxu0 %v1477_v33  ;;  %v13145_v33 = vld [vmem:[%s16796_s1 + $0x70] sm:$0xff]  }
 0x118   :  { %v13913_v56 = vpop.permute.xlu1 %1960  ;;  %1226 = vmatpush1.bf16.msra.mxu1 %v13439_v44  ;;  %1607 = vmatprep.subr.bf16.mxu0 %v1476_v50 }
 0x119   :  { %11799 = vmatmul.mubr.msk.bf16.gmra.mrb[8].mxu1 %vm169_vm1, %v13781_v35  ;;  %v13918_v57 = vpop.permute.xlu0 %1958  ;;  %2471 = vperm.xlu1 %13115, %v2457_v62   ;;  %v13142_v35 = vld [vmem:[%s16796_s1 + $0x58] sm:$0xff]  }
 0x11a   :  { %11825 = vmatmul.mubr.msk.bf16.gmra.mrb[8].mxu0 %vm169_vm1, %v13865_v31  ;;  %1255 = vmatprep.mubr.bf16.mxu1 %v13222_v14  ;;  %v1986_v37 = vsel %vm1984_vm7, %v13918_v57, %v13913_v56 }
 0x11b   :  { %1533 = vmatprep.mubr.bf16.mxu0 %v13222_v14  ;;  %2476 = vperm.xlu0 %13114, %v2458_v55  }
 0x11c   :  { %v1449_v44 = vpop.permute.xlu1 %1448 }
 0x11d   :  { %v1474_v58 = vsel %vm1470_vm5, %v1449_v44, %v13806_v27  ;;  %v13932_v61 = vpop.permute.xlu0 %1956  ;;  %v1473_v4 = vsel %vm1470_vm5, %v13734_v63, %v1449_v44  ;;  %v1481_v63 = vsel %vm1470_vm5, %v13826_v26, %v13816_v34  ;;  %2654 = vrot.lane.b32.xlu1 %v13222_v14, %s13221_s5  ;;  %v13146_v44 = vld [vmem:[%s16796_s1 + $0x78] sm:$0xff]  }
 0x11e   :  { %1554 = vmatprep.subr.bf16.mxu1 %v1474_v58  ;;  %v1985_v54 = vsel %vm1984_vm7, %v13932_v61, %v13918_v57 }
 0x120   :  { %v13943_v19 = vpop.permute.xlu1 %1974 }
 0x121   :  { %11822 = vmatmul.mubr.msk.bf16.vlgmr.msra.gmra.mrb[4].mxu1 %vm169_vm1, %v13839_v52  ;;  %v13955_v8 = vpop.permute.xlu0 %1972 }
 0x122   :  { %11846 = vmatmul.mubr.msk.bf16.vlgmr.msra.gmra.mrb[0].mxu0 %vm169_vm1, %v13141_v15  ;;  %1555 = vmatpush1.bf16.msra.mxu1 %v1473_v4 }
 0x123   :  { %1608 = vmatpush1.bf16.msra.mxu0 %v1475_v2  ;;  %1265 = vmatprep.mubr.bf16.mxu1 %v13222_v14 }
 0x124   :  { %v1463_v1 = vpop.permute.xlu1 %1462  ;;  %1543 = vmatprep.mubr.bf16.mxu0 %v13222_v14  ;;  %1609 = vmatprep.subr.bf16.mxu0 %v1482_v5 }
 0x125   :  { %v1480_v11 = vsel %vm1470_vm5, %v1463_v1, %v13826_v26  ;;  %v1479_v23 = vsel %vm1470_vm5, %v13766_v51, %v1463_v1  ;;  %v13148_v1 = vld [vmem:[%s16796_s1 + $0x88] sm:$0xff]  }
 0x126   :  { %1556 = vmatprep.subr.bf16.mxu1 %v1480_v11  ;;  %v13975_v18 = vpop.permute.xlu0 %1970 }
 0x127   :  { %1557 = vmatpush1.bf16.msra.mxu1 %v1479_v23  ;;  %1610 = vmatpush1.bf16.msra.mxu0 %v1481_v63  ;;  %v1991_v57 = vsel %vm1984_vm7, %v13975_v18, %v13955_v8 }
 0x128   :  { %v13977_v21 = vpop.permute.xlu1 %1968  ;;  %1758 = vmatprep.subr.bf16.mxu0 %v1729_v6 }
 0x129   :  { %11823 = vmatmul.mubr.msk.bf16.gmra.mrb[8].mxu1 %vm169_vm1, %v13865_v31 }
 0x12a   :  { %11847 = vmatmul.mubr.msk.bf16.gmra.mrb[12].mxu0 %vm169_vm1, %v13142_v35  ;;  %1586 = vmatprep.mubr.bf16.mxu1 %v13222_v14  ;;  %v13983_v51 = vpop.permute.xlu0 %1966 }
 0x12b   :  { %1639 = vmatprep.mubr.bf16.mxu0 %v13222_v14  ;;  %v1990_v61 = vsel %vm1984_vm7, %v13983_v51, %v13977_v21 }
 0x12c   :  { %v1706_v22 = vpop.permute.xlu1 %1705 }
 0x12d   :  { %v1731_v24 = vsel %vm1727_vm6, %v1706_v22, %v13895_v46  ;;  %v1730_v43 = vsel %vm1727_vm6, %v13831_v45, %v1706_v22 }
 0x12e   :  { %1811 = vmatprep.subr.bf16.mxu1 %v1731_v24  ;;  %v13988_v0 = vpop.permute.xlu0 %1964 }
 0x12f   :  { %v1989_v4 = vsel %vm1984_vm7, %v13988_v0, %v13983_v51 }
 0x130   :  { %v13995_v40 = vpop.permute.xlu1 %1982 }
 0x131   :  { %11848 = vmatmul.mubr.msk.bf16.vlgmr.msra.gmra.mrb[4].mxu1 %vm169_vm1, %v13141_v15 }
 0x132   :  { %11850 = vmatmul.mubr.msk.bf16.vlgmr.msra.gmra.mrb[4].mxu0 %vm169_vm1, %v13141_v15  ;;  %1812 = vmatpush1.bf16.msra.mxu1 %v1730_v43  ;;  %v14002_v27 = vpop.permute.xlu0 %1980 }
 0x133   :  { %1759 = vmatpush1.bf16.msra.mxu0 %v1728_v10  ;;  %1596 = vmatprep.mubr.bf16.mxu1 %v13222_v14  ;;  %v1996_v5 = vsel %vm1984_vm7, %v14002_v27, %v13995_v40  ;;  %v2528_v10 = vlaneseq }
 0x134   :  { %1649 = vmatprep.mubr.bf16.mxu0 %v13222_v14  ;;  %1760 = vmatprep.subr.bf16.mxu0 %v1735_v12  ;;  %v1720_v34 = vpop.permute.xlu1 %1719 }
 0x135   :  { %v1737_v53 = vsel %vm1727_vm6, %v1720_v34, %v13904_v48  ;;  %v1736_v41 = vsel %vm1727_vm6, %v13852_v13, %v1720_v34  ;;  %v14167_v40 = vshrl.u32 %v2528_v10, 7 }
 0x136   :  { %1813 = vmatprep.subr.bf16.mxu1 %v1737_v53  ;;  %v14016_v26 = vpop.permute.xlu0 %1978 }
 0x137   :  { %1761 = vmatpush1.bf16.msra.mxu0 %v1734_v25  ;;  %1814 = vmatpush1.bf16.msra.mxu1 %v1736_v41  ;;  %v14175_v25 = vld [vmem:[%s16798_s3] sm:$0x3f]  ;;  %v2542_v53 = vsub.s32 3, %v14167_v40 }
 0x138   :  { %v14018_v45 = vpop.permute.xlu1 %2217  ;;  %1864 = vmatprep.subr.bf16.mxu0 %v1733_v7 }
 0x139   :  { %11849 = vmatmul.mubr.msk.bf16.gmra.mrb[8].mxu1 %vm169_vm1, %v13142_v35 }
 0x13a   :  { %11851 = vmatmul.mubr.msk.bf16.gmra.mrb[8].mxu0 %vm169_vm1, %v13142_v35  ;;  %1843 = vmatprep.mubr.bf16.mxu1 %v13222_v14  ;;  %v14023_v47 = vpop.permute.xlu0 %2215 }
 0x13b   :  { %1790 = vmatprep.mubr.bf16.mxu0 %v13222_v14  ;;  %v2243_v63 = vsel %vm2241_vm8, %v14023_v47, %v14018_v45 }
 0x13c   :  { %v1963_v52 = vpop.permute.xlu1 %1962 }
 0x13d   :  { %v1988_v60 = vsel %vm1984_vm7, %v1963_v52, %v13988_v0  ;;  %v1987_v20 = vsel %vm1984_vm7, %v13913_v56, %v1963_v52  ;;  %v1992_v56 = vsel %vm1984_vm7, %v13955_v8, %v13943_v19  ;;  %v1995_v8 = vsel %vm1984_vm7, %v14016_v26, %v14002_v27 }
 0x13e   :  { %2068 = vmatprep.subr.bf16.mxu1 %v1988_v60  ;;  %v14031_v16 = vpop.permute.xlu0 %2213  ;;  %v2538_v27 = vsub.s32 2, %v14167_v40 }
 0x13f   :  { %v2242_v11 = vsel %vm2241_vm8, %v14031_v16, %v14023_v47 }
 0x140   :  { %v14036_v13 = vpop.permute.xlu1 %2231 }
 0x141   :  { %11860 = vmatmul.mubr.msk.bf16.vlgmr.msra.gmra.mrb[4].mxu1 %vm169_vm1, %v13143_v49 }
 0x142   :  { %11858 = vmatmul.mubr.msk.bf16.vlgmr.msra.gmra.mrb[0].mxu0 %vm169_vm1, %v13143_v49  ;;  %1853 = vmatprep.mubr.bf16.mxu1 %v13222_v14  ;;  %v14046_v31 = vpop.permute.xlu0 %2229 }
 0x143   :  { %1865 = vmatpush1.bf16.msra.mxu0 %v1732_v30  ;;  %1800 = vmatprep.mubr.bf16.mxu0 %v13222_v14  ;;  %v2249_v23 = vsel %vm2241_vm8, %v14046_v31, %v14036_v13 }
 0x144   :  { %1866 = vmatprep.subr.bf16.mxu0 %v1739_v17  ;;  %2069 = vmatpush1.bf16.msra.mxu1 %v1987_v20 }
 0x145   :  { %v1977_v32 = vpop.permute.xlu1 %1976 }
 0x146   :  { %v1994_v9 = vsel %vm1984_vm7, %v1977_v32, %v14016_v26  ;;  %v1993_v28 = vsel %vm1984_vm7, %v13943_v19, %v1977_v32  ;;  %v14062_v29 = vpop.permute.xlu0 %2227  ;;  %v13147_v19 = vld [vmem:[%s16796_s1 + $0x80] sm:$0xff]  }
 0x147   :  { %1867 = vmatpush1.bf16.msra.mxu0 %v1738_v59  ;;  %2070 = vmatprep.subr.bf16.mxu1 %v1994_v9  ;;  %v2248_v18 = vsel %vm2241_vm8, %v14062_v29, %v14046_v31 }
 0x148   :  { %2071 = vmatpush1.bf16.msra.mxu1 %v1993_v28  ;;  %2015 = vmatprep.subr.bf16.mxu0 %v1986_v37 }
 0x149   :  { %11861 = vmatmul.mubr.msk.bf16.gmra.mrb[8].mxu1 %vm169_vm1, %v13144_v3  ;;  %v14065_v38 = vpop.permute.xlu1 %2221 }
 0x14a   :  { %11859 = vmatmul.mubr.msk.bf16.gmra.mrb[12].mxu0 %vm169_vm1, %v13144_v3  ;;  %2100 = vmatprep.mubr.bf16.mxu1 %v13222_v14  ;;  %v2220_v42 = vpop.permute.xlu0 %2219 }
 0x14b   :  { %1896 = vmatprep.mubr.bf16.mxu0 %v13222_v14  ;;  %v2245_v46 = vsel %vm2241_vm8, %v2220_v42, %v14065_v38  ;;  %v2244_v36 = vsel %vm2241_vm8, %v14018_v45, %v2220_v42 }
 0x14c   :  { %2325 = vmatprep.subr.bf16.mxu1 %v2245_v46 }
 0x14d   :  { %v14075_v50 = vpop.permute.xlu1 %2235 }
 0x14e   :  { %v2234_v48 = vpop.permute.xlu0 %2233 }
 0x14f   :  { %v2251_v39 = vsel %vm2241_vm8, %v2234_v48, %v14075_v50  ;;  %v2250_v58 = vsel %vm2241_vm8, %v14036_v13, %v2234_v48  ;;  %v14187_v13 = vrot.slane %v14175_v25, %v2542_v53 }
 0x151   :  { %11872 = vmatmul.mubr.msk.bf16.vlgmr.msra.gmra.mrb[4].mxu1 %vm169_vm1, %v13145_v33  ;;  %v2226_v35 = vpop.permute.xlu1 %2225 }
 0x152   :  { %11862 = vmatmul.mubr.msk.bf16.vlgmr.msra.gmra.mrb[4].mxu0 %vm169_vm1, %v13143_v49  ;;  %2110 = vmatprep.mubr.bf16.mxu1 %v13222_v14  ;;  %v2224_v6 = vpop.permute.xlu0 %2223  ;;  %v14183_v49 = vrot.slane %v14175_v25, %v2538_v27 }
 0x153   :  { %2016 = vmatpush1.bf16.msra.mxu0 %v1985_v54  ;;  %1906 = vmatprep.mubr.bf16.mxu0 %v13222_v14  ;;  %v2247_v21 = vsel %vm2241_vm8, %v2224_v6, %v2226_v35  ;;  %v2246_v24 = vsel %vm2241_vm8, %v14065_v38, %v2224_v6 }
 0x154   :  { %2017 = vmatprep.subr.bf16.mxu0 %v1992_v56  ;;  %2326 = vmatpush1.bf16.msra.mxu1 %v2244_v36 }
 0x155   :  { %2327 = vmatprep.subr.bf16.mxu1 %v2251_v39 }
 0x157   :  { %2018 = vmatpush1.bf16.msra.mxu0 %v1991_v57  ;;  %v2238_v51 = vpop.permute.xlu0 %2237  ;;  %v2240_v22 = vpop.permute.xlu1 %2239 }
 0x158   :  { %2328 = vmatpush1.bf16.msra.mxu1 %v2250_v58  ;;  %2121 = vmatprep.subr.bf16.mxu0 %v1990_v61  ;;  %v2253_v0 = vsel %vm2241_vm8, %v2238_v51, %v2240_v22  ;;  %v2252_v43 = vsel %vm2241_vm8, %v14075_v50, %v2238_v51 }
 0x159   :  { %11873 = vmatmul.mubr.msk.bf16.gmra.mrb[8].mxu1 %vm169_vm1, %v13146_v44 }
 0x15a   :  { %11863 = vmatmul.mubr.msk.bf16.gmra.mrb[8].mxu0 %vm169_vm1, %v13144_v3  ;;  %2357 = vmatprep.mubr.bf16.mxu1 %v13222_v14  ;;  %v14105_v62 = vpop.f32.mrb[0].mxu1 }
 0x15b   :  { %2047 = vmatprep.mubr.bf16.mxu0 %v13222_v14  ;;  %v14108_v55 = vpop.f32.mrb[1].mxu1 }
 0x15c   :  { %v14110_v15 = vpop.f32.mrb[2].mxu1 }
 0x15d   :  { %v14115_v2 = vpop.f32.mrb[3].mxu1 }
 0x161   :  { %11884 = vmatmul.mubr.msk.bf16.vlgmr.msra.gmra.mrb[4].mxu1 %vm169_vm1, %v13147_v19 }
 0x162   :  { %11870 = vmatmul.mubr.msk.bf16.vlgmr.msra.gmra.mrb[0].mxu0 %vm169_vm1, %v13145_v33  ;;  %2367 = vmatprep.mubr.bf16.mxu1 %v13222_v14 }
 0x163   :  { %2122 = vmatpush1.bf16.msra.mxu0 %v1989_v4  ;;  %2057 = vmatprep.mubr.bf16.mxu0 %v13222_v14 }
 0x164   :  { %2123 = vmatprep.subr.bf16.mxu0 %v1996_v5 }
 0x167   :  { %2124 = vmatpush1.bf16.msra.mxu0 %v1995_v8 }
 0x168   :  { %2272 = vmatprep.subr.bf16.mxu0 %v2243_v63  ;;  %v2530_v63 = vsub.s32 0, %v14167_v40 }
 0x169   :  { %11885 = vmatmul.mubr.msk.bf16.gmra.mrb[8].mxu1 %vm169_vm1, %v13148_v1 }
 0x16a   :  { %11871 = vmatmul.mubr.msk.bf16.gmra.mrb[12].mxu0 %vm169_vm1, %v13146_v44  ;;  %2744 = vmatprep.mubr.bf16.mxu1 %v13222_v14  ;;  %v14219_v22 = vrot.slane %v14175_v25, %v2530_v63 }
 0x16b   :  { %2153 = vmatprep.mubr.bf16.mxu0 %v13222_v14 }
 0x172   :  { %11874 = vmatmul.mubr.msk.bf16.vlgmr.msra.gmra.mrb[4].mxu0 %vm169_vm1, %v13145_v33 }
 0x173   :  { %2273 = vmatpush1.bf16.msra.mxu0 %v2242_v11  ;;  %2163 = vmatprep.mubr.bf16.mxu0 %v13222_v14 }
 0x174   :  { %2274 = vmatprep.subr.bf16.mxu0 %v2249_v23  ;;  %v2534_v23 = vsub.s32 1, %v14167_v40 }
 0x176   :  { %v14223_v10 = vrot.slane %v14175_v25, %v2534_v23 }
 0x177   :  { %2275 = vmatpush1.bf16.msra.mxu0 %v2248_v18 }
 0x178   :  { %2378 = vmatprep.subr.bf16.mxu0 %v2247_v21 }
 0x17a   :  { %11875 = vmatmul.mubr.msk.bf16.gmra.mrb[8].mxu0 %vm169_vm1, %v13146_v44 }
 0x17b   :  { %2304 = vmatprep.mubr.bf16.mxu0 %v13222_v14 }
 0x182   :  { %11882 = vmatmul.mubr.msk.bf16.vlgmr.msra.gmra.mrb[0].mxu0 %vm169_vm1, %v13147_v19 }
 0x183   :  { %2314 = vmatprep.mubr.bf16.mxu0 %v13222_v14  ;;  %2379 = vmatpush1.bf16.msra.mxu0 %v2246_v24 }
 0x184   :  { %2380 = vmatprep.subr.bf16.mxu0 %v2253_v0 }
 0x187   :  { %2381 = vmatpush1.bf16.msra.mxu0 %v2252_v43 }
 0x18a   :  { %11883 = vmatmul.mubr.msk.bf16.gmra.mrb[12].mxu0 %vm169_vm1, %v13148_v1 }
 0x18b   :  { %2410 = vmatprep.mubr.bf16.mxu0 %v13222_v14 }
 0x192   :  { %11886 = vmatmul.mubr.msk.bf16.vlgmr.msra.gmra.mrb[4].mxu0 %vm169_vm1, %v13147_v19 }
 0x193   :  { %2420 = vmatprep.mubr.bf16.mxu0 %v13222_v14 }
 0x194   :  { %v14178_v41 = vpop.permute.xlu1 %2466 }
 0x195   :  { %v14169_v12 = vpop.permute.xlu0 %2461 }
 0x198   :  { %v14190_v59 = vpop.permute.xlu1 %2471 }
 0x19a   :  { %11887 = vmatmul.mubr.msk.bf16.gmra.mrb[8].mxu0 %vm169_vm1, %v13148_v1  ;;  %v14196_v29 = vpop.permute.xlu0 %2476 }
 0x19b   :  { %5125 = vmatprep.mubr.bf16.mxu0 %v13222_v14 }
 0x234   :  { %v2359_v34 = vpop.f32.mrb[4].mxu1 }
 0x235   :  { %v2481_v7 = vadd.f32 %v14169_v12, %v2359_v34  ;;  %v2361_v26 = vpop.f32.mrb[5].mxu1 }
 0x236   :  { %v2482_v45 = vadd.f32 %v14169_v12, %v2361_v26  ;;  %v2363_v47 = vpop.f32.mrb[6].mxu1 }
 0x237   :  { %v2505_v52 = vmax.f32 %v2481_v7, 0.0  ;;  %v2487_v60 = vadd.f32 %v14178_v41, %v2363_v47  ;;  %v2365_v16 = vpop.f32.mrb[7].mxu1 }
 0x238   :  { %v2506_v30 = vmax.f32 %v2482_v45, 0.0  ;;  %v2488_v17 = vadd.f32 %v14178_v41, %v2365_v16 }
 0x239   :  { %v2511_v20 = vmax.f32 %v2487_v60, 0.0  ;;  %v2560_v3 = vmul.f32 %v14183_v49, %v2505_v52 }
 0x23a   :  { %v2512_v31 = vmax.f32 %v2488_v17, 0.0  ;;  %v2561_v37 = vmul.f32 %v14187_v13, %v2506_v30 }
 0x23b   :  { %v2566_v32 = vmul.f32 %v14183_v49, %v2511_v20 }
 0x23c   :  { %v2567_v9 = vmul.f32 %v14187_v13, %v2512_v31  ;;  %v2369_v28 = vpop.f32.mrb[8].mxu1 }
 0x23d   :  { %v14198_v38 = vpack.c.bf16 %v2566_v32, %v2560_v3  ;;  %v2371_v42 = vpop.f32.mrb[9].mxu1  ;;  %v2493_v46 = vadd.f32 %v14190_v59, %v2369_v28 }
 0x23e   :  { %v14201_v33 = vpack.c.bf16 %v2567_v9, %v2561_v37  ;;  %v2494_v48 = vadd.f32 %v14190_v59, %v2371_v42  ;;  %v2373_v50 = vpop.f32.mrb[10].mxu1 }
 0x23f   :  { %v2499_v54 = vadd.f32 %v14196_v29, %v2373_v50  ;;  %v2517_v56 = vmax.f32 %v2493_v46, 0.0  ;;  %v2375_v36 = vpop.f32.mrb[11].mxu1 }
 0x240   :  { %v2518_v39 = vmax.f32 %v2494_v48, 0.0  ;;  %v2500_v57 = vadd.f32 %v14196_v29, %v2375_v36 }
 0x241   :  { %v2523_v44 = vmax.f32 %v2499_v54, 0.0  ;;  %v2572_v61 = vmul.f32 %v14183_v49, %v2517_v56  ;;  %v2550_v56 = vsub.s32 5, %v14167_v40 }
 0x242   :  { %v2524_v58 = vmax.f32 %v2500_v57, 0.0  ;;  %v2573_v4 = vmul.f32 %v14187_v13, %v2518_v39 }
 0x243   :  { %v2578_v19 = vmul.f32 %v14183_v49, %v2523_v44 }
 0x244   :  { %v2579_v5 = vmul.f32 %v14187_v13, %v2524_v58 }
 0x245   :  { %v14210_v8 = vpack.c.bf16 %v2578_v19, %v2572_v61 }
 0x246   :  { %v14212_v1 = vpack.c.bf16 %v2579_v5, %v2573_v4 }
 0x255   :  { %v2306_v11 = vpop.f32.mrb[0].mxu0 }
 0x256   :  { %v2479_v6 = vadd.f32 %v14169_v12, %v2306_v11  ;;  %v2308_v35 = vpop.f32.mrb[1].mxu0 }
 0x257   :  { %v2480_v18 = vadd.f32 %v14169_v12, %v2308_v35  ;;  %v2310_v21 = vpop.f32.mrb[2].mxu0  ;;  %v14263_v35 = vrot.slane %v14175_v25, %v2550_v56 }
 0x258   :  { %v2503_v51 = vmax.f32 %v2479_v6, 0.0  ;;  %v2485_v24 = vadd.f32 %v14178_v41, %v2310_v21  ;;  %v2312_v0 = vpop.f32.mrb[3].mxu0 }
 0x259   :  { %v2504_v43 = vmax.f32 %v2480_v18, 0.0  ;;  %v2486_v27 = vadd.f32 %v14178_v41, %v2312_v0 }
 0x25a   :  { %v2509_v34 = vmax.f32 %v2485_v24, 0.0  ;;  %v2558_v7 = vmul.f32 %v14219_v22, %v2503_v51 }
 0x25b   :  { %v2510_v53 = vmax.f32 %v2486_v27, 0.0  ;;  %v2559_v45 = vmul.f32 %v14223_v10, %v2504_v43 }
 0x25c   :  { %v2564_v26 = vmul.f32 %v14219_v22, %v2509_v34 }
 0x25d   :  { %v2565_v47 = vmul.f32 %v14223_v10, %v2510_v53  ;;  %v2316_v52 = vpop.f32.mrb[12].mxu0 }
 0x25e   :  { %v14230_v60 = vpack.c.bf16 %v2564_v26, %v2558_v7  ;;  %v12337_v16 = vadd.f32 %v2316_v52, %v14105_v62  ;;  %v2318_v30 = vpop.f32.mrb[13].mxu0 }
 0x25f   :  { %v14233_v17 = vpack.c.bf16 %v2565_v47, %v2559_v45  ;;  %v12338_v20 = vadd.f32 %v2318_v30, %v14108_v55  ;;  %v2320_v31 = vpop.f32.mrb[14].mxu0 }
 0x260   :  { %v2491_v3 = vadd.f32 %v12337_v16, %v14190_v59  ;;  %v12339_v32 = vadd.f32 %v2320_v31, %v14110_v15  ;;  %v2322_v37 = vpop.f32.mrb[15].mxu0  ;;  %2656 = vrot.lane.b32.xlu1 %v14230_v60, %s13221_s5  ;;  %v2546_v15 = vsub.s32 4, %v14167_v40 }
 0x261   :  { %v2492_v9 = vadd.f32 %v12338_v20, %v14190_v59  ;;  %v12340_v28 = vadd.f32 %v2322_v37, %v14115_v2  ;;  %2658 = vrot.lane.b32.xlu0 %v14233_v17, %s13221_s5 }
 0x262   :  { %v2515_v62 = vmax.f32 %v2491_v3, 0.0  ;;  %v2497_v42 = vadd.f32 %v12339_v32, %v14196_v29  ;;  %v14257_v63 = vrot.slane %v14175_v25, %v2546_v15 }
 0x263   :  { %v2516_v55 = vmax.f32 %v2492_v9, 0.0  ;;  %v2498_v46 = vadd.f32 %v12340_v28, %v14196_v29  ;;  %v2655_v28 = vpop.permute.xlu1 %2654 }
 0x264   :  { %v2521_v48 = vmax.f32 %v2497_v42, 0.0  ;;  %v2570_v36 = vmul.f32 %v14219_v22, %v2515_v62 }
 0x265   :  { %v2522_v50 = vmax.f32 %v2498_v46, 0.0  ;;  %v2412_v54 = vpop.f32.mrb[4].mxu0  ;;  %v2571_v44 = vmul.f32 %v14223_v10, %v2516_v55 }
 0x266   :  { %v2576_v2 = vmul.f32 %v14219_v22, %v2521_v48  ;;  %v2483_v39 = vadd.f32 %v14169_v12, %v2412_v54  ;;  %v2414_v57 = vpop.f32.mrb[5].mxu0 }
 0x267   :  { %v2577_v58 = vmul.f32 %v14223_v10, %v2522_v50  ;;  %v2484_v61 = vadd.f32 %v14169_v12, %v2414_v57  ;;  %v2416_v19 = vpop.f32.mrb[6].mxu0 }
 0x268   :  { %v14254_v4 = vpack.c.bf16 %v2576_v2, %v2570_v36  ;;  %v2507_v5 = vmax.f32 %v2483_v39, 0.0  ;;  %v2489_v40 = vadd.f32 %v14178_v41, %v2416_v19  ;;  %v2418_v11 = vpop.f32.mrb[7].mxu0  ;;  %v13149_v2 = vld [vmem:[%s16796_s1 + $0xa0] sm:$0xff]  }
 0x269   :  { %v14260_v23 = vpack.c.bf16 %v2577_v58, %v2571_v44  ;;  %v2508_v6 = vmax.f32 %v2484_v61, 0.0  ;;  %v2490_v18 = vadd.f32 %v14178_v41, %v2418_v11 }
 0x26a   :  { %v2513_v21 = vmax.f32 %v2489_v40, 0.0  ;;  %2670 = vrot.lane.b32.xlu0 %v14254_v4, %s13221_s5  ;;  %v2562_v51 = vmul.f32 %v14257_v63, %v2507_v5  ;;  %v13150_v5 = vld [vmem:[%s16796_s1 + $0xa8] sm:$0xff]  }
 0x26b   :  { %v2514_v12 = vmax.f32 %v2490_v18, 0.0  ;;  %2672 = vrot.lane.b32.xlu1 %v14260_v23, %s13221_s5  ;;  %v2563_v0 = vmul.f32 %v14263_v35, %v2508_v6 }
 0x26c   :  { %v2568_v24 = vmul.f32 %v14257_v63, %v2513_v21 }
 0x26d   :  { %v2569_v43 = vmul.f32 %v14263_v35, %v2514_v12  ;;  %v2422_v25 = vpop.f32.mrb[8].mxu0 }
 0x26e   :  { %v14274_v27 = vpack.c.bf16 %v2568_v24, %v2562_v51  ;;  %v2495_v41 = vadd.f32 %v14190_v59, %v2422_v25  ;;  %v2424_v34 = vpop.f32.mrb[9].mxu0  ;;  %2668 = vrot.lane.b32.xlu0 %v13222_v14, %s13221_s5 }
 0x26f   :  { %v14279_v53 = vpack.c.bf16 %v2569_v43, %v2563_v0  ;;  %v2496_v7 = vadd.f32 %v14190_v59, %v2424_v34  ;;  %v2426_v26 = vpop.f32.mrb[10].mxu0  ;;  %2660 = vrot.lane.b32.xlu1 %v14198_v38, %s13221_s5 }
 0x270   :  { %v2519_v45 = vmax.f32 %v2495_v41, 0.0  ;;  %v2501_v47 = vadd.f32 %v14196_v29, %v2426_v26  ;;  %v2428_v52 = vpop.f32.mrb[11].mxu0 }
 0x271   :  { %v2520_v16 = vmax.f32 %v2496_v7, 0.0  ;;  %v2502_v30 = vadd.f32 %v14196_v29, %v2428_v52 }
 0x272   :  { %v2525_v20 = vmax.f32 %v2501_v47, 0.0  ;;  %2662 = vrot.lane.b32.xlu0 %v14201_v33, %s13221_s5  ;;  %v2574_v59 = vmul.f32 %v14257_v63, %v2519_v45 }
 0x273   :  { %v2526_v31 = vmax.f32 %v2502_v30, 0.0  ;;  %2674 = vrot.lane.b32.xlu1 %v14210_v8, %s13221_s5  ;;  %v2575_v32 = vmul.f32 %v14263_v35, %v2520_v16 }
 0x274   :  { %v2580_v3 = vmul.f32 %v14257_v63, %v2525_v20 }
 0x275   :  { %v2581_v37 = vmul.f32 %v14263_v35, %v2526_v31 }
 0x276   :  { %v14294_v9 = vpack.c.bf16 %v2580_v3, %v2574_v59  ;;  %2676 = vrot.lane.b32.xlu0 %v14212_v1, %s13221_s5  ;;  %v13151_v3 = vld [vmem:[%s16796_s1 + $0x90] sm:$0xff]  }
 0x277   :  { %v14298_v29 = vpack.c.bf16 %v2581_v37, %v2575_v32  ;;  %2664 = vrot.lane.b32.xlu1 %v14274_v27, %s13221_s5 }
 0x27a   :  { %2666 = vrot.lane.b32.xlu0 %v14279_v53, %s13221_s5 }
 0x27b   :  { %2678 = vrot.lane.b32.xlu1 %v14294_v9, %s13221_s5 }
 0x27e   :  { %2680 = vrot.lane.b32.xlu0 %v14298_v29, %s13221_s5 }
 0x27f   :  { %2883 = vrot.lane.b32.xlu1 %v14230_v60, %s13223_s22 }
 0x282   :  { %2885 = vrot.lane.b32.xlu0 %v14233_v17, %s13223_s22 }
 0x283   :  { %2881 = vrot.lane.b32.xlu1 %v13222_v14, %s13223_s22 }
 0x286   :  { %2897 = vrot.lane.b32.xlu0 %v14254_v4, %s13223_s22 }
 0x287   :  { %2899 = vrot.lane.b32.xlu1 %v14260_v23, %s13223_s22 }
 0x28a   :  { %2895 = vrot.lane.b32.xlu0 %v13222_v14, %s13223_s22 }
 0x28b   :  { %2887 = vrot.lane.b32.xlu1 %v14198_v38, %s13223_s22 }
 0x28e   :  { %2889 = vrot.lane.b32.xlu0 %v14201_v33, %s13223_s22 }
 0x28f   :  { %2901 = vrot.lane.b32.xlu1 %v14210_v8, %s13223_s22 }
 0x292   :  { %2903 = vrot.lane.b32.xlu0 %v14212_v1, %s13223_s22 }
 0x293   :  { %2891 = vrot.lane.b32.xlu1 %v14274_v27, %s13223_s22 }
 0x296   :  { %2893 = vrot.lane.b32.xlu0 %v14279_v53, %s13223_s22 }
 0x297   :  { %2905 = vrot.lane.b32.xlu1 %v14294_v9, %s13223_s22 }
 0x29a   :  { %2907 = vrot.lane.b32.xlu0 %v14298_v29, %s13223_s22 }
 0x29b   :  { %3115 = vrot.lane.b32.xlu1 %v14230_v60, %s13224_s6 }
 0x29e   :  { %3117 = vrot.lane.b32.xlu0 %v14233_v17, %s13224_s6 }
 0x29f   :  { %3113 = vrot.lane.b32.xlu1 %v13222_v14, %s13224_s6 }
 0x2a2   :  { %3129 = vrot.lane.b32.xlu0 %v14254_v4, %s13224_s6 }
 0x2a3   :  { %3131 = vrot.lane.b32.xlu1 %v14260_v23, %s13224_s6 }
 0x2a6   :  { %3127 = vrot.lane.b32.xlu0 %v13222_v14, %s13224_s6 }
 0x2a7   :  { %3119 = vrot.lane.b32.xlu1 %v14198_v38, %s13224_s6 }
 0x2aa   :  { %3121 = vrot.lane.b32.xlu0 %v14201_v33, %s13224_s6 }
 0x2ab   :  { %3133 = vrot.lane.b32.xlu1 %v14210_v8, %s13224_s6 }
 0x2ae   :  { %3135 = vrot.lane.b32.xlu0 %v14212_v1, %s13224_s6 }
 0x2af   :  { %3123 = vrot.lane.b32.xlu1 %v14274_v27, %s13224_s6 }
 0x2b2   :  { %3125 = vrot.lane.b32.xlu0 %v14279_v53, %s13224_s6 }
 0x2b3   :  { %3137 = vrot.lane.b32.xlu1 %v14294_v9, %s13224_s6 }
 0x2b6   :  { %3139 = vrot.lane.b32.xlu0 %v14298_v29, %s13224_s6 }
 0x2b7   :  { %3371 = vrot.lane.b32.xlu1 %v14230_v60, %s13225_s7 }
 0x2ba   :  { %3373 = vrot.lane.b32.xlu0 %v14233_v17, %s13225_s7 }
 0x2bb   :  { %3369 = vrot.lane.b32.xlu1 %v13222_v14, %s13225_s7 }
 0x2be   :  { %3385 = vrot.lane.b32.xlu0 %v14254_v4, %s13225_s7 }
 0x2bf   :  { %3387 = vrot.lane.b32.xlu1 %v14260_v23, %s13225_s7 }
 0x2c2   :  { %3383 = vrot.lane.b32.xlu0 %v13222_v14, %s13225_s7 }
 0x2c3   :  { %3375 = vrot.lane.b32.xlu1 %v14198_v38, %s13225_s7 }
 0x2c6   :  { %3377 = vrot.lane.b32.xlu0 %v14201_v33, %s13225_s7 }
 0x2c7   :  { %3389 = vrot.lane.b32.xlu1 %v14210_v8, %s13225_s7 }
 0x2ca   :  { %3391 = vrot.lane.b32.xlu0 %v14212_v1, %s13225_s7 }
 0x2cb   :  { %3379 = vrot.lane.b32.xlu1 %v14274_v27, %s13225_s7 }
 0x2ce   :  { %3381 = vrot.lane.b32.xlu0 %v14279_v53, %s13225_s7 }
 0x2cf   :  { %3393 = vrot.lane.b32.xlu1 %v14294_v9, %s13225_s7 }
 0x2d2   :  { %3395 = vrot.lane.b32.xlu0 %v14298_v29, %s13225_s7  ;;  %v2657_v62 = vpop.permute.xlu1 %2656 }
 0x2d3   :  { %v2659_v42 = vpop.permute.xlu0 %2658  ;;  %3859 = vrot.lane.b32.xlu1 %v14233_v17, %s13226_s12  ;;  %v2682_v46 = vsel %vm144_vm0, %v2655_v28, %v2657_v62 }
 0x2d4   :  { %v2683_v55 = vsel %vm144_vm0, %v2657_v62, %v2659_v42 }
 0x2d5   :  { %2712 = vmatprep.subr.bf16.mxu1 %v2683_v55 }
 0x2d6   :  { %3861 = vrot.lane.b32.xlu0 %v14198_v38, %s13226_s12  ;;  %2713 = vmatpush1.bf16.msra.mxu1 %v2682_v46  ;;  %v13152_v46 = vld [vmem:[%s16796_s1 + $0x98] sm:$0xff]  }
 0x2d7   :  { %3857 = vrot.lane.b32.xlu1 %v14230_v60, %s13226_s12 }
 0x2da   :  { %3873 = vrot.lane.b32.xlu0 %v14260_v23, %s13226_s12 }
 0x2db   :  { %3875 = vrot.lane.b32.xlu1 %v14210_v8, %s13226_s12 }
 0x2dc   :  { %v2671_v48 = vpop.permute.xlu0 %2670 }
 0x2dd   :  { %v2673_v15 = vpop.permute.xlu1 %2672 }
 0x2de   :  { %3871 = vrot.lane.b32.xlu0 %v14254_v4, %s13226_s12  ;;  %v2689_v50 = vsel %vm144_vm0, %v2671_v48, %v2673_v15 }
 0x2df   :  { %3863 = vrot.lane.b32.xlu1 %v14201_v33, %s13226_s12  ;;  %2714 = vmatprep.subr.bf16.mxu1 %v2689_v50 }
 0x2e0   :  { %v2669_v54 = vpop.permute.xlu0 %2668 }
 0x2e1   :  { %v2688_v56 = vsel %vm144_vm0, %v2669_v54, %v2671_v48  ;;  %v2661_v36 = vpop.permute.xlu1 %2660 }
 0x2e2   :  { %3865 = vrot.lane.b32.xlu0 %v14274_v27, %s13226_s12  ;;  %2715 = vmatpush1.bf16.msra.mxu1 %v2688_v56  ;;  %v2684_v58 = vsel %vm144_vm0, %v2659_v42, %v2661_v36 }
 0x2e3   :  { %3877 = vrot.lane.b32.xlu1 %v14212_v1, %s13226_s12 }
 0x2e4   :  { %v2663_v39 = vpop.permute.xlu0 %2662 }
 0x2e5   :  { %11898 = vmatmul.mubr.msk.bf16.vlgmr.msra.gmra.mrb[12].mxu1 %vm169_vm1, %v13149_v2  ;;  %v2675_v57 = vpop.permute.xlu1 %2674  ;;  %v2685_v44 = vsel %vm144_vm0, %v2661_v36, %v2663_v39 }
 0x2e6   :  { %3879 = vrot.lane.b32.xlu0 %v14294_v9, %s13226_s12  ;;  %2765 = vmatprep.subr.bf16.mxu1 %v2685_v44  ;;  %v2690_v40 = vsel %vm144_vm0, %v2673_v15, %v2675_v57 }
 0x2e7   :  { %3867 = vrot.lane.b32.xlu1 %v14279_v53, %s13226_s12  ;;  %2766 = vmatpush1.bf16.msra.mxu1 %v2684_v58 }
 0x2e8   :  { %v2677_v61 = vpop.permute.xlu0 %2676  ;;  %2754 = vmatprep.mubr.bf16.mxu1 %v13222_v14 }
 0x2e9   :  { %v2691_v19 = vsel %vm144_vm0, %v2675_v57, %v2677_v61  ;;  %v2665_v11 = vpop.permute.xlu1 %2664 }
 0x2ea   :  { %3869 = vrot.lane.b32.xlu0 %v13222_v14, %s13226_s12  ;;  %2767 = vmatprep.subr.bf16.mxu1 %v2691_v19  ;;  %v2686_v24 = vsel %vm144_vm0, %v2663_v39, %v2665_v11 }
 0x2eb   :  { %3881 = vrot.lane.b32.xlu1 %v14298_v29, %s13226_s12  ;;  %2768 = vmatpush1.bf16.msra.mxu1 %v2690_v40 }
 0x2ec   :  { %v2667_v6 = vpop.permute.xlu0 %2666 }
 0x2ed   :  { %11899 = vmatmul.mubr.msk.bf16.gmra.mrb[16].mxu1 %vm169_vm1, %v13150_v5  ;;  %v2687_v18 = vsel %vm144_vm0, %v2665_v11, %v2667_v6  ;;  %v2679_v12 = vpop.permute.xlu1 %2678 }
 0x2ee   :  { %3883 = vrot.lane.b32.xlu0 %v13222_v14, %s13226_s12  ;;  %2818 = vmatprep.subr.bf16.mxu1 %v2687_v18  ;;  %v2692_v25 = vsel %vm144_vm0, %v2677_v61, %v2679_v12 }
 0x2ef   :  { %4115 = vrot.lane.b32.xlu1 %v14233_v17, %s13227_s15  ;;  %2797 = vmatprep.mubr.bf16.mxu1 %v13222_v14 }
 0x2f0   :  { %v2681_v21 = vpop.permute.xlu0 %2680 }
 0x2f1   :  { %v2693_v0 = vsel %vm144_vm0, %v2679_v12, %v2681_v21  ;;  %v2884_v43 = vpop.permute.xlu1 %2883  ;;  %v11996_v12 = vld [vmem:[%s16797_s2 + $0x20] sm:$0xff] }
 0x2f2   :  { %4117 = vrot.lane.b32.xlu0 %v14198_v38, %s13227_s15 }
 0x2f3   :  { %4113 = vrot.lane.b32.xlu1 %v14230_v60, %s13227_s15 }
 0x2f4   :  { %v2886_v51 = vpop.permute.xlu0 %2885 }
 0x2f5   :  { %11900 = vmatmul.mubr.msk.bf16.vlgmr.msra.gmra.mrb[20].mxu1 %vm169_vm1, %v13149_v2  ;;  %v2910_v41 = vsel %vm373_vm2, %v2884_v43, %v2886_v51  ;;  %v2882_v7 = vpop.permute.xlu1 %2881 }
 0x2f6   :  { %2819 = vmatpush1.bf16.msra.mxu1 %v2686_v24  ;;  %4129 = vrot.lane.b32.xlu0 %v14260_v23, %s13227_s15  ;;  %v2909_v47 = vsel %vm373_vm2, %v2882_v7, %v2884_v43  ;;  %v13153_v24 = vld [vmem:[%s16796_s1 + $0xb0] sm:$0xff]   ;;  %v11997_v43 = vld [vmem:[%s16797_s2 + $0x28] sm:$0xff] }
 0x2f7   :  { %2820 = vmatprep.subr.bf16.mxu1 %v2693_v0  ;;  %4131 = vrot.lane.b32.xlu1 %v14210_v8, %s13227_s15 }
 0x2f8   :  { %2807 = vmatprep.mubr.bf16.mxu1 %v13222_v14  ;;  %v2898_v34 = vpop.permute.xlu0 %2897 }
 0x2f9   :  { %v2900_v45 = vpop.permute.xlu1 %2899 }
 0x2fa   :  { %2821 = vmatpush1.bf16.msra.mxu1 %v2692_v25  ;;  %4127 = vrot.lane.b32.xlu0 %v14254_v4, %s13227_s15  ;;  %v2916_v52 = vsel %vm373_vm2, %v2898_v34, %v2900_v45  ;;  %v11998_v25 = vld [vmem:[%s16797_s2 + $0x30] sm:$0xff] }
 0x2fb   :  { %2939 = vmatprep.subr.bf16.mxu1 %v2910_v41  ;;  %4119 = vrot.lane.b32.xlu1 %v14201_v33, %s13227_s15 }
 0x2fc   :  { %v2896_v26 = vpop.permute.xlu0 %2895 }
 0x2fd   :  { %11901 = vmatmul.mubr.msk.bf16.gmra.mrb[24].mxu1 %vm169_vm1, %v13150_v5  ;;  %v2915_v30 = vsel %vm373_vm2, %v2896_v26, %v2898_v34  ;;  %v2888_v20 = vpop.permute.xlu1 %2887  ;;  %v11999_v26 = vld [vmem:[%s16797_s2 + $0x38] sm:$0xff] }
 0x2fe   :  { %4121 = vrot.lane.b32.xlu0 %v14274_v27, %s13227_s15  ;;  %2850 = vmatprep.mubr.bf16.mxu1 %v13222_v14  ;;  %v2911_v37 = vsel %vm373_vm2, %v2886_v51, %v2888_v20 }
 0x2ff   :  { %4133 = vrot.lane.b32.xlu1 %v14212_v1, %s13227_s15 }
 0x300   :  { %v2890_v16 = vpop.permute.xlu0 %2889 }
 0x301   :  { %v2912_v31 = vsel %vm373_vm2, %v2888_v20, %v2890_v16  ;;  %v2902_v32 = vpop.permute.xlu1 %2901 }
 0x302   :  { %4135 = vrot.lane.b32.xlu0 %v14294_v9, %s13227_s15  ;;  %v2917_v55 = vsel %vm373_vm2, %v2900_v45, %v2902_v32 }
 0x303   :  { %4123 = vrot.lane.b32.xlu1 %v14279_v53, %s13227_s15 }
 0x304   :  { %v2904_v59 = vpop.permute.xlu0 %2903 }
 0x305   :  { %11902 = vmatmul.mubr.msk.bf16.vlgmr.msra.gmra.mrb[28].mxu1 %vm169_vm1, %v13149_v2  ;;  %v2918_v28 = vsel %vm373_vm2, %v2902_v32, %v2904_v59  ;;  %v2892_v42 = vpop.permute.xlu1 %2891 }
 0x306   :  { %2940 = vmatpush1.bf16.msra.mxu1 %v2909_v47  ;;  %4125 = vrot.lane.b32.xlu0 %v13222_v14, %s13227_s15  ;;  %v2913_v56 = vsel %vm373_vm2, %v2890_v16, %v2892_v42 }
 0x307   :  { %2941 = vmatprep.subr.bf16.mxu1 %v2916_v52  ;;  %4137 = vrot.lane.b32.xlu1 %v14298_v29, %s13227_s15  ;;  %v13154_v52 = vld [vmem:[%s16796_s1 + $0xb8] sm:$0xff]  }
 0x308   :  { %2860 = vmatprep.mubr.bf16.mxu1 %v13222_v14  ;;  %v2894_v62 = vpop.permute.xlu0 %2893 }
 0x309   :  { %v2914_v48 = vsel %vm373_vm2, %v2892_v42, %v2894_v62  ;;  %v2906_v50 = vpop.permute.xlu1 %2905 }
 0x30a   :  { %2942 = vmatpush1.bf16.msra.mxu1 %v2915_v30  ;;  %4139 = vrot.lane.b32.xlu0 %v13222_v14, %s13227_s15  ;;  %v2919_v39 = vsel %vm373_vm2, %v2904_v59, %v2906_v50 }
 0x30b   :  { %2992 = vmatprep.subr.bf16.mxu1 %v2912_v31  ;;  %4371 = vrot.lane.b32.xlu1 %v14233_v17, %s13228_s20 }
 0x30c   :  { %v2908_v15 = vpop.permute.xlu0 %2907 }
 0x30d   :  { %11903 = vmatmul.mubr.msk.bf16.gmra.mrb[32].mxu1 %vm169_vm1, %v13150_v5  ;;  %v2920_v36 = vsel %vm373_vm2, %v2906_v50, %v2908_v15  ;;  %v3116_v2 = vpop.permute.xlu1 %3115 }
 0x30e   :  { %4373 = vrot.lane.b32.xlu0 %v14198_v38, %s13228_s20  ;;  %2971 = vmatprep.mubr.bf16.mxu1 %v13222_v14 }
 0x30f   :  { %4369 = vrot.lane.b32.xlu1 %v14230_v60, %s13228_s20 }
 0x310   :  { %v3118_v54 = vpop.permute.xlu0 %3117 }
 0x311   :  { %v3142_v57 = vsel %vm606_vm3, %v3116_v2, %v3118_v54  ;;  %v3114_v58 = vpop.permute.xlu1 %3113 }
 0x312   :  { %4385 = vrot.lane.b32.xlu0 %v14260_v23, %s13228_s20  ;;  %v3141_v5 = vsel %vm606_vm3, %v3114_v58, %v3116_v2 }
 0x313   :  { %4387 = vrot.lane.b32.xlu1 %v14210_v8, %s13228_s20 }
 0x314   :  { %v3130_v44 = vpop.permute.xlu0 %3129 }
 0x315   :  { %11906 = vmatmul.mubr.msk.bf16.vlgmr.msra.gmra.mrb[12].mxu1 %vm169_vm1, %v13151_v3  ;;  %v3132_v19 = vpop.permute.xlu1 %3131 }
 0x316   :  { %2993 = vmatpush1.bf16.msra.mxu1 %v2911_v37  ;;  %4383 = vrot.lane.b32.xlu0 %v14254_v4, %s13228_s20  ;;  %v3148_v40 = vsel %vm606_vm3, %v3130_v44, %v3132_v19 }
 0x317   :  { %2994 = vmatprep.subr.bf16.mxu1 %v2918_v28  ;;  %4375 = vrot.lane.b32.xlu1 %v14201_v33, %s13228_s20 }
 0x318   :  { %2981 = vmatprep.mubr.bf16.mxu1 %v13222_v14  ;;  %v3128_v61 = vpop.permute.xlu0 %3127 }
 0x319   :  { %v3147_v6 = vsel %vm606_vm3, %v3128_v61, %v3130_v44  ;;  %v3120_v18 = vpop.permute.xlu1 %3119 }
 0x31a   :  { %2995 = vmatpush1.bf16.msra.mxu1 %v2917_v55  ;;  %4377 = vrot.lane.b32.xlu0 %v14274_v27, %s13228_s20  ;;  %v3143_v41 = vsel %vm606_vm3, %v3118_v54, %v3120_v18 }
 0x31b   :  { %3045 = vmatprep.subr.bf16.mxu1 %v2914_v48  ;;  %4389 = vrot.lane.b32.xlu1 %v14212_v1, %s13228_s20 }
 0x31c   :  { %v3122_v11 = vpop.permute.xlu0 %3121 }
 0x31d   :  { %11907 = vmatmul.mubr.msk.bf16.gmra.mrb[16].mxu1 %vm169_vm1, %v13152_v46  ;;  %v3144_v21 = vsel %vm606_vm3, %v3120_v18, %v3122_v11  ;;  %v3134_v0 = vpop.permute.xlu1 %3133 }
 0x31e   :  { %4391 = vrot.lane.b32.xlu0 %v14294_v9, %s13228_s20  ;;  %3024 = vmatprep.mubr.bf16.mxu1 %v13222_v14  ;;  %v3149_v47 = vsel %vm606_vm3, %v3132_v19, %v3134_v0 }
 0x31f   :  { %4379 = vrot.lane.b32.xlu1 %v14279_v53, %s13228_s20 }
 0x320   :  { %v3136_v51 = vpop.permute.xlu0 %3135 }
 0x321   :  { %v3150_v34 = vsel %vm606_vm3, %v3134_v0, %v3136_v51  ;;  %v3124_v45 = vpop.permute.xlu1 %3123 }
 0x322   :  { %4381 = vrot.lane.b32.xlu0 %v13222_v14, %s13228_s20  ;;  %v3145_v59 = vsel %vm606_vm3, %v3122_v11, %v3124_v45 }
 0x323   :  { %4393 = vrot.lane.b32.xlu1 %v14298_v29, %s13228_s20 }
 0x324   :  { %v3126_v7 = vpop.permute.xlu0 %3125 }
 0x325   :  { %11908 = vmatmul.mubr.msk.bf16.vlgmr.msra.gmra.mrb[20].mxu1 %vm169_vm1, %v13151_v3  ;;  %v3146_v16 = vsel %vm606_vm3, %v3124_v45, %v3126_v7  ;;  %v3138_v20 = vpop.permute.xlu1 %3137 }
 0x326   :  { %3046 = vmatpush1.bf16.msra.mxu1 %v2913_v56  ;;  %4395 = vrot.lane.b32.xlu0 %v13222_v14, %s13228_s20  ;;  %v3151_v37 = vsel %vm606_vm3, %v3136_v51, %v3138_v20 }
 0x327   :  { %3047 = vmatprep.subr.bf16.mxu1 %v2920_v36  ;;  %4627 = vrot.lane.b32.xlu1 %v14233_v17, %s13229_s26 }
 0x328   :  { %3034 = vmatprep.mubr.bf16.mxu1 %v13222_v14  ;;  %v3140_v30 = vpop.permute.xlu0 %3139 }
 0x329   :  { %v3372_v32 = vpop.permute.xlu1 %3371 }
 0x32a   :  { %3048 = vmatpush1.bf16.msra.mxu1 %v2919_v39  ;;  %4629 = vrot.lane.b32.xlu0 %v14198_v38, %s13229_s26  ;;  %v13155_v39 = vld [vmem:[%s16796_s1 + $0xc0] sm:$0xff]  }
 0x32b   :  { %3171 = vmatprep.subr.bf16.mxu1 %v3142_v57  ;;  %4625 = vrot.lane.b32.xlu1 %v14230_v60, %s13229_s26 }
 0x32c   :  { %v3374_v31 = vpop.permute.xlu0 %3373 }
 0x32d   :  { %11909 = vmatmul.mubr.msk.bf16.gmra.mrb[24].mxu1 %vm169_vm1, %v13152_v46  ;;  %v3398_v28 = vsel %vm863_vm4, %v3372_v32, %v3374_v31  ;;  %v3370_v42 = vpop.permute.xlu1 %3369 }
 0x32e   :  { %4641 = vrot.lane.b32.xlu0 %v14260_v23, %s13229_s26  ;;  %3077 = vmatprep.mubr.bf16.mxu1 %v13222_v14  ;;  %v3397_v48 = vsel %vm863_vm4, %v3370_v42, %v3372_v32 }
 0x32f   :  { %4643 = vrot.lane.b32.xlu1 %v14210_v8, %s13229_s26 }
 0x330   :  { %v3386_v62 = vpop.permute.xlu0 %3385 }
 0x332   :  { %4639 = vrot.lane.b32.xlu0 %v14254_v4, %s13229_s26 }
 0x333   :  { %4631 = vrot.lane.b32.xlu1 %v14201_v33, %s13229_s26 }
 0x334   :  { %v3384_v55 = vpop.permute.xlu0 %3383 }
 0x335   :  { %11910 = vmatmul.mubr.msk.bf16.vlgmr.msra.gmra.mrb[28].mxu1 %vm169_vm1, %v13151_v3  ;;  %v3152_v3 = vsel %vm606_vm3, %v3138_v20, %v3140_v30  ;;  %v3403_v54 = vsel %vm863_vm4, %v3384_v55, %v3386_v62 }
 0x336   :  { %3172 = vmatpush1.bf16.msra.mxu1 %v3141_v5  ;;  %4633 = vrot.lane.b32.xlu0 %v14274_v27, %s13229_s26 }
 0x337   :  { %3173 = vmatprep.subr.bf16.mxu1 %v3148_v40  ;;  %4645 = vrot.lane.b32.xlu1 %v14212_v1, %s13229_s26  ;;  %v13156_v40 = vld [vmem:[%s16796_s1 + $0xc8] sm:$0xff]  }
 0x338   :  { %3087 = vmatprep.mubr.bf16.mxu1 %v13222_v14  ;;  %v3378_v50 = vpop.permute.xlu0 %3377 }
 0x33a   :  { %3174 = vmatpush1.bf16.msra.mxu1 %v3147_v6  ;;  %4647 = vrot.lane.b32.xlu0 %v14294_v9, %s13229_s26 }
 0x33b   :  { %3224 = vmatprep.subr.bf16.mxu1 %v3144_v21  ;;  %4635 = vrot.lane.b32.xlu1 %v14279_v53, %s13229_s26 }
 0x33c   :  { %v3392_v2 = vpop.permute.xlu0 %3391 }
 0x33d   :  { %11911 = vmatmul.mubr.msk.bf16.gmra.mrb[32].mxu1 %vm169_vm1, %v13152_v46  ;;  %v3388_v46 = vpop.permute.xlu1 %3387 }
 0x33e   :  { %4637 = vrot.lane.b32.xlu0 %v13222_v14, %s13229_s26  ;;  %3203 = vmatprep.mubr.bf16.mxu1 %v13222_v14  ;;  %v3404_v15 = vsel %vm863_vm4, %v3386_v62, %v3388_v46 }
 0x33f   :  { %4649 = vrot.lane.b32.xlu1 %v14298_v29, %s13229_s26 }
 0x340   :  { %v3382_v61 = vpop.permute.xlu0 %3381 }
 0x341   :  { %v3376_v56 = vpop.permute.xlu1 %3375 }
 0x342   :  { %4651 = vrot.lane.b32.xlu0 %v13222_v14, %s13229_s26  ;;  %v3400_v36 = vsel %vm863_vm4, %v3376_v56, %v3378_v50  ;;  %v3399_v44 = vsel %vm863_vm4, %v3374_v31, %v3376_v56 }
 0x343   :  { %4873 = vperm.xlu1 %13115, %v11996_v12  }
 0x344   :  { %v3396_v6 = vpop.permute.xlu0 %3395 }
 0x345   :  { %11918 = vmatmul.mubr.msk.bf16.vlgmr.msra.gmra.mrb[12].mxu1 %vm169_vm1, %v13153_v24  ;;  %v3390_v57 = vpop.permute.xlu1 %3389 }
 0x346   :  { %3225 = vmatpush1.bf16.msra.mxu1 %v3143_v41  ;;  %4878 = vperm.xlu0 %13114, %v11997_v43   ;;  %v3406_v58 = vsel %vm863_vm4, %v3390_v57, %v3392_v2  ;;  %v3405_v5 = vsel %vm863_vm4, %v3388_v46, %v3390_v57  ;;  %v13159_v41 = vld [vmem:[%s16796_s1 + $0xe0] sm:$0xff]   ;;  %v13161_v57 = vld [vmem:[%s16796_s1 + $0xf0] sm:$0xff]  }
 0x347   :  { %3226 = vmatprep.subr.bf16.mxu1 %v3150_v34  ;;  %4883 = vperm.xlu1 %13115, %v11998_v25  }
 0x348   :  { %3213 = vmatprep.mubr.bf16.mxu1 %v13222_v14 }
 0x349   :  { %v3380_v19 = vpop.permute.xlu1 %3379 }
 0x34a   :  { %3227 = vmatpush1.bf16.msra.mxu1 %v3149_v47  ;;  %4888 = vperm.xlu0 %13114, %v11999_v26   ;;  %v3402_v11 = vsel %vm863_vm4, %v3380_v19, %v3382_v61  ;;  %v3401_v21 = vsel %vm863_vm4, %v3378_v50, %v3380_v19 }
 0x34b   :  { %3277 = vmatprep.subr.bf16.mxu1 %v3146_v16  ;;  %5035 = vrot.lane.b32.xlu1 %v13222_v14, %s13221_s5  ;;  %v13160_v16 = vld [vmem:[%s16796_s1 + $0xe8] sm:$0xff]  }
 0x34d   :  { %11919 = vmatmul.mubr.msk.bf16.gmra.mrb[16].mxu1 %vm169_vm1, %v13154_v52  ;;  %v3394_v18 = vpop.permute.xlu1 %3393 }
 0x34e   :  { %3256 = vmatprep.mubr.bf16.mxu1 %v13222_v14  ;;  %v3408_v12 = vsel %vm863_vm4, %v3394_v18, %v3396_v6  ;;  %v3407_v51 = vsel %vm863_vm4, %v3392_v2, %v3394_v18 }
 0x355   :  { %11920 = vmatmul.mubr.msk.bf16.vlgmr.msra.gmra.mrb[20].mxu1 %vm169_vm1, %v13153_v24 }
 0x356   :  { %3278 = vmatpush1.bf16.msra.mxu1 %v3145_v59  ;;  %3266 = vmatprep.mubr.bf16.mxu1 %v13222_v14 }
 0x357   :  { %3279 = vmatprep.subr.bf16.mxu1 %v3152_v3 }
 0x35a   :  { %3280 = vmatpush1.bf16.msra.mxu1 %v3151_v37 }
 0x35b   :  { %3427 = vmatprep.subr.bf16.mxu1 %v3398_v28 }
 0x35d   :  { %11921 = vmatmul.mubr.msk.bf16.gmra.mrb[24].mxu1 %vm169_vm1, %v13154_v52 }
 0x35e   :  { %3309 = vmatprep.mubr.bf16.mxu1 %v13222_v14 }
 0x365   :  { %11922 = vmatmul.mubr.msk.bf16.vlgmr.msra.gmra.mrb[28].mxu1 %vm169_vm1, %v13153_v24 }
 0x366   :  { %3428 = vmatpush1.bf16.msra.mxu1 %v3397_v48  ;;  %3319 = vmatprep.mubr.bf16.mxu1 %v13222_v14 }
 0x367   :  { %3429 = vmatprep.subr.bf16.mxu1 %v3404_v15 }
 0x36a   :  { %3430 = vmatpush1.bf16.msra.mxu1 %v3403_v54 }
 0x36b   :  { %3480 = vmatprep.subr.bf16.mxu1 %v3400_v36 }
 0x36d   :  { %11923 = vmatmul.mubr.msk.bf16.gmra.mrb[32].mxu1 %vm169_vm1, %v13154_v52 }
 0x36e   :  { %3459 = vmatprep.mubr.bf16.mxu1 %v13222_v14 }
 0x375   :  { %11930 = vmatmul.mubr.msk.bf16.vlgmr.msra.gmra.mrb[12].mxu1 %vm169_vm1, %v13155_v39 }
 0x376   :  { %3481 = vmatpush1.bf16.msra.mxu1 %v3399_v44  ;;  %3469 = vmatprep.mubr.bf16.mxu1 %v13222_v14 }
 0x377   :  { %3482 = vmatprep.subr.bf16.mxu1 %v3406_v58 }
 0x37a   :  { %3483 = vmatpush1.bf16.msra.mxu1 %v3405_v5 }
 0x37b   :  { %3533 = vmatprep.subr.bf16.mxu1 %v3402_v11  ;;  %v13162_v11 = vld [vmem:[%s16796_s1 + $0xf8] sm:$0xff]  }
 0x37d   :  { %11931 = vmatmul.mubr.msk.bf16.gmra.mrb[16].mxu1 %vm169_vm1, %v13156_v40 }
 0x37e   :  { %3512 = vmatprep.mubr.bf16.mxu1 %v13222_v14 }
 0x385   :  { %11932 = vmatmul.mubr.msk.bf16.vlgmr.msra.gmra.mrb[20].mxu1 %vm169_vm1, %v13155_v39 }
 0x386   :  { %3534 = vmatpush1.bf16.msra.mxu1 %v3401_v21  ;;  %3522 = vmatprep.mubr.bf16.mxu1 %v13222_v14 }
 0x387   :  { %3535 = vmatprep.subr.bf16.mxu1 %v3408_v12 }
 0x38a   :  { %3536 = vmatpush1.bf16.msra.mxu1 %v3407_v51 }
 0x38b   :  { %3631 = vmatprep.subr.bf16.mxu1 %v14233_v17  ;;  %v13157_v17 = vld [vmem:[%s16796_s1 + $0xd0] sm:$0xff]  }
 0x38d   :  { %11933 = vmatmul.mubr.msk.bf16.gmra.mrb[24].mxu1 %vm169_vm1, %v13156_v40 }
 0x38e   :  { %3565 = vmatprep.mubr.bf16.mxu1 %v13222_v14 }
 0x395   :  { %11934 = vmatmul.mubr.msk.bf16.vlgmr.msra.gmra.mrb[28].mxu1 %vm169_vm1, %v13155_v39 }
 0x396   :  { %3632 = vmatpush1.bf16.msra.mxu1 %v14230_v60  ;;  %3575 = vmatprep.mubr.bf16.mxu1 %v13222_v14  ;;  %v3862_v60 = vpop.permute.xlu0 %3861 }
 0x397   :  { %3633 = vmatprep.subr.bf16.mxu1 %v14260_v23 }
 0x39a   :  { %3634 = vmatpush1.bf16.msra.mxu1 %v14254_v4 }
 0x39b   :  { %3684 = vmatprep.subr.bf16.mxu1 %v14201_v33  ;;  %v13158_v33 = vld [vmem:[%s16796_s1 + $0xd8] sm:$0xff]  }
 0x39d   :  { %11935 = vmatmul.mubr.msk.bf16.gmra.mrb[32].mxu1 %vm169_vm1, %v13156_v40 }
 0x39e   :  { %3663 = vmatprep.mubr.bf16.mxu1 %v13222_v14 }
 0x3a5   :  { %11942 = vmatmul.mubr.msk.bf16.vlgmr.msra.gmra.mrb[12].mxu1 %vm169_vm1, %v13157_v17 }
 0x3a6   :  { %3685 = vmatpush1.bf16.msra.mxu1 %v14198_v38  ;;  %3673 = vmatprep.mubr.bf16.mxu1 %v13222_v14  ;;  %v3860_v38 = vpop.permute.xlu1 %3859 }
 0x3a7   :  { %3686 = vmatprep.subr.bf16.mxu1 %v14212_v1  ;;  %v3874_v1 = vpop.permute.xlu0 %3873 }
 0x3aa   :  { %3687 = vmatpush1.bf16.msra.mxu1 %v14210_v8  ;;  %v3886_v8 = vsel %vm1470_vm5, %v3860_v38, %v3862_v60  ;;  %v3858_v4 = vpop.permute.xlu1 %3857 }
 0x3ab   :  { %3737 = vmatprep.subr.bf16.mxu1 %v14279_v53  ;;  %v3872_v23 = vpop.permute.xlu0 %3871 }
 0x3ac   :  { %v3891_v24 = vsel %vm1470_vm5, %v3872_v23, %v3874_v1 }
 0x3ad   :  { %11943 = vmatmul.mubr.msk.bf16.gmra.mrb[16].mxu1 %vm169_vm1, %v13158_v33 }
 0x3ae   :  { %3716 = vmatprep.mubr.bf16.mxu1 %v13222_v14  ;;  %v3876_v53 = vpop.permute.xlu1 %3875 }
 0x3b2   :  { %v3864_v0 = vpop.permute.xlu1 %3863 }
 0x3b3   :  { %v3887_v7 = vsel %vm1470_vm5, %v3862_v60, %v3864_v0 }
 0x3b5   :  { %11944 = vmatmul.mubr.msk.bf16.vlgmr.msra.gmra.mrb[20].mxu1 %vm169_vm1, %v13157_v17 }
 0x3b6   :  { %3738 = vmatpush1.bf16.msra.mxu1 %v14274_v27  ;;  %3726 = vmatprep.mubr.bf16.mxu1 %v13222_v14  ;;  %v3885_v27 = vsel %vm1470_vm5, %v3858_v4, %v3860_v38  ;;  %v3878_v34 = vpop.permute.xlu1 %3877 }
 0x3b7   :  { %3739 = vmatprep.subr.bf16.mxu1 %v14298_v29  ;;  %v3892_v29 = vsel %vm1470_vm5, %v3874_v1, %v3876_v53  ;;  %v3893_v52 = vsel %vm1470_vm5, %v3876_v53, %v3878_v34 }
 0x3ba   :  { %3740 = vmatpush1.bf16.msra.mxu1 %v14294_v9  ;;  %v3866_v9 = vpop.permute.xlu0 %3865  ;;  %v3868_v47 = vpop.permute.xlu1 %3867 }
 0x3bb   :  { %3915 = vmatprep.subr.bf16.mxu1 %v3886_v8  ;;  %v3888_v43 = vsel %vm1470_vm5, %v3864_v0, %v3866_v9  ;;  %v3889_v3 = vsel %vm1470_vm5, %v3866_v9, %v3868_v47 }
 0x3bd   :  { %11945 = vmatmul.mubr.msk.bf16.gmra.mrb[24].mxu1 %vm169_vm1, %v13158_v33 }
 0x3be   :  { %3769 = vmatprep.mubr.bf16.mxu1 %v13222_v14  ;;  %v3880_v25 = vpop.permute.xlu0 %3879  ;;  %v3882_v31 = vpop.permute.xlu1 %3881 }
 0x3bf   :  { %v3894_v26 = vsel %vm1470_vm5, %v3878_v34, %v3880_v25  ;;  %v3895_v28 = vsel %vm1470_vm5, %v3880_v25, %v3882_v31  ;;  %v13163_v25 = vld [vmem:[%s16796_s1 + $0x100] sm:$0xff]  }
 0x3c2   :  { %v3870_v45 = vpop.permute.xlu0 %3869  ;;  %v4116_v37 = vpop.permute.xlu1 %4115 }
 0x3c3   :  { %v3890_v30 = vsel %vm1470_vm5, %v3868_v47, %v3870_v45 }
 0x3c5   :  { %11946 = vmatmul.mubr.msk.bf16.vlgmr.msra.gmra.mrb[28].mxu1 %vm169_vm1, %v13157_v17 }
 0x3c6   :  { %3916 = vmatpush1.bf16.msra.mxu1 %v3885_v27  ;;  %3779 = vmatprep.mubr.bf16.mxu1 %v13222_v14  ;;  %v3884_v20 = vpop.permute.xlu0 %3883  ;;  %v4114_v55 = vpop.permute.xlu1 %4113 }
 0x3c7   :  { %3917 = vmatprep.subr.bf16.mxu1 %v3892_v29  ;;  %v3896_v32 = vsel %vm1470_vm5, %v3882_v31, %v3884_v20  ;;  %v4141_v15 = vsel %vm1727_vm6, %v4114_v55, %v4116_v37 }
 0x3ca   :  { %3918 = vmatpush1.bf16.msra.mxu1 %v3891_v24  ;;  %v4118_v59 = vpop.permute.xlu0 %4117  ;;  %v4132_v48 = vpop.permute.xlu1 %4131 }
 0x3cb   :  { %3968 = vmatprep.subr.bf16.mxu1 %v3888_v43  ;;  %v4142_v62 = vsel %vm1727_vm6, %v4116_v37, %v4118_v59 }
 0x3cd   :  { %11947 = vmatmul.mubr.msk.bf16.gmra.mrb[32].mxu1 %vm169_vm1, %v13158_v33 }
 0x3ce   :  { %3947 = vmatprep.mubr.bf16.mxu1 %v13222_v14  ;;  %v4130_v42 = vpop.permute.xlu0 %4129  ;;  %v4120_v36 = vpop.permute.xlu1 %4119 }
 0x3cf   :  { %v4148_v50 = vsel %vm1727_vm6, %v4130_v42, %v4132_v48  ;;  %v4143_v58 = vsel %vm1727_vm6, %v4118_v59, %v4120_v36 }
 0x3d2   :  { %v4128_v46 = vpop.permute.xlu0 %4127  ;;  %v4134_v44 = vpop.permute.xlu1 %4133 }
 0x3d3   :  { %v4147_v56 = vsel %vm1727_vm6, %v4128_v46, %v4130_v42  ;;  %v4149_v40 = vsel %vm1727_vm6, %v4132_v48, %v4134_v44 }
 0x3d5   :  { %11954 = vmatmul.mubr.msk.bf16.vlgmr.msra.gmra.mrb[12].mxu1 %vm169_vm1, %v13159_v41 }
 0x3d6   :  { %3969 = vmatpush1.bf16.msra.mxu1 %v3887_v7  ;;  %3957 = vmatprep.mubr.bf16.mxu1 %v13222_v14  ;;  %v4122_v54 = vpop.permute.xlu0 %4121  ;;  %v4124_v5 = vpop.permute.xlu1 %4123 }
 0x3d7   :  { %3970 = vmatprep.subr.bf16.mxu1 %v3894_v26  ;;  %v4144_v2 = vsel %vm1727_vm6, %v4120_v36, %v4122_v54  ;;  %v4145_v51 = vsel %vm1727_vm6, %v4122_v54, %v4124_v5 }
 0x3da   :  { %3971 = vmatpush1.bf16.msra.mxu1 %v3893_v52  ;;  %v4136_v39 = vpop.permute.xlu0 %4135  ;;  %v4138_v21 = vpop.permute.xlu1 %4137  ;;  %v13164_v52 = vld [vmem:[%s16796_s1 + $0x108] sm:$0xff]  }
 0x3db   :  { %4021 = vmatprep.subr.bf16.mxu1 %v3890_v30  ;;  %v4150_v61 = vsel %vm1727_vm6, %v4134_v44, %v4136_v39  ;;  %v4151_v60 = vsel %vm1727_vm6, %v4136_v39, %v4138_v21  ;;  %v13165_v39 = vld [vmem:[%s16796_s1 + $0x110] sm:$0xff]  }
 0x3dd   :  { %11955 = vmatmul.mubr.msk.bf16.gmra.mrb[16].mxu1 %vm169_vm1, %v13160_v16 }
 0x3de   :  { %4000 = vmatprep.mubr.bf16.mxu1 %v13222_v14  ;;  %v4126_v19 = vpop.permute.xlu0 %4125  ;;  %v4372_v33 = vpop.permute.xlu1 %4371 }
 0x3df   :  { %v4146_v6 = vsel %vm1727_vm6, %v4124_v5, %v4126_v19 }
 0x3e2   :  { %v4140_v18 = vpop.permute.xlu0 %4139  ;;  %v4370_v1 = vpop.permute.xlu1 %4369 }
 0x3e3   :  { %v4152_v17 = vsel %vm1727_vm6, %v4138_v21, %v4140_v18  ;;  %v4397_v53 = vsel %vm1984_vm7, %v4370_v1, %v4372_v33 }
 0x3e5   :  { %11956 = vmatmul.mubr.msk.bf16.vlgmr.msra.gmra.mrb[20].mxu1 %vm169_vm1, %v13159_v41 }
 0x3e6   :  { %4022 = vmatpush1.bf16.msra.mxu1 %v3889_v3  ;;  %4010 = vmatprep.mubr.bf16.mxu1 %v13222_v14  ;;  %v4374_v12 = vpop.permute.xlu0 %4373  ;;  %v4388_v23 = vpop.permute.xlu1 %4387 }
 0x3e7   :  { %4023 = vmatprep.subr.bf16.mxu1 %v3896_v32  ;;  %v4398_v38 = vsel %vm1984_vm7, %v4372_v33, %v4374_v12 }
 0x3ea   :  { %4024 = vmatpush1.bf16.msra.mxu1 %v3895_v28  ;;  %v4386_v8 = vpop.permute.xlu0 %4385  ;;  %v4376_v24 = vpop.permute.xlu1 %4375 }
 0x3eb   :  { %4171 = vmatprep.subr.bf16.mxu1 %v4142_v62  ;;  %v4404_v27 = vsel %vm1984_vm7, %v4386_v8, %v4388_v23  ;;  %v4399_v34 = vsel %vm1984_vm7, %v4374_v12, %v4376_v24 }
 0x3ed   :  { %11957 = vmatmul.mubr.msk.bf16.gmra.mrb[24].mxu1 %vm169_vm1, %v13160_v16 }
 0x3ee   :  { %4053 = vmatprep.mubr.bf16.mxu1 %v13222_v14  ;;  %v4384_v4 = vpop.permute.xlu0 %4383 }
 0x3ef   :  { %v4403_v9 = vsel %vm1984_vm7, %v4384_v4, %v4386_v8 }
 0x3f2   :  { %v4378_v29 = vpop.permute.xlu0 %4377 }
 0x3f3   :  { %v4400_v0 = vsel %vm1984_vm7, %v4376_v24, %v4378_v29 }
 0x3f5   :  { %11958 = vmatmul.mubr.msk.bf16.vlgmr.msra.gmra.mrb[28].mxu1 %vm169_vm1, %v13159_v41  ;;  %v4390_v41 = vpop.permute.xlu1 %4389 }
 0x3f6   :  { %4172 = vmatpush1.bf16.msra.mxu1 %v4141_v15  ;;  %4063 = vmatprep.mubr.bf16.mxu1 %v13222_v14  ;;  %v4392_v43 = vpop.permute.xlu0 %4391  ;;  %v4405_v47 = vsel %vm1984_vm7, %v4388_v23, %v4390_v41 }
 0x3f7   :  { %4173 = vmatprep.subr.bf16.mxu1 %v4148_v50  ;;  %v4406_v7 = vsel %vm1984_vm7, %v4390_v41, %v4392_v43 }
 0x3f9   :  { %v4380_v45 = vpop.permute.xlu1 %4379 }
 0x3fa   :  { %4174 = vmatpush1.bf16.msra.mxu1 %v4147_v56  ;;  %v4382_v26 = vpop.permute.xlu0 %4381  ;;  %v4401_v59 = vsel %vm1984_vm7, %v4378_v29, %v4380_v45 }
 0x3fb   :  { %4224 = vmatprep.subr.bf16.mxu1 %v4144_v2 }
 0x3fd   :  { %11959 = vmatmul.mubr.msk.bf16.gmra.mrb[32].mxu1 %vm169_vm1, %v13160_v16  ;;  %v4402_v16 = vsel %vm1984_vm7, %v4380_v45, %v4382_v26  ;;  %v4394_v20 = vpop.permute.xlu1 %4393 }
 0x3fe   :  { %4203 = vmatprep.mubr.bf16.mxu1 %v13222_v14  ;;  %v4396_v30 = vpop.permute.xlu0 %4395  ;;  %v4407_v37 = vsel %vm1984_vm7, %v4392_v43, %v4394_v20 }
 0x3ff   :  { %v4408_v3 = vsel %vm1984_vm7, %v4394_v20, %v4396_v30 }
 0x401   :  { %v4628_v32 = vpop.permute.xlu1 %4627 }
 0x402   :  { %v4630_v31 = vpop.permute.xlu0 %4629 }
 0x403   :  { %v4654_v28 = vsel %vm2241_vm8, %v4628_v32, %v4630_v31 }
 0x405   :  { %11966 = vmatmul.mubr.msk.bf16.vlgmr.msra.gmra.mrb[12].mxu1 %vm169_vm1, %v13161_v57  ;;  %v4626_v42 = vpop.permute.xlu1 %4625 }
 0x406   :  { %4225 = vmatpush1.bf16.msra.mxu1 %v4143_v58  ;;  %4213 = vmatprep.mubr.bf16.mxu1 %v13222_v14  ;;  %v4642_v62 = vpop.permute.xlu0 %4641  ;;  %v4653_v48 = vsel %vm2241_vm8, %v4626_v42, %v4628_v32 }
 0x407   :  { %4226 = vmatprep.subr.bf16.mxu1 %v4150_v61 }
 0x409   :  { %v4644_v46 = vpop.permute.xlu1 %4643 }
 0x40a   :  { %4227 = vmatpush1.bf16.msra.mxu1 %v4149_v40  ;;  %v4640_v55 = vpop.permute.xlu0 %4639  ;;  %v4660_v15 = vsel %vm2241_vm8, %v4642_v62, %v4644_v46  ;;  %v13166_v40 = vld [vmem:[%s16796_s1 + $0x118] sm:$0xff]  }
 0x40b   :  { %4277 = vmatprep.subr.bf16.mxu1 %v4146_v6  ;;  %v4659_v54 = vsel %vm2241_vm8, %v4640_v55, %v4642_v62 }
 0x40d   :  { %11967 = vmatmul.mubr.msk.bf16.gmra.mrb[16].mxu1 %vm169_vm1, %v13162_v11  ;;  %v4632_v56 = vpop.permute.xlu1 %4631 }
 0x40e   :  { %4256 = vmatprep.mubr.bf16.mxu1 %v13222_v14  ;;  %v4634_v50 = vpop.permute.xlu0 %4633  ;;  %v4655_v44 = vsel %vm2241_vm8, %v4630_v31, %v4632_v56 }
 0x40f   :  { %v4656_v36 = vsel %vm2241_vm8, %v4632_v56, %v4634_v50 }
 0x412   :  { %v4648_v2 = vpop.permute.xlu0 %4647 }
 0x415   :  { %11968 = vmatmul.mubr.msk.bf16.vlgmr.msra.gmra.mrb[20].mxu1 %vm169_vm1, %v13161_v57 }
 0x416   :  { %4278 = vmatpush1.bf16.msra.mxu1 %v4145_v51  ;;  %4266 = vmatprep.mubr.bf16.mxu1 %v13222_v14  ;;  %v4638_v61 = vpop.permute.xlu0 %4637 }
 0x417   :  { %4279 = vmatprep.subr.bf16.mxu1 %v4152_v17 }
 0x41a   :  { %4280 = vmatpush1.bf16.msra.mxu1 %v4151_v60  ;;  %v4652_v6 = vpop.permute.xlu0 %4651 }
 0x41b   :  { %4427 = vmatprep.subr.bf16.mxu1 %v4398_v38 }
 0x41d   :  { %11969 = vmatmul.mubr.msk.bf16.gmra.mrb[24].mxu1 %vm169_vm1, %v13162_v11 }
 0x41e   :  { %4309 = vmatprep.mubr.bf16.mxu1 %v13222_v14  ;;  %v14791_v8 = vpop.permute.xlu0 %4878 }
 0x425   :  { %11970 = vmatmul.mubr.msk.bf16.vlgmr.msra.gmra.mrb[28].mxu1 %vm169_vm1, %v13161_v57  ;;  %v4646_v57 = vpop.permute.xlu1 %4645 }
 0x426   :  { %4428 = vmatpush1.bf16.msra.mxu1 %v4397_v53  ;;  %4319 = vmatprep.mubr.bf16.mxu1 %v13222_v14  ;;  %v4662_v58 = vsel %vm2241_vm8, %v4646_v57, %v4648_v2  ;;  %v4661_v5 = vsel %vm2241_vm8, %v4644_v46, %v4646_v57 }
 0x427   :  { %4429 = vmatprep.subr.bf16.mxu1 %v4404_v27 }
 0x429   :  { %v4636_v19 = vpop.permute.xlu1 %4635 }
 0x42a   :  { %4430 = vmatpush1.bf16.msra.mxu1 %v4403_v9  ;;  %v4657_v21 = vsel %vm2241_vm8, %v4634_v50, %v4636_v19 }
 0x42b   :  { %4480 = vmatprep.subr.bf16.mxu1 %v4400_v0 }
 0x42d   :  { %11971 = vmatmul.mubr.msk.bf16.gmra.mrb[32].mxu1 %vm169_vm1, %v13162_v11  ;;  %v4658_v11 = vsel %vm2241_vm8, %v4636_v19, %v4638_v61  ;;  %v4650_v18 = vpop.permute.xlu1 %4649 }
 0x42e   :  { %4459 = vmatprep.mubr.bf16.mxu1 %v13222_v14  ;;  %v4664_v12 = vsel %vm2241_vm8, %v4650_v18, %v4652_v6  ;;  %v4663_v51 = vsel %vm2241_vm8, %v4648_v2, %v4650_v18 }
 0x431   :  { %v14788_v17 = vpop.permute.xlu1 %4873 }
 0x435   :  { %11978 = vmatmul.mubr.msk.bf16.vlgmr.msra.gmra.mrb[12].mxu1 %vm169_vm1, %v13163_v25  ;;  %v14798_v41 = vpop.permute.xlu1 %4883 }
 0x436   :  { %4481 = vmatpush1.bf16.msra.mxu1 %v4399_v34  ;;  %4469 = vmatprep.mubr.bf16.mxu1 %v13222_v14 }
 0x437   :  { %4482 = vmatprep.subr.bf16.mxu1 %v4406_v7 }
 0x43a   :  { %4483 = vmatpush1.bf16.msra.mxu1 %v4405_v47 }
 0x43b   :  { %4533 = vmatprep.subr.bf16.mxu1 %v4402_v16  ;;  %v14805_v16 = vpop.permute.xlu0 %4888 }
 0x43d   :  { %11979 = vmatmul.mubr.msk.bf16.gmra.mrb[16].mxu1 %vm169_vm1, %v13164_v52 }
 0x43e   :  { %4512 = vmatprep.mubr.bf16.mxu1 %v13222_v14 }
 0x445   :  { %11980 = vmatmul.mubr.msk.bf16.vlgmr.msra.gmra.mrb[20].mxu1 %vm169_vm1, %v13163_v25 }
 0x446   :  { %4534 = vmatpush1.bf16.msra.mxu1 %v4401_v59  ;;  %4522 = vmatprep.mubr.bf16.mxu1 %v13222_v14 }
 0x447   :  { %4535 = vmatprep.subr.bf16.mxu1 %v4408_v3 }
 0x44a   :  { %4536 = vmatpush1.bf16.msra.mxu1 %v4407_v37 }
 0x44b   :  { %4683 = vmatprep.subr.bf16.mxu1 %v4654_v28 }
 0x44d   :  { %11981 = vmatmul.mubr.msk.bf16.gmra.mrb[24].mxu1 %vm169_vm1, %v13164_v52 }
 0x44e   :  { %4565 = vmatprep.mubr.bf16.mxu1 %v13222_v14 }
 0x455   :  { %11982 = vmatmul.mubr.msk.bf16.vlgmr.msra.gmra.mrb[28].mxu1 %vm169_vm1, %v13163_v25 }
 0x456   :  { %4684 = vmatpush1.bf16.msra.mxu1 %v4653_v48  ;;  %4575 = vmatprep.mubr.bf16.mxu1 %v13222_v14 }
 0x457   :  { %4685 = vmatprep.subr.bf16.mxu1 %v4660_v15 }
 0x45a   :  { %4686 = vmatpush1.bf16.msra.mxu1 %v4659_v54 }
 0x45b   :  { %4736 = vmatprep.subr.bf16.mxu1 %v4656_v36 }
 0x45d   :  { %11983 = vmatmul.mubr.msk.bf16.gmra.mrb[32].mxu1 %vm169_vm1, %v13164_v52 }
 0x45e   :  { %4715 = vmatprep.mubr.bf16.mxu1 %v13222_v14 }
 0x465   :  { %11990 = vmatmul.mubr.msk.bf16.vlgmr.msra.gmra.mrb[12].mxu1 %vm169_vm1, %v13165_v39 }
 0x466   :  { %4737 = vmatpush1.bf16.msra.mxu1 %v4655_v44  ;;  %4725 = vmatprep.mubr.bf16.mxu1 %v13222_v14 }
 0x467   :  { %4738 = vmatprep.subr.bf16.mxu1 %v4662_v58 }
 0x46a   :  { %4739 = vmatpush1.bf16.msra.mxu1 %v4661_v5 }
 0x46b   :  { %4789 = vmatprep.subr.bf16.mxu1 %v4658_v11 }
 0x46d   :  { %11991 = vmatmul.mubr.msk.bf16.gmra.mrb[16].mxu1 %vm169_vm1, %v13166_v40 }
 0x46e   :  { %4768 = vmatprep.mubr.bf16.mxu1 %v13222_v14 }
 0x475   :  { %11992 = vmatmul.mubr.msk.bf16.vlgmr.msra.gmra.mrb[20].mxu1 %vm169_vm1, %v13165_v39 }
 0x476   :  { %4790 = vmatpush1.bf16.msra.mxu1 %v4657_v21  ;;  %4778 = vmatprep.mubr.bf16.mxu1 %v13222_v14 }
 0x477   :  { %4791 = vmatprep.subr.bf16.mxu1 %v4664_v12 }
 0x47a   :  { %4792 = vmatpush1.bf16.msra.mxu1 %v4663_v51 }
 0x47d   :  { %11993 = vmatmul.mubr.msk.bf16.gmra.mrb[24].mxu1 %vm169_vm1, %v13166_v40 }
 0x47e   :  { %4821 = vmatprep.mubr.bf16.mxu1 %v13222_v14 }
 0x485   :  { %11994 = vmatmul.mubr.msk.bf16.vlgmr.msra.gmra.mrb[28].mxu1 %vm169_vm1, %v13165_v39 }
 0x486   :  { %4831 = vmatprep.mubr.bf16.mxu1 %v13222_v14 }
 0x48d   :  { %11995 = vmatmul.mubr.msk.bf16.gmra.mrb[32].mxu1 %vm169_vm1, %v13166_v40 }
 0x48e   :  { %7506 = vmatprep.mubr.bf16.mxu1 %v13222_v14 }
 0x538   :  { %v4717_v33 = vpop.f32.mrb[12].mxu1 }
 0x539   :  { %v4891_v60 = vadd.f32 %v14788_v17, %v4717_v33  ;;  %v4719_v38 = vpop.f32.mrb[13].mxu1 }
 0x53a   :  { %v4892_v1 = vadd.f32 %v14788_v17, %v4719_v38  ;;  %v4721_v4 = vpop.f32.mrb[14].mxu1 }
 0x53b   :  { %v4915_v23 = vmax.f32 %v4891_v60, 0.0  ;;  %v4897_v53 = vadd.f32 %v14791_v8, %v4721_v4  ;;  %v4723_v27 = vpop.f32.mrb[15].mxu1 }
 0x53c   :  { %v4916_v29 = vmax.f32 %v4892_v1, 0.0  ;;  %v4898_v9 = vadd.f32 %v14791_v8, %v4723_v27 }
 0x53d   :  { %v4921_v24 = vmax.f32 %v4897_v53, 0.0  ;;  %v4939_v43 = vmul.f32 %v4915_v23, %v14219_v22 }
 0x53e   :  { %v4922_v0 = vmax.f32 %v4898_v9, 0.0  ;;  %v4940_v34 = vmul.f32 %v4916_v29, %v14223_v10 }
 0x53f   :  { %v4945_v25 = vmul.f32 %v4921_v24, %v14219_v22 }
 0x540   :  { %v4946_v7 = vmul.f32 %v4922_v0, %v14223_v10  ;;  %v4727_v26 = vpop.f32.mrb[16].mxu1 }
 0x541   :  { %v14802_v45 = vpack.c.bf16 %v4945_v25, %v4939_v43  ;;  %v4903_v47 = vadd.f32 %v14798_v41, %v4727_v26  ;;  %v4729_v52 = vpop.f32.mrb[17].mxu1 }
 0x542   :  { %v14807_v30 = vpack.c.bf16 %v4946_v7, %v4940_v34  ;;  %v4904_v20 = vadd.f32 %v14798_v41, %v4729_v52  ;;  %v4731_v31 = vpop.f32.mrb[18].mxu1 }
 0x543   :  { %v4927_v59 = vmax.f32 %v4903_v47, 0.0  ;;  %v4909_v3 = vadd.f32 %v14805_v16, %v4731_v31  ;;  %v4733_v32 = vpop.f32.mrb[19].mxu1  ;;  %5037 = vrot.lane.b32.xlu1 %v14802_v45, %s13221_s5 }
 0x544   :  { %v4928_v37 = vmax.f32 %v4904_v20, 0.0  ;;  %v4910_v28 = vadd.f32 %v14805_v16, %v4733_v32  ;;  %5039 = vrot.lane.b32.xlu0 %v14807_v30, %s13221_s5 }
 0x545   :  { %v4933_v62 = vmax.f32 %v4909_v3, 0.0  ;;  %v4951_v55 = vmul.f32 %v4927_v59, %v14219_v22 }
 0x546   :  { %v4934_v42 = vmax.f32 %v4910_v28, 0.0  ;;  %v4952_v48 = vmul.f32 %v4928_v37, %v14223_v10 }
 0x547   :  { %v4957_v46 = vmul.f32 %v4933_v62, %v14219_v22 }
 0x548   :  { %v4958_v15 = vmul.f32 %v4934_v42, %v14223_v10  ;;  %v4770_v50 = vpop.f32.mrb[20].mxu1 }
 0x549   :  { %v14820_v54 = vpack.c.bf16 %v4957_v46, %v4951_v55  ;;  %v4893_v56 = vadd.f32 %v14788_v17, %v4770_v50  ;;  %v4772_v36 = vpop.f32.mrb[21].mxu1 }
 0x54a   :  { %v14823_v2 = vpack.c.bf16 %v4958_v15, %v4952_v48  ;;  %v4894_v39 = vadd.f32 %v14788_v17, %v4772_v36  ;;  %v4774_v57 = vpop.f32.mrb[22].mxu1 }
 0x54b   :  { %v4917_v44 = vmax.f32 %v4893_v56, 0.0  ;;  %v4899_v58 = vadd.f32 %v14791_v8, %v4774_v57  ;;  %v4776_v61 = vpop.f32.mrb[23].mxu1  ;;  %5051 = vrot.lane.b32.xlu0 %v14820_v54, %s13221_s5 }
 0x54c   :  { %v4918_v19 = vmax.f32 %v4894_v39, 0.0  ;;  %v4900_v5 = vadd.f32 %v14791_v8, %v4776_v61  ;;  %5053 = vrot.lane.b32.xlu1 %v14823_v2, %s13221_s5 }
 0x54d   :  { %v4923_v40 = vmax.f32 %v4899_v58, 0.0  ;;  %v4941_v6 = vmul.f32 %v4917_v44, %v14183_v49 }
 0x54e   :  { %v4924_v11 = vmax.f32 %v4900_v5, 0.0  ;;  %v4942_v21 = vmul.f32 %v4918_v19, %v14187_v13 }
 0x54f   :  { %v4947_v18 = vmul.f32 %v4923_v40, %v14183_v49  ;;  %5049 = vrot.lane.b32.xlu0 %v13222_v14, %s13221_s5 }
 0x550   :  { %v4948_v12 = vmul.f32 %v4924_v11, %v14187_v13  ;;  %v4780_v51 = vpop.f32.mrb[24].mxu1 }
 0x551   :  { %v14838_v33 = vpack.c.bf16 %v4947_v18, %v4941_v6  ;;  %v4905_v60 = vadd.f32 %v14798_v41, %v4780_v51  ;;  %v4782_v38 = vpop.f32.mrb[25].mxu1 }
 0x552   :  { %v14841_v1 = vpack.c.bf16 %v4948_v12, %v4942_v21  ;;  %v4906_v4 = vadd.f32 %v14798_v41, %v4782_v38  ;;  %v4784_v23 = vpop.f32.mrb[26].mxu1 }
 0x553   :  { %v4929_v53 = vmax.f32 %v4905_v60, 0.0  ;;  %v4911_v27 = vadd.f32 %v14805_v16, %v4784_v23  ;;  %v4786_v29 = vpop.f32.mrb[27].mxu1  ;;  %5041 = vrot.lane.b32.xlu1 %v14838_v33, %s13221_s5 }
 0x554   :  { %v4930_v9 = vmax.f32 %v4906_v4, 0.0  ;;  %v4912_v24 = vadd.f32 %v14805_v16, %v4786_v29  ;;  %5043 = vrot.lane.b32.xlu0 %v14841_v1, %s13221_s5 }
 0x555   :  { %v4935_v0 = vmax.f32 %v4911_v27, 0.0  ;;  %v4953_v25 = vmul.f32 %v4929_v53, %v14183_v49 }
 0x556   :  { %v4936_v43 = vmax.f32 %v4912_v24, 0.0  ;;  %v4954_v7 = vmul.f32 %v4930_v9, %v14187_v13 }
 0x557   :  { %v4959_v34 = vmul.f32 %v4935_v0, %v14183_v49 }
 0x558   :  { %v4960_v26 = vmul.f32 %v4936_v43, %v14187_v13  ;;  %v4823_v47 = vpop.f32.mrb[28].mxu1 }
 0x559   :  { %v14854_v52 = vpack.c.bf16 %v4959_v34, %v4953_v25  ;;  %v4895_v20 = vadd.f32 %v14788_v17, %v4823_v47  ;;  %v4825_v31 = vpop.f32.mrb[29].mxu1  ;;  %v13167_v34 = vld [vmem:[%s16796_s1 + $0x130] sm:$0xff]  }
 0x55a   :  { %v14857_v59 = vpack.c.bf16 %v4960_v26, %v4954_v7  ;;  %v4896_v3 = vadd.f32 %v14788_v17, %v4825_v31  ;;  %v4827_v32 = vpop.f32.mrb[30].mxu1  ;;  %v13168_v31 = vld [vmem:[%s16796_s1 + $0x138] sm:$0xff]  }
 0x55b   :  { %v4919_v37 = vmax.f32 %v4895_v20, 0.0  ;;  %v4901_v28 = vadd.f32 %v14791_v8, %v4827_v32  ;;  %v4829_v62 = vpop.f32.mrb[31].mxu1  ;;  %5055 = vrot.lane.b32.xlu1 %v14854_v52, %s13221_s5 }
 0x55c   :  { %v4920_v42 = vmax.f32 %v4896_v3, 0.0  ;;  %v4902_v55 = vadd.f32 %v14791_v8, %v4829_v62  ;;  %5057 = vrot.lane.b32.xlu0 %v14857_v59, %s13221_s5 }
 0x55d   :  { %v4925_v46 = vmax.f32 %v4901_v28, 0.0  ;;  %v4943_v15 = vmul.f32 %v4919_v37, %v14257_v63 }
 0x55e   :  { %v4926_v48 = vmax.f32 %v4902_v55, 0.0  ;;  %v4944_v50 = vmul.f32 %v4920_v42, %v14263_v35 }
 0x55f   :  { %v4949_v17 = vmul.f32 %v4925_v46, %v14257_v63 }
 0x560   :  { %v4950_v56 = vmul.f32 %v4926_v48, %v14263_v35  ;;  %v4833_v36 = vpop.f32.mrb[32].mxu1 }
 0x561   :  { %v14870_v39 = vpack.c.bf16 %v4949_v17, %v4943_v15  ;;  %v4907_v57 = vadd.f32 %v14798_v41, %v4833_v36  ;;  %v4835_v44 = vpop.f32.mrb[33].mxu1 }
 0x562   :  { %v14873_v8 = vpack.c.bf16 %v4950_v56, %v4944_v50  ;;  %v4908_v58 = vadd.f32 %v14798_v41, %v4835_v44  ;;  %v4837_v61 = vpop.f32.mrb[34].mxu1 }
 0x563   :  { %v4931_v19 = vmax.f32 %v4907_v57, 0.0  ;;  %v4913_v5 = vadd.f32 %v14805_v16, %v4837_v61  ;;  %v4839_v40 = vpop.f32.mrb[35].mxu1  ;;  %5045 = vrot.lane.b32.xlu1 %v14870_v39, %s13221_s5 }
 0x564   :  { %v4932_v11 = vmax.f32 %v4908_v58, 0.0  ;;  %v4914_v6 = vadd.f32 %v14805_v16, %v4839_v40  ;;  %5047 = vrot.lane.b32.xlu0 %v14873_v8, %s13221_s5  ;;  %v5036_v16 = vpop.permute.xlu1 %5035 }
 0x565   :  { %v4937_v18 = vmax.f32 %v4913_v5, 0.0  ;;  %v4955_v12 = vmul.f32 %v4931_v19, %v14257_v63 }
 0x566   :  { %v4938_v21 = vmax.f32 %v4914_v6, 0.0  ;;  %v4956_v51 = vmul.f32 %v4932_v11, %v14263_v35 }
 0x567   :  { %v4961_v41 = vmul.f32 %v4937_v18, %v14257_v63 }
 0x568   :  { %v4962_v60 = vmul.f32 %v4938_v21, %v14263_v35 }
 0x569   :  { %v14886_v38 = vpack.c.bf16 %v4961_v41, %v4955_v12 }
 0x56a   :  { %v14888_v4 = vpack.c.bf16 %v4962_v60, %v4956_v51  ;;  %v13169_v51 = vld [vmem:[%s16796_s1 + $0x120] sm:$0xff]  }
 0x56b   :  { %5059 = vrot.lane.b32.xlu1 %v14886_v38, %s13221_s5 }
 0x56c   :  { %5061 = vrot.lane.b32.xlu0 %v14888_v4, %s13221_s5 }
 0x56f   :  { %5264 = vrot.lane.b32.xlu1 %v14802_v45, %s13223_s22 }
 0x570   :  { %5266 = vrot.lane.b32.xlu0 %v14807_v30, %s13223_s22 }
 0x573   :  { %5262 = vrot.lane.b32.xlu1 %v13222_v14, %s13223_s22 }
 0x574   :  { %5278 = vrot.lane.b32.xlu0 %v14820_v54, %s13223_s22 }
 0x577   :  { %5280 = vrot.lane.b32.xlu1 %v14823_v2, %s13223_s22 }
 0x578   :  { %5276 = vrot.lane.b32.xlu0 %v13222_v14, %s13223_s22 }
 0x57b   :  { %5268 = vrot.lane.b32.xlu1 %v14838_v33, %s13223_s22 }
 0x57c   :  { %5270 = vrot.lane.b32.xlu0 %v14841_v1, %s13223_s22 }
 0x57f   :  { %5282 = vrot.lane.b32.xlu1 %v14854_v52, %s13223_s22 }
 0x580   :  { %5284 = vrot.lane.b32.xlu0 %v14857_v59, %s13223_s22 }
 0x583   :  { %5272 = vrot.lane.b32.xlu1 %v14870_v39, %s13223_s22 }
 0x584   :  { %5274 = vrot.lane.b32.xlu0 %v14873_v8, %s13223_s22 }
 0x587   :  { %5286 = vrot.lane.b32.xlu1 %v14886_v38, %s13223_s22 }
 0x588   :  { %5288 = vrot.lane.b32.xlu0 %v14888_v4, %s13223_s22 }
 0x58b   :  { %5496 = vrot.lane.b32.xlu1 %v14802_v45, %s13224_s6 }
 0x58c   :  { %5498 = vrot.lane.b32.xlu0 %v14807_v30, %s13224_s6 }
 0x58f   :  { %5494 = vrot.lane.b32.xlu1 %v13222_v14, %s13224_s6 }
 0x590   :  { %5510 = vrot.lane.b32.xlu0 %v14820_v54, %s13224_s6 }
 0x593   :  { %5512 = vrot.lane.b32.xlu1 %v14823_v2, %s13224_s6 }
 0x594   :  { %5508 = vrot.lane.b32.xlu0 %v13222_v14, %s13224_s6 }
 0x597   :  { %5500 = vrot.lane.b32.xlu1 %v14838_v33, %s13224_s6 }
 0x598   :  { %5502 = vrot.lane.b32.xlu0 %v14841_v1, %s13224_s6 }
 0x59b   :  { %5514 = vrot.lane.b32.xlu1 %v14854_v52, %s13224_s6 }
 0x59c   :  { %5516 = vrot.lane.b32.xlu0 %v14857_v59, %s13224_s6 }
 0x59f   :  { %5504 = vrot.lane.b32.xlu1 %v14870_v39, %s13224_s6 }
 0x5a0   :  { %5506 = vrot.lane.b32.xlu0 %v14873_v8, %s13224_s6 }
 0x5a3   :  { %5518 = vrot.lane.b32.xlu1 %v14886_v38, %s13224_s6 }
 0x5a4   :  { %5520 = vrot.lane.b32.xlu0 %v14888_v4, %s13224_s6 }
 0x5a7   :  { %5752 = vrot.lane.b32.xlu1 %v14802_v45, %s13225_s7 }
 0x5a8   :  { %5754 = vrot.lane.b32.xlu0 %v14807_v30, %s13225_s7 }
 0x5ab   :  { %5750 = vrot.lane.b32.xlu1 %v13222_v14, %s13225_s7 }
 0x5ac   :  { %5766 = vrot.lane.b32.xlu0 %v14820_v54, %s13225_s7 }
 0x5af   :  { %5768 = vrot.lane.b32.xlu1 %v14823_v2, %s13225_s7 }
 0x5b0   :  { %5764 = vrot.lane.b32.xlu0 %v13222_v14, %s13225_s7 }
 0x5b3   :  { %5756 = vrot.lane.b32.xlu1 %v14838_v33, %s13225_s7 }
 0x5b4   :  { %5758 = vrot.lane.b32.xlu0 %v14841_v1, %s13225_s7 }
 0x5b5   :  { %v5038_v23 = vpop.permute.xlu1 %5037 }
 0x5b6   :  { %v5040_v53 = vpop.permute.xlu0 %5039  ;;  %v5063_v29 = vsel %vm144_vm0, %v5036_v16, %v5038_v23 }
 0x5b7   :  { %5770 = vrot.lane.b32.xlu1 %v14854_v52, %s13225_s7  ;;  %v5064_v27 = vsel %vm144_vm0, %v5038_v23, %v5040_v53 }
 0x5b8   :  { %5772 = vrot.lane.b32.xlu0 %v14857_v59, %s13225_s7  ;;  %5093 = vmatprep.subr.bf16.mxu0 %v5064_v27 }
 0x5b9   :  { %5094 = vmatpush1.bf16.msra.mxu0 %v5063_v29  ;;  %v13170_v29 = vld [vmem:[%s16796_s1 + $0x128] sm:$0xff]  }
 0x5bb   :  { %5760 = vrot.lane.b32.xlu1 %v14870_v39, %s13225_s7 }
 0x5bc   :  { %5762 = vrot.lane.b32.xlu0 %v14873_v8, %s13225_s7 }
 0x5bd   :  { %v5052_v9 = vpop.permute.xlu0 %5051 }
 0x5be   :  { %v5054_v24 = vpop.permute.xlu1 %5053 }
 0x5bf   :  { %5774 = vrot.lane.b32.xlu1 %v14886_v38, %s13225_s7  ;;  %v5070_v0 = vsel %vm144_vm0, %v5052_v9, %v5054_v24 }
 0x5c0   :  { %5776 = vrot.lane.b32.xlu0 %v14888_v4, %s13225_s7  ;;  %5095 = vmatprep.subr.bf16.mxu0 %v5070_v0 }
 0x5c1   :  { %v5050_v43 = vpop.permute.xlu0 %5049 }
 0x5c2   :  { %v5069_v25 = vsel %vm144_vm0, %v5050_v43, %v5052_v9 }
 0x5c3   :  { %6240 = vrot.lane.b32.xlu1 %v14807_v30, %s13226_s12  ;;  %5096 = vmatpush1.bf16.msra.mxu0 %v5069_v25 }
 0x5c4   :  { %6242 = vrot.lane.b32.xlu0 %v14838_v33, %s13226_s12 }
 0x5c5   :  { %v5042_v7 = vpop.permute.xlu1 %5041 }
 0x5c6   :  { %v5044_v26 = vpop.permute.xlu0 %5043  ;;  %12010 = vmatmul.mubr.msk.bf16.vlgmr.msra.gmra.mrb[16].mxu0 %vm169_vm1, %v13167_v34  ;;  %v5065_v20 = vsel %vm144_vm0, %v5040_v53, %v5042_v7 }
 0x5c7   :  { %6238 = vrot.lane.b32.xlu1 %v14802_v45, %s13226_s12  ;;  %v5066_v47 = vsel %vm144_vm0, %v5042_v7, %v5044_v26  ;;  %5135 = vmatprep.mubr.bf16.mxu0 %v13222_v14 }
 0x5c8   :  { %6254 = vrot.lane.b32.xlu0 %v14823_v2, %s13226_s12  ;;  %5146 = vmatprep.subr.bf16.mxu0 %v5066_v47 }
 0x5c9   :  { %5147 = vmatpush1.bf16.msra.mxu0 %v5065_v20 }
 0x5cb   :  { %6256 = vrot.lane.b32.xlu1 %v14854_v52, %s13226_s12 }
 0x5cc   :  { %6252 = vrot.lane.b32.xlu0 %v14820_v54, %s13226_s12 }
 0x5cd   :  { %v5056_v3 = vpop.permute.xlu1 %5055 }
 0x5ce   :  { %v5058_v32 = vpop.permute.xlu0 %5057  ;;  %12011 = vmatmul.mubr.msk.bf16.gmra.mrb[20].mxu0 %vm169_vm1, %v13168_v31  ;;  %v5071_v28 = vsel %vm144_vm0, %v5054_v24, %v5056_v3 }
 0x5cf   :  { %6244 = vrot.lane.b32.xlu1 %v14841_v1, %s13226_s12  ;;  %v5072_v37 = vsel %vm144_vm0, %v5056_v3, %v5058_v32  ;;  %5178 = vmatprep.mubr.bf16.mxu0 %v13222_v14 }
 0x5d0   :  { %6246 = vrot.lane.b32.xlu0 %v14870_v39, %s13226_s12  ;;  %5148 = vmatprep.subr.bf16.mxu0 %v5072_v37 }
 0x5d1   :  { %5149 = vmatpush1.bf16.msra.mxu0 %v5071_v28 }
 0x5d3   :  { %6258 = vrot.lane.b32.xlu1 %v14857_v59, %s13226_s12 }
 0x5d4   :  { %6260 = vrot.lane.b32.xlu0 %v14886_v38, %s13226_s12 }
 0x5d5   :  { %v5046_v62 = vpop.permute.xlu1 %5045 }
 0x5d6   :  { %v5048_v42 = vpop.permute.xlu0 %5047  ;;  %12012 = vmatmul.mubr.msk.bf16.vlgmr.msra.gmra.mrb[24].mxu0 %vm169_vm1, %v13167_v34  ;;  %v5067_v46 = vsel %vm144_vm0, %v5044_v26, %v5046_v62 }
 0x5d7   :  { %6248 = vrot.lane.b32.xlu1 %v14873_v8, %s13226_s12  ;;  %v5068_v55 = vsel %vm144_vm0, %v5046_v62, %v5048_v42  ;;  %5188 = vmatprep.mubr.bf16.mxu0 %v13222_v14 }
 0x5d8   :  { %6250 = vrot.lane.b32.xlu0 %v13222_v14, %s13226_s12  ;;  %5199 = vmatprep.subr.bf16.mxu0 %v5068_v55 }
 0x5d9   :  { %5200 = vmatpush1.bf16.msra.mxu0 %v5067_v46 }
 0x5db   :  { %6262 = vrot.lane.b32.xlu1 %v14888_v4, %s13226_s12 }
 0x5dc   :  { %6264 = vrot.lane.b32.xlu0 %v13222_v14, %s13226_s12 }
 0x5dd   :  { %v5060_v48 = vpop.permute.xlu1 %5059 }
 0x5de   :  { %v5062_v15 = vpop.permute.xlu0 %5061  ;;  %12013 = vmatmul.mubr.msk.bf16.gmra.mrb[28].mxu0 %vm169_vm1, %v13168_v31  ;;  %v5073_v50 = vsel %vm144_vm0, %v5058_v32, %v5060_v48 }
 0x5df   :  { %6496 = vrot.lane.b32.xlu1 %v14807_v30, %s13227_s15  ;;  %v5074_v17 = vsel %vm144_vm0, %v5060_v48, %v5062_v15  ;;  %5231 = vmatprep.mubr.bf16.mxu0 %v13222_v14 }
 0x5e0   :  { %6498 = vrot.lane.b32.xlu0 %v14838_v33, %s13227_s15  ;;  %5201 = vmatprep.subr.bf16.mxu0 %v5074_v17  ;;  %v13171_v17 = vld [vmem:[%s16796_s1 + $0x140] sm:$0xff]  }
 0x5e1   :  { %5202 = vmatpush1.bf16.msra.mxu0 %v5073_v50  ;;  %v5265_v56 = vpop.permute.xlu1 %5264 }
 0x5e2   :  { %v5267_v36 = vpop.permute.xlu0 %5266 }
 0x5e3   :  { %6494 = vrot.lane.b32.xlu1 %v14802_v45, %s13227_s15  ;;  %v5291_v57 = vsel %vm373_vm2, %v5265_v56, %v5267_v36 }
 0x5e4   :  { %6510 = vrot.lane.b32.xlu0 %v14823_v2, %s13227_s15  ;;  %5320 = vmatprep.subr.bf16.mxu0 %v5291_v57 }
 0x5e5   :  { %v5263_v44 = vpop.permute.xlu1 %5262 }
 0x5e6   :  { %v5290_v58 = vsel %vm373_vm2, %v5263_v44, %v5265_v56  ;;  %v5279_v61 = vpop.permute.xlu0 %5278  ;;  %12014 = vmatmul.mubr.msk.bf16.vlgmr.msra.gmra.mrb[32].mxu0 %vm169_vm1, %v13167_v34 }
 0x5e7   :  { %6512 = vrot.lane.b32.xlu1 %v14854_v52, %s13227_s15  ;;  %5321 = vmatpush1.bf16.msra.mxu0 %v5290_v58  ;;  %v13172_v58 = vld [vmem:[%s16796_s1 + $0x148] sm:$0xff]  }
 0x5e8   :  { %6508 = vrot.lane.b32.xlu0 %v14820_v54, %s13227_s15  ;;  %5241 = vmatprep.mubr.bf16.mxu0 %v13222_v14 }
 0x5e9   :  { %v5281_v19 = vpop.permute.xlu1 %5280 }
 0x5ea   :  { %v5277_v5 = vpop.permute.xlu0 %5276  ;;  %v5297_v40 = vsel %vm373_vm2, %v5279_v61, %v5281_v19 }
 0x5eb   :  { %v5296_v11 = vsel %vm373_vm2, %v5277_v5, %v5279_v61  ;;  %6500 = vrot.lane.b32.xlu1 %v14841_v1, %s13227_s15  ;;  %5322 = vmatprep.subr.bf16.mxu0 %v5297_v40  ;;  %v12108_v40 = vld [vmem:[%s16797_s2 + $0x40] sm:$0xff] }
 0x5ec   :  { %6502 = vrot.lane.b32.xlu0 %v14870_v39, %s13227_s15  ;;  %5323 = vmatpush1.bf16.msra.mxu0 %v5296_v11  ;;  %v12109_v11 = vld [vmem:[%s16797_s2 + $0x48] sm:$0xff] }
 0x5ed   :  { %v5269_v6 = vpop.permute.xlu1 %5268 }
 0x5ee   :  { %v5271_v18 = vpop.permute.xlu0 %5270  ;;  %12015 = vmatmul.mubr.msk.bf16.gmra.mrb[36].mxu0 %vm169_vm1, %v13168_v31  ;;  %v5292_v60 = vsel %vm373_vm2, %v5267_v36, %v5269_v6 }
 0x5ef   :  { %6514 = vrot.lane.b32.xlu1 %v14857_v59, %s13227_s15  ;;  %v5293_v21 = vsel %vm373_vm2, %v5269_v6, %v5271_v18  ;;  %5352 = vmatprep.mubr.bf16.mxu0 %v13222_v14  ;;  %v12110_v6 = vld [vmem:[%s16797_s2 + $0x50] sm:$0xff] }
 0x5f0   :  { %6516 = vrot.lane.b32.xlu0 %v14886_v38, %s13227_s15  ;;  %5373 = vmatprep.subr.bf16.mxu0 %v5293_v21 }
 0x5f1   :  { %v5283_v12 = vpop.permute.xlu1 %5282 }
 0x5f2   :  { %v5285_v41 = vpop.permute.xlu0 %5284  ;;  %v5298_v27 = vsel %vm373_vm2, %v5281_v19, %v5283_v12 }
 0x5f3   :  { %6504 = vrot.lane.b32.xlu1 %v14873_v8, %s13227_s15  ;;  %v5299_v16 = vsel %vm373_vm2, %v5283_v12, %v5285_v41 }
 0x5f4   :  { %6506 = vrot.lane.b32.xlu0 %v13222_v14, %s13227_s15 }
 0x5f5   :  { %v5273_v23 = vpop.permute.xlu1 %5272 }
 0x5f6   :  { %12018 = vmatmul.mubr.msk.bf16.vlgmr.msra.gmra.mrb[16].mxu0 %vm169_vm1, %v13169_v51  ;;  %v5275_v53 = vpop.permute.xlu0 %5274  ;;  %v5294_v34 = vsel %vm373_vm2, %v5271_v18, %v5273_v23  ;;  %v12111_v18 = vld [vmem:[%s16797_s2 + $0x58] sm:$0xff] }
 0x5f7   :  { %5374 = vmatpush1.bf16.msra.mxu0 %v5292_v60  ;;  %6518 = vrot.lane.b32.xlu1 %v14888_v4, %s13227_s15  ;;  %v5295_v9 = vsel %vm373_vm2, %v5273_v23, %v5275_v53 }
 0x5f8   :  { %5375 = vmatprep.subr.bf16.mxu0 %v5299_v16  ;;  %6520 = vrot.lane.b32.xlu0 %v13222_v14, %s13227_s15 }
 0x5f9   :  { %5362 = vmatprep.mubr.bf16.mxu0 %v13222_v14  ;;  %v5287_v24 = vpop.permute.xlu1 %5286 }
 0x5fa   :  { %v5289_v0 = vpop.permute.xlu0 %5288  ;;  %v5300_v26 = vsel %vm373_vm2, %v5285_v41, %v5287_v24 }
 0x5fb   :  { %5376 = vmatpush1.bf16.msra.mxu0 %v5298_v27  ;;  %6752 = vrot.lane.b32.xlu1 %v14807_v30, %s13228_s20  ;;  %v5301_v7 = vsel %vm373_vm2, %v5287_v24, %v5289_v0 }
 0x5fc   :  { %5426 = vmatprep.subr.bf16.mxu0 %v5295_v9  ;;  %6754 = vrot.lane.b32.xlu0 %v14838_v33, %s13228_s20 }
 0x5fd   :  { %v5497_v43 = vpop.permute.xlu1 %5496 }
 0x5fe   :  { %12019 = vmatmul.mubr.msk.bf16.gmra.mrb[20].mxu0 %vm169_vm1, %v13170_v29  ;;  %v5499_v25 = vpop.permute.xlu0 %5498 }
 0x5ff   :  { %6750 = vrot.lane.b32.xlu1 %v14802_v45, %s13228_s20  ;;  %5405 = vmatprep.mubr.bf16.mxu0 %v13222_v14  ;;  %v5523_v47 = vsel %vm606_vm3, %v5497_v43, %v5499_v25 }
 0x600   :  { %6766 = vrot.lane.b32.xlu0 %v14823_v2, %s13228_s20 }
 0x601   :  { %v5495_v20 = vpop.permute.xlu1 %5494 }
 0x602   :  { %v5511_v31 = vpop.permute.xlu0 %5510  ;;  %v5522_v37 = vsel %vm606_vm3, %v5495_v20, %v5497_v43 }
 0x603   :  { %6768 = vrot.lane.b32.xlu1 %v14854_v52, %s13228_s20 }
 0x604   :  { %6764 = vrot.lane.b32.xlu0 %v14820_v54, %s13228_s20 }
 0x605   :  { %v5513_v3 = vpop.permute.xlu1 %5512 }
 0x606   :  { %12020 = vmatmul.mubr.msk.bf16.vlgmr.msra.gmra.mrb[24].mxu0 %vm169_vm1, %v13169_v51  ;;  %v5509_v32 = vpop.permute.xlu0 %5508  ;;  %v5529_v28 = vsel %vm606_vm3, %v5511_v31, %v5513_v3 }
 0x607   :  { %5427 = vmatpush1.bf16.msra.mxu0 %v5294_v34  ;;  %6756 = vrot.lane.b32.xlu1 %v14841_v1, %s13228_s20  ;;  %v5528_v55 = vsel %vm606_vm3, %v5509_v32, %v5511_v31 }
 0x608   :  { %5428 = vmatprep.subr.bf16.mxu0 %v5301_v7  ;;  %6758 = vrot.lane.b32.xlu0 %v14870_v39, %s13228_s20 }
 0x609   :  { %5415 = vmatprep.mubr.bf16.mxu0 %v13222_v14  ;;  %v5501_v62 = vpop.permute.xlu1 %5500 }
 0x60a   :  { %v5503_v42 = vpop.permute.xlu0 %5502  ;;  %v5524_v50 = vsel %vm606_vm3, %v5499_v25, %v5501_v62 }
 0x60b   :  { %5429 = vmatpush1.bf16.msra.mxu0 %v5300_v26  ;;  %6770 = vrot.lane.b32.xlu1 %v14857_v59, %s13228_s20  ;;  %v5525_v46 = vsel %vm606_vm3, %v5501_v62, %v5503_v42 }
 0x60c   :  { %5552 = vmatprep.subr.bf16.mxu0 %v5523_v47  ;;  %6772 = vrot.lane.b32.xlu0 %v14886_v38, %s13228_s20  ;;  %v13173_v47 = vld [vmem:[%s16796_s1 + $0x150] sm:$0xff]  }
 0x60d   :  { %v5515_v48 = vpop.permute.xlu1 %5514 }
 0x60e   :  { %12021 = vmatmul.mubr.msk.bf16.gmra.mrb[28].mxu0 %vm169_vm1, %v13170_v29  ;;  %v5517_v15 = vpop.permute.xlu0 %5516  ;;  %v5530_v44 = vsel %vm606_vm3, %v5513_v3, %v5515_v48 }
 0x60f   :  { %6760 = vrot.lane.b32.xlu1 %v14873_v8, %s13228_s20  ;;  %5458 = vmatprep.mubr.bf16.mxu0 %v13222_v14  ;;  %v5531_v56 = vsel %vm606_vm3, %v5515_v48, %v5517_v15 }
 0x610   :  { %6762 = vrot.lane.b32.xlu0 %v13222_v14, %s13228_s20 }
 0x611   :  { %v5505_v36 = vpop.permute.xlu1 %5504 }
 0x612   :  { %v5507_v57 = vpop.permute.xlu0 %5506  ;;  %v5526_v41 = vsel %vm606_vm3, %v5503_v42, %v5505_v36 }
 0x613   :  { %6774 = vrot.lane.b32.xlu1 %v14888_v4, %s13228_s20  ;;  %v5527_v61 = vsel %vm606_vm3, %v5505_v36, %v5507_v57 }
 0x614   :  { %6776 = vrot.lane.b32.xlu0 %v13222_v14, %s13228_s20 }
 0x615   :  { %v5519_v19 = vpop.permute.xlu1 %5518 }
 0x616   :  { %12022 = vmatmul.mubr.msk.bf16.vlgmr.msra.gmra.mrb[32].mxu0 %vm169_vm1, %v13169_v51  ;;  %v5521_v5 = vpop.permute.xlu0 %5520  ;;  %v5532_v60 = vsel %vm606_vm3, %v5517_v15, %v5519_v19 }
 0x617   :  { %5553 = vmatpush1.bf16.msra.mxu0 %v5522_v37  ;;  %7008 = vrot.lane.b32.xlu1 %v14807_v30, %s13229_s26  ;;  %v5533_v51 = vsel %vm606_vm3, %v5519_v19, %v5521_v5 }
 0x618   :  { %5554 = vmatprep.subr.bf16.mxu0 %v5529_v28  ;;  %7010 = vrot.lane.b32.xlu0 %v14838_v33, %s13229_s26  ;;  %v13174_v28 = vld [vmem:[%s16796_s1 + $0x158] sm:$0xff]  }
 0x619   :  { %5468 = vmatprep.mubr.bf16.mxu0 %v13222_v14  ;;  %v5753_v21 = vpop.permute.xlu1 %5752 }
 0x61a   :  { %v5755_v12 = vpop.permute.xlu0 %5754 }
 0x61b   :  { %5555 = vmatpush1.bf16.msra.mxu0 %v5528_v55  ;;  %7006 = vrot.lane.b32.xlu1 %v14802_v45, %s13229_s26  ;;  %v5779_v16 = vsel %vm863_vm4, %v5753_v21, %v5755_v12 }
 0x61c   :  { %5605 = vmatprep.subr.bf16.mxu0 %v5525_v46  ;;  %7022 = vrot.lane.b32.xlu0 %v14823_v2, %s13229_s26 }
 0x61d   :  { %v5751_v23 = vpop.permute.xlu1 %5750 }
 0x61e   :  { %12023 = vmatmul.mubr.msk.bf16.gmra.mrb[36].mxu0 %vm169_vm1, %v13170_v29  ;;  %v5767_v53 = vpop.permute.xlu0 %5766  ;;  %v5778_v9 = vsel %vm863_vm4, %v5751_v23, %v5753_v21 }
 0x61f   :  { %7024 = vrot.lane.b32.xlu1 %v14854_v52, %s13229_s26  ;;  %5584 = vmatprep.mubr.bf16.mxu0 %v13222_v14 }
 0x620   :  { %7020 = vrot.lane.b32.xlu0 %v14820_v54, %s13229_s26 }
 0x621   :  { %v5769_v27 = vpop.permute.xlu1 %5768 }
 0x622   :  { %v5765_v29 = vpop.permute.xlu0 %5764  ;;  %v5785_v24 = vsel %vm863_vm4, %v5767_v53, %v5769_v27 }
 0x623   :  { %7012 = vrot.lane.b32.xlu1 %v14841_v1, %s13229_s26  ;;  %v5784_v25 = vsel %vm863_vm4, %v5765_v29, %v5767_v53 }
 0x624   :  { %7014 = vrot.lane.b32.xlu0 %v14870_v39, %s13229_s26 }
 0x625   :  { %v5757_v0 = vpop.permute.xlu1 %5756 }
 0x626   :  { %12030 = vmatmul.mubr.msk.bf16.vlgmr.msra.gmra.mrb[16].mxu0 %vm169_vm1, %v13171_v17  ;;  %v5759_v43 = vpop.permute.xlu0 %5758  ;;  %v5780_v20 = vsel %vm863_vm4, %v5755_v12, %v5757_v0 }
 0x627   :  { %5606 = vmatpush1.bf16.msra.mxu0 %v5524_v50  ;;  %7026 = vrot.lane.b32.xlu1 %v14857_v59, %s13229_s26  ;;  %v5781_v34 = vsel %vm863_vm4, %v5757_v0, %v5759_v43 }
 0x628   :  { %5607 = vmatprep.subr.bf16.mxu0 %v5531_v56  ;;  %7028 = vrot.lane.b32.xlu0 %v14886_v38, %s13229_s26 }
 0x629   :  { %5594 = vmatprep.mubr.bf16.mxu0 %v13222_v14  ;;  %v5771_v7 = vpop.permute.xlu1 %5770 }
 0x62a   :  { %v5773_v26 = vpop.permute.xlu0 %5772  ;;  %v5786_v37 = vsel %vm863_vm4, %v5769_v27, %v5771_v7 }
 0x62b   :  { %5608 = vmatpush1.bf16.msra.mxu0 %v5530_v44  ;;  %7016 = vrot.lane.b32.xlu1 %v14873_v8, %s13229_s26  ;;  %v5787_v31 = vsel %vm863_vm4, %v5771_v7, %v5773_v26  ;;  %v13177_v44 = vld [vmem:[%s16796_s1 + $0x170] sm:$0xff]  }
 0x62c   :  { %5658 = vmatprep.subr.bf16.mxu0 %v5527_v61  ;;  %7018 = vrot.lane.b32.xlu0 %v13222_v14, %s13229_s26 }
 0x62d   :  { %v5761_v3 = vpop.permute.xlu1 %5760 }
 0x62e   :  { %12031 = vmatmul.mubr.msk.bf16.gmra.mrb[20].mxu0 %vm169_vm1, %v13172_v58  ;;  %v5763_v32 = vpop.permute.xlu0 %5762  ;;  %v5782_v46 = vsel %vm863_vm4, %v5759_v43, %v5761_v3 }
 0x62f   :  { %7030 = vrot.lane.b32.xlu1 %v14888_v4, %s13229_s26  ;;  %5637 = vmatprep.mubr.bf16.mxu0 %v13222_v14  ;;  %v5783_v62 = vsel %vm863_vm4, %v5761_v3, %v5763_v32 }
 0x630   :  { %7032 = vrot.lane.b32.xlu0 %v13222_v14, %s13229_s26 }
 0x631   :  { %v5775_v42 = vpop.permute.xlu1 %5774 }
 0x632   :  { %v5777_v55 = vpop.permute.xlu0 %5776  ;;  %v5788_v15 = vsel %vm863_vm4, %v5773_v26, %v5775_v42 }
 0x633   :  { %7254 = vperm.xlu1 %13115, %v12108_v40   ;;  %v5789_v48 = vsel %vm863_vm4, %v5775_v42, %v5777_v55 }
 0x634   :  { %7259 = vperm.xlu0 %13114, %v12109_v11   ;;  %v13178_v11 = vld [vmem:[%s16796_s1 + $0x178] sm:$0xff]  }
 0x636   :  { %12032 = vmatmul.mubr.msk.bf16.vlgmr.msra.gmra.mrb[24].mxu0 %vm169_vm1, %v13171_v17 }
 0x637   :  { %5659 = vmatpush1.bf16.msra.mxu0 %v5526_v41  ;;  %7264 = vperm.xlu1 %13115, %v12110_v6  }
 0x638   :  { %5660 = vmatprep.subr.bf16.mxu0 %v5533_v51  ;;  %7269 = vperm.xlu0 %13114, %v12111_v18  }
 0x639   :  { %5647 = vmatprep.mubr.bf16.mxu0 %v13222_v14 }
 0x63b   :  { %5661 = vmatpush1.bf16.msra.mxu0 %v5532_v60  ;;  %7416 = vrot.lane.b32.xlu1 %v13222_v14, %s13221_s5 }
 0x63c   :  { %5808 = vmatprep.subr.bf16.mxu0 %v5779_v16 }
 0x63e   :  { %12033 = vmatmul.mubr.msk.bf16.gmra.mrb[28].mxu0 %vm169_vm1, %v13172_v58 }
 0x63f   :  { %5690 = vmatprep.mubr.bf16.mxu0 %v13222_v14 }
 0x646   :  { %12034 = vmatmul.mubr.msk.bf16.vlgmr.msra.gmra.mrb[32].mxu0 %vm169_vm1, %v13171_v17 }
 0x647   :  { %5809 = vmatpush1.bf16.msra.mxu0 %v5778_v9  ;;  %5700 = vmatprep.mubr.bf16.mxu0 %v13222_v14 }
 0x648   :  { %5810 = vmatprep.subr.bf16.mxu0 %v5785_v24 }
 0x64b   :  { %5811 = vmatpush1.bf16.msra.mxu0 %v5784_v25 }
 0x64c   :  { %5861 = vmatprep.subr.bf16.mxu0 %v5781_v34 }
 0x64e   :  { %12035 = vmatmul.mubr.msk.bf16.gmra.mrb[36].mxu0 %vm169_vm1, %v13172_v58 }
 0x64f   :  { %5840 = vmatprep.mubr.bf16.mxu0 %v13222_v14 }
 0x656   :  { %12042 = vmatmul.mubr.msk.bf16.vlgmr.msra.gmra.mrb[16].mxu0 %vm169_vm1, %v13173_v47 }
 0x657   :  { %5862 = vmatpush1.bf16.msra.mxu0 %v5780_v20  ;;  %5850 = vmatprep.mubr.bf16.mxu0 %v13222_v14  ;;  %v13179_v20 = vld [vmem:[%s16796_s1 + $0x180] sm:$0xff]  }
 0x658   :  { %5863 = vmatprep.subr.bf16.mxu0 %v5787_v31 }
 0x65b   :  { %5864 = vmatpush1.bf16.msra.mxu0 %v5786_v37 }
 0x65c   :  { %5914 = vmatprep.subr.bf16.mxu0 %v5783_v62  ;;  %v13180_v62 = vld [vmem:[%s16796_s1 + $0x188] sm:$0xff]  }
 0x65e   :  { %12043 = vmatmul.mubr.msk.bf16.gmra.mrb[20].mxu0 %vm169_vm1, %v13174_v28 }
 0x65f   :  { %5893 = vmatprep.mubr.bf16.mxu0 %v13222_v14 }
 0x666   :  { %12044 = vmatmul.mubr.msk.bf16.vlgmr.msra.gmra.mrb[24].mxu0 %vm169_vm1, %v13173_v47 }
 0x667   :  { %5915 = vmatpush1.bf16.msra.mxu0 %v5782_v46  ;;  %5903 = vmatprep.mubr.bf16.mxu0 %v13222_v14 }
 0x668   :  { %5916 = vmatprep.subr.bf16.mxu0 %v5789_v48 }
 0x66b   :  { %5917 = vmatpush1.bf16.msra.mxu0 %v5788_v15 }
 0x66c   :  { %6012 = vmatprep.subr.bf16.mxu0 %v14807_v30  ;;  %v13175_v30 = vld [vmem:[%s16796_s1 + $0x160] sm:$0xff]  }
 0x66e   :  { %12045 = vmatmul.mubr.msk.bf16.gmra.mrb[28].mxu0 %vm169_vm1, %v13174_v28 }
 0x66f   :  { %5946 = vmatprep.mubr.bf16.mxu0 %v13222_v14 }
 0x676   :  { %12046 = vmatmul.mubr.msk.bf16.vlgmr.msra.gmra.mrb[32].mxu0 %vm169_vm1, %v13173_v47 }
 0x677   :  { %6013 = vmatpush1.bf16.msra.mxu0 %v14802_v45  ;;  %5956 = vmatprep.mubr.bf16.mxu0 %v13222_v14  ;;  %v13176_v45 = vld [vmem:[%s16796_s1 + $0x168] sm:$0xff]  }
 0x678   :  { %6014 = vmatprep.subr.bf16.mxu0 %v14823_v2  ;;  %v6243_v2 = vpop.permute.xlu0 %6242 }
 0x67b   :  { %6015 = vmatpush1.bf16.msra.mxu0 %v14820_v54  ;;  %v6241_v54 = vpop.permute.xlu1 %6240 }
 0x67c   :  { %6065 = vmatprep.subr.bf16.mxu0 %v14841_v1 }
 0x67e   :  { %12047 = vmatmul.mubr.msk.bf16.gmra.mrb[36].mxu0 %vm169_vm1, %v13174_v28 }
 0x67f   :  { %6044 = vmatprep.mubr.bf16.mxu0 %v13222_v14  ;;  %v6239_v1 = vpop.permute.xlu1 %6238 }
 0x680   :  { %v6266_v17 = vsel %vm1470_vm5, %v6239_v1, %v6241_v54 }
 0x686   :  { %12054 = vmatmul.mubr.msk.bf16.vlgmr.msra.gmra.mrb[16].mxu0 %vm169_vm1, %v13175_v30 }
 0x687   :  { %6066 = vmatpush1.bf16.msra.mxu0 %v14838_v33  ;;  %6054 = vmatprep.mubr.bf16.mxu0 %v13222_v14  ;;  %v6267_v33 = vsel %vm1470_vm5, %v6241_v54, %v6243_v2 }
 0x688   :  { %6067 = vmatprep.subr.bf16.mxu0 %v14857_v59  ;;  %v6257_v59 = vpop.permute.xlu1 %6256 }
 0x68b   :  { %6068 = vmatpush1.bf16.msra.mxu0 %v14854_v52  ;;  %v6255_v52 = vpop.permute.xlu0 %6254 }
 0x68c   :  { %6118 = vmatprep.subr.bf16.mxu0 %v14873_v8 }
 0x68e   :  { %12055 = vmatmul.mubr.msk.bf16.gmra.mrb[20].mxu0 %vm169_vm1, %v13176_v45 }
 0x68f   :  { %6097 = vmatprep.mubr.bf16.mxu0 %v13222_v14  ;;  %v6253_v8 = vpop.permute.xlu0 %6252 }
 0x690   :  { %v6272_v50 = vsel %vm1470_vm5, %v6253_v8, %v6255_v52 }
 0x696   :  { %12056 = vmatmul.mubr.msk.bf16.vlgmr.msra.gmra.mrb[24].mxu0 %vm169_vm1, %v13175_v30 }
 0x697   :  { %6119 = vmatpush1.bf16.msra.mxu0 %v14870_v39  ;;  %6107 = vmatprep.mubr.bf16.mxu0 %v13222_v14  ;;  %v6273_v39 = vsel %vm1470_vm5, %v6255_v52, %v6257_v59 }
 0x698   :  { %6120 = vmatprep.subr.bf16.mxu0 %v14888_v4  ;;  %v6247_v4 = vpop.permute.xlu0 %6246 }
 0x69b   :  { %6121 = vmatpush1.bf16.msra.mxu0 %v14886_v38  ;;  %v6245_v38 = vpop.permute.xlu1 %6244 }
 0x69c   :  { %6296 = vmatprep.subr.bf16.mxu0 %v6267_v33  ;;  %v6269_v56 = vsel %vm1470_vm5, %v6245_v38, %v6247_v4  ;;  %v6261_v57 = vpop.permute.xlu0 %6260  ;;  %v6268_v58 = vsel %vm1470_vm5, %v6243_v2, %v6245_v38 }
 0x69e   :  { %12057 = vmatmul.mubr.msk.bf16.gmra.mrb[28].mxu0 %vm169_vm1, %v13176_v45 }
 0x69f   :  { %6150 = vmatprep.mubr.bf16.mxu0 %v13222_v14  ;;  %v6259_v36 = vpop.permute.xlu1 %6258 }
 0x6a0   :  { %v6275_v61 = vsel %vm1470_vm5, %v6259_v36, %v6261_v57  ;;  %v6251_v5 = vpop.permute.xlu0 %6250  ;;  %v6274_v40 = vsel %vm1470_vm5, %v6257_v59, %v6259_v36 }
 0x6a3   :  { %v6249_v19 = vpop.permute.xlu1 %6248 }
 0x6a4   :  { %v6271_v6 = vsel %vm1470_vm5, %v6249_v19, %v6251_v5  ;;  %v6265_v21 = vpop.permute.xlu0 %6264  ;;  %v6270_v51 = vsel %vm1470_vm5, %v6247_v4, %v6249_v19 }
 0x6a6   :  { %12058 = vmatmul.mubr.msk.bf16.vlgmr.msra.gmra.mrb[32].mxu0 %vm169_vm1, %v13175_v30 }
 0x6a7   :  { %6297 = vmatpush1.bf16.msra.mxu0 %v6266_v17  ;;  %6160 = vmatprep.mubr.bf16.mxu0 %v13222_v14  ;;  %v6263_v18 = vpop.permute.xlu1 %6262 }
 0x6a8   :  { %6298 = vmatprep.subr.bf16.mxu0 %v6273_v39  ;;  %v6499_v41 = vpop.permute.xlu0 %6498  ;;  %v6277_v60 = vsel %vm1470_vm5, %v6263_v18, %v6265_v21  ;;  %v6276_v16 = vsel %vm1470_vm5, %v6261_v57, %v6263_v18  ;;  %v13181_v57 = vld [vmem:[%s16796_s1 + $0x190] sm:$0xff]  }
 0x6ab   :  { %6299 = vmatpush1.bf16.msra.mxu0 %v6272_v50  ;;  %v6497_v12 = vpop.permute.xlu1 %6496 }
 0x6ac   :  { %6349 = vmatprep.subr.bf16.mxu0 %v6269_v56  ;;  %v6523_v23 = vsel %vm1727_vm6, %v6497_v12, %v6499_v41  ;;  %v6511_v27 = vpop.permute.xlu0 %6510 }
 0x6ae   :  { %12059 = vmatmul.mubr.msk.bf16.gmra.mrb[36].mxu0 %vm169_vm1, %v13176_v45 }
 0x6af   :  { %6328 = vmatprep.mubr.bf16.mxu0 %v13222_v14  ;;  %v6495_v53 = vpop.permute.xlu1 %6494 }
 0x6b0   :  { %v6509_v9 = vpop.permute.xlu0 %6508  ;;  %v6522_v24 = vsel %vm1727_vm6, %v6495_v53, %v6497_v12 }
 0x6b1   :  { %v6528_v34 = vsel %vm1727_vm6, %v6509_v9, %v6511_v27 }
 0x6b3   :  { %v6513_v29 = vpop.permute.xlu1 %6512 }
 0x6b4   :  { %v6529_v0 = vsel %vm1727_vm6, %v6511_v27, %v6513_v29  ;;  %v6503_v25 = vpop.permute.xlu0 %6502 }
 0x6b6   :  { %12066 = vmatmul.mubr.msk.bf16.vlgmr.msra.gmra.mrb[16].mxu0 %vm169_vm1, %v13177_v44 }
 0x6b7   :  { %6350 = vmatpush1.bf16.msra.mxu0 %v6268_v58  ;;  %6338 = vmatprep.mubr.bf16.mxu0 %v13222_v14  ;;  %v6501_v43 = vpop.permute.xlu1 %6500 }
 0x6b8   :  { %6351 = vmatprep.subr.bf16.mxu0 %v6275_v61  ;;  %v6525_v7 = vsel %vm1727_vm6, %v6501_v43, %v6503_v25  ;;  %v6517_v47 = vpop.permute.xlu0 %6516  ;;  %v6524_v31 = vsel %vm1727_vm6, %v6499_v41, %v6501_v43 }
 0x6bb   :  { %6352 = vmatpush1.bf16.msra.mxu0 %v6274_v40  ;;  %v6515_v26 = vpop.permute.xlu1 %6514  ;;  %v13182_v40 = vld [vmem:[%s16796_s1 + $0x198] sm:$0xff]  }
 0x6bc   :  { %6402 = vmatprep.subr.bf16.mxu0 %v6271_v6  ;;  %v6531_v3 = vsel %vm1727_vm6, %v6515_v26, %v6517_v47  ;;  %v6507_v37 = vpop.permute.xlu0 %6506  ;;  %v6530_v28 = vsel %vm1727_vm6, %v6513_v29, %v6515_v26 }
 0x6be   :  { %12067 = vmatmul.mubr.msk.bf16.gmra.mrb[20].mxu0 %vm169_vm1, %v13178_v11 }
 0x6bf   :  { %6381 = vmatprep.mubr.bf16.mxu0 %v13222_v14  ;;  %v6505_v32 = vpop.permute.xlu1 %6504 }
 0x6c0   :  { %v6527_v42 = vsel %vm1727_vm6, %v6505_v32, %v6507_v37  ;;  %v6521_v46 = vpop.permute.xlu0 %6520  ;;  %v6526_v30 = vsel %vm1727_vm6, %v6503_v25, %v6505_v32 }
 0x6c3   :  { %v6519_v55 = vpop.permute.xlu1 %6518 }
 0x6c4   :  { %v6755_v15 = vpop.permute.xlu0 %6754  ;;  %v6533_v45 = vsel %vm1727_vm6, %v6519_v55, %v6521_v46  ;;  %v6532_v54 = vsel %vm1727_vm6, %v6517_v47, %v6519_v55  ;;  %v13183_v47 = vld [vmem:[%s16796_s1 + $0x1a0] sm:$0xff]  }
 0x6c6   :  { %12068 = vmatmul.mubr.msk.bf16.vlgmr.msra.gmra.mrb[24].mxu0 %vm169_vm1, %v13177_v44 }
 0x6c7   :  { %6403 = vmatpush1.bf16.msra.mxu0 %v6270_v51  ;;  %6391 = vmatprep.mubr.bf16.mxu0 %v13222_v14  ;;  %v6753_v48 = vpop.permute.xlu1 %6752 }
 0x6c8   :  { %6404 = vmatprep.subr.bf16.mxu0 %v6277_v60  ;;  %v6779_v2 = vsel %vm1984_vm7, %v6753_v48, %v6755_v15  ;;  %v6767_v1 = vpop.permute.xlu0 %6766 }
 0x6cb   :  { %6405 = vmatpush1.bf16.msra.mxu0 %v6276_v16  ;;  %v6751_v33 = vpop.permute.xlu1 %6750 }
 0x6cc   :  { %6552 = vmatprep.subr.bf16.mxu0 %v6523_v23  ;;  %v6765_v59 = vpop.permute.xlu0 %6764  ;;  %v6778_v8 = vsel %vm1984_vm7, %v6751_v33, %v6753_v48 }
 0x6cd   :  { %v6784_v4 = vsel %vm1984_vm7, %v6765_v59, %v6767_v1 }
 0x6ce   :  { %12069 = vmatmul.mubr.msk.bf16.gmra.mrb[28].mxu0 %vm169_vm1, %v13178_v11 }
 0x6cf   :  { %6434 = vmatprep.mubr.bf16.mxu0 %v13222_v14  ;;  %v6769_v52 = vpop.permute.xlu1 %6768 }
 0x6d0   :  { %v6785_v17 = vsel %vm1984_vm7, %v6767_v1, %v6769_v52  ;;  %v6759_v38 = vpop.permute.xlu0 %6758 }
 0x6d3   :  { %v6757_v39 = vpop.permute.xlu1 %6756 }
 0x6d4   :  { %v6781_v50 = vsel %vm1984_vm7, %v6757_v39, %v6759_v38  ;;  %v6773_v36 = vpop.permute.xlu0 %6772 }
 0x6d6   :  { %12070 = vmatmul.mubr.msk.bf16.vlgmr.msra.gmra.mrb[32].mxu0 %vm169_vm1, %v13177_v44  ;;  %v6780_v44 = vsel %vm1984_vm7, %v6755_v15, %v6757_v39 }
 0x6d7   :  { %6553 = vmatpush1.bf16.msra.mxu0 %v6522_v24  ;;  %6444 = vmatprep.mubr.bf16.mxu0 %v13222_v14  ;;  %v6771_v56 = vpop.permute.xlu1 %6770 }
 0x6d8   :  { %6554 = vmatprep.subr.bf16.mxu0 %v6529_v0  ;;  %v6787_v58 = vsel %vm1984_vm7, %v6771_v56, %v6773_v36  ;;  %v6763_v19 = vpop.permute.xlu0 %6762  ;;  %v6786_v5 = vsel %vm1984_vm7, %v6769_v52, %v6771_v56 }
 0x6db   :  { %6555 = vmatpush1.bf16.msra.mxu0 %v6528_v34  ;;  %v6761_v61 = vpop.permute.xlu1 %6760 }
 0x6dc   :  { %6605 = vmatprep.subr.bf16.mxu0 %v6525_v7  ;;  %v6777_v18 = vpop.permute.xlu0 %6776  ;;  %v6782_v41 = vsel %vm1984_vm7, %v6759_v38, %v6761_v61 }
 0x6de   :  { %12071 = vmatmul.mubr.msk.bf16.gmra.mrb[36].mxu0 %vm169_vm1, %v13178_v11  ;;  %v6783_v11 = vsel %vm1984_vm7, %v6761_v61, %v6763_v19 }
 0x6df   :  { %6584 = vmatprep.mubr.bf16.mxu0 %v13222_v14  ;;  %v6775_v6 = vpop.permute.xlu1 %6774 }
 0x6e0   :  { %v7011_v12 = vpop.permute.xlu0 %7010  ;;  %v6789_v51 = vsel %vm1984_vm7, %v6775_v6, %v6777_v18  ;;  %v6788_v60 = vsel %vm1984_vm7, %v6773_v36, %v6775_v6 }
 0x6e3   :  { %v7009_v21 = vpop.permute.xlu1 %7008 }
 0x6e4   :  { %v7035_v16 = vsel %vm2241_vm8, %v7009_v21, %v7011_v12  ;;  %v7023_v53 = vpop.permute.xlu0 %7022 }
 0x6e6   :  { %12078 = vmatmul.mubr.msk.bf16.vlgmr.msra.gmra.mrb[16].mxu0 %vm169_vm1, %v13179_v20 }
 0x6e7   :  { %6606 = vmatpush1.bf16.msra.mxu0 %v6524_v31  ;;  %6594 = vmatprep.mubr.bf16.mxu0 %v13222_v14  ;;  %v7007_v23 = vpop.permute.xlu1 %7006 }
 0x6e8   :  { %6607 = vmatprep.subr.bf16.mxu0 %v6531_v3  ;;  %v7021_v29 = vpop.permute.xlu0 %7020  ;;  %v7034_v9 = vsel %vm2241_vm8, %v7007_v23, %v7009_v21 }
 0x6e9   :  { %v7040_v25 = vsel %vm2241_vm8, %v7021_v29, %v7023_v53 }
 0x6eb   :  { %6608 = vmatpush1.bf16.msra.mxu0 %v6530_v28  ;;  %v7025_v27 = vpop.permute.xlu1 %7024  ;;  %v13184_v28 = vld [vmem:[%s16796_s1 + $0x1a8] sm:$0xff]  }
 0x6ec   :  { %6658 = vmatprep.subr.bf16.mxu0 %v6527_v42  ;;  %v7041_v24 = vsel %vm2241_vm8, %v7023_v53, %v7025_v27  ;;  %v7015_v43 = vpop.permute.xlu0 %7014 }
 0x6ee   :  { %12079 = vmatmul.mubr.msk.bf16.gmra.mrb[20].mxu0 %vm169_vm1, %v13180_v62 }
 0x6ef   :  { %6637 = vmatprep.mubr.bf16.mxu0 %v13222_v14  ;;  %v7013_v0 = vpop.permute.xlu1 %7012 }
 0x6f0   :  { %v7037_v34 = vsel %vm2241_vm8, %v7013_v0, %v7015_v43  ;;  %v7029_v26 = vpop.permute.xlu0 %7028 }
 0x6f3   :  { %v7027_v7 = vpop.permute.xlu1 %7026 }
 0x6f4   :  { %v7043_v31 = vsel %vm2241_vm8, %v7027_v7, %v7029_v26  ;;  %v7019_v32 = vpop.permute.xlu0 %7018  ;;  %v7042_v37 = vsel %vm2241_vm8, %v7025_v27, %v7027_v7 }
 0x6f6   :  { %12080 = vmatmul.mubr.msk.bf16.vlgmr.msra.gmra.mrb[24].mxu0 %vm169_vm1, %v13179_v20 }
 0x6f7   :  { %6659 = vmatpush1.bf16.msra.mxu0 %v6526_v30  ;;  %6647 = vmatprep.mubr.bf16.mxu0 %v13222_v14  ;;  %v7017_v3 = vpop.permute.xlu1 %7016 }
 0x6f8   :  { %6660 = vmatprep.subr.bf16.mxu0 %v6533_v45  ;;  %v7033_v55 = vpop.permute.xlu0 %7032  ;;  %v7038_v46 = vsel %vm2241_vm8, %v7015_v43, %v7017_v3 }
 0x6fb   :  { %6661 = vmatpush1.bf16.msra.mxu0 %v6532_v54  ;;  %v7031_v42 = vpop.permute.xlu1 %7030 }
 0x6fc   :  { %6808 = vmatprep.subr.bf16.mxu0 %v6779_v2  ;;  %v7045_v48 = vsel %vm2241_vm8, %v7031_v42, %v7033_v55  ;;  %v7044_v15 = vsel %vm2241_vm8, %v7029_v26, %v7031_v42  ;;  %v15377_v33 = vpop.permute.xlu0 %7259 }
 0x6fe   :  { %12081 = vmatmul.mubr.msk.bf16.gmra.mrb[28].mxu0 %vm169_vm1, %v13180_v62 }
 0x6ff   :  { %6690 = vmatprep.mubr.bf16.mxu0 %v13222_v14  ;;  %v15374_v30 = vpop.permute.xlu1 %7254 }
 0x706   :  { %12082 = vmatmul.mubr.msk.bf16.vlgmr.msra.gmra.mrb[32].mxu0 %vm169_vm1, %v13179_v20  ;;  %v7036_v20 = vsel %vm2241_vm8, %v7011_v12, %v7013_v0 }
 0x707   :  { %6809 = vmatpush1.bf16.msra.mxu0 %v6778_v8  ;;  %6700 = vmatprep.mubr.bf16.mxu0 %v13222_v14 }
 0x708   :  { %6810 = vmatprep.subr.bf16.mxu0 %v6785_v17 }
 0x70b   :  { %6811 = vmatpush1.bf16.msra.mxu0 %v6784_v4 }
 0x70c   :  { %6861 = vmatprep.subr.bf16.mxu0 %v6781_v50 }
 0x70e   :  { %12083 = vmatmul.mubr.msk.bf16.gmra.mrb[36].mxu0 %vm169_vm1, %v13180_v62  ;;  %v7039_v62 = vsel %vm2241_vm8, %v7017_v3, %v7019_v32 }
 0x70f   :  { %6840 = vmatprep.mubr.bf16.mxu0 %v13222_v14 }
 0x716   :  { %12090 = vmatmul.mubr.msk.bf16.vlgmr.msra.gmra.mrb[16].mxu0 %vm169_vm1, %v13181_v57 }
 0x717   :  { %6862 = vmatpush1.bf16.msra.mxu0 %v6780_v44  ;;  %6850 = vmatprep.mubr.bf16.mxu0 %v13222_v14 }
 0x718   :  { %6863 = vmatprep.subr.bf16.mxu0 %v6787_v58 }
 0x71b   :  { %6864 = vmatpush1.bf16.msra.mxu0 %v6786_v5 }
 0x71c   :  { %6914 = vmatprep.subr.bf16.mxu0 %v6783_v11  ;;  %v15391_v11 = vpop.permute.xlu0 %7269 }
 0x71e   :  { %12091 = vmatmul.mubr.msk.bf16.gmra.mrb[20].mxu0 %vm169_vm1, %v13182_v40 }
 0x71f   :  { %6893 = vmatprep.mubr.bf16.mxu0 %v13222_v14 }
 0x726   :  { %12092 = vmatmul.mubr.msk.bf16.vlgmr.msra.gmra.mrb[24].mxu0 %vm169_vm1, %v13181_v57 }
 0x727   :  { %6915 = vmatpush1.bf16.msra.mxu0 %v6782_v41  ;;  %6903 = vmatprep.mubr.bf16.mxu0 %v13222_v14 }
 0x728   :  { %6916 = vmatprep.subr.bf16.mxu0 %v6789_v51 }
 0x72b   :  { %6917 = vmatpush1.bf16.msra.mxu0 %v6788_v60 }
 0x72c   :  { %7064 = vmatprep.subr.bf16.mxu0 %v7035_v16 }
 0x72e   :  { %12093 = vmatmul.mubr.msk.bf16.gmra.mrb[28].mxu0 %vm169_vm1, %v13182_v40 }
 0x72f   :  { %6946 = vmatprep.mubr.bf16.mxu0 %v13222_v14 }
 0x736   :  { %12094 = vmatmul.mubr.msk.bf16.vlgmr.msra.gmra.mrb[32].mxu0 %vm169_vm1, %v13181_v57  ;;  %v15384_v57 = vpop.permute.xlu1 %7264 }
 0x737   :  { %7065 = vmatpush1.bf16.msra.mxu0 %v7034_v9  ;;  %6956 = vmatprep.mubr.bf16.mxu0 %v13222_v14 }
 0x738   :  { %7066 = vmatprep.subr.bf16.mxu0 %v7041_v24 }
 0x73b   :  { %7067 = vmatpush1.bf16.msra.mxu0 %v7040_v25 }
 0x73c   :  { %7117 = vmatprep.subr.bf16.mxu0 %v7037_v34 }
 0x73e   :  { %12095 = vmatmul.mubr.msk.bf16.gmra.mrb[36].mxu0 %vm169_vm1, %v13182_v40 }
 0x73f   :  { %7096 = vmatprep.mubr.bf16.mxu0 %v13222_v14 }
 0x746   :  { %12102 = vmatmul.mubr.msk.bf16.vlgmr.msra.gmra.mrb[16].mxu0 %vm169_vm1, %v13183_v47 }
 0x747   :  { %7118 = vmatpush1.bf16.msra.mxu0 %v7036_v20  ;;  %7106 = vmatprep.mubr.bf16.mxu0 %v13222_v14 }
 0x748   :  { %7119 = vmatprep.subr.bf16.mxu0 %v7043_v31 }
 0x74b   :  { %7120 = vmatpush1.bf16.msra.mxu0 %v7042_v37 }
 0x74c   :  { %7170 = vmatprep.subr.bf16.mxu0 %v7039_v62 }
 0x74e   :  { %12103 = vmatmul.mubr.msk.bf16.gmra.mrb[20].mxu0 %vm169_vm1, %v13184_v28 }
 0x74f   :  { %7149 = vmatprep.mubr.bf16.mxu0 %v13222_v14 }
 0x756   :  { %12104 = vmatmul.mubr.msk.bf16.vlgmr.msra.gmra.mrb[24].mxu0 %vm169_vm1, %v13183_v47 }
 0x757   :  { %7171 = vmatpush1.bf16.msra.mxu0 %v7038_v46  ;;  %7159 = vmatprep.mubr.bf16.mxu0 %v13222_v14 }
 0x758   :  { %7172 = vmatprep.subr.bf16.mxu0 %v7045_v48 }
 0x75b   :  { %7173 = vmatpush1.bf16.msra.mxu0 %v7044_v15 }
 0x75e   :  { %12105 = vmatmul.mubr.msk.bf16.gmra.mrb[28].mxu0 %vm169_vm1, %v13184_v28 }
 0x75f   :  { %7202 = vmatprep.mubr.bf16.mxu0 %v13222_v14 }
 0x766   :  { %12106 = vmatmul.mubr.msk.bf16.vlgmr.msra.gmra.mrb[32].mxu0 %vm169_vm1, %v13183_v47 }
 0x767   :  { %7212 = vmatprep.mubr.bf16.mxu0 %v13222_v14 }
 0x76e   :  { %12107 = vmatmul.mubr.msk.bf16.gmra.mrb[36].mxu0 %vm169_vm1, %v13184_v28 }
 0x76f   :  { %9887 = vmatprep.mubr.bf16.mxu0 %v13222_v14 }
 0x819   :  { %v7098_v45 = vpop.f32.mrb[16].mxu0 }
 0x81a   :  { %v7272_v54 = vadd.f32 %v15374_v30, %v7098_v45  ;;  %v7100_v2 = vpop.f32.mrb[17].mxu0 }
 0x81b   :  { %v7273_v1 = vadd.f32 %v15374_v30, %v7100_v2  ;;  %v7102_v52 = vpop.f32.mrb[18].mxu0 }
 0x81c   :  { %v7296_v59 = vmax.f32 %v7272_v54, 0.0  ;;  %v7278_v8 = vadd.f32 %v15377_v33, %v7102_v52  ;;  %v7104_v17 = vpop.f32.mrb[19].mxu0 }
 0x81d   :  { %v7297_v39 = vmax.f32 %v7273_v1, 0.0  ;;  %v7279_v38 = vadd.f32 %v15377_v33, %v7104_v17 }
 0x81e   :  { %v7302_v4 = vmax.f32 %v7278_v8, 0.0  ;;  %v7320_v56 = vmul.f32 %v7296_v59, %v14219_v22 }
 0x81f   :  { %v7303_v50 = vmax.f32 %v7279_v38, 0.0  ;;  %v7321_v44 = vmul.f32 %v7297_v39, %v14223_v10 }
 0x820   :  { %v7326_v36 = vmul.f32 %v7302_v4, %v14219_v22 }
 0x821   :  { %v7327_v58 = vmul.f32 %v7303_v50, %v14223_v10  ;;  %v7108_v61 = vpop.f32.mrb[20].mxu0 }
 0x822   :  { %v15388_v19 = vpack.c.bf16 %v7326_v36, %v7320_v56  ;;  %v7284_v5 = vadd.f32 %v15384_v57, %v7108_v61  ;;  %v7110_v40 = vpop.f32.mrb[21].mxu0 }
 0x823   :  { %v15393_v6 = vpack.c.bf16 %v7327_v58, %v7321_v44  ;;  %v7285_v18 = vadd.f32 %v15384_v57, %v7110_v40  ;;  %v7112_v21 = vpop.f32.mrb[22].mxu0 }
 0x824   :  { %v7308_v12 = vmax.f32 %v7284_v5, 0.0  ;;  %v7290_v41 = vadd.f32 %v15391_v11, %v7112_v21  ;;  %v7114_v51 = vpop.f32.mrb[23].mxu0  ;;  %7418 = vrot.lane.b32.xlu1 %v15388_v19, %s13221_s5 }
 0x825   :  { %v7309_v60 = vmax.f32 %v7285_v18, 0.0  ;;  %v7291_v16 = vadd.f32 %v15391_v11, %v7114_v51  ;;  %7420 = vrot.lane.b32.xlu0 %v15393_v6, %s13221_s5 }
 0x826   :  { %v7314_v23 = vmax.f32 %v7290_v41, 0.0  ;;  %v7332_v27 = vmul.f32 %v7308_v12, %v14219_v22 }
 0x827   :  { %v7315_v53 = vmax.f32 %v7291_v16, 0.0  ;;  %v7333_v9 = vmul.f32 %v7309_v60, %v14223_v10 }
 0x828   :  { %v7338_v29 = vmul.f32 %v7314_v23, %v14219_v22 }
 0x829   :  { %v7339_v24 = vmul.f32 %v7315_v53, %v14223_v10  ;;  %v7151_v0 = vpop.f32.mrb[24].mxu0 }
 0x82a   :  { %v15406_v43 = vpack.c.bf16 %v7338_v29, %v7332_v27  ;;  %v7274_v25 = vadd.f32 %v15374_v30, %v7151_v0  ;;  %v7153_v34 = vpop.f32.mrb[25].mxu0 }
 0x82b   :  { %v15409_v7 = vpack.c.bf16 %v7339_v24, %v7333_v9  ;;  %v7275_v26 = vadd.f32 %v15374_v30, %v7153_v34  ;;  %v7155_v47 = vpop.f32.mrb[26].mxu0 }
 0x82c   :  { %v7298_v20 = vmax.f32 %v7274_v25, 0.0  ;;  %v7280_v31 = vadd.f32 %v15377_v33, %v7155_v47  ;;  %v7157_v3 = vpop.f32.mrb[27].mxu0  ;;  %7432 = vrot.lane.b32.xlu0 %v15406_v43, %s13221_s5 }
 0x82d   :  { %v7299_v32 = vmax.f32 %v7275_v26, 0.0  ;;  %v7281_v37 = vadd.f32 %v15377_v33, %v7157_v3  ;;  %7434 = vrot.lane.b32.xlu1 %v15409_v7, %s13221_s5 }
 0x82e   :  { %v7304_v28 = vmax.f32 %v7280_v31, 0.0  ;;  %v7322_v42 = vmul.f32 %v7298_v20, %v14183_v49 }
 0x82f   :  { %v7305_v62 = vmax.f32 %v7281_v37, 0.0  ;;  %v7323_v46 = vmul.f32 %v7299_v32, %v14187_v13 }
 0x830   :  { %v7328_v55 = vmul.f32 %v7304_v28, %v14183_v49  ;;  %7430 = vrot.lane.b32.xlu0 %v13222_v14, %s13221_s5 }
 0x831   :  { %v7329_v48 = vmul.f32 %v7305_v62, %v14187_v13  ;;  %v7161_v15 = vpop.f32.mrb[28].mxu0 }
 0x832   :  { %v15424_v45 = vpack.c.bf16 %v7328_v55, %v7322_v42  ;;  %v7286_v54 = vadd.f32 %v15384_v57, %v7161_v15  ;;  %v7163_v2 = vpop.f32.mrb[29].mxu0 }
 0x833   :  { %v15427_v1 = vpack.c.bf16 %v7329_v48, %v7323_v46  ;;  %v7287_v52 = vadd.f32 %v15384_v57, %v7163_v2  ;;  %v7165_v59 = vpop.f32.mrb[30].mxu0 }
 0x834   :  { %v7310_v8 = vmax.f32 %v7286_v54, 0.0  ;;  %v7292_v17 = vadd.f32 %v15391_v11, %v7165_v59  ;;  %v7167_v39 = vpop.f32.mrb[31].mxu0  ;;  %7422 = vrot.lane.b32.xlu1 %v15424_v45, %s13221_s5 }
 0x835   :  { %v7311_v38 = vmax.f32 %v7287_v52, 0.0  ;;  %v7293_v4 = vadd.f32 %v15391_v11, %v7167_v39  ;;  %7424 = vrot.lane.b32.xlu0 %v15427_v1, %s13221_s5 }
 0x836   :  { %v7316_v50 = vmax.f32 %v7292_v17, 0.0  ;;  %v7334_v36 = vmul.f32 %v7310_v8, %v14183_v49 }
 0x837   :  { %v7317_v56 = vmax.f32 %v7293_v4, 0.0  ;;  %v7335_v58 = vmul.f32 %v7311_v38, %v14187_v13 }
 0x838   :  { %v7340_v44 = vmul.f32 %v7316_v50, %v14183_v49 }
 0x839   :  { %v7341_v61 = vmul.f32 %v7317_v56, %v14187_v13  ;;  %v7204_v5 = vpop.f32.mrb[32].mxu0 }
 0x83a   :  { %v15440_v40 = vpack.c.bf16 %v7340_v44, %v7334_v36  ;;  %v7276_v18 = vadd.f32 %v15374_v30, %v7204_v5  ;;  %v7206_v21 = vpop.f32.mrb[33].mxu0  ;;  %v13185_v44 = vld [vmem:[%s16796_s1 + $0x1c0] sm:$0xff]  }
 0x83b   :  { %v15443_v12 = vpack.c.bf16 %v7341_v61, %v7335_v58  ;;  %v7277_v41 = vadd.f32 %v15374_v30, %v7206_v21  ;;  %v7208_v51 = vpop.f32.mrb[34].mxu0  ;;  %v13186_v21 = vld [vmem:[%s16796_s1 + $0x1c8] sm:$0xff]  }
 0x83c   :  { %v7300_v60 = vmax.f32 %v7276_v18, 0.0  ;;  %v7282_v16 = vadd.f32 %v15377_v33, %v7208_v51  ;;  %v7210_v23 = vpop.f32.mrb[35].mxu0  ;;  %7436 = vrot.lane.b32.xlu1 %v15440_v40, %s13221_s5 }
 0x83d   :  { %v7301_v53 = vmax.f32 %v7277_v41, 0.0  ;;  %v7283_v27 = vadd.f32 %v15377_v33, %v7210_v23  ;;  %7438 = vrot.lane.b32.xlu0 %v15443_v12, %s13221_s5 }
 0x83e   :  { %v7306_v29 = vmax.f32 %v7282_v16, 0.0  ;;  %v7324_v24 = vmul.f32 %v7300_v60, %v14257_v63 }
 0x83f   :  { %v7307_v9 = vmax.f32 %v7283_v27, 0.0  ;;  %v7325_v0 = vmul.f32 %v7301_v53, %v14263_v35 }
 0x840   :  { %v7330_v30 = vmul.f32 %v7306_v29, %v14257_v63 }
 0x841   :  { %v7331_v25 = vmul.f32 %v7307_v9, %v14263_v35  ;;  %v7214_v34 = vpop.f32.mrb[36].mxu0 }
 0x842   :  { %v15456_v26 = vpack.c.bf16 %v7330_v30, %v7324_v24  ;;  %v7288_v47 = vadd.f32 %v15384_v57, %v7214_v34  ;;  %v7216_v20 = vpop.f32.mrb[37].mxu0 }
 0x843   :  { %v15459_v33 = vpack.c.bf16 %v7331_v25, %v7325_v0  ;;  %v7289_v31 = vadd.f32 %v15384_v57, %v7216_v20  ;;  %v7218_v3 = vpop.f32.mrb[38].mxu0 }
 0x844   :  { %v7312_v32 = vmax.f32 %v7288_v47, 0.0  ;;  %v7294_v37 = vadd.f32 %v15391_v11, %v7218_v3  ;;  %v7220_v28 = vpop.f32.mrb[39].mxu0  ;;  %7426 = vrot.lane.b32.xlu1 %v15456_v26, %s13221_s5 }
 0x845   :  { %v7313_v62 = vmax.f32 %v7289_v31, 0.0  ;;  %v7295_v42 = vadd.f32 %v15391_v11, %v7220_v28  ;;  %7428 = vrot.lane.b32.xlu0 %v15459_v33, %s13221_s5  ;;  %v7417_v11 = vpop.permute.xlu1 %7416 }
 0x846   :  { %v7318_v55 = vmax.f32 %v7294_v37, 0.0  ;;  %v7336_v48 = vmul.f32 %v7312_v32, %v14257_v63 }
 0x847   :  { %v7319_v46 = vmax.f32 %v7295_v42, 0.0  ;;  %v7337_v15 = vmul.f32 %v7313_v62, %v14263_v35 }
 0x848   :  { %v7342_v57 = vmul.f32 %v7318_v55, %v14257_v63 }
 0x849   :  { %v7343_v54 = vmul.f32 %v7319_v46, %v14263_v35 }
 0x84a   :  { %v15472_v2 = vpack.c.bf16 %v7342_v57, %v7336_v48 }
 0x84b   :  { %v15474_v52 = vpack.c.bf16 %v7343_v54, %v7337_v15  ;;  %v13187_v15 = vld [vmem:[%s16796_s1 + $0x1b0] sm:$0xff]  }
 0x84c   :  { %7440 = vrot.lane.b32.xlu1 %v15472_v2, %s13221_s5 }
 0x84d   :  { %7442 = vrot.lane.b32.xlu0 %v15474_v52, %s13221_s5 }
 0x850   :  { %7645 = vrot.lane.b32.xlu1 %v15388_v19, %s13223_s22 }
 0x851   :  { %7647 = vrot.lane.b32.xlu0 %v15393_v6, %s13223_s22 }
 0x854   :  { %7643 = vrot.lane.b32.xlu1 %v13222_v14, %s13223_s22 }
 0x855   :  { %7659 = vrot.lane.b32.xlu0 %v15406_v43, %s13223_s22 }
 0x858   :  { %7661 = vrot.lane.b32.xlu1 %v15409_v7, %s13223_s22 }
 0x859   :  { %7657 = vrot.lane.b32.xlu0 %v13222_v14, %s13223_s22 }
 0x85c   :  { %7649 = vrot.lane.b32.xlu1 %v15424_v45, %s13223_s22 }
 0x85d   :  { %7651 = vrot.lane.b32.xlu0 %v15427_v1, %s13223_s22 }
 0x860   :  { %7663 = vrot.lane.b32.xlu1 %v15440_v40, %s13223_s22 }
 0x861   :  { %7665 = vrot.lane.b32.xlu0 %v15443_v12, %s13223_s22 }
 0x864   :  { %7653 = vrot.lane.b32.xlu1 %v15456_v26, %s13223_s22 }
 0x865   :  { %7655 = vrot.lane.b32.xlu0 %v15459_v33, %s13223_s22 }
 0x868   :  { %7667 = vrot.lane.b32.xlu1 %v15472_v2, %s13223_s22 }
 0x869   :  { %7669 = vrot.lane.b32.xlu0 %v15474_v52, %s13223_s22 }
 0x86c   :  { %7877 = vrot.lane.b32.xlu1 %v15388_v19, %s13224_s6 }
 0x86d   :  { %7879 = vrot.lane.b32.xlu0 %v15393_v6, %s13224_s6 }
 0x870   :  { %7875 = vrot.lane.b32.xlu1 %v13222_v14, %s13224_s6 }
 0x871   :  { %7891 = vrot.lane.b32.xlu0 %v15406_v43, %s13224_s6 }
 0x874   :  { %7893 = vrot.lane.b32.xlu1 %v15409_v7, %s13224_s6 }
 0x875   :  { %7889 = vrot.lane.b32.xlu0 %v13222_v14, %s13224_s6 }
 0x878   :  { %7881 = vrot.lane.b32.xlu1 %v15424_v45, %s13224_s6 }
 0x879   :  { %7883 = vrot.lane.b32.xlu0 %v15427_v1, %s13224_s6 }
 0x87c   :  { %7895 = vrot.lane.b32.xlu1 %v15440_v40, %s13224_s6 }
 0x87d   :  { %7897 = vrot.lane.b32.xlu0 %v15443_v12, %s13224_s6 }
 0x880   :  { %7885 = vrot.lane.b32.xlu1 %v15456_v26, %s13224_s6 }
 0x881   :  { %7887 = vrot.lane.b32.xlu0 %v15459_v33, %s13224_s6 }
 0x884   :  { %7899 = vrot.lane.b32.xlu1 %v15472_v2, %s13224_s6 }
 0x885   :  { %7901 = vrot.lane.b32.xlu0 %v15474_v52, %s13224_s6 }
 0x888   :  { %8133 = vrot.lane.b32.xlu1 %v15388_v19, %s13225_s7 }
 0x889   :  { %8135 = vrot.lane.b32.xlu0 %v15393_v6, %s13225_s7 }
 0x88c   :  { %8131 = vrot.lane.b32.xlu1 %v13222_v14, %s13225_s7 }
 0x88d   :  { %8147 = vrot.lane.b32.xlu0 %v15406_v43, %s13225_s7 }
 0x890   :  { %8149 = vrot.lane.b32.xlu1 %v15409_v7, %s13225_s7 }
 0x891   :  { %8145 = vrot.lane.b32.xlu0 %v13222_v14, %s13225_s7 }
 0x894   :  { %8137 = vrot.lane.b32.xlu1 %v15424_v45, %s13225_s7 }
 0x895   :  { %8139 = vrot.lane.b32.xlu0 %v15427_v1, %s13225_s7 }
 0x896   :  { %v7419_v59 = vpop.permute.xlu1 %7418 }
 0x897   :  { %v7421_v8 = vpop.permute.xlu0 %7420  ;;  %v7444_v39 = vsel %vm144_vm0, %v7417_v11, %v7419_v59 }
 0x898   :  { %8151 = vrot.lane.b32.xlu1 %v15440_v40, %s13225_s7  ;;  %v7445_v17 = vsel %vm144_vm0, %v7419_v59, %v7421_v8 }
 0x899   :  { %8153 = vrot.lane.b32.xlu0 %v15443_v12, %s13225_s7  ;;  %7474 = vmatprep.subr.bf16.mxu1 %v7445_v17 }
 0x89a   :  { %7475 = vmatpush1.bf16.msra.mxu1 %v7444_v39  ;;  %v13188_v39 = vld [vmem:[%s16796_s1 + $0x1b8] sm:$0xff]  }
 0x89c   :  { %8141 = vrot.lane.b32.xlu1 %v15456_v26, %s13225_s7 }
 0x89d   :  { %8143 = vrot.lane.b32.xlu0 %v15459_v33, %s13225_s7 }
 0x89e   :  { %v7433_v38 = vpop.permute.xlu0 %7432 }
 0x89f   :  { %v7435_v4 = vpop.permute.xlu1 %7434 }
 0x8a0   :  { %8155 = vrot.lane.b32.xlu1 %v15472_v2, %s13225_s7  ;;  %v7451_v50 = vsel %vm144_vm0, %v7433_v38, %v7435_v4 }
 0x8a1   :  { %8157 = vrot.lane.b32.xlu0 %v15474_v52, %s13225_s7  ;;  %7476 = vmatprep.subr.bf16.mxu1 %v7451_v50 }
 0x8a2   :  { %v7431_v56 = vpop.permute.xlu0 %7430 }
 0x8a3   :  { %v7450_v36 = vsel %vm144_vm0, %v7431_v56, %v7433_v38 }
 0x8a4   :  { %8621 = vrot.lane.b32.xlu1 %v15393_v6, %s13226_s12  ;;  %7477 = vmatpush1.bf16.msra.mxu1 %v7450_v36 }
 0x8a5   :  { %8623 = vrot.lane.b32.xlu0 %v15424_v45, %s13226_s12 }
 0x8a6   :  { %v7423_v58 = vpop.permute.xlu1 %7422 }
 0x8a7   :  { %v7425_v61 = vpop.permute.xlu0 %7424  ;;  %12122 = vmatmul.mubr.msk.bf16.vlgmr.msra.gmra.mrb[36].mxu1 %vm169_vm1, %v13185_v44  ;;  %v7446_v18 = vsel %vm144_vm0, %v7421_v8, %v7423_v58 }
 0x8a8   :  { %8619 = vrot.lane.b32.xlu1 %v15388_v19, %s13226_s12  ;;  %v7447_v5 = vsel %vm144_vm0, %v7423_v58, %v7425_v61  ;;  %7516 = vmatprep.mubr.bf16.mxu1 %v13222_v14 }
 0x8a9   :  { %8635 = vrot.lane.b32.xlu0 %v15409_v7, %s13226_s12  ;;  %7527 = vmatprep.subr.bf16.mxu1 %v7447_v5 }
 0x8aa   :  { %7528 = vmatpush1.bf16.msra.mxu1 %v7446_v18 }
 0x8ac   :  { %8637 = vrot.lane.b32.xlu1 %v15440_v40, %s13226_s12 }
 0x8ad   :  { %8633 = vrot.lane.b32.xlu0 %v15406_v43, %s13226_s12 }
 0x8ae   :  { %v7437_v41 = vpop.permute.xlu1 %7436 }
 0x8af   :  { %v7439_v51 = vpop.permute.xlu0 %7438  ;;  %12123 = vmatmul.mubr.msk.bf16.gmra.mrb[40].mxu1 %vm169_vm1, %v13186_v21  ;;  %v7452_v16 = vsel %vm144_vm0, %v7435_v4, %v7437_v41 }
 0x8b0   :  { %8625 = vrot.lane.b32.xlu1 %v15427_v1, %s13226_s12  ;;  %v7453_v60 = vsel %vm144_vm0, %v7437_v41, %v7439_v51  ;;  %7559 = vmatprep.mubr.bf16.mxu1 %v13222_v14 }
 0x8b1   :  { %8627 = vrot.lane.b32.xlu0 %v15456_v26, %s13226_s12  ;;  %7529 = vmatprep.subr.bf16.mxu1 %v7453_v60 }
 0x8b2   :  { %7530 = vmatpush1.bf16.msra.mxu1 %v7452_v16 }
 0x8b4   :  { %8639 = vrot.lane.b32.xlu1 %v15443_v12, %s13226_s12 }
 0x8b5   :  { %8641 = vrot.lane.b32.xlu0 %v15472_v2, %s13226_s12 }
 0x8b6   :  { %v7427_v23 = vpop.permute.xlu1 %7426 }
 0x8b7   :  { %v7429_v53 = vpop.permute.xlu0 %7428  ;;  %12124 = vmatmul.mubr.msk.bf16.vlgmr.msra.gmra.mrb[44].mxu1 %vm169_vm1, %v13185_v44  ;;  %v7448_v29 = vsel %vm144_vm0, %v7425_v61, %v7427_v23 }
 0x8b8   :  { %8629 = vrot.lane.b32.xlu1 %v15459_v33, %s13226_s12  ;;  %v7449_v27 = vsel %vm144_vm0, %v7427_v23, %v7429_v53  ;;  %7569 = vmatprep.mubr.bf16.mxu1 %v13222_v14 }
 0x8b9   :  { %8631 = vrot.lane.b32.xlu0 %v13222_v14, %s13226_s12  ;;  %7580 = vmatprep.subr.bf16.mxu1 %v7449_v27 }
 0x8ba   :  { %7581 = vmatpush1.bf16.msra.mxu1 %v7448_v29 }
 0x8bc   :  { %8643 = vrot.lane.b32.xlu1 %v15474_v52, %s13226_s12 }
 0x8bd   :  { %8645 = vrot.lane.b32.xlu0 %v13222_v14, %s13226_s12 }
 0x8be   :  { %v7441_v9 = vpop.permute.xlu1 %7440 }
 0x8bf   :  { %v7443_v24 = vpop.permute.xlu0 %7442  ;;  %12125 = vmatmul.mubr.msk.bf16.gmra.mrb[48].mxu1 %vm169_vm1, %v13186_v21  ;;  %v7454_v0 = vsel %vm144_vm0, %v7439_v51, %v7441_v9 }
 0x8c0   :  { %8877 = vrot.lane.b32.xlu1 %v15393_v6, %s13227_s15  ;;  %v7455_v30 = vsel %vm144_vm0, %v7441_v9, %v7443_v24  ;;  %7612 = vmatprep.mubr.bf16.mxu1 %v13222_v14 }
 0x8c1   :  { %8879 = vrot.lane.b32.xlu0 %v15424_v45, %s13227_s15  ;;  %7582 = vmatprep.subr.bf16.mxu1 %v7455_v30  ;;  %v13189_v30 = vld [vmem:[%s16796_s1 + $0x1d0] sm:$0xff]  }
 0x8c2   :  { %7583 = vmatpush1.bf16.msra.mxu1 %v7454_v0  ;;  %v7646_v25 = vpop.permute.xlu1 %7645 }
 0x8c3   :  { %v7648_v34 = vpop.permute.xlu0 %7647 }
 0x8c4   :  { %8875 = vrot.lane.b32.xlu1 %v15388_v19, %s13227_s15  ;;  %v7672_v47 = vsel %vm373_vm2, %v7646_v25, %v7648_v34 }
 0x8c5   :  { %8891 = vrot.lane.b32.xlu0 %v15409_v7, %s13227_s15  ;;  %7701 = vmatprep.subr.bf16.mxu1 %v7672_v47 }
 0x8c6   :  { %v7644_v20 = vpop.permute.xlu1 %7643 }
 0x8c7   :  { %v7671_v31 = vsel %vm373_vm2, %v7644_v20, %v7646_v25  ;;  %v7660_v3 = vpop.permute.xlu0 %7659  ;;  %12126 = vmatmul.mubr.msk.bf16.vlgmr.msra.gmra.mrb[52].mxu1 %vm169_vm1, %v13185_v44 }
 0x8c8   :  { %8893 = vrot.lane.b32.xlu1 %v15440_v40, %s13227_s15  ;;  %7702 = vmatpush1.bf16.msra.mxu1 %v7671_v31  ;;  %v13190_v31 = vld [vmem:[%s16796_s1 + $0x1d8] sm:$0xff]  }
 0x8c9   :  { %8889 = vrot.lane.b32.xlu0 %v15406_v43, %s13227_s15  ;;  %7622 = vmatprep.mubr.bf16.mxu1 %v13222_v14 }
 0x8ca   :  { %v7662_v32 = vpop.permute.xlu1 %7661 }
 0x8cb   :  { %v7658_v37 = vpop.permute.xlu0 %7657  ;;  %v7678_v28 = vsel %vm373_vm2, %v7660_v3, %v7662_v32 }
 0x8cc   :  { %v7677_v62 = vsel %vm373_vm2, %v7658_v37, %v7660_v3  ;;  %8881 = vrot.lane.b32.xlu1 %v15427_v1, %s13227_s15  ;;  %7703 = vmatprep.subr.bf16.mxu1 %v7678_v28  ;;  %v12220_v28 = vld [vmem:[%s16797_s2 + $0x60] sm:$0xff] }
 0x8cd   :  { %8883 = vrot.lane.b32.xlu0 %v15456_v26, %s13227_s15  ;;  %7704 = vmatpush1.bf16.msra.mxu1 %v7677_v62  ;;  %v12221_v62 = vld [vmem:[%s16797_s2 + $0x68] sm:$0xff] }
 0x8ce   :  { %v7650_v42 = vpop.permute.xlu1 %7649 }
 0x8cf   :  { %v7652_v55 = vpop.permute.xlu0 %7651  ;;  %12127 = vmatmul.mubr.msk.bf16.gmra.mrb[56].mxu1 %vm169_vm1, %v13186_v21  ;;  %v7673_v54 = vsel %vm373_vm2, %v7648_v34, %v7650_v42 }
 0x8d0   :  { %8895 = vrot.lane.b32.xlu1 %v15443_v12, %s13227_s15  ;;  %v7674_v46 = vsel %vm373_vm2, %v7650_v42, %v7652_v55  ;;  %7733 = vmatprep.mubr.bf16.mxu1 %v13222_v14  ;;  %v12222_v42 = vld [vmem:[%s16797_s2 + $0x70] sm:$0xff] }
 0x8d1   :  { %8897 = vrot.lane.b32.xlu0 %v15472_v2, %s13227_s15  ;;  %7754 = vmatprep.subr.bf16.mxu1 %v7674_v46 }
 0x8d2   :  { %v7664_v48 = vpop.permute.xlu1 %7663 }
 0x8d3   :  { %v7666_v57 = vpop.permute.xlu0 %7665  ;;  %v7679_v17 = vsel %vm373_vm2, %v7662_v32, %v7664_v48 }
 0x8d4   :  { %8885 = vrot.lane.b32.xlu1 %v15459_v33, %s13227_s15  ;;  %v7680_v11 = vsel %vm373_vm2, %v7664_v48, %v7666_v57 }
 0x8d5   :  { %8887 = vrot.lane.b32.xlu0 %v13222_v14, %s13227_s15 }
 0x8d6   :  { %v7654_v59 = vpop.permute.xlu1 %7653 }
 0x8d7   :  { %12130 = vmatmul.mubr.msk.bf16.vlgmr.msra.gmra.mrb[36].mxu1 %vm169_vm1, %v13187_v15  ;;  %v7656_v8 = vpop.permute.xlu0 %7655  ;;  %v7675_v44 = vsel %vm373_vm2, %v7652_v55, %v7654_v59  ;;  %v12223_v55 = vld [vmem:[%s16797_s2 + $0x78] sm:$0xff] }
 0x8d8   :  { %7755 = vmatpush1.bf16.msra.mxu1 %v7673_v54  ;;  %8899 = vrot.lane.b32.xlu1 %v15474_v52, %s13227_s15  ;;  %v7676_v38 = vsel %vm373_vm2, %v7654_v59, %v7656_v8 }
 0x8d9   :  { %7756 = vmatprep.subr.bf16.mxu1 %v7680_v11  ;;  %8901 = vrot.lane.b32.xlu0 %v13222_v14, %s13227_s15 }
 0x8da   :  { %7743 = vmatprep.mubr.bf16.mxu1 %v13222_v14  ;;  %v7668_v4 = vpop.permute.xlu1 %7667 }
 0x8db   :  { %v7670_v50 = vpop.permute.xlu0 %7669  ;;  %v7681_v61 = vsel %vm373_vm2, %v7666_v57, %v7668_v4 }
 0x8dc   :  { %7757 = vmatpush1.bf16.msra.mxu1 %v7679_v17  ;;  %9133 = vrot.lane.b32.xlu1 %v15393_v6, %s13228_s20  ;;  %v7682_v58 = vsel %vm373_vm2, %v7668_v4, %v7670_v50 }
 0x8dd   :  { %7807 = vmatprep.subr.bf16.mxu1 %v7676_v38  ;;  %9135 = vrot.lane.b32.xlu0 %v15424_v45, %s13228_s20 }
 0x8de   :  { %v7878_v56 = vpop.permute.xlu1 %7877 }
 0x8df   :  { %12131 = vmatmul.mubr.msk.bf16.gmra.mrb[40].mxu1 %vm169_vm1, %v13188_v39  ;;  %v7880_v36 = vpop.permute.xlu0 %7879 }
 0x8e0   :  { %9131 = vrot.lane.b32.xlu1 %v15388_v19, %s13228_s20  ;;  %7786 = vmatprep.mubr.bf16.mxu1 %v13222_v14  ;;  %v7904_v5 = vsel %vm606_vm3, %v7878_v56, %v7880_v36 }
 0x8e1   :  { %9147 = vrot.lane.b32.xlu0 %v15409_v7, %s13228_s20 }
 0x8e2   :  { %v7876_v18 = vpop.permute.xlu1 %7875 }
 0x8e3   :  { %v7892_v21 = vpop.permute.xlu0 %7891  ;;  %v7903_v60 = vsel %vm606_vm3, %v7876_v18, %v7878_v56 }
 0x8e4   :  { %9149 = vrot.lane.b32.xlu1 %v15440_v40, %s13228_s20 }
 0x8e5   :  { %9145 = vrot.lane.b32.xlu0 %v15406_v43, %s13228_s20 }
 0x8e6   :  { %v7894_v41 = vpop.permute.xlu1 %7893 }
 0x8e7   :  { %12132 = vmatmul.mubr.msk.bf16.vlgmr.msra.gmra.mrb[44].mxu1 %vm169_vm1, %v13187_v15  ;;  %v7890_v51 = vpop.permute.xlu0 %7889  ;;  %v7910_v16 = vsel %vm606_vm3, %v7892_v21, %v7894_v41 }
 0x8e8   :  { %7808 = vmatpush1.bf16.msra.mxu1 %v7675_v44  ;;  %9137 = vrot.lane.b32.xlu1 %v15427_v1, %s13228_s20  ;;  %v7909_v27 = vsel %vm606_vm3, %v7890_v51, %v7892_v21 }
 0x8e9   :  { %7809 = vmatprep.subr.bf16.mxu1 %v7682_v58  ;;  %9139 = vrot.lane.b32.xlu0 %v15456_v26, %s13228_s20 }
 0x8ea   :  { %7796 = vmatprep.mubr.bf16.mxu1 %v13222_v14  ;;  %v7882_v23 = vpop.permute.xlu1 %7881 }
 0x8eb   :  { %v7884_v53 = vpop.permute.xlu0 %7883  ;;  %v7905_v0 = vsel %vm606_vm3, %v7880_v36, %v7882_v23 }
 0x8ec   :  { %7810 = vmatpush1.bf16.msra.mxu1 %v7681_v61  ;;  %9151 = vrot.lane.b32.xlu1 %v15443_v12, %s13228_s20  ;;  %v7906_v29 = vsel %vm606_vm3, %v7882_v23, %v7884_v53 }
 0x8ed   :  { %7933 = vmatprep.subr.bf16.mxu1 %v7904_v5  ;;  %9153 = vrot.lane.b32.xlu0 %v15472_v2, %s13228_s20  ;;  %v13191_v5 = vld [vmem:[%s16796_s1 + $0x1e0] sm:$0xff]  }
 0x8ee   :  { %v7896_v9 = vpop.permute.xlu1 %7895 }
 0x8ef   :  { %12133 = vmatmul.mubr.msk.bf16.gmra.mrb[48].mxu1 %vm169_vm1, %v13188_v39  ;;  %v7898_v24 = vpop.permute.xlu0 %7897  ;;  %v7911_v20 = vsel %vm606_vm3, %v7894_v41, %v7896_v9 }
 0x8f0   :  { %9141 = vrot.lane.b32.xlu1 %v15459_v33, %s13228_s20  ;;  %7839 = vmatprep.mubr.bf16.mxu1 %v13222_v14  ;;  %v7912_v25 = vsel %vm606_vm3, %v7896_v9, %v7898_v24 }
 0x8f1   :  { %9143 = vrot.lane.b32.xlu0 %v13222_v14, %s13228_s20 }
 0x8f2   :  { %v7886_v34 = vpop.permute.xlu1 %7885 }
 0x8f3   :  { %v7888_v47 = vpop.permute.xlu0 %7887  ;;  %v7907_v57 = vsel %vm606_vm3, %v7884_v53, %v7886_v34 }
 0x8f4   :  { %9155 = vrot.lane.b32.xlu1 %v15474_v52, %s13228_s20  ;;  %v7908_v3 = vsel %vm606_vm3, %v7886_v34, %v7888_v47 }
 0x8f5   :  { %9157 = vrot.lane.b32.xlu0 %v13222_v14, %s13228_s20 }
 0x8f6   :  { %v7900_v32 = vpop.permute.xlu1 %7899 }
 0x8f7   :  { %12134 = vmatmul.mubr.msk.bf16.vlgmr.msra.gmra.mrb[52].mxu1 %vm169_vm1, %v13187_v15  ;;  %v7902_v37 = vpop.permute.xlu0 %7901  ;;  %v7913_v54 = vsel %vm606_vm3, %v7898_v24, %v7900_v32 }
 0x8f8   :  { %7934 = vmatpush1.bf16.msra.mxu1 %v7903_v60  ;;  %9389 = vrot.lane.b32.xlu1 %v15393_v6, %s13229_s26  ;;  %v7914_v15 = vsel %vm606_vm3, %v7900_v32, %v7902_v37 }
 0x8f9   :  { %7935 = vmatprep.subr.bf16.mxu1 %v7910_v16  ;;  %9391 = vrot.lane.b32.xlu0 %v15424_v45, %s13229_s26  ;;  %v13192_v16 = vld [vmem:[%s16796_s1 + $0x1e8] sm:$0xff]  }
 0x8fa   :  { %7849 = vmatprep.mubr.bf16.mxu1 %v13222_v14  ;;  %v8134_v46 = vpop.permute.xlu1 %8133 }
 0x8fb   :  { %v8136_v48 = vpop.permute.xlu0 %8135 }
 0x8fc   :  { %7936 = vmatpush1.bf16.msra.mxu1 %v7909_v27  ;;  %9387 = vrot.lane.b32.xlu1 %v15388_v19, %s13229_s26  ;;  %v8160_v11 = vsel %vm863_vm4, %v8134_v46, %v8136_v48 }
 0x8fd   :  { %7986 = vmatprep.subr.bf16.mxu1 %v7906_v29  ;;  %9403 = vrot.lane.b32.xlu0 %v15409_v7, %s13229_s26 }
 0x8fe   :  { %v8132_v59 = vpop.permute.xlu1 %8131 }
 0x8ff   :  { %12135 = vmatmul.mubr.msk.bf16.gmra.mrb[56].mxu1 %vm169_vm1, %v13188_v39  ;;  %v8148_v8 = vpop.permute.xlu0 %8147  ;;  %v8159_v38 = vsel %vm863_vm4, %v8132_v59, %v8134_v46 }
 0x900   :  { %9405 = vrot.lane.b32.xlu1 %v15440_v40, %s13229_s26  ;;  %7965 = vmatprep.mubr.bf16.mxu1 %v13222_v14 }
 0x901   :  { %9401 = vrot.lane.b32.xlu0 %v15406_v43, %s13229_s26 }
 0x902   :  { %v8150_v17 = vpop.permute.xlu1 %8149 }
 0x903   :  { %v8146_v39 = vpop.permute.xlu0 %8145  ;;  %v8166_v4 = vsel %vm863_vm4, %v8148_v8, %v8150_v17 }
 0x904   :  { %9393 = vrot.lane.b32.xlu1 %v15427_v1, %s13229_s26  ;;  %v8165_v36 = vsel %vm863_vm4, %v8146_v39, %v8148_v8 }
 0x905   :  { %9395 = vrot.lane.b32.xlu0 %v15456_v26, %s13229_s26 }
 0x906   :  { %v8138_v50 = vpop.permute.xlu1 %8137 }
 0x907   :  { %12142 = vmatmul.mubr.msk.bf16.vlgmr.msra.gmra.mrb[36].mxu1 %vm169_vm1, %v13189_v30  ;;  %v8140_v56 = vpop.permute.xlu0 %8139  ;;  %v8161_v18 = vsel %vm863_vm4, %v8136_v48, %v8138_v50 }
 0x908   :  { %7987 = vmatpush1.bf16.msra.mxu1 %v7905_v0  ;;  %9407 = vrot.lane.b32.xlu1 %v15443_v12, %s13229_s26  ;;  %v8162_v44 = vsel %vm863_vm4, %v8138_v50, %v8140_v56 }
 0x909   :  { %7988 = vmatprep.subr.bf16.mxu1 %v7912_v25  ;;  %9409 = vrot.lane.b32.xlu0 %v15472_v2, %s13229_s26 }
 0x90a   :  { %7975 = vmatprep.mubr.bf16.mxu1 %v13222_v14  ;;  %v8152_v58 = vpop.permute.xlu1 %8151 }
 0x90b   :  { %v8154_v61 = vpop.permute.xlu0 %8153  ;;  %v8167_v60 = vsel %vm863_vm4, %v8150_v17, %v8152_v58 }
 0x90c   :  { %7989 = vmatpush1.bf16.msra.mxu1 %v7911_v20  ;;  %9397 = vrot.lane.b32.xlu1 %v15459_v33, %s13229_s26  ;;  %v8168_v21 = vsel %vm863_vm4, %v8152_v58, %v8154_v61  ;;  %v13195_v20 = vld [vmem:[%s16796_s1 + $0x200] sm:$0xff]  }
 0x90d   :  { %8039 = vmatprep.subr.bf16.mxu1 %v7908_v3  ;;  %9399 = vrot.lane.b32.xlu0 %v13222_v14, %s13229_s26 }
 0x90e   :  { %v8142_v41 = vpop.permute.xlu1 %8141 }
 0x90f   :  { %12143 = vmatmul.mubr.msk.bf16.gmra.mrb[40].mxu1 %vm169_vm1, %v13190_v31  ;;  %v8144_v51 = vpop.permute.xlu0 %8143  ;;  %v8163_v29 = vsel %vm863_vm4, %v8140_v56, %v8142_v41 }
 0x910   :  { %9411 = vrot.lane.b32.xlu1 %v15474_v52, %s13229_s26  ;;  %8018 = vmatprep.mubr.bf16.mxu1 %v13222_v14  ;;  %v8164_v23 = vsel %vm863_vm4, %v8142_v41, %v8144_v51 }
 0x911   :  { %9413 = vrot.lane.b32.xlu0 %v13222_v14, %s13229_s26 }
 0x912   :  { %v8156_v53 = vpop.permute.xlu1 %8155 }
 0x913   :  { %v8158_v27 = vpop.permute.xlu0 %8157  ;;  %v8169_v24 = vsel %vm863_vm4, %v8154_v61, %v8156_v53 }
 0x914   :  { %9635 = vperm.xlu1 %13115, %v12220_v28   ;;  %v8170_v9 = vsel %vm863_vm4, %v8156_v53, %v8158_v27 }
 0x915   :  { %9640 = vperm.xlu0 %13114, %v12221_v62   ;;  %v13196_v62 = vld [vmem:[%s16796_s1 + $0x208] sm:$0xff]  }
 0x917   :  { %12144 = vmatmul.mubr.msk.bf16.vlgmr.msra.gmra.mrb[44].mxu1 %vm169_vm1, %v13189_v30 }
 0x918   :  { %8040 = vmatpush1.bf16.msra.mxu1 %v7907_v57  ;;  %9645 = vperm.xlu1 %13115, %v12222_v42  }
 0x919   :  { %8041 = vmatprep.subr.bf16.mxu1 %v7914_v15  ;;  %9650 = vperm.xlu0 %13114, %v12223_v55  }
 0x91a   :  { %8028 = vmatprep.mubr.bf16.mxu1 %v13222_v14 }
 0x91c   :  { %8042 = vmatpush1.bf16.msra.mxu1 %v7913_v54  ;;  %9797 = vrot.lane.b32.xlu1 %v13222_v14, %s13221_s5 }
 0x91d   :  { %8189 = vmatprep.subr.bf16.mxu1 %v8160_v11 }
 0x91f   :  { %12145 = vmatmul.mubr.msk.bf16.gmra.mrb[48].mxu1 %vm169_vm1, %v13190_v31 }
 0x920   :  { %8071 = vmatprep.mubr.bf16.mxu1 %v13222_v14 }
 0x927   :  { %12146 = vmatmul.mubr.msk.bf16.vlgmr.msra.gmra.mrb[52].mxu1 %vm169_vm1, %v13189_v30 }
 0x928   :  { %8190 = vmatpush1.bf16.msra.mxu1 %v8159_v38  ;;  %8081 = vmatprep.mubr.bf16.mxu1 %v13222_v14 }
 0x929   :  { %8191 = vmatprep.subr.bf16.mxu1 %v8166_v4 }
 0x92c   :  { %8192 = vmatpush1.bf16.msra.mxu1 %v8165_v36 }
 0x92d   :  { %8242 = vmatprep.subr.bf16.mxu1 %v8162_v44 }
 0x92f   :  { %12147 = vmatmul.mubr.msk.bf16.gmra.mrb[56].mxu1 %vm169_vm1, %v13190_v31 }
 0x930   :  { %8221 = vmatprep.mubr.bf16.mxu1 %v13222_v14 }
 0x937   :  { %12154 = vmatmul.mubr.msk.bf16.vlgmr.msra.gmra.mrb[36].mxu1 %vm169_vm1, %v13191_v5 }
 0x938   :  { %8243 = vmatpush1.bf16.msra.mxu1 %v8161_v18  ;;  %8231 = vmatprep.mubr.bf16.mxu1 %v13222_v14  ;;  %v13197_v18 = vld [vmem:[%s16796_s1 + $0x210] sm:$0xff]  }
 0x939   :  { %8244 = vmatprep.subr.bf16.mxu1 %v8168_v21 }
 0x93c   :  { %8245 = vmatpush1.bf16.msra.mxu1 %v8167_v60 }
 0x93d   :  { %8295 = vmatprep.subr.bf16.mxu1 %v8164_v23  ;;  %v13198_v23 = vld [vmem:[%s16796_s1 + $0x218] sm:$0xff]  }
 0x93f   :  { %12155 = vmatmul.mubr.msk.bf16.gmra.mrb[40].mxu1 %vm169_vm1, %v13192_v16 }
 0x940   :  { %8274 = vmatprep.mubr.bf16.mxu1 %v13222_v14 }
 0x947   :  { %12156 = vmatmul.mubr.msk.bf16.vlgmr.msra.gmra.mrb[44].mxu1 %vm169_vm1, %v13191_v5 }
 0x948   :  { %8296 = vmatpush1.bf16.msra.mxu1 %v8163_v29  ;;  %8284 = vmatprep.mubr.bf16.mxu1 %v13222_v14 }
 0x949   :  { %8297 = vmatprep.subr.bf16.mxu1 %v8170_v9 }
 0x94c   :  { %8298 = vmatpush1.bf16.msra.mxu1 %v8169_v24 }
 0x94d   :  { %8393 = vmatprep.subr.bf16.mxu1 %v15393_v6  ;;  %v13193_v6 = vld [vmem:[%s16796_s1 + $0x1f0] sm:$0xff]  }
 0x94f   :  { %12157 = vmatmul.mubr.msk.bf16.gmra.mrb[48].mxu1 %vm169_vm1, %v13192_v16 }
 0x950   :  { %8327 = vmatprep.mubr.bf16.mxu1 %v13222_v14 }
 0x957   :  { %12158 = vmatmul.mubr.msk.bf16.vlgmr.msra.gmra.mrb[52].mxu1 %vm169_vm1, %v13191_v5 }
 0x958   :  { %8394 = vmatpush1.bf16.msra.mxu1 %v15388_v19  ;;  %8337 = vmatprep.mubr.bf16.mxu1 %v13222_v14  ;;  %v13194_v19 = vld [vmem:[%s16796_s1 + $0x1f8] sm:$0xff]  }
 0x959   :  { %8395 = vmatprep.subr.bf16.mxu1 %v15409_v7  ;;  %v8624_v7 = vpop.permute.xlu0 %8623 }
 0x95c   :  { %8396 = vmatpush1.bf16.msra.mxu1 %v15406_v43  ;;  %v8622_v43 = vpop.permute.xlu1 %8621 }
 0x95d   :  { %8446 = vmatprep.subr.bf16.mxu1 %v15427_v1 }
 0x95f   :  { %12159 = vmatmul.mubr.msk.bf16.gmra.mrb[56].mxu1 %vm169_vm1, %v13192_v16 }
 0x960   :  { %8425 = vmatprep.mubr.bf16.mxu1 %v13222_v14  ;;  %v8620_v1 = vpop.permute.xlu1 %8619 }
 0x961   :  { %v8647_v30 = vsel %vm1470_vm5, %v8620_v1, %v8622_v43 }
 0x967   :  { %12166 = vmatmul.mubr.msk.bf16.vlgmr.msra.gmra.mrb[36].mxu1 %vm169_vm1, %v13193_v6 }
 0x968   :  { %8447 = vmatpush1.bf16.msra.mxu1 %v15424_v45  ;;  %8435 = vmatprep.mubr.bf16.mxu1 %v13222_v14  ;;  %v8648_v45 = vsel %vm1470_vm5, %v8622_v43, %v8624_v7 }
 0x969   :  { %8448 = vmatprep.subr.bf16.mxu1 %v15443_v12  ;;  %v8638_v12 = vpop.permute.xlu1 %8637 }
 0x96c   :  { %8449 = vmatpush1.bf16.msra.mxu1 %v15440_v40  ;;  %v8636_v40 = vpop.permute.xlu0 %8635 }
 0x96d   :  { %8499 = vmatprep.subr.bf16.mxu1 %v15459_v33 }
 0x96f   :  { %12167 = vmatmul.mubr.msk.bf16.gmra.mrb[40].mxu1 %vm169_vm1, %v13194_v19 }
 0x970   :  { %8478 = vmatprep.mubr.bf16.mxu1 %v13222_v14  ;;  %v8634_v33 = vpop.permute.xlu0 %8633 }
 0x971   :  { %v8653_v0 = vsel %vm1470_vm5, %v8634_v33, %v8636_v40 }
 0x977   :  { %12168 = vmatmul.mubr.msk.bf16.vlgmr.msra.gmra.mrb[44].mxu1 %vm169_vm1, %v13193_v6 }
 0x978   :  { %8500 = vmatpush1.bf16.msra.mxu1 %v15456_v26  ;;  %8488 = vmatprep.mubr.bf16.mxu1 %v13222_v14  ;;  %v8654_v26 = vsel %vm1470_vm5, %v8636_v40, %v8638_v12 }
 0x979   :  { %8501 = vmatprep.subr.bf16.mxu1 %v15474_v52  ;;  %v8628_v52 = vpop.permute.xlu0 %8627 }
 0x97c   :  { %8502 = vmatpush1.bf16.msra.mxu1 %v15472_v2  ;;  %v8626_v2 = vpop.permute.xlu1 %8625 }
 0x97d   :  { %8677 = vmatprep.subr.bf16.mxu1 %v8648_v45  ;;  %v8650_v25 = vsel %vm1470_vm5, %v8626_v2, %v8628_v52  ;;  %v8642_v47 = vpop.permute.xlu0 %8641  ;;  %v8649_v31 = vsel %vm1470_vm5, %v8624_v7, %v8626_v2 }
 0x97f   :  { %12169 = vmatmul.mubr.msk.bf16.gmra.mrb[48].mxu1 %vm169_vm1, %v13194_v19 }
 0x980   :  { %8531 = vmatprep.mubr.bf16.mxu1 %v13222_v14  ;;  %v8640_v34 = vpop.permute.xlu1 %8639 }
 0x981   :  { %v8656_v3 = vsel %vm1470_vm5, %v8640_v34, %v8642_v47  ;;  %v8632_v37 = vpop.permute.xlu0 %8631  ;;  %v8655_v28 = vsel %vm1470_vm5, %v8638_v12, %v8640_v34 }
 0x984   :  { %v8630_v32 = vpop.permute.xlu1 %8629 }
 0x985   :  { %v8652_v42 = vsel %vm1470_vm5, %v8630_v32, %v8632_v37  ;;  %v8646_v46 = vpop.permute.xlu0 %8645  ;;  %v8651_v15 = vsel %vm1470_vm5, %v8628_v52, %v8630_v32 }
 0x987   :  { %12170 = vmatmul.mubr.msk.bf16.vlgmr.msra.gmra.mrb[52].mxu1 %vm169_vm1, %v13193_v6 }
 0x988   :  { %8678 = vmatpush1.bf16.msra.mxu1 %v8647_v30  ;;  %8541 = vmatprep.mubr.bf16.mxu1 %v13222_v14  ;;  %v8644_v55 = vpop.permute.xlu1 %8643 }
 0x989   :  { %8679 = vmatprep.subr.bf16.mxu1 %v8654_v26  ;;  %v8880_v57 = vpop.permute.xlu0 %8879  ;;  %v8658_v54 = vsel %vm1470_vm5, %v8644_v55, %v8646_v46  ;;  %v8657_v11 = vsel %vm1470_vm5, %v8642_v47, %v8644_v55  ;;  %v13199_v47 = vld [vmem:[%s16796_s1 + $0x220] sm:$0xff]  }
 0x98c   :  { %8680 = vmatpush1.bf16.msra.mxu1 %v8653_v0  ;;  %v8878_v48 = vpop.permute.xlu1 %8877 }
 0x98d   :  { %8730 = vmatprep.subr.bf16.mxu1 %v8650_v25  ;;  %v8904_v59 = vsel %vm1727_vm6, %v8878_v48, %v8880_v57  ;;  %v8892_v17 = vpop.permute.xlu0 %8891 }
 0x98f   :  { %12171 = vmatmul.mubr.msk.bf16.gmra.mrb[56].mxu1 %vm169_vm1, %v13194_v19 }
 0x990   :  { %8709 = vmatprep.mubr.bf16.mxu1 %v13222_v14  ;;  %v8876_v8 = vpop.permute.xlu1 %8875 }
 0x991   :  { %v8890_v38 = vpop.permute.xlu0 %8889  ;;  %v8903_v4 = vsel %vm1727_vm6, %v8876_v8, %v8878_v48 }
 0x992   :  { %v8909_v44 = vsel %vm1727_vm6, %v8890_v38, %v8892_v17 }
 0x994   :  { %v8894_v39 = vpop.permute.xlu1 %8893 }
 0x995   :  { %v8910_v50 = vsel %vm1727_vm6, %v8892_v17, %v8894_v39  ;;  %v8884_v36 = vpop.permute.xlu0 %8883 }
 0x997   :  { %12178 = vmatmul.mubr.msk.bf16.vlgmr.msra.gmra.mrb[36].mxu1 %vm169_vm1, %v13195_v20 }
 0x998   :  { %8731 = vmatpush1.bf16.msra.mxu1 %v8649_v31  ;;  %8719 = vmatprep.mubr.bf16.mxu1 %v13222_v14  ;;  %v8882_v56 = vpop.permute.xlu1 %8881 }
 0x999   :  { %8732 = vmatprep.subr.bf16.mxu1 %v8656_v3  ;;  %v8906_v58 = vsel %vm1727_vm6, %v8882_v56, %v8884_v36  ;;  %v8898_v5 = vpop.permute.xlu0 %8897  ;;  %v8905_v21 = vsel %vm1727_vm6, %v8880_v57, %v8882_v56 }
 0x99c   :  { %8733 = vmatpush1.bf16.msra.mxu1 %v8655_v28  ;;  %v8896_v61 = vpop.permute.xlu1 %8895  ;;  %v13200_v28 = vld [vmem:[%s16796_s1 + $0x228] sm:$0xff]  }
 0x99d   :  { %8783 = vmatprep.subr.bf16.mxu1 %v8652_v42  ;;  %v8912_v41 = vsel %vm1727_vm6, %v8896_v61, %v8898_v5  ;;  %v8888_v60 = vpop.permute.xlu0 %8887  ;;  %v8911_v16 = vsel %vm1727_vm6, %v8894_v39, %v8896_v61 }
 0x99f   :  { %12179 = vmatmul.mubr.msk.bf16.gmra.mrb[40].mxu1 %vm169_vm1, %v13196_v62 }
 0x9a0   :  { %8762 = vmatprep.mubr.bf16.mxu1 %v13222_v14  ;;  %v8886_v51 = vpop.permute.xlu1 %8885 }
 0x9a1   :  { %v8908_v53 = vsel %vm1727_vm6, %v8886_v51, %v8888_v60  ;;  %v8902_v29 = vpop.permute.xlu0 %8901  ;;  %v8907_v6 = vsel %vm1727_vm6, %v8884_v36, %v8886_v51 }
 0x9a4   :  { %v8900_v27 = vpop.permute.xlu1 %8899 }
 0x9a5   :  { %v9136_v24 = vpop.permute.xlu0 %9135  ;;  %v8914_v19 = vsel %vm1727_vm6, %v8900_v27, %v8902_v29  ;;  %v8913_v43 = vsel %vm1727_vm6, %v8898_v5, %v8900_v27  ;;  %v13201_v5 = vld [vmem:[%s16796_s1 + $0x230] sm:$0xff]  }
 0x9a7   :  { %12180 = vmatmul.mubr.msk.bf16.vlgmr.msra.gmra.mrb[44].mxu1 %vm169_vm1, %v13195_v20 }
 0x9a8   :  { %8784 = vmatpush1.bf16.msra.mxu1 %v8651_v15  ;;  %8772 = vmatprep.mubr.bf16.mxu1 %v13222_v14  ;;  %v9134_v9 = vpop.permute.xlu1 %9133 }
 0x9a9   :  { %8785 = vmatprep.subr.bf16.mxu1 %v8658_v54  ;;  %v9160_v7 = vsel %vm1984_vm7, %v9134_v9, %v9136_v24  ;;  %v9148_v1 = vpop.permute.xlu0 %9147 }
 0x9ac   :  { %8786 = vmatpush1.bf16.msra.mxu1 %v8657_v11  ;;  %v9132_v45 = vpop.permute.xlu1 %9131 }
 0x9ad   :  { %8933 = vmatprep.subr.bf16.mxu1 %v8904_v59  ;;  %v9146_v12 = vpop.permute.xlu0 %9145  ;;  %v9159_v33 = vsel %vm1984_vm7, %v9132_v45, %v9134_v9 }
 0x9ae   :  { %v9165_v52 = vsel %vm1984_vm7, %v9146_v12, %v9148_v1 }
 0x9af   :  { %12181 = vmatmul.mubr.msk.bf16.gmra.mrb[48].mxu1 %vm169_vm1, %v13196_v62 }
 0x9b0   :  { %8815 = vmatprep.mubr.bf16.mxu1 %v13222_v14  ;;  %v9150_v40 = vpop.permute.xlu1 %9149 }
 0x9b1   :  { %v9166_v30 = vsel %vm1984_vm7, %v9148_v1, %v9150_v40  ;;  %v9140_v2 = vpop.permute.xlu0 %9139 }
 0x9b4   :  { %v9138_v26 = vpop.permute.xlu1 %9137 }
 0x9b5   :  { %v9162_v0 = vsel %vm1984_vm7, %v9138_v26, %v9140_v2  ;;  %v9154_v34 = vpop.permute.xlu0 %9153 }
 0x9b7   :  { %12182 = vmatmul.mubr.msk.bf16.vlgmr.msra.gmra.mrb[52].mxu1 %vm169_vm1, %v13195_v20  ;;  %v9161_v20 = vsel %vm1984_vm7, %v9136_v24, %v9138_v26 }
 0x9b8   :  { %8934 = vmatpush1.bf16.msra.mxu1 %v8903_v4  ;;  %8825 = vmatprep.mubr.bf16.mxu1 %v13222_v14  ;;  %v9152_v25 = vpop.permute.xlu1 %9151 }
 0x9b9   :  { %8935 = vmatprep.subr.bf16.mxu1 %v8910_v50  ;;  %v9168_v31 = vsel %vm1984_vm7, %v9152_v25, %v9154_v34  ;;  %v9144_v32 = vpop.permute.xlu0 %9143  ;;  %v9167_v37 = vsel %vm1984_vm7, %v9150_v40, %v9152_v25 }
 0x9bc   :  { %8936 = vmatpush1.bf16.msra.mxu1 %v8909_v44  ;;  %v9142_v3 = vpop.permute.xlu1 %9141 }
 0x9bd   :  { %8986 = vmatprep.subr.bf16.mxu1 %v8906_v58  ;;  %v9158_v55 = vpop.permute.xlu0 %9157  ;;  %v9163_v57 = vsel %vm1984_vm7, %v9140_v2, %v9142_v3 }
 0x9bf   :  { %12183 = vmatmul.mubr.msk.bf16.gmra.mrb[56].mxu1 %vm169_vm1, %v13196_v62  ;;  %v9164_v62 = vsel %vm1984_vm7, %v9142_v3, %v9144_v32 }
 0x9c0   :  { %8965 = vmatprep.mubr.bf16.mxu1 %v13222_v14  ;;  %v9156_v42 = vpop.permute.xlu1 %9155 }
 0x9c1   :  { %v9392_v48 = vpop.permute.xlu0 %9391  ;;  %v9170_v15 = vsel %vm1984_vm7, %v9156_v42, %v9158_v55  ;;  %v9169_v54 = vsel %vm1984_vm7, %v9154_v34, %v9156_v42 }
 0x9c4   :  { %v9390_v46 = vpop.permute.xlu1 %9389 }
 0x9c5   :  { %v9416_v11 = vsel %vm2241_vm8, %v9390_v46, %v9392_v48  ;;  %v9404_v8 = vpop.permute.xlu0 %9403 }
 0x9c7   :  { %12190 = vmatmul.mubr.msk.bf16.vlgmr.msra.gmra.mrb[36].mxu1 %vm169_vm1, %v13197_v18 }
 0x9c8   :  { %8987 = vmatpush1.bf16.msra.mxu1 %v8905_v21  ;;  %8975 = vmatprep.mubr.bf16.mxu1 %v13222_v14  ;;  %v9388_v59 = vpop.permute.xlu1 %9387 }
 0x9c9   :  { %8988 = vmatprep.subr.bf16.mxu1 %v8912_v41  ;;  %v9402_v39 = vpop.permute.xlu0 %9401  ;;  %v9415_v38 = vsel %vm2241_vm8, %v9388_v59, %v9390_v46 }
 0x9ca   :  { %v9421_v36 = vsel %vm2241_vm8, %v9402_v39, %v9404_v8 }
 0x9cc   :  { %8989 = vmatpush1.bf16.msra.mxu1 %v8911_v16  ;;  %v9406_v17 = vpop.permute.xlu1 %9405  ;;  %v13202_v16 = vld [vmem:[%s16796_s1 + $0x238] sm:$0xff]  }
 0x9cd   :  { %9039 = vmatprep.subr.bf16.mxu1 %v8908_v53  ;;  %v9422_v4 = vsel %vm2241_vm8, %v9404_v8, %v9406_v17  ;;  %v9396_v56 = vpop.permute.xlu0 %9395 }
 0x9cf   :  { %12191 = vmatmul.mubr.msk.bf16.gmra.mrb[40].mxu1 %vm169_vm1, %v13198_v23 }
 0x9d0   :  { %9018 = vmatprep.mubr.bf16.mxu1 %v13222_v14  ;;  %v9394_v50 = vpop.permute.xlu1 %9393 }
 0x9d1   :  { %v9418_v44 = vsel %vm2241_vm8, %v9394_v50, %v9396_v56  ;;  %v9410_v61 = vpop.permute.xlu0 %9409 }
 0x9d4   :  { %v9408_v58 = vpop.permute.xlu1 %9407 }
 0x9d5   :  { %v9424_v21 = vsel %vm2241_vm8, %v9408_v58, %v9410_v61  ;;  %v9400_v51 = vpop.permute.xlu0 %9399  ;;  %v9423_v60 = vsel %vm2241_vm8, %v9406_v17, %v9408_v58 }
 0x9d7   :  { %12192 = vmatmul.mubr.msk.bf16.vlgmr.msra.gmra.mrb[44].mxu1 %vm169_vm1, %v13197_v18 }
 0x9d8   :  { %9040 = vmatpush1.bf16.msra.mxu1 %v8907_v6  ;;  %9028 = vmatprep.mubr.bf16.mxu1 %v13222_v14  ;;  %v9398_v41 = vpop.permute.xlu1 %9397 }
 0x9d9   :  { %9041 = vmatprep.subr.bf16.mxu1 %v8914_v19  ;;  %v9414_v27 = vpop.permute.xlu0 %9413  ;;  %v9419_v29 = vsel %vm2241_vm8, %v9396_v56, %v9398_v41 }
 0x9dc   :  { %9042 = vmatpush1.bf16.msra.mxu1 %v8913_v43  ;;  %v9412_v53 = vpop.permute.xlu1 %9411 }
 0x9dd   :  { %9189 = vmatprep.subr.bf16.mxu1 %v9160_v7  ;;  %v9426_v9 = vsel %vm2241_vm8, %v9412_v53, %v9414_v27  ;;  %v9425_v24 = vsel %vm2241_vm8, %v9410_v61, %v9412_v53  ;;  %v15963_v45 = vpop.permute.xlu0 %9640 }
 0x9df   :  { %12193 = vmatmul.mubr.msk.bf16.gmra.mrb[48].mxu1 %vm169_vm1, %v13198_v23 }
 0x9e0   :  { %9071 = vmatprep.mubr.bf16.mxu1 %v13222_v14  ;;  %v15960_v6 = vpop.permute.xlu1 %9635 }
 0x9e7   :  { %12194 = vmatmul.mubr.msk.bf16.vlgmr.msra.gmra.mrb[52].mxu1 %vm169_vm1, %v13197_v18  ;;  %v9417_v18 = vsel %vm2241_vm8, %v9392_v48, %v9394_v50 }
 0x9e8   :  { %9190 = vmatpush1.bf16.msra.mxu1 %v9159_v33  ;;  %9081 = vmatprep.mubr.bf16.mxu1 %v13222_v14 }
 0x9e9   :  { %9191 = vmatprep.subr.bf16.mxu1 %v9166_v30 }
 0x9ec   :  { %9192 = vmatpush1.bf16.msra.mxu1 %v9165_v52 }
 0x9ed   :  { %9242 = vmatprep.subr.bf16.mxu1 %v9162_v0 }
 0x9ef   :  { %12195 = vmatmul.mubr.msk.bf16.gmra.mrb[56].mxu1 %vm169_vm1, %v13198_v23  ;;  %v9420_v23 = vsel %vm2241_vm8, %v9398_v41, %v9400_v51 }
 0x9f0   :  { %9221 = vmatprep.mubr.bf16.mxu1 %v13222_v14 }
 0x9f7   :  { %12202 = vmatmul.mubr.msk.bf16.vlgmr.msra.gmra.mrb[36].mxu1 %vm169_vm1, %v13199_v47 }
 0x9f8   :  { %9243 = vmatpush1.bf16.msra.mxu1 %v9161_v20  ;;  %9231 = vmatprep.mubr.bf16.mxu1 %v13222_v14 }
 0x9f9   :  { %9244 = vmatprep.subr.bf16.mxu1 %v9168_v31 }
 0x9fc   :  { %9245 = vmatpush1.bf16.msra.mxu1 %v9167_v37 }
 0x9fd   :  { %9295 = vmatprep.subr.bf16.mxu1 %v9164_v62  ;;  %v15977_v62 = vpop.permute.xlu0 %9650 }
 0x9ff   :  { %12203 = vmatmul.mubr.msk.bf16.gmra.mrb[40].mxu1 %vm169_vm1, %v13200_v28 }
 0xa00   :  { %9274 = vmatprep.mubr.bf16.mxu1 %v13222_v14 }
 0xa07   :  { %12204 = vmatmul.mubr.msk.bf16.vlgmr.msra.gmra.mrb[44].mxu1 %vm169_vm1, %v13199_v47 }
 0xa08   :  { %9296 = vmatpush1.bf16.msra.mxu1 %v9163_v57  ;;  %9284 = vmatprep.mubr.bf16.mxu1 %v13222_v14 }
 0xa09   :  { %9297 = vmatprep.subr.bf16.mxu1 %v9170_v15 }
 0xa0c   :  { %9298 = vmatpush1.bf16.msra.mxu1 %v9169_v54 }
 0xa0d   :  { %9445 = vmatprep.subr.bf16.mxu1 %v9416_v11 }
 0xa0f   :  { %12205 = vmatmul.mubr.msk.bf16.gmra.mrb[48].mxu1 %vm169_vm1, %v13200_v28 }
 0xa10   :  { %9327 = vmatprep.mubr.bf16.mxu1 %v13222_v14 }
 0xa17   :  { %12206 = vmatmul.mubr.msk.bf16.vlgmr.msra.gmra.mrb[52].mxu1 %vm169_vm1, %v13199_v47  ;;  %v15970_v47 = vpop.permute.xlu1 %9645 }
 0xa18   :  { %9446 = vmatpush1.bf16.msra.mxu1 %v9415_v38  ;;  %9337 = vmatprep.mubr.bf16.mxu1 %v13222_v14 }
 0xa19   :  { %9447 = vmatprep.subr.bf16.mxu1 %v9422_v4 }
 0xa1c   :  { %9448 = vmatpush1.bf16.msra.mxu1 %v9421_v36 }
 0xa1d   :  { %9498 = vmatprep.subr.bf16.mxu1 %v9418_v44 }
 0xa1f   :  { %12207 = vmatmul.mubr.msk.bf16.gmra.mrb[56].mxu1 %vm169_vm1, %v13200_v28 }
 0xa20   :  { %9477 = vmatprep.mubr.bf16.mxu1 %v13222_v14 }
 0xa27   :  { %12214 = vmatmul.mubr.msk.bf16.vlgmr.msra.gmra.mrb[36].mxu1 %vm169_vm1, %v13201_v5 }
 0xa28   :  { %9499 = vmatpush1.bf16.msra.mxu1 %v9417_v18  ;;  %9487 = vmatprep.mubr.bf16.mxu1 %v13222_v14 }
 0xa29   :  { %9500 = vmatprep.subr.bf16.mxu1 %v9424_v21 }
 0xa2c   :  { %9501 = vmatpush1.bf16.msra.mxu1 %v9423_v60 }
 0xa2d   :  { %9551 = vmatprep.subr.bf16.mxu1 %v9420_v23 }
 0xa2f   :  { %12215 = vmatmul.mubr.msk.bf16.gmra.mrb[40].mxu1 %vm169_vm1, %v13202_v16 }
 0xa30   :  { %9530 = vmatprep.mubr.bf16.mxu1 %v13222_v14 }
 0xa37   :  { %12216 = vmatmul.mubr.msk.bf16.vlgmr.msra.gmra.mrb[44].mxu1 %vm169_vm1, %v13201_v5 }
 0xa38   :  { %9552 = vmatpush1.bf16.msra.mxu1 %v9419_v29  ;;  %9540 = vmatprep.mubr.bf16.mxu1 %v13222_v14 }
 0xa39   :  { %9553 = vmatprep.subr.bf16.mxu1 %v9426_v9 }
 0xa3c   :  { %9554 = vmatpush1.bf16.msra.mxu1 %v9425_v24 }
 0xa3f   :  { %12217 = vmatmul.mubr.msk.bf16.gmra.mrb[48].mxu1 %vm169_vm1, %v13202_v16 }
 0xa40   :  { %9583 = vmatprep.mubr.bf16.mxu1 %v13222_v14 }
 0xa47   :  { %12218 = vmatmul.mubr.msk.bf16.vlgmr.msra.gmra.mrb[52].mxu1 %vm169_vm1, %v13201_v5 }
 0xa48   :  { %9593 = vmatprep.mubr.bf16.mxu1 %v13222_v14 }
 0xa4f   :  { %12219 = vmatmul.mubr.msk.bf16.gmra.mrb[56].mxu1 %vm169_vm1, %v13202_v16 }
 0xa50   :  { %11213 = vmatprep.mubr.bf16.mxu1 %v13222_v14 }
 0xafa   :  { %v9479_v19 = vpop.f32.mrb[36].mxu1 }
 0xafb   :  { %v9653_v43 = vadd.f32 %v15960_v6, %v9479_v19  ;;  %v9481_v7 = vpop.f32.mrb[37].mxu1 }
 0xafc   :  { %v9654_v1 = vadd.f32 %v15960_v6, %v9481_v7  ;;  %v9483_v40 = vpop.f32.mrb[38].mxu1 }
 0xafd   :  { %v9677_v12 = vmax.f32 %v9653_v43, 0.0  ;;  %v9659_v33 = vadd.f32 %v15963_v45, %v9483_v40  ;;  %v9485_v30 = vpop.f32.mrb[39].mxu1 }
 0xafe   :  { %v9678_v26 = vmax.f32 %v9654_v1, 0.0  ;;  %v9660_v2 = vadd.f32 %v15963_v45, %v9485_v30 }
 0xaff   :  { %v9683_v52 = vmax.f32 %v9659_v33, 0.0  ;;  %v9701_v25 = vmul.f32 %v9677_v12, %v14219_v22 }
 0xb00   :  { %v9684_v0 = vmax.f32 %v9660_v2, 0.0  ;;  %v9702_v20 = vmul.f32 %v9678_v26, %v14223_v10 }
 0xb01   :  { %v9707_v34 = vmul.f32 %v9683_v52, %v14219_v22 }
 0xb02   :  { %v9708_v31 = vmul.f32 %v9684_v0, %v14223_v10  ;;  %v9489_v3 = vpop.f32.mrb[40].mxu1 }
 0xb03   :  { %v15974_v32 = vpack.c.bf16 %v9707_v34, %v9701_v25  ;;  %v9665_v37 = vadd.f32 %v15970_v47, %v9489_v3  ;;  %v9491_v28 = vpop.f32.mrb[41].mxu1 }
 0xb04   :  { %v15979_v42 = vpack.c.bf16 %v9708_v31, %v9702_v20  ;;  %v9666_v55 = vadd.f32 %v15970_v47, %v9491_v28  ;;  %v9493_v46 = vpop.f32.mrb[42].mxu1 }
 0xb05   :  { %v9689_v48 = vmax.f32 %v9665_v37, 0.0  ;;  %v9671_v57 = vadd.f32 %v15977_v62, %v9493_v46  ;;  %v9495_v15 = vpop.f32.mrb[43].mxu1  ;;  %9799 = vrot.lane.b32.xlu1 %v15974_v32, %s13221_s5 }
 0xb06   :  { %v9690_v54 = vmax.f32 %v9666_v55, 0.0  ;;  %v9672_v11 = vadd.f32 %v15977_v62, %v9495_v15  ;;  %9801 = vrot.lane.b32.xlu0 %v15979_v42, %s13221_s5 }
 0xb07   :  { %v9695_v59 = vmax.f32 %v9671_v57, 0.0  ;;  %v9713_v17 = vmul.f32 %v9689_v48, %v14219_v22 }
 0xb08   :  { %v9696_v8 = vmax.f32 %v9672_v11, 0.0  ;;  %v9714_v38 = vmul.f32 %v9690_v54, %v14223_v10 }
 0xb09   :  { %v9719_v39 = vmul.f32 %v9695_v59, %v14219_v22 }
 0xb0a   :  { %v9720_v4 = vmul.f32 %v9696_v8, %v14223_v10  ;;  %v9532_v50 = vpop.f32.mrb[44].mxu1 }
 0xb0b   :  { %v15992_v56 = vpack.c.bf16 %v9719_v39, %v9713_v17  ;;  %v9655_v36 = vadd.f32 %v15960_v6, %v9532_v50  ;;  %v9534_v44 = vpop.f32.mrb[45].mxu1 }
 0xb0c   :  { %v15995_v58 = vpack.c.bf16 %v9720_v4, %v9714_v38  ;;  %v9656_v61 = vadd.f32 %v15960_v6, %v9534_v44  ;;  %v9536_v5 = vpop.f32.mrb[46].mxu1 }
 0xb0d   :  { %v9679_v18 = vmax.f32 %v9655_v36, 0.0  ;;  %v9661_v21 = vadd.f32 %v15963_v45, %v9536_v5  ;;  %v9538_v41 = vpop.f32.mrb[47].mxu1  ;;  %9813 = vrot.lane.b32.xlu0 %v15992_v56, %s13221_s5 }
 0xb0e   :  { %v9680_v22 = vmax.f32 %v9656_v61, 0.0  ;;  %v9662_v10 = vadd.f32 %v15963_v45, %v9538_v41  ;;  %9815 = vrot.lane.b32.xlu1 %v15995_v58, %s13221_s5 }
 0xb0f   :  { %v9685_v51 = vmax.f32 %v9661_v21, 0.0  ;;  %v9703_v16 = vmul.f32 %v9679_v18, %v14183_v49 }
 0xb10   :  { %v9686_v60 = vmax.f32 %v9662_v10, 0.0  ;;  %v9704_v53 = vmul.f32 %v9680_v22, %v14187_v13 }
 0xb11   :  { %v9709_v23 = vmul.f32 %v9685_v51, %v14183_v49  ;;  %9811 = vrot.lane.b32.xlu0 %v13222_v14, %s13221_s5 }
 0xb12   :  { %v9710_v27 = vmul.f32 %v9686_v60, %v14187_v13  ;;  %v9542_v29 = vpop.f32.mrb[48].mxu1 }
 0xb13   :  { %v16010_v9 = vpack.c.bf16 %v9709_v23, %v9703_v16  ;;  %v9667_v24 = vadd.f32 %v15970_v47, %v9542_v29  ;;  %v9544_v19 = vpop.f32.mrb[49].mxu1 }
 0xb14   :  { %v16013_v43 = vpack.c.bf16 %v9710_v27, %v9704_v53  ;;  %v9668_v7 = vadd.f32 %v15970_v47, %v9544_v19  ;;  %v9546_v1 = vpop.f32.mrb[50].mxu1 }
 0xb15   :  { %v9691_v40 = vmax.f32 %v9667_v24, 0.0  ;;  %v9673_v12 = vadd.f32 %v15977_v62, %v9546_v1  ;;  %v9548_v33 = vpop.f32.mrb[51].mxu1  ;;  %9803 = vrot.lane.b32.xlu1 %v16010_v9, %s13221_s5 }
 0xb16   :  { %v9692_v30 = vmax.f32 %v9668_v7, 0.0  ;;  %v9674_v26 = vadd.f32 %v15977_v62, %v9548_v33  ;;  %9805 = vrot.lane.b32.xlu0 %v16013_v43, %s13221_s5  ;;  %v13203_v33 = vld [vmem:[%s16796_s1 + $0x250] sm:$0xff]  }
 0xb17   :  { %v9697_v2 = vmax.f32 %v9673_v12, 0.0  ;;  %v9715_v0 = vmul.f32 %v9691_v40, %v14183_v49 }
 0xb18   :  { %v9698_v52 = vmax.f32 %v9674_v26, 0.0  ;;  %v9716_v34 = vmul.f32 %v9692_v30, %v14187_v13 }
 0xb19   :  { %v9721_v25 = vmul.f32 %v9697_v2, %v14183_v49 }
 0xb1a   :  { %v9722_v20 = vmul.f32 %v9698_v52, %v14187_v13  ;;  %v9585_v31 = vpop.f32.mrb[52].mxu1 }
 0xb1b   :  { %v16026_v3 = vpack.c.bf16 %v9721_v25, %v9715_v0  ;;  %v9657_v37 = vadd.f32 %v15960_v6, %v9585_v31  ;;  %v9587_v28 = vpop.f32.mrb[53].mxu1  ;;  %v13204_v0 = vld [vmem:[%s16796_s1 + $0x258] sm:$0xff]  }
 0xb1c   :  { %v16029_v55 = vpack.c.bf16 %v9722_v20, %v9716_v34  ;;  %v9658_v46 = vadd.f32 %v15960_v6, %v9587_v28  ;;  %v9589_v48 = vpop.f32.mrb[54].mxu1 }
 0xb1d   :  { %v9681_v57 = vmax.f32 %v9657_v37, 0.0  ;;  %v9663_v15 = vadd.f32 %v15963_v45, %v9589_v48  ;;  %v9591_v54 = vpop.f32.mrb[55].mxu1  ;;  %9817 = vrot.lane.b32.xlu1 %v16026_v3, %s13221_s5 }
 0xb1e   :  { %v9682_v49 = vmax.f32 %v9658_v46, 0.0  ;;  %v9664_v13 = vadd.f32 %v15963_v45, %v9591_v54  ;;  %9819 = vrot.lane.b32.xlu0 %v16029_v55, %s13221_s5 }
 0xb1f   :  { %v9687_v11 = vmax.f32 %v9663_v15, 0.0  ;;  %v9705_v8 = vmul.f32 %v9681_v57, %v14257_v63 }
 0xb20   :  { %v9688_v59 = vmax.f32 %v9664_v13, 0.0  ;;  %v9706_v17 = vmul.f32 %v9682_v49, %v14263_v35 }
 0xb21   :  { %v9711_v6 = vmul.f32 %v9687_v11, %v14257_v63 }
 0xb22   :  { %v9712_v39 = vmul.f32 %v9688_v59, %v14263_v35  ;;  %v9595_v38 = vpop.f32.mrb[56].mxu1 }
 0xb23   :  { %v16042_v4 = vpack.c.bf16 %v9711_v6, %v9705_v8  ;;  %v9669_v50 = vadd.f32 %v15970_v47, %v9595_v38  ;;  %v9597_v36 = vpop.f32.mrb[57].mxu1 }
 0xb24   :  { %v16045_v45 = vpack.c.bf16 %v9712_v39, %v9706_v17  ;;  %v9670_v44 = vadd.f32 %v15970_v47, %v9597_v36  ;;  %v9599_v61 = vpop.f32.mrb[58].mxu1 }
 0xb25   :  { %v9693_v5 = vmax.f32 %v9669_v50, 0.0  ;;  %v9675_v18 = vadd.f32 %v15977_v62, %v9599_v61  ;;  %v9601_v21 = vpop.f32.mrb[59].mxu1  ;;  %9807 = vrot.lane.b32.xlu1 %v16042_v4, %s13221_s5 }
 0xb26   :  { %v9694_v41 = vmax.f32 %v9670_v44, 0.0  ;;  %v9676_v22 = vadd.f32 %v15977_v62, %v9601_v21  ;;  %9809 = vrot.lane.b32.xlu0 %v16045_v45, %s13221_s5 }
 0xb27   :  { %v9699_v10 = vmax.f32 %v9675_v18, 0.0  ;;  %v9717_v60 = vmul.f32 %v9693_v5, %v14257_v63 }
 0xb28   :  { %v9700_v51 = vmax.f32 %v9676_v22, 0.0  ;;  %v9718_v16 = vmul.f32 %v9694_v41, %v14263_v35  ;;  %v16236_v41 = vld [vmem:[%s16796_s1 + $0x240] sm:$0xff]  }
 0xb29   :  { %v9723_v47 = vmul.f32 %v9699_v10, %v14257_v63  ;;  %v9798_v63 = vpop.permute.xlu1 %9797 }
 0xb2a   :  { %v9724_v23 = vmul.f32 %v9700_v51, %v14263_v35 }
 0xb2b   :  { %v16058_v53 = vpack.c.bf16 %v9723_v47, %v9717_v60 }
 0xb2c   :  { %v16060_v27 = vpack.c.bf16 %v9724_v23, %v9718_v16 }
 0xb2d   :  { %9821 = vrot.lane.b32.xlu1 %v16058_v53, %s13221_s5 }
 0xb2e   :  { %9823 = vrot.lane.b32.xlu0 %v16060_v27, %s13221_s5 }
 0xb31   :  { %10008 = vrot.lane.b32.xlu1 %v15974_v32, %s13223_s22 }
 0xb32   :  { %10010 = vrot.lane.b32.xlu0 %v15979_v42, %s13223_s22 }
 0xb35   :  { %10006 = vrot.lane.b32.xlu1 %v13222_v14, %s13223_s22 }
 0xb36   :  { %10022 = vrot.lane.b32.xlu0 %v15992_v56, %s13223_s22 }
 0xb39   :  { %10024 = vrot.lane.b32.xlu1 %v15995_v58, %s13223_s22 }
 0xb3a   :  { %10020 = vrot.lane.b32.xlu0 %v13222_v14, %s13223_s22 }
 0xb3d   :  { %10012 = vrot.lane.b32.xlu1 %v16010_v9, %s13223_s22 }
 0xb3e   :  { %10014 = vrot.lane.b32.xlu0 %v16013_v43, %s13223_s22 }
 0xb41   :  { %10026 = vrot.lane.b32.xlu1 %v16026_v3, %s13223_s22 }
 0xb42   :  { %10028 = vrot.lane.b32.xlu0 %v16029_v55, %s13223_s22 }
 0xb45   :  { %10016 = vrot.lane.b32.xlu1 %v16042_v4, %s13223_s22 }
 0xb46   :  { %10018 = vrot.lane.b32.xlu0 %v16045_v45, %s13223_s22 }
 0xb49   :  { %10030 = vrot.lane.b32.xlu1 %v16058_v53, %s13223_s22 }
 0xb4a   :  { %10032 = vrot.lane.b32.xlu0 %v16060_v27, %s13223_s22 }
 0xb4d   :  { %10222 = vrot.lane.b32.xlu1 %v15974_v32, %s13224_s6 }
 0xb4e   :  { %10224 = vrot.lane.b32.xlu0 %v15979_v42, %s13224_s6 }
 0xb51   :  { %10220 = vrot.lane.b32.xlu1 %v13222_v14, %s13224_s6 }
 0xb52   :  { %10236 = vrot.lane.b32.xlu0 %v15992_v56, %s13224_s6 }
 0xb55   :  { %10238 = vrot.lane.b32.xlu1 %v15995_v58, %s13224_s6 }
 0xb56   :  { %10234 = vrot.lane.b32.xlu0 %v13222_v14, %s13224_s6 }
 0xb59   :  { %10226 = vrot.lane.b32.xlu1 %v16010_v9, %s13224_s6 }
 0xb5a   :  { %10228 = vrot.lane.b32.xlu0 %v16013_v43, %s13224_s6 }
 0xb5d   :  { %10240 = vrot.lane.b32.xlu1 %v16026_v3, %s13224_s6 }
 0xb5e   :  { %10242 = vrot.lane.b32.xlu0 %v16029_v55, %s13224_s6 }
 0xb61   :  { %10230 = vrot.lane.b32.xlu1 %v16042_v4, %s13224_s6 }
 0xb62   :  { %10232 = vrot.lane.b32.xlu0 %v16045_v45, %s13224_s6 }
 0xb65   :  { %10244 = vrot.lane.b32.xlu1 %v16058_v53, %s13224_s6 }
 0xb66   :  { %10246 = vrot.lane.b32.xlu0 %v16060_v27, %s13224_s6 }
 0xb69   :  { %10442 = vrot.lane.b32.xlu1 %v15974_v32, %s13225_s7 }
 0xb6a   :  { %10444 = vrot.lane.b32.xlu0 %v15979_v42, %s13225_s7 }
 0xb6d   :  { %10440 = vrot.lane.b32.xlu1 %v13222_v14, %s13225_s7 }
 0xb6e   :  { %10456 = vrot.lane.b32.xlu0 %v15992_v56, %s13225_s7 }
 0xb71   :  { %10458 = vrot.lane.b32.xlu1 %v15995_v58, %s13225_s7 }
 0xb72   :  { %10454 = vrot.lane.b32.xlu0 %v13222_v14, %s13225_s7 }
 0xb75   :  { %10446 = vrot.lane.b32.xlu1 %v16010_v9, %s13225_s7 }
 0xb76   :  { %10448 = vrot.lane.b32.xlu0 %v16013_v43, %s13225_s7 }
 0xb77   :  { %v9800_v35 = vpop.permute.xlu1 %9799 }
 0xb78   :  { %v9802_v62 = vpop.permute.xlu0 %9801  ;;  %v9825_v24 = vsel %vm144_vm0, %v9798_v63, %v9800_v35  ;;  %v16255_v63 = vld [vmem:[%s16796_s1 + $0x248] sm:$0xff]  }
 0xb79   :  { %10460 = vrot.lane.b32.xlu1 %v16026_v3, %s13225_s7  ;;  %v9826_v29 = vsel %vm144_vm0, %v9800_v35, %v9802_v62 }
 0xb7a   :  { %10462 = vrot.lane.b32.xlu0 %v16029_v55, %s13225_s7  ;;  %9855 = vmatprep.subr.bf16.mxu0 %v9826_v29 }
 0xb7b   :  { %9856 = vmatpush1.bf16.msra.mxu0 %v9825_v24 }
 0xb7d   :  { %10450 = vrot.lane.b32.xlu1 %v16042_v4, %s13225_s7 }
 0xb7e   :  { %10452 = vrot.lane.b32.xlu0 %v16045_v45, %s13225_s7 }
 0xb7f   :  { %v9814_v19 = vpop.permute.xlu0 %9813 }
 0xb80   :  { %v9816_v7 = vpop.permute.xlu1 %9815 }
 0xb81   :  { %10464 = vrot.lane.b32.xlu1 %v16058_v53, %s13225_s7  ;;  %v9832_v1 = vsel %vm144_vm0, %v9814_v19, %v9816_v7 }
 0xb82   :  { %10466 = vrot.lane.b32.xlu0 %v16060_v27, %s13225_s7  ;;  %9857 = vmatprep.subr.bf16.mxu0 %v9832_v1 }
 0xb83   :  { %v9812_v40 = vpop.permute.xlu0 %9811 }
 0xb84   :  { %v9831_v12 = vsel %vm144_vm0, %v9812_v40, %v9814_v19 }
 0xb85   :  { %10858 = vrot.lane.b32.xlu1 %v15979_v42, %s13226_s12  ;;  %9858 = vmatpush1.bf16.msra.mxu0 %v9831_v12 }
 0xb86   :  { %10860 = vrot.lane.b32.xlu0 %v16010_v9, %s13226_s12 }
 0xb87   :  { %v9804_v30 = vpop.permute.xlu1 %9803 }
 0xb88   :  { %v9806_v26 = vpop.permute.xlu0 %9805  ;;  %12234 = vmatmul.mubr.msk.bf16.vlgmr.msra.gmra.mrb[40].mxu0 %vm169_vm1, %v13203_v33  ;;  %v9827_v52 = vsel %vm144_vm0, %v9802_v62, %v9804_v30 }
 0xb89   :  { %10856 = vrot.lane.b32.xlu1 %v15974_v32, %s13226_s12  ;;  %v9828_v2 = vsel %vm144_vm0, %v9804_v30, %v9806_v26  ;;  %9895 = vmatprep.mubr.bf16.mxu0 %v13222_v14 }
 0xb8a   :  { %10872 = vrot.lane.b32.xlu0 %v15995_v58, %s13226_s12  ;;  %9902 = vmatprep.subr.bf16.mxu0 %v9828_v2 }
 0xb8b   :  { %9903 = vmatpush1.bf16.msra.mxu0 %v9827_v52 }
 0xb8d   :  { %10874 = vrot.lane.b32.xlu1 %v16026_v3, %s13226_s12 }
 0xb8e   :  { %10870 = vrot.lane.b32.xlu0 %v15992_v56, %s13226_s12 }
 0xb8f   :  { %v9818_v25 = vpop.permute.xlu1 %9817 }
 0xb90   :  { %v9820_v34 = vpop.permute.xlu0 %9819  ;;  %12235 = vmatmul.mubr.msk.bf16.gmra.mrb[44].mxu0 %vm169_vm1, %v13204_v0  ;;  %v9833_v31 = vsel %vm144_vm0, %v9816_v7, %v9818_v25 }
 0xb91   :  { %10862 = vrot.lane.b32.xlu1 %v16013_v43, %s13226_s12  ;;  %v9834_v20 = vsel %vm144_vm0, %v9818_v25, %v9820_v34  ;;  %9934 = vmatprep.mubr.bf16.mxu0 %v13222_v14 }
 0xb92   :  { %10864 = vrot.lane.b32.xlu0 %v16042_v4, %s13226_s12  ;;  %9904 = vmatprep.subr.bf16.mxu0 %v9834_v20 }
 0xb93   :  { %9905 = vmatpush1.bf16.msra.mxu0 %v9833_v31 }
 0xb95   :  { %10876 = vrot.lane.b32.xlu1 %v16029_v55, %s13226_s12 }
 0xb96   :  { %10878 = vrot.lane.b32.xlu0 %v16058_v53, %s13226_s12 }
 0xb97   :  { %v9808_v37 = vpop.permute.xlu1 %9807 }
 0xb98   :  { %v9810_v28 = vpop.permute.xlu0 %9809  ;;  %12236 = vmatmul.mubr.msk.bf16.vlgmr.msra.gmra.mrb[48].mxu0 %vm169_vm1, %v13203_v33  ;;  %v9829_v48 = vsel %vm144_vm0, %v9806_v26, %v9808_v37 }
 0xb99   :  { %10866 = vrot.lane.b32.xlu1 %v16045_v45, %s13226_s12  ;;  %v9830_v46 = vsel %vm144_vm0, %v9808_v37, %v9810_v28  ;;  %9942 = vmatprep.mubr.bf16.mxu0 %v13222_v14 }
 0xb9a   :  { %13117 = vrot.lane.b32.xlu0 %v13222_v14, %s13226_s12  ;;  %9949 = vmatprep.subr.bf16.mxu0 %v9830_v46 }
 0xb9b   :  { %9950 = vmatpush1.bf16.msra.mxu0 %v9829_v48 }
 0xb9d   :  { %10880 = vrot.lane.b32.xlu1 %v16060_v27, %s13226_s12 }
 0xb9e   :  { %11078 = vrot.lane.b32.xlu0 %v15979_v42, %s13227_s15 }
 0xb9f   :  { %v9822_v57 = vpop.permute.xlu1 %9821 }
 0xba0   :  { %v9824_v15 = vpop.permute.xlu0 %9823  ;;  %12237 = vmatmul.mubr.msk.bf16.gmra.mrb[52].mxu0 %vm169_vm1, %v13204_v0  ;;  %v9835_v49 = vsel %vm144_vm0, %v9820_v34, %v9822_v57 }
 0xba1   :  { %11080 = vrot.lane.b32.xlu1 %v16010_v9, %s13227_s15  ;;  %v9836_v54 = vsel %vm144_vm0, %v9822_v57, %v9824_v15  ;;  %9981 = vmatprep.mubr.bf16.mxu0 %v13222_v14 }
 0xba2   :  { %11076 = vrot.lane.b32.xlu0 %v15974_v32, %s13227_s15  ;;  %9951 = vmatprep.subr.bf16.mxu0 %v9836_v54 }
 0xba3   :  { %9952 = vmatpush1.bf16.msra.mxu0 %v9835_v49  ;;  %v10009_v13 = vpop.permute.xlu1 %10008 }
 0xba4   :  { %v10011_v11 = vpop.permute.xlu0 %10010 }
 0xba5   :  { %11092 = vrot.lane.b32.xlu1 %v15995_v58, %s13227_s15  ;;  %v10035_v59 = vsel %vm373_vm2, %v10009_v13, %v10011_v11 }
 0xba6   :  { %11094 = vrot.lane.b32.xlu0 %v16026_v3, %s13227_s15  ;;  %10064 = vmatprep.subr.bf16.mxu0 %v10035_v59  ;;  %v13207_v59 = vld [vmem:[%s16796_s1 + $0x260] sm:$0xff]  }
 0xba7   :  { %v10007_v8 = vpop.permute.xlu1 %10006 }
 0xba8   :  { %v10034_v6 = vsel %vm373_vm2, %v10007_v8, %v10009_v13  ;;  %v10023_v17 = vpop.permute.xlu0 %10022  ;;  %12238 = vmatmul.mubr.msk.bf16.vlgmr.msra.gmra.mrb[56].mxu0 %vm169_vm1, %v13203_v33 }
 0xba9   :  { %11090 = vrot.lane.b32.xlu1 %v15992_v56, %s13227_s15  ;;  %10065 = vmatpush1.bf16.msra.mxu0 %v10034_v6 }
 0xbaa   :  { %11082 = vrot.lane.b32.xlu0 %v16013_v43, %s13227_s15  ;;  %9989 = vmatprep.mubr.bf16.mxu0 %v13222_v14 }
 0xbab   :  { %v10025_v39 = vpop.permute.xlu1 %10024 }
 0xbac   :  { %v10021_v38 = vpop.permute.xlu0 %10020  ;;  %v10041_v50 = vsel %vm373_vm2, %v10023_v17, %v10025_v39 }
 0xbad   :  { %v10040_v36 = vsel %vm373_vm2, %v10021_v38, %v10023_v17  ;;  %11084 = vrot.lane.b32.xlu1 %v16042_v4, %s13227_s15  ;;  %10066 = vmatprep.subr.bf16.mxu0 %v10041_v50  ;;  %v12332_v50 = vld [vmem:[%s16797_s2 + $0x80] sm:$0xff] }
 0xbae   :  { %11086 = vrot.lane.b32.xlu0 %v16045_v45, %s13227_s15  ;;  %10067 = vmatpush1.bf16.msra.mxu0 %v10040_v36 }
 0xbaf   :  { %v10013_v44 = vpop.permute.xlu1 %10012 }
 0xbb0   :  { %v10015_v61 = vpop.permute.xlu0 %10014  ;;  %12239 = vmatmul.mubr.msk.bf16.gmra.mrb[60].mxu0 %vm169_vm1, %v13204_v0  ;;  %v10036_v10 = vsel %vm373_vm2, %v10011_v11, %v10013_v44 }
 0xbb1   :  { %13122 = vrot.lane.b32.xlu1 %v13222_v14, %s13227_s15  ;;  %v10037_v5 = vsel %vm373_vm2, %v10013_v44, %v10015_v61  ;;  %10096 = vmatprep.mubr.bf16.mxu0 %v13222_v14 }
 0xbb2   :  { %11096 = vrot.lane.b32.xlu0 %v16029_v55, %s13227_s15  ;;  %10111 = vmatprep.subr.bf16.mxu0 %v10037_v5 }
 0xbb3   :  { %v10027_v18 = vpop.permute.xlu1 %10026 }
 0xbb4   :  { %v10029_v21 = vpop.permute.xlu0 %10028  ;;  %v10042_v16 = vsel %vm373_vm2, %v10025_v39, %v10027_v18 }
 0xbb5   :  { %11098 = vrot.lane.b32.xlu1 %v16058_v53, %s13227_s15  ;;  %v10043_v60 = vsel %vm373_vm2, %v10027_v18, %v10029_v21 }
 0xbb6   :  { %11300 = vrot.lane.b32.xlu0 %v16010_v9, %s13228_s20 }
 0xbb7   :  { %v10017_v22 = vpop.permute.xlu1 %10016 }
 0xbb8   :  { %v10019_v51 = vpop.permute.xlu0 %10018  ;;  %12242 = vmatmul.mubr.msk.bf16.vlgmr.msra.gmra.mrb[64].mxu0 %vm169_vm1, %v16236_v41  ;;  %v10038_v1 = vsel %vm373_vm2, %v10015_v61, %v10017_v22  ;;  %v13208_v61 = vld [vmem:[%s16796_s1 + $0x268] sm:$0xff]  }
 0xbb9   :  { %10112 = vmatpush1.bf16.msra.mxu0 %v10036_v10  ;;  %11298 = vrot.lane.b32.xlu1 %v15979_v42, %s13228_s20  ;;  %v10039_v35 = vsel %vm373_vm2, %v10017_v22, %v10019_v51 }
 0xbba   :  { %10113 = vmatprep.subr.bf16.mxu0 %v10043_v60  ;;  %11100 = vrot.lane.b32.xlu0 %v16060_v27, %s13227_s15 }
 0xbbb   :  { %v10031_v47 = vpop.permute.xlu1 %10030  ;;  %10104 = vmatprep.mubr.bf16.mxu0 %v13222_v14 }
 0xbbc   :  { %v10033_v23 = vpop.permute.xlu0 %10032  ;;  %v10044_v30 = vsel %vm373_vm2, %v10029_v21, %v10031_v47 }
 0xbbd   :  { %10114 = vmatpush1.bf16.msra.mxu0 %v10042_v16  ;;  %11302 = vrot.lane.b32.xlu1 %v16013_v43, %s13228_s20  ;;  %v10045_v12 = vsel %vm373_vm2, %v10031_v47, %v10033_v23 }
 0xbbe   :  { %10158 = vmatprep.subr.bf16.mxu0 %v10039_v35  ;;  %11304 = vrot.lane.b32.xlu0 %v16042_v4, %s13228_s20 }
 0xbbf   :  { %v10223_v62 = vpop.permute.xlu1 %10222 }
 0xbc0   :  { %v16262_v29 = vpop.permute.xlu0 %10224  ;;  %12243 = vmatmul.mubr.msk.bf16.gmra.mrb[68].mxu0 %vm169_vm1, %v16255_v63 }
 0xbc1   :  { %11296 = vrot.lane.b32.xlu1 %v15974_v32, %s13228_s20  ;;  %10143 = vmatprep.mubr.bf16.mxu0 %v13222_v14  ;;  %v10249_v2 = vsel %vm606_vm3, %v10223_v62, %v16262_v29 }
 0xbc2   :  { %11312 = vrot.lane.b32.xlu0 %v15995_v58, %s13228_s20 }
 0xbc3   :  { %v10221_v24 = vpop.permute.xlu1 %10220 }
 0xbc4   :  { %v10237_v19 = vpop.permute.xlu0 %10236  ;;  %v10248_v31 = vsel %vm606_vm3, %v10221_v24, %v10223_v62 }
 0xbc5   :  { %11314 = vrot.lane.b32.xlu1 %v16026_v3, %s13228_s20 }
 0xbc6   :  { %11316 = vrot.lane.b32.xlu0 %v16029_v55, %s13228_s20 }
 0xbc7   :  { %v16275_v7 = vpop.permute.xlu1 %10238 }
 0xbc8   :  { %v10235_v40 = vpop.permute.xlu0 %10234  ;;  %12244 = vmatmul.mubr.msk.bf16.vlgmr.msra.gmra.mrb[72].mxu0 %vm169_vm1, %v16236_v41  ;;  %v10255_v28 = vsel %vm606_vm3, %v10237_v19, %v16275_v7 }
 0xbc9   :  { %10159 = vmatpush1.bf16.msra.mxu0 %v10038_v1  ;;  %11318 = vrot.lane.b32.xlu1 %v16058_v53, %s13228_s20  ;;  %v10254_v48 = vsel %vm606_vm3, %v10235_v40, %v10237_v19 }
 0xbca   :  { %10160 = vmatprep.subr.bf16.mxu0 %v10045_v12  ;;  %11310 = vrot.lane.b32.xlu0 %v15992_v56, %s13228_s20 }
 0xbcb   :  { %v10227_v33 = vpop.permute.xlu1 %10226  ;;  %10151 = vmatprep.mubr.bf16.mxu0 %v13222_v14 }
 0xbcc   :  { %v16287_v26 = vpop.permute.xlu0 %10228  ;;  %v10250_v6 = vsel %vm606_vm3, %v16262_v29, %v10227_v33 }
 0xbcd   :  { %10161 = vmatpush1.bf16.msra.mxu0 %v10044_v30  ;;  %11306 = vrot.lane.b32.xlu1 %v16045_v45, %s13228_s20  ;;  %v10251_v15 = vsel %vm606_vm3, %v10227_v33, %v16287_v26 }
 0xbce   :  { %10278 = vmatprep.subr.bf16.mxu0 %v10249_v2  ;;  %13127 = vrot.lane.b32.xlu0 %v13222_v14, %s13228_s20 }
 0xbcf   :  { %v10241_v52 = vpop.permute.xlu1 %10240 }
 0xbd0   :  { %v16295_v0 = vpop.permute.xlu0 %10242  ;;  %12245 = vmatmul.mubr.msk.bf16.gmra.mrb[76].mxu0 %vm169_vm1, %v16255_v63  ;;  %v10256_v36 = vsel %vm606_vm3, %v16275_v7, %v10241_v52 }
 0xbd1   :  { %11518 = vrot.lane.b32.xlu1 %v15979_v42, %s13229_s26  ;;  %10190 = vmatprep.mubr.bf16.mxu0 %v13222_v14  ;;  %v10257_v39 = vsel %vm606_vm3, %v10241_v52, %v16295_v0 }
 0xbd2   :  { %11520 = vrot.lane.b32.xlu0 %v16010_v9, %s13229_s26 }
 0xbd3   :  { %v10231_v25 = vpop.permute.xlu1 %10230 }
 0xbd4   :  { %v10233_v34 = vpop.permute.xlu0 %10232  ;;  %v10252_v51 = vsel %vm606_vm3, %v16287_v26, %v10231_v25 }
 0xbd5   :  { %11516 = vrot.lane.b32.xlu1 %v15974_v32, %s13229_s26  ;;  %v10253_v5 = vsel %vm606_vm3, %v10231_v25, %v10233_v34 }
 0xbd6   :  { %11534 = vrot.lane.b32.xlu0 %v16026_v3, %s13229_s26 }
 0xbd7   :  { %v16308_v20 = vpop.permute.xlu1 %10244 }
 0xbd8   :  { %v10247_v37 = vpop.permute.xlu0 %10246  ;;  %12246 = vmatmul.mubr.msk.bf16.vlgmr.msra.gmra.mrb[80].mxu0 %vm169_vm1, %v16236_v41 }
 0xbd9   :  { %10279 = vmatpush1.bf16.msra.mxu0 %v10248_v31  ;;  %11532 = vrot.lane.b32.xlu1 %v15995_v58, %s13229_s26  ;;  %v10259_v47 = vsel %vm606_vm3, %v16308_v20, %v10247_v37 }
 0xbda   :  { %10280 = vmatprep.subr.bf16.mxu0 %v10255_v28  ;;  %11320 = vrot.lane.b32.xlu0 %v16060_v27, %s13228_s20 }
 0xbdb   :  { %v16319_v46 = vpop.permute.xlu1 %10442  ;;  %10198 = vmatprep.mubr.bf16.mxu0 %v13222_v14 }
 0xbdc   :  { %v16323_v57 = vpop.permute.xlu0 %10444 }
 0xbdd   :  { %10281 = vmatpush1.bf16.msra.mxu0 %v10254_v48  ;;  %11530 = vrot.lane.b32.xlu1 %v15992_v56, %s13229_s26  ;;  %v10469_v29 = vsel %vm863_vm4, %v16319_v46, %v16323_v57 }
 0xbde   :  { %10325 = vmatprep.subr.bf16.mxu0 %v10251_v15  ;;  %11522 = vrot.lane.b32.xlu0 %v16013_v43, %s13229_s26 }
 0xbdf   :  { %v16331_v54 = vpop.permute.xlu1 %10440 }
 0xbe0   :  { %v16333_v49 = vpop.permute.xlu0 %10456  ;;  %12247 = vmatmul.mubr.msk.bf16.gmra.mrb[84].mxu0 %vm169_vm1, %v16255_v63  ;;  %v10258_v63 = vsel %vm606_vm3, %v16295_v0, %v16308_v20  ;;  %v10468_v2 = vsel %vm863_vm4, %v16331_v54, %v16319_v46 }
 0xbe1   :  { %11524 = vrot.lane.b32.xlu1 %v16042_v4, %s13229_s26  ;;  %10310 = vmatprep.mubr.bf16.mxu0 %v13222_v14 }
 0xbe2   :  { %11526 = vrot.lane.b32.xlu0 %v16045_v45, %s13229_s26 }
 0xbe3   :  { %v16342_v13 = vpop.permute.xlu1 %10458 }
 0xbe4   :  { %v16344_v11 = vpop.permute.xlu0 %10454  ;;  %v10475_v25 = vsel %vm863_vm4, %v16333_v49, %v16342_v13 }
 0xbe5   :  { %11528 = vrot.lane.b32.xlu1 %v13222_v14, %s13229_s26  ;;  %v10474_v31 = vsel %vm863_vm4, %v16344_v11, %v16333_v49 }
 0xbe6   :  { %11536 = vrot.lane.b32.xlu0 %v16029_v55, %s13229_s26 }
 0xbe7   :  { %v16353_v8 = vpop.permute.xlu1 %10446 }
 0xbe8   :  { %v16357_v17 = vpop.permute.xlu0 %10448  ;;  %12254 = vmatmul.mubr.msk.bf16.vlgmr.msra.gmra.mrb[88].mxu0 %vm169_vm1, %v13207_v59 }
 0xbe9   :  { %10326 = vmatpush1.bf16.msra.mxu0 %v10250_v6  ;;  %11538 = vrot.lane.b32.xlu1 %v16058_v53, %s13229_s26  ;;  %v10471_v15 = vsel %vm863_vm4, %v16353_v8, %v16357_v17 }
 0xbea   :  { %10327 = vmatprep.subr.bf16.mxu0 %v10257_v39  ;;  %11540 = vrot.lane.b32.xlu0 %v16060_v27, %s13229_s26 }
 0xbeb   :  { %v16366_v38 = vpop.permute.xlu1 %10460  ;;  %10318 = vmatprep.mubr.bf16.mxu0 %v13222_v14 }
 0xbec   :  { %v16374_v44 = vpop.permute.xlu0 %10462 }
 0xbed   :  { %10328 = vmatpush1.bf16.msra.mxu0 %v10256_v36  ;;  %11542 = vrot.lane.b32.xlu1 %v13222_v14, %s13229_s26  ;;  %v16461_v36 = vld [vmem:[%s16796_s1 + $0x270] sm:$0xff]  }
 0xbee   :  { %10372 = vmatprep.subr.bf16.mxu0 %v10253_v5  ;;  %11725 = vperm.xlu0 %13114, %v12332_v50  }
 0xbef   :  { %v16382_v18 = vpop.permute.xlu1 %10450 }
 0xbf0   :  { %v16384_v21 = vpop.permute.xlu0 %10452  ;;  %12255 = vmatmul.mubr.msk.bf16.gmra.mrb[92].mxu0 %vm169_vm1, %v13208_v61 }
 0xbf1   :  { %10357 = vmatprep.mubr.bf16.mxu0 %v13222_v14 }
 0xbf3   :  { %v16388_v41 = vpop.permute.xlu1 %10464 }
 0xbf4   :  { %v16390_v22 = vpop.permute.xlu0 %10466 }
 0xbf7   :  { %v10859_v10 = vpop.permute.xlu1 %10858 }
 0xbf8   :  { %v10861_v60 = vpop.permute.xlu0 %10860  ;;  %12256 = vmatmul.mubr.msk.bf16.vlgmr.msra.gmra.mrb[96].mxu0 %vm169_vm1, %v13207_v59 }
 0xbf9   :  { %10373 = vmatpush1.bf16.msra.mxu0 %v10252_v51  ;;  %10365 = vmatprep.mubr.bf16.mxu0 %v13222_v14  ;;  %v16399_v16 = vsel %vm1470_vm5, %v10859_v10, %v10861_v60 }
 0xbfa   :  { %10374 = vmatprep.subr.bf16.mxu0 %v10259_v47  ;;  %v10477_v47 = vsel %vm863_vm4, %v16366_v38, %v16374_v44 }
 0xbfb   :  { %v10857_v23 = vpop.permute.xlu1 %10856 }
 0xbfc   :  { %v16405_v35 = vsel %vm1470_vm5, %v10857_v23, %v10859_v10  ;;  %v10873_v62 = vpop.permute.xlu0 %10872 }
 0xbfd   :  { %10375 = vmatpush1.bf16.msra.mxu0 %v10258_v63 }
 0xbfe   :  { %10498 = vmatprep.subr.bf16.mxu0 %v10469_v29  ;;  %v16490_v29 = vld [vmem:[%s16796_s1 + $0x278] sm:$0xff]  }
 0xbff   :  { %v10875_v24 = vpop.permute.xlu1 %10874 }
 0xc00   :  { %v10871_v19 = vpop.permute.xlu0 %10870  ;;  %12257 = vmatmul.mubr.msk.bf16.gmra.mrb[100].mxu0 %vm169_vm1, %v13208_v61  ;;  %v16412_v7 = vsel %vm1470_vm5, %v10873_v62, %v10875_v24 }
 0xc01   :  { %v16415_v1 = vsel %vm1470_vm5, %v10871_v19, %v10873_v62  ;;  %10404 = vmatprep.mubr.bf16.mxu0 %v13222_v14 }
 0xc03   :  { %v10863_v40 = vpop.permute.xlu1 %10862 }
 0xc04   :  { %v16419_v12 = vsel %vm1470_vm5, %v10861_v60, %v10863_v40  ;;  %v10865_v33 = vpop.permute.xlu0 %10864 }
 0xc05   :  { %v16422_v30 = vsel %vm1470_vm5, %v10863_v40, %v10865_v33 }
 0xc07   :  { %v10877_v26 = vpop.permute.xlu1 %10876 }
 0xc08   :  { %v16428_v52 = vsel %vm1470_vm5, %v10875_v24, %v10877_v26  ;;  %v10879_v0 = vpop.permute.xlu0 %10878  ;;  %12258 = vmatmul.mubr.msk.bf16.vlgmr.msra.gmra.mrb[104].mxu0 %vm169_vm1, %v13207_v59  ;;  %v10473_v24 = vsel %vm863_vm4, %v16382_v18, %v16384_v21 }
 0xc09   :  { %10499 = vmatpush1.bf16.msra.mxu0 %v10468_v2  ;;  %10412 = vmatprep.mubr.bf16.mxu0 %v13222_v14  ;;  %v16436_v34 = vsel %vm1470_vm5, %v10877_v26, %v10879_v0 }
 0xc0a   :  { %10500 = vmatprep.subr.bf16.mxu0 %v10475_v25 }
 0xc0b   :  { %v10867_v20 = vpop.permute.xlu1 %10866 }
 0xc0c   :  { %v16442_v37 = vsel %vm1470_vm5, %v10865_v33, %v10867_v20  ;;  %v13118_v28 = vpop.permute.xlu0 %13117 }
 0xc0d   :  { %v13120_v46 = vunpack.i.h.bf16 %v13118_v28  ;;  %v13119_v48 = vunpack.i.l.bf16 %v13118_v28  ;;  %10501 = vmatpush1.bf16.msra.mxu0 %v10474_v31 }
 0xc0e   :  { %10545 = vmatprep.subr.bf16.mxu0 %v10471_v15  ;;  %v10479_v15 = vsel %vm863_vm4, %v16388_v41, %v16390_v22 }
 0xc0f   :  { %v10881_v54 = vpop.permute.xlu1 %10880  ;;  %v16448_v59 = vsel %vm1470_vm5, %v10867_v20, %v13119_v48  ;;  %v10472_v20 = vsel %vm863_vm4, %v16357_v17, %v16382_v18  ;;  %v16519_v17 = vld [vmem:[%s16796_s1 + $0x2a0] sm:$0xff]  }
 0xc10   :  { %v16451_v6 = vsel %vm1470_vm5, %v10879_v0, %v10881_v54  ;;  %v11079_v49 = vpop.permute.xlu0 %11078  ;;  %12259 = vmatmul.mubr.msk.bf16.gmra.mrb[108].mxu0 %vm169_vm1, %v13208_v61  ;;  %v16455_v11 = vsel %vm1470_vm5, %v10881_v54, %v13120_v46  ;;  %v10470_v61 = vsel %vm863_vm4, %v16323_v57, %v16353_v8  ;;  %v10476_v57 = vsel %vm863_vm4, %v16342_v13, %v16366_v38 }
 0xc11   :  { %10530 = vmatprep.mubr.bf16.mxu0 %v13222_v14  ;;  %v10478_v54 = vsel %vm863_vm4, %v16374_v44, %v16388_v41 }
 0xc13   :  { %v11081_v39 = vpop.permute.xlu1 %11080 }
 0xc14   :  { %v11077_v50 = vpop.permute.xlu0 %11076  ;;  %v16464_v5 = vsel %vm1727_vm6, %v11079_v49, %v11081_v39 }
 0xc15   :  { %v16467_v10 = vsel %vm1727_vm6, %v11077_v50, %v11079_v49 }
 0xc17   :  { %v11093_v51 = vpop.permute.xlu1 %11092 }
 0xc18   :  { %v11095_v60 = vpop.permute.xlu0 %11094  ;;  %12266 = vmatmul.mubr.msk.bf16.vlgmr.msra.gmra.mrb[112].mxu0 %vm169_vm1, %v16461_v36 }
 0xc19   :  { %10546 = vmatpush1.bf16.msra.mxu0 %v10470_v61  ;;  %10538 = vmatprep.mubr.bf16.mxu0 %v13222_v14  ;;  %v16479_v23 = vsel %vm1727_vm6, %v11093_v51, %v11095_v60 }
 0xc1a   :  { %10547 = vmatprep.subr.bf16.mxu0 %v10477_v47 }
 0xc1b   :  { %v11091_v63 = vpop.permute.xlu1 %11090 }
 0xc1c   :  { %v16485_v8 = vsel %vm1727_vm6, %v11091_v63, %v11093_v51  ;;  %v11083_v62 = vpop.permute.xlu0 %11082 }
 0xc1d   :  { %10548 = vmatpush1.bf16.msra.mxu0 %v10476_v57  ;;  %v11106_v38 = vsel %vm1727_vm6, %v11081_v39, %v11083_v62 }
 0xc1e   :  { %10592 = vmatprep.subr.bf16.mxu0 %v10473_v24 }
 0xc1f   :  { %v11085_v19 = vpop.permute.xlu1 %11084 }
 0xc20   :  { %v11087_v40 = vpop.permute.xlu0 %11086  ;;  %12267 = vmatmul.mubr.msk.bf16.gmra.mrb[116].mxu0 %vm169_vm1, %v16490_v29  ;;  %v11107_v13 = vsel %vm1727_vm6, %v11083_v62, %v11085_v19 }
 0xc21   :  { %v16500_v33 = vsel %vm1727_vm6, %v11085_v19, %v11087_v40  ;;  %11181 = vmatprep.subr.bf16.mxu1 %v11107_v13  ;;  %10577 = vmatprep.mubr.bf16.mxu0 %v13222_v14 }
 0xc22   :  { %11182 = vmatpush1.bf16.msra.mxu1 %v11106_v38 }
 0xc23   :  { %v13123_v26 = vpop.permute.xlu1 %13122 }
 0xc24   :  { %v13124_v2 = vunpack.i.l.bf16 %v13123_v26  ;;  %v11097_v21 = vpop.permute.xlu0 %11096  ;;  %v13125_v46 = vunpack.i.h.bf16 %v13123_v26 }
 0xc25   :  { %v11112_v48 = vsel %vm1727_vm6, %v11095_v60, %v11097_v21 }
 0xc26   :  { %v16504_v0 = vsel %vm1727_vm6, %v11087_v40, %v13124_v2 }
 0xc27   :  { %v11099_v25 = vpop.permute.xlu1 %11098 }
 0xc28   :  { %v11301_v31 = vpop.permute.xlu0 %11300  ;;  %12268 = vmatmul.mubr.msk.bf16.vlgmr.msra.gmra.mrb[120].mxu0 %vm169_vm1, %v16461_v36  ;;  %v11113_v28 = vsel %vm1727_vm6, %v11097_v21, %v11099_v25 }
 0xc29   :  { %10593 = vmatpush1.bf16.msra.mxu0 %v10472_v20  ;;  %11183 = vmatprep.subr.bf16.mxu1 %v11113_v28  ;;  %v16585_v20 = vld [vmem:[%s16796_s1 + $0x280] sm:$0xff]  }
 0xc2a   :  { %10594 = vmatprep.subr.bf16.mxu0 %v10479_v15  ;;  %11184 = vmatpush1.bf16.msra.mxu1 %v11112_v48 }
 0xc2b   :  { %v11299_v18 = vpop.permute.xlu1 %11298  ;;  %10585 = vmatprep.mubr.bf16.mxu0 %v13222_v14 }
 0xc2c   :  { %v11101_v49 = vpop.permute.xlu0 %11100  ;;  %v11325_v39 = vsel %vm1984_vm7, %v11299_v18, %v11301_v31 }
 0xc2d   :  { %v16527_v22 = vsel %vm1727_vm6, %v11099_v25, %v11101_v49  ;;  %10595 = vmatpush1.bf16.msra.mxu0 %v10478_v54  ;;  %11354 = vmatprep.subr.bf16.mxu1 %v11325_v39  ;;  %v16530_v50 = vsel %vm1727_vm6, %v11101_v49, %v13125_v46  ;;  %v16609_v49 = vld [vmem:[%s16796_s1 + $0x288] sm:$0xff]  }
 0xc2e   :  { %10666 = vmatprep.subr.bf16.mxu0 %v15979_v42  ;;  %12304 = vmatmul.mubr.msk.bf16.vlgmr.msra.gmra.mrb[60].mxu1 %vm169_vm1, %v16519_v17  ;;  %v16548_v42 = vld [vmem:[%s16796_s1 + $0x2a8] sm:$0xff]  }
 0xc2f   :  { %v11303_v51 = vpop.permute.xlu1 %11302  ;;  %11221 = vmatprep.mubr.bf16.mxu1 %v13222_v14 }
 0xc30   :  { %v16537_v44 = vsel %vm1984_vm7, %v11301_v31, %v11303_v51  ;;  %v11305_v41 = vpop.permute.xlu0 %11304  ;;  %12269 = vmatmul.mubr.msk.bf16.gmra.mrb[124].mxu0 %vm169_vm1, %v16490_v29 }
 0xc31   :  { %10624 = vmatprep.mubr.bf16.mxu0 %v13222_v14  ;;  %v16543_v61 = vsel %vm1984_vm7, %v11303_v51, %v11305_v41 }
 0xc33   :  { %v11297_v60 = vpop.permute.xlu1 %11296 }
 0xc34   :  { %v11324_v47 = vsel %vm1984_vm7, %v11297_v60, %v11299_v18  ;;  %v11313_v63 = vpop.permute.xlu0 %11312 }
 0xc35   :  { %11355 = vmatpush1.bf16.msra.mxu1 %v11324_v47 }
 0xc36   :  { %12305 = vmatmul.mubr.msk.bf16.gmra.mrb[64].mxu1 %vm169_vm1, %v16548_v42 }
 0xc37   :  { %v11315_v57 = vpop.permute.xlu1 %11314  ;;  %11386 = vmatprep.mubr.bf16.mxu1 %v13222_v14 }
 0xc38   :  { %v11317_v62 = vpop.permute.xlu0 %11316  ;;  %12270 = vmatmul.mubr.msk.bf16.vlgmr.msra.gmra.mrb[128].mxu0 %vm169_vm1, %v16461_v36  ;;  %v11331_v24 = vsel %vm1984_vm7, %v11313_v63, %v11315_v57  ;;  %v16571_v36 = vld [vmem:[%s16796_s1 + $0x2b0] sm:$0xff]  }
 0xc39   :  { %v16558_v19 = vsel %vm1984_vm7, %v11315_v57, %v11317_v62  ;;  %10667 = vmatpush1.bf16.msra.mxu0 %v15974_v32  ;;  %11356 = vmatprep.subr.bf16.mxu1 %v11331_v24 }
 0xc3a   :  { %10668 = vmatprep.subr.bf16.mxu0 %v15995_v58  ;;  %10632 = vmatprep.mubr.bf16.mxu0 %v13222_v14 }
 0xc3b   :  { %v11319_v40 = vpop.permute.xlu1 %11318 }
 0xc3c   :  { %v11311_v13 = vpop.permute.xlu0 %11310  ;;  %v16564_v38 = vsel %vm1984_vm7, %v11317_v62, %v11319_v40 }
 0xc3d   :  { %v11330_v26 = vsel %vm1984_vm7, %v11311_v13, %v11313_v63  ;;  %10669 = vmatpush1.bf16.msra.mxu0 %v15992_v56 }
 0xc3e   :  { %10713 = vmatprep.subr.bf16.mxu0 %v16013_v43  ;;  %11357 = vmatpush1.bf16.msra.mxu1 %v11330_v26 }
 0xc3f   :  { %v11307_v32 = vpop.permute.xlu1 %11306 }
 0xc40   :  { %v13128_v58 = vpop.permute.xlu0 %13127  ;;  %12271 = vmatmul.mubr.msk.bf16.gmra.mrb[132].mxu0 %vm169_vm1, %v16490_v29  ;;  %v11328_v25 = vsel %vm1984_vm7, %v11305_v41, %v11307_v32  ;;  %v16590_v29 = vld [vmem:[%s16796_s1 + $0x2b8] sm:$0xff]  }
 0xc41   :  { %v13129_v2 = vunpack.i.l.bf16 %v13128_v58  ;;  %12314 = vmatmul.mubr.msk.bf16.vlgmr.msra.gmra.mrb[68].mxu1 %vm169_vm1, %v16571_v36  ;;  %10698 = vmatprep.mubr.bf16.mxu0 %v13222_v14  ;;  %v13130_v15 = vunpack.i.h.bf16 %v13128_v58 }
 0xc42   :  { %11394 = vmatprep.mubr.bf16.mxu1 %v13222_v14 }
 0xc43   :  { %v11519_v56 = vpop.permute.xlu1 %11518  ;;  %v11329_v21 = vsel %vm1984_vm7, %v11307_v32, %v13129_v2 }
 0xc44   :  { %v11521_v43 = vpop.permute.xlu0 %11520  ;;  %11448 = vmatprep.subr.bf16.mxu1 %v11329_v21 }
 0xc45   :  { %11449 = vmatpush1.bf16.msra.mxu1 %v11328_v25  ;;  %v16593_v31 = vsel %vm2241_vm8, %v11519_v56, %v11521_v43 }
 0xc47   :  { %v11517_v28 = vpop.permute.xlu1 %11516 }
 0xc48   :  { %v16596_v46 = vsel %vm2241_vm8, %v11517_v28, %v11519_v56  ;;  %v11535_v48 = vpop.permute.xlu0 %11534  ;;  %12278 = vmatmul.mubr.msk.bf16.vlgmr.msra.gmra.mrb[136].mxu0 %vm169_vm1, %v16585_v20  ;;  %v16653_v56 = vld [vmem:[%s16796_s1 + $0x2c0] sm:$0xff]  }
 0xc49   :  { %10714 = vmatpush1.bf16.msra.mxu0 %v16010_v9  ;;  %12315 = vmatmul.mubr.msk.bf16.gmra.mrb[72].mxu1 %vm169_vm1, %v16590_v29 }
 0xc4a   :  { %10715 = vmatprep.subr.bf16.mxu0 %v16029_v55  ;;  %10706 = vmatprep.mubr.bf16.mxu0 %v13222_v14 }
 0xc4b   :  { %v11533_v18 = vpop.permute.xlu1 %11532  ;;  %11480 = vmatprep.mubr.bf16.mxu1 %v13222_v14 }
 0xc4c   :  { %v11321_v54 = vpop.permute.xlu0 %11320  ;;  %v16612_v39 = vsel %vm2241_vm8, %v11533_v18, %v11535_v48 }
 0xc4d   :  { %v11334_v9 = vsel %vm1984_vm7, %v11319_v40, %v11321_v54  ;;  %10716 = vmatpush1.bf16.msra.mxu0 %v16026_v3  ;;  %v11335_v55 = vsel %vm1984_vm7, %v11321_v54, %v13130_v15 }
 0xc4e   :  { %10760 = vmatprep.subr.bf16.mxu0 %v16045_v45  ;;  %11450 = vmatprep.subr.bf16.mxu1 %v11335_v55 }
 0xc4f   :  { %11451 = vmatpush1.bf16.msra.mxu1 %v11334_v9  ;;  %v11531_v51 = vpop.permute.xlu1 %11530 }
 0xc50   :  { %v16619_v41 = vsel %vm2241_vm8, %v11531_v51, %v11533_v18  ;;  %v11523_v60 = vpop.permute.xlu0 %11522  ;;  %12279 = vmatmul.mubr.msk.bf16.gmra.mrb[140].mxu0 %vm169_vm1, %v16609_v49 }
 0xc51   :  { %10745 = vmatprep.mubr.bf16.mxu0 %v13222_v14  ;;  %v11546_v63 = vsel %vm2241_vm8, %v11521_v43, %v11523_v60  ;;  %v16666_v43 = vld [vmem:[%s16796_s1 + $0x2c8] sm:$0xff]  }
 0xc52   :  { %12318 = vmatmul.mubr.msk.bf16.vlgmr.msra.gmra.mrb[76].mxu1 %vm169_vm1, %v16571_v36 }
 0xc53   :  { %v11525_v3 = vpop.permute.xlu1 %11524  ;;  %11488 = vmatprep.mubr.bf16.mxu1 %v13222_v14 }
 0xc54   :  { %v11527_v47 = vpop.permute.xlu0 %11526  ;;  %v11547_v45 = vsel %vm2241_vm8, %v11523_v60, %v11525_v3 }
 0xc55   :  { %v16630_v57 = vsel %vm2241_vm8, %v11525_v3, %v11527_v47  ;;  %11621 = vmatprep.subr.bf16.mxu1 %v11547_v45 }
 0xc56   :  { %11622 = vmatpush1.bf16.msra.mxu1 %v11546_v63 }
 0xc57   :  { %v11529_v62 = vpop.permute.xlu1 %11528 }
 0xc58   :  { %12280 = vmatmul.mubr.msk.bf16.vlgmr.msra.gmra.mrb[144].mxu0 %vm169_vm1, %v16585_v20  ;;  %v16635_v24 = vsel %vm2241_vm8, %v11527_v47, %v11529_v62  ;;  %v11537_v40 = vpop.permute.xlu0 %11536 }
 0xc59   :  { %10761 = vmatpush1.bf16.msra.mxu0 %v16042_v4  ;;  %10753 = vmatprep.mubr.bf16.mxu0 %v13222_v14  ;;  %v11552_v2 = vsel %vm2241_vm8, %v11535_v48, %v11537_v40 }
 0xc5a   :  { %10762 = vmatprep.subr.bf16.mxu0 %v16060_v27  ;;  %12319 = vmatmul.mubr.msk.bf16.gmra.mrb[80].mxu1 %vm169_vm1, %v16590_v29 }
 0xc5b   :  { %v16642_v13 = vpop.permute.xlu1 %11538  ;;  %v9889_v26 = vpop.f32.mrb[40].mxu0  ;;  %11653 = vmatprep.mubr.bf16.mxu1 %v13222_v14 }
 0xc5c   :  { %v11553_v32 = vsel %vm2241_vm8, %v11537_v40, %v16642_v13  ;;  %v9891_v58 = vpop.f32.mrb[41].mxu0 }
 0xc5d   :  { %10763 = vmatpush1.bf16.msra.mxu0 %v16058_v53  ;;  %11623 = vmatprep.subr.bf16.mxu1 %v11553_v32  ;;  %v9893_v4 = vpop.f32.mrb[42].mxu0 }
 0xc5e   :  { %10914 = vmatprep.subr.bf16.mxu0 %v16399_v16  ;;  %11624 = vmatpush1.bf16.msra.mxu1 %v11552_v2  ;;  %v9894_v27 = vpop.f32.mrb[43].mxu0 }
 0xc60   :  { %12281 = vmatmul.mubr.msk.bf16.gmra.mrb[148].mxu0 %vm169_vm1, %v16609_v49 }
 0xc61   :  { %10792 = vmatprep.mubr.bf16.mxu0 %v13222_v14 }
 0xc62   :  { %12328 = vmatmul.mubr.msk.bf16.vlgmr.msra.gmra.mrb[84].mxu1 %vm169_vm1, %v16653_v56 }
 0xc63   :  { %v9897_v53 = vpop.f32.mrb[44].mxu0  ;;  %11661 = vmatprep.mubr.bf16.mxu1 %v13222_v14 }
 0xc64   :  { %v9898_v21 = vpop.f32.mrb[45].mxu0 }
 0xc65   :  { %v9899_v16 = vpop.f32.mrb[46].mxu0 }
 0xc66   :  { %v9900_v25 = vpop.f32.mrb[47].mxu0 }
 0xc68   :  { %12282 = vmatmul.mubr.msk.bf16.vlgmr.msra.gmra.mrb[152].mxu0 %vm169_vm1, %v16585_v20 }
 0xc69   :  { %10915 = vmatpush1.bf16.msra.mxu0 %v16405_v35  ;;  %10800 = vmatprep.mubr.bf16.mxu0 %v13222_v14 }
 0xc6a   :  { %10916 = vmatprep.subr.bf16.mxu0 %v16412_v7  ;;  %12329 = vmatmul.mubr.msk.bf16.gmra.mrb[88].mxu1 %vm169_vm1, %v16666_v43  ;;  %v13217_v7 = vld [vmem:[%s16796_s1 + $0x290] sm:$0xff]  }
 0xc6b   :  { %v9936_v28 = vpop.f32.mrb[48].mxu0 }
 0xc6c   :  { %v9938_v48 = vpop.f32.mrb[49].mxu0 }
 0xc6d   :  { %10917 = vmatpush1.bf16.msra.mxu0 %v16415_v1  ;;  %v9940_v15 = vpop.f32.mrb[50].mxu0 }
 0xc6e   :  { %10961 = vmatprep.subr.bf16.mxu0 %v16422_v30  ;;  %v9941_v20 = vpop.f32.mrb[51].mxu0 }
 0xc70   :  { %12283 = vmatmul.mubr.msk.bf16.gmra.mrb[156].mxu0 %vm169_vm1, %v16609_v49  ;;  %v13218_v49 = vld [vmem:[%s16796_s1 + $0x298] sm:$0xff]  }
 0xc71   :  { %10946 = vmatprep.mubr.bf16.mxu0 %v13222_v14 }
 0xc73   :  { %v9944_v35 = vpop.f32.mrb[52].mxu0 }
 0xc74   :  { %v9945_v18 = vpop.f32.mrb[53].mxu0 }
 0xc75   :  { %v9946_v54 = vpop.f32.mrb[54].mxu0 }
 0xc76   :  { %v9947_v9 = vpop.f32.mrb[55].mxu0 }
 0xc78   :  { %12290 = vmatmul.mubr.msk.bf16.vlgmr.msra.gmra.mrb[160].mxu0 %vm169_vm1, %v13217_v7 }
 0xc79   :  { %10962 = vmatpush1.bf16.msra.mxu0 %v16419_v12  ;;  %10954 = vmatprep.mubr.bf16.mxu0 %v13222_v14 }
 0xc7a   :  { %10963 = vmatprep.subr.bf16.mxu0 %v16436_v34 }
 0xc7b   :  { %v9983_v1 = vpop.f32.mrb[56].mxu0 }
 0xc7c   :  { %v9985_v30 = vpop.f32.mrb[57].mxu0 }
 0xc7d   :  { %10964 = vmatpush1.bf16.msra.mxu0 %v16428_v52  ;;  %v9987_v55 = vpop.f32.mrb[58].mxu0 }
 0xc7e   :  { %11008 = vmatprep.subr.bf16.mxu0 %v16448_v59  ;;  %v9988_v51 = vpop.f32.mrb[59].mxu0  ;;  %v11543_v55 = vpop.permute.xlu1 %11542 }
 0xc7f   :  { %v11541_v51 = vpop.permute.xlu0 %11540 }
 0xc80   :  { %12291 = vmatmul.mubr.msk.bf16.gmra.mrb[164].mxu0 %vm169_vm1, %v13218_v49 }
 0xc81   :  { %10993 = vmatprep.mubr.bf16.mxu0 %v13222_v14 }
 0xc83   :  { %v9991_v12 = vpop.f32.mrb[60].mxu0 }
 0xc84   :  { %v9992_v60 = vpop.f32.mrb[61].mxu0 }
 0xc85   :  { %v9993_v3 = vpop.f32.mrb[62].mxu0 }
 0xc86   :  { %v9994_v34 = vpop.f32.mrb[63].mxu0 }
 0xc88   :  { %12292 = vmatmul.mubr.msk.bf16.vlgmr.msra.gmra.mrb[168].mxu0 %vm169_vm1, %v13217_v7 }
 0xc89   :  { %11009 = vmatpush1.bf16.msra.mxu0 %v16442_v37  ;;  %11001 = vmatprep.mubr.bf16.mxu0 %v13222_v14 }
 0xc8a   :  { %11010 = vmatprep.subr.bf16.mxu0 %v16455_v11 }
 0xc8b   :  { %v10098_v52 = vpop.f32.mrb[64].mxu0 }
 0xc8c   :  { %v10099_v47 = vadd.f32 %v10098_v52, %v9889_v26  ;;  %v10100_v59 = vpop.f32.mrb[65].mxu0 }
 0xc8d   :  { %v10101_v45 = vadd.f32 %v10100_v59, %v9891_v58  ;;  %11011 = vmatpush1.bf16.msra.mxu0 %v16451_v6  ;;  %v10102_v63 = vpop.f32.mrb[66].mxu0 }
 0xc8e   :  { %11134 = vmatprep.subr.bf16.mxu0 %v16464_v5  ;;  %v10103_v62 = vpop.f32.mrb[67].mxu0 }
 0xc90   :  { %12293 = vmatmul.mubr.msk.bf16.gmra.mrb[172].mxu0 %vm169_vm1, %v13218_v49 }
 0xc91   :  { %11040 = vmatprep.mubr.bf16.mxu0 %v13222_v14 }
 0xc93   :  { %v10106_v40 = vpop.f32.mrb[68].mxu0 }
 0xc94   :  { %v10107_v37 = vpop.f32.mrb[69].mxu0 }
 0xc95   :  { %v10108_v32 = vpop.f32.mrb[70].mxu0 }
 0xc96   :  { %v10109_v2 = vpop.f32.mrb[71].mxu0 }
 0xc98   :  { %12294 = vmatmul.mubr.msk.bf16.vlgmr.msra.gmra.mrb[176].mxu0 %vm169_vm1, %v13217_v7 }
 0xc99   :  { %11135 = vmatpush1.bf16.msra.mxu0 %v16467_v10  ;;  %11048 = vmatprep.mubr.bf16.mxu0 %v13222_v14 }
 0xc9a   :  { %11136 = vmatprep.subr.bf16.mxu0 %v16479_v23 }
 0xc9b   :  { %v10145_v6 = vpop.f32.mrb[72].mxu0 }
 0xc9c   :  { %v10146_v11 = vadd.f32 %v10145_v6, %v9936_v28  ;;  %v10147_v5 = vpop.f32.mrb[73].mxu0 }
 0xc9d   :  { %v10148_v26 = vadd.f32 %v10147_v5, %v9938_v48  ;;  %11137 = vmatpush1.bf16.msra.mxu0 %v16485_v8  ;;  %v10149_v58 = vpop.f32.mrb[74].mxu0 }
 0xc9e   :  { %11228 = vmatprep.subr.bf16.mxu0 %v16504_v0  ;;  %v10150_v4 = vpop.f32.mrb[75].mxu0 }
 0xca0   :  { %12295 = vmatmul.mubr.msk.bf16.gmra.mrb[180].mxu0 %vm169_vm1, %v13218_v49 }
 0xca1   :  { %11166 = vmatprep.mubr.bf16.mxu0 %v13222_v14 }
 0xca3   :  { %v10153_v27 = vpop.f32.mrb[76].mxu0 }
 0xca4   :  { %v10154_v10 = vpop.f32.mrb[77].mxu0 }
 0xca5   :  { %v10155_v53 = vpop.f32.mrb[78].mxu0 }
 0xca6   :  { %v10156_v21 = vpop.f32.mrb[79].mxu0 }
 0xca8   :  { %12302 = vmatmul.mubr.msk.bf16.vlgmr.msra.gmra.mrb[184].mxu0 %vm169_vm1, %v16519_v17 }
 0xca9   :  { %11229 = vmatpush1.bf16.msra.mxu0 %v16500_v33  ;;  %11174 = vmatprep.mubr.bf16.mxu0 %v13222_v14 }
 0xcaa   :  { %11230 = vmatprep.subr.bf16.mxu0 %v16530_v50 }
 0xcab   :  { %v10192_v23 = vpop.f32.mrb[80].mxu0 }
 0xcac   :  { %v10193_v8 = vadd.f32 %v10192_v23, %v9983_v1  ;;  %v10194_v0 = vpop.f32.mrb[81].mxu0 }
 0xcad   :  { %v10195_v16 = vadd.f32 %v10194_v0, %v9985_v30  ;;  %11231 = vmatpush1.bf16.msra.mxu0 %v16527_v22  ;;  %v10196_v25 = vpop.f32.mrb[82].mxu0 }
 0xcae   :  { %11401 = vmatprep.subr.bf16.mxu0 %v16543_v61  ;;  %v10197_v28 = vpop.f32.mrb[83].mxu0 }
 0xcb0   :  { %12303 = vmatmul.mubr.msk.bf16.gmra.mrb[188].mxu0 %vm169_vm1, %v16548_v42 }
 0xcb1   :  { %11260 = vmatprep.mubr.bf16.mxu0 %v13222_v14 }
 0xcb3   :  { %v10200_v33 = vpop.f32.mrb[84].mxu0 }
 0xcb4   :  { %v10201_v48 = vpop.f32.mrb[85].mxu0 }
 0xcb5   :  { %v10202_v15 = vpop.f32.mrb[86].mxu0 }
 0xcb6   :  { %v10203_v20 = vpop.f32.mrb[87].mxu0 }
 0xcb8   :  { %12306 = vmatmul.mubr.msk.bf16.vlgmr.msra.gmra.mrb[192].mxu0 %vm169_vm1, %v16519_v17 }
 0xcb9   :  { %11402 = vmatpush1.bf16.msra.mxu0 %v16537_v44  ;;  %11268 = vmatprep.mubr.bf16.mxu0 %v13222_v14 }
 0xcba   :  { %11403 = vmatprep.subr.bf16.mxu0 %v16564_v38 }
 0xcbb   :  { %v10312_v22 = vpop.f32.mrb[88].mxu0 }
 0xcbc   :  { %v10419_v50 = vadd.f32 %v10312_v22, %v10099_v47  ;;  %v10314_v61 = vpop.f32.mrb[89].mxu0 }
 0xcbd   :  { %v10420_v35 = vadd.f32 %v10314_v61, %v10101_v45  ;;  %11404 = vmatpush1.bf16.msra.mxu0 %v16558_v19  ;;  %v10316_v18 = vpop.f32.mrb[90].mxu0 }
 0xcbe   :  { %11574 = vmatprep.subr.bf16.mxu0 %v16593_v31  ;;  %v10317_v7 = vpop.f32.mrb[91].mxu0 }
 0xcc0   :  { %12307 = vmatmul.mubr.msk.bf16.gmra.mrb[196].mxu0 %vm169_vm1, %v16548_v42 }
 0xcc1   :  { %11433 = vmatprep.mubr.bf16.mxu0 %v13222_v14 }
 0xcc3   :  { %v10320_v17 = vpop.f32.mrb[92].mxu0 }
 0xcc4   :  { %v10321_v44 = vpop.f32.mrb[93].mxu0 }
 0xcc5   :  { %v10322_v54 = vpop.f32.mrb[94].mxu0 }
 0xcc6   :  { %v10323_v9 = vpop.f32.mrb[95].mxu0 }
 0xcc8   :  { %12316 = vmatmul.mubr.msk.bf16.vlgmr.msra.gmra.mrb[200].mxu0 %vm169_vm1, %v16571_v36 }
 0xcc9   :  { %11575 = vmatpush1.bf16.msra.mxu0 %v16596_v46  ;;  %11441 = vmatprep.mubr.bf16.mxu0 %v13222_v14 }
 0xcca   :  { %11576 = vmatprep.subr.bf16.mxu0 %v16612_v39 }
 0xccb   :  { %v10359_v19 = vpop.f32.mrb[96].mxu0 }
 0xccc   :  { %v10421_v38 = vadd.f32 %v10359_v19, %v10146_v11  ;;  %v10361_v31 = vpop.f32.mrb[97].mxu0 }
 0xccd   :  { %v10422_v1 = vadd.f32 %v10361_v31, %v10148_v26  ;;  %11577 = vmatpush1.bf16.msra.mxu0 %v16619_v41  ;;  %v10363_v42 = vpop.f32.mrb[98].mxu0  ;;  %v11555_v41 = vsel %vm2241_vm8, %v11541_v51, %v11543_v55 }
 0xcce   :  { %11668 = vmatprep.subr.bf16.mxu0 %v16635_v24  ;;  %v10364_v30 = vpop.f32.mrb[99].mxu0 }
 0xcd0   :  { %12317 = vmatmul.mubr.msk.bf16.gmra.mrb[204].mxu0 %vm169_vm1, %v16590_v29  ;;  %v11554_v29 = vsel %vm2241_vm8, %v16642_v13, %v11541_v51 }
 0xcd1   :  { %11606 = vmatprep.mubr.bf16.mxu0 %v13222_v14 }
 0xcd3   :  { %v10367_v36 = vpop.f32.mrb[100].mxu0 }
 0xcd4   :  { %v10368_v46 = vpop.f32.mrb[101].mxu0 }
 0xcd5   :  { %v10369_v49 = vpop.f32.mrb[102].mxu0 }
 0xcd6   :  { %v10370_v39 = vpop.f32.mrb[103].mxu0 }
 0xcd8   :  { %12326 = vmatmul.mubr.msk.bf16.vlgmr.msra.gmra.mrb[208].mxu0 %vm169_vm1, %v16653_v56 }
 0xcd9   :  { %11669 = vmatpush1.bf16.msra.mxu0 %v16630_v57  ;;  %11614 = vmatprep.mubr.bf16.mxu0 %v13222_v14 }
 0xcda   :  { %11670 = vmatprep.subr.bf16.mxu0 %v11555_v41 }
 0xcdb   :  { %v10406_v24 = vpop.f32.mrb[104].mxu0 }
 0xcdc   :  { %v10423_v12 = vadd.f32 %v10406_v24, %v10193_v8  ;;  %v10408_v60 = vpop.f32.mrb[105].mxu0 }
 0xcdd   :  { %v10424_v3 = vadd.f32 %v10408_v60, %v10195_v16  ;;  %11671 = vmatpush1.bf16.msra.mxu0 %v11554_v29  ;;  %v10410_v34 = vpop.f32.mrb[106].mxu0 }
 0xcde   :  { %v10411_v52 = vpop.f32.mrb[107].mxu0 }
 0xce0   :  { %12327 = vmatmul.mubr.msk.bf16.gmra.mrb[212].mxu0 %vm169_vm1, %v16666_v43 }
 0xce1   :  { %11700 = vmatprep.mubr.bf16.mxu0 %v13222_v14 }
 0xce3   :  { %v10414_v57 = vpop.f32.mrb[108].mxu0 }
 0xce4   :  { %v10415_v47 = vpop.f32.mrb[109].mxu0 }
 0xce5   :  { %v10416_v59 = vpop.f32.mrb[110].mxu0 }
 0xce6   :  { %v10417_v45 = vpop.f32.mrb[111].mxu0 }
 0xce8   :  { %12330 = vmatmul.mubr.msk.bf16.vlgmr.msra.gmra.mrb[216].mxu0 %vm169_vm1, %v16653_v56 }
 0xce9   :  { %11708 = vmatprep.mubr.bf16.mxu0 %v13222_v14 }
 0xceb   :  { %v10532_v13 = vpop.f32.mrb[112].mxu0 }
 0xcec   :  { %v10639_v63 = vadd.f32 %v10532_v13, %v10419_v50  ;;  %v10534_v62 = vpop.f32.mrb[113].mxu0 }
 0xced   :  { %v10640_v40 = vadd.f32 %v10534_v62, %v10420_v35  ;;  %v10536_v37 = vpop.f32.mrb[114].mxu0 }
 0xcee   :  { %v10537_v32 = vpop.f32.mrb[115].mxu0 }
 0xcf0   :  { %12331 = vmatmul.mubr.msk.bf16.gmra.mrb[220].mxu0 %vm169_vm1, %v16666_v43 }
 0xcf3   :  { %v10540_v2 = vpop.f32.mrb[116].mxu0 }
 0xcf4   :  { %v10541_v6 = vpop.f32.mrb[117].mxu0 }
 0xcf5   :  { %v10542_v11 = vpop.f32.mrb[118].mxu0 }
 0xcf6   :  { %v10543_v5 = vpop.f32.mrb[119].mxu0 }
 0xcfb   :  { %v10579_v26 = vpop.f32.mrb[120].mxu0 }
 0xcfc   :  { %v10641_v58 = vadd.f32 %v10579_v26, %v10421_v38  ;;  %v10581_v4 = vpop.f32.mrb[121].mxu0 }
 0xcfd   :  { %v10642_v27 = vadd.f32 %v10581_v4, %v10422_v1  ;;  %v10583_v56 = vpop.f32.mrb[122].mxu0 }
 0xcfe   :  { %v10584_v10 = vpop.f32.mrb[123].mxu0 }
 0xd01   :  { %v16753_v14 = vpop.f32.mrb[60].mxu1 }
 0xd02   :  { %v16755_v53 = vpop.f32.mrb[61].mxu1 }
 0xd03   :  { %v10587_v21 = vpop.f32.mrb[124].mxu0  ;;  %v11219_v23 = vpop.f32.mrb[62].mxu1 }
 0xd04   :  { %v10588_v8 = vpop.f32.mrb[125].mxu0  ;;  %v11220_v0 = vpop.f32.mrb[63].mxu1 }
 0xd05   :  { %v10589_v16 = vpop.f32.mrb[126].mxu0 }
 0xd06   :  { %v10590_v43 = vpop.f32.mrb[127].mxu0 }
 0xd09   :  { %v11223_v25 = vpop.f32.mrb[64].mxu1 }
 0xd0a   :  { %v11224_v28 = vpop.f32.mrb[65].mxu1 }
 0xd0b   :  { %v10626_v33 = vpop.f32.mrb[128].mxu0  ;;  %v11225_v48 = vpop.f32.mrb[66].mxu1 }
 0xd0c   :  { %v10643_v15 = vadd.f32 %v10626_v33, %v10423_v12  ;;  %v10628_v20 = vpop.f32.mrb[129].mxu0  ;;  %v11226_v22 = vpop.f32.mrb[67].mxu1 }
 0xd0d   :  { %v10644_v50 = vadd.f32 %v10628_v20, %v10424_v3  ;;  %v10630_v61 = vpop.f32.mrb[130].mxu0 }
 0xd0e   :  { %v10631_v35 = vpop.f32.mrb[131].mxu0 }
 0xd13   :  { %v10634_v18 = vpop.f32.mrb[132].mxu0 }
 0xd14   :  { %v10635_v7 = vpop.f32.mrb[133].mxu0  ;;  %v16757_v17 = vpop.f32.mrb[68].mxu1 }
 0xd15   :  { %v10636_v44 = vpop.f32.mrb[134].mxu0  ;;  %v16759_v54 = vpop.f32.mrb[69].mxu1 }
 0xd16   :  { %v10637_v9 = vpop.f32.mrb[135].mxu0  ;;  %v11392_v19 = vpop.f32.mrb[70].mxu1 }
 0xd17   :  { %v11393_v38 = vpop.f32.mrb[71].mxu1 }
 0xd1b   :  { %v10700_v31 = vpop.f32.mrb[136].mxu0 }
 0xd1c   :  { %v10807_v1 = vadd.f32 %v10700_v31, %v10639_v63  ;;  %v10702_v42 = vpop.f32.mrb[137].mxu0  ;;  %v11396_v30 = vpop.f32.mrb[72].mxu1 }
 0xd1d   :  { %v10808_v36 = vadd.f32 %v10702_v42, %v10640_v40  ;;  %v10704_v46 = vpop.f32.mrb[138].mxu0  ;;  %v11397_v49 = vpop.f32.mrb[73].mxu1 }
 0xd1e   :  { %v10705_v55 = vpop.f32.mrb[139].mxu0  ;;  %v11398_v39 = vpop.f32.mrb[74].mxu1 }
 0xd1f   :  { %v11399_v51 = vpop.f32.mrb[75].mxu1 }
 0xd23   :  { %v10708_v41 = vpop.f32.mrb[140].mxu0 }
 0xd24   :  { %v10709_v24 = vpop.f32.mrb[141].mxu0 }
 0xd25   :  { %v10710_v29 = vpop.f32.mrb[142].mxu0  ;;  %v16761_v12 = vpop.f32.mrb[76].mxu1 }
 0xd26   :  { %v10711_v60 = vpop.f32.mrb[143].mxu0  ;;  %v16763_v3 = vpop.f32.mrb[77].mxu1 }
 0xd27   :  { %v11486_v34 = vpop.f32.mrb[78].mxu1 }
 0xd28   :  { %v11487_v52 = vpop.f32.mrb[79].mxu1 }
 0xd2b   :  { %v10747_v57 = vpop.f32.mrb[144].mxu0 }
 0xd2c   :  { %v10809_v47 = vadd.f32 %v10747_v57, %v10641_v58  ;;  %v10749_v59 = vpop.f32.mrb[145].mxu0 }
 0xd2d   :  { %v10810_v45 = vadd.f32 %v10749_v59, %v10642_v27  ;;  %v10751_v13 = vpop.f32.mrb[146].mxu0  ;;  %v11490_v63 = vpop.f32.mrb[80].mxu1 }
 0xd2e   :  { %v10752_v62 = vpop.f32.mrb[147].mxu0  ;;  %v11491_v40 = vpop.f32.mrb[81].mxu1 }
 0xd2f   :  { %v11492_v37 = vpop.f32.mrb[82].mxu1 }
 0xd30   :  { %v11493_v32 = vpop.f32.mrb[83].mxu1 }
 0xd33   :  { %v10755_v2 = vpop.f32.mrb[148].mxu0 }
 0xd34   :  { %v10756_v6 = vpop.f32.mrb[149].mxu0 }
 0xd35   :  { %v10757_v11 = vpop.f32.mrb[150].mxu0  ;;  %v16765_v5 = vpop.f32.mrb[84].mxu1 }
 0xd36   :  { %v10758_v26 = vpop.f32.mrb[151].mxu0  ;;  %v16767_v4 = vpop.f32.mrb[85].mxu1 }
 0xd37   :  { %v11659_v56 = vpop.f32.mrb[86].mxu1 }
 0xd38   :  { %v11660_v10 = vpop.f32.mrb[87].mxu1 }
 0xd3b   :  { %v10794_v21 = vpop.f32.mrb[152].mxu0 }
 0xd3c   :  { %v10811_v58 = vadd.f32 %v10794_v21, %v10643_v15  ;;  %v10796_v23 = vpop.f32.mrb[153].mxu0 }
 0xd3d   :  { %v10812_v27 = vadd.f32 %v10796_v23, %v10644_v50  ;;  %v10798_v8 = vpop.f32.mrb[154].mxu0  ;;  %v11663_v0 = vpop.f32.mrb[88].mxu1 }
 0xd3e   :  { %v10799_v16 = vpop.f32.mrb[155].mxu0  ;;  %v11664_v43 = vpop.f32.mrb[89].mxu1 }
 0xd3f   :  { %v11665_v25 = vpop.f32.mrb[90].mxu1 }
 0xd40   :  { %v11666_v28 = vpop.f32.mrb[91].mxu1 }
 0xd43   :  { %v10802_v33 = vpop.f32.mrb[156].mxu0 }
 0xd44   :  { %v10803_v48 = vpop.f32.mrb[157].mxu0 }
 0xd45   :  { %v10804_v20 = vpop.f32.mrb[158].mxu0 }
 0xd46   :  { %v10805_v22 = vpop.f32.mrb[159].mxu0 }
 0xd4b   :  { %v10948_v61 = vpop.f32.mrb[160].mxu0 }
 0xd4c   :  { %v11055_v35 = vadd.f32 %v10948_v61, %v10807_v1  ;;  %v10950_v18 = vpop.f32.mrb[161].mxu0 }
 0xd4d   :  { %v11056_v7 = vadd.f32 %v10950_v18, %v10808_v36  ;;  %v10952_v44 = vpop.f32.mrb[162].mxu0 }
 0xd4e   :  { %v10953_v9 = vpop.f32.mrb[163].mxu0 }
 0xd53   :  { %v10956_v19 = vpop.f32.mrb[164].mxu0 }
 0xd54   :  { %v10957_v15 = vpop.f32.mrb[165].mxu0 }
 0xd55   :  { %v10958_v38 = vpop.f32.mrb[166].mxu0 }
 0xd56   :  { %v10959_v50 = vpop.f32.mrb[167].mxu0 }
 0xd5b   :  { %v10995_v31 = vpop.f32.mrb[168].mxu0 }
 0xd5c   :  { %v11057_v42 = vadd.f32 %v10995_v31, %v10809_v47  ;;  %v10997_v30 = vpop.f32.mrb[169].mxu0 }
 0xd5d   :  { %v11058_v46 = vadd.f32 %v10997_v30, %v10810_v45  ;;  %v10999_v49 = vpop.f32.mrb[170].mxu0 }
 0xd5e   :  { %v11277_v55 = vadd.f32 %v16753_v14, %v11057_v42  ;;  %v11000_v39 = vpop.f32.mrb[171].mxu0 }
 0xd5f   :  { %v11278_v51 = vadd.f32 %v16755_v53, %v11058_v46 }
 0xd63   :  { %v11003_v41 = vpop.f32.mrb[172].mxu0 }
 0xd64   :  { %v11004_v1 = vpop.f32.mrb[173].mxu0 }
 0xd65   :  { %v11005_v24 = vpop.f32.mrb[174].mxu0 }
 0xd66   :  { %v11006_v36 = vpop.f32.mrb[175].mxu0 }
 0xd6b   :  { %v11042_v29 = vpop.f32.mrb[176].mxu0 }
 0xd6c   :  { %v11059_v60 = vadd.f32 %v11042_v29, %v10811_v58  ;;  %v11044_v34 = vpop.f32.mrb[177].mxu0 }
 0xd6d   :  { %v11060_v52 = vadd.f32 %v11044_v34, %v10812_v27  ;;  %v11046_v57 = vpop.f32.mrb[178].mxu0 }
 0xd6e   :  { %v11047_v59 = vpop.f32.mrb[179].mxu0 }
 0xd73   :  { %v11050_v13 = vpop.f32.mrb[180].mxu0 }
 0xd74   :  { %v11051_v47 = vpop.f32.mrb[181].mxu0 }
 0xd75   :  { %v11052_v63 = vpop.f32.mrb[182].mxu0 }
 0xd76   :  { %v11053_v45 = vpop.f32.mrb[183].mxu0 }
 0xd7b   :  { %v11168_v62 = vpop.f32.mrb[184].mxu0 }
 0xd7c   :  { %v11275_v40 = vadd.f32 %v11168_v62, %v11055_v35  ;;  %v11170_v14 = vpop.f32.mrb[185].mxu0 }
 0xd7d   :  { %v11276_v37 = vadd.f32 %v11170_v14, %v11056_v7  ;;  %v11172_v32 = vpop.f32.mrb[186].mxu0  ;;  %v11726_v7 = vpop.permute.xlu0 %11725 }
 0xd7e   :  { %v11495_v53 = vadd.f32 %v16757_v17, %v11275_v40  ;;  %v11173_v2 = vpop.f32.mrb[187].mxu0 }
 0xd7f   :  { %v11496_v6 = vadd.f32 %v16759_v54, %v11276_v37 }
 0xd83   :  { %v11176_v11 = vpop.f32.mrb[188].mxu0 }
 0xd84   :  { %v11177_v26 = vpop.f32.mrb[189].mxu0 }
 0xd85   :  { %v11178_v56 = vpop.f32.mrb[190].mxu0 }
 0xd86   :  { %v11179_v10 = vpop.f32.mrb[191].mxu0 }
 0xd8b   :  { %v11262_v21 = vpop.f32.mrb[192].mxu0 }
 0xd8c   :  { %v11279_v58 = vadd.f32 %v11262_v21, %v11059_v60  ;;  %v11264_v23 = vpop.f32.mrb[193].mxu0 }
 0xd8d   :  { %v11280_v27 = vadd.f32 %v11264_v23, %v11060_v52  ;;  %v11266_v8 = vpop.f32.mrb[194].mxu0 }
 0xd8e   :  { %v11499_v0 = vadd.f32 %v16761_v12, %v11279_v58  ;;  %v11267_v16 = vpop.f32.mrb[195].mxu0 }
 0xd8f   :  { %v11500_v43 = vadd.f32 %v16763_v3, %v11280_v27 }
 0xd93   :  { %v11270_v25 = vpop.f32.mrb[196].mxu0 }
 0xd94   :  { %v11271_v28 = vpop.f32.mrb[197].mxu0 }
 0xd95   :  { %v11272_v17 = vpop.f32.mrb[198].mxu0 }
 0xd96   :  { %v11273_v33 = vpop.f32.mrb[199].mxu0 }
 0xd9b   :  { %v11435_v48 = vpop.f32.mrb[200].mxu0 }
 0xd9c   :  { %v11497_v54 = vadd.f32 %v11435_v48, %v11277_v55  ;;  %v11437_v20 = vpop.f32.mrb[201].mxu0 }
 0xd9d   :  { %v11498_v22 = vadd.f32 %v11437_v20, %v11278_v51  ;;  %v11439_v61 = vpop.f32.mrb[202].mxu0 }
 0xd9e   :  { %v11717_v35 = vadd.f32 %v16765_v5, %v11497_v54  ;;  %v11440_v18 = vpop.f32.mrb[203].mxu0 }
 0xd9f   :  { %v11718_v44 = vadd.f32 %v16767_v4, %v11498_v22 }
 0xda0   :  { %v11730_v9 = vadd.f32 %v11726_v7, %v11717_v35 }
 0xda1   :  { %v11731_v12 = vadd.f32 %v11726_v7, %v11718_v44 }
 0xda2   :  { %11736 = vst [vmem:[%s16799_s4 + $0x10] sm:$0xff] %v11730_v9 }
 0xda3   :  { %11737 = vst [vmem:[%s16799_s4 + $0x18] sm:$0xff] %v11731_v12  ;;  %v11443_v3 = vpop.f32.mrb[204].mxu0 }
 0xda4   :  { %v11444_v19 = vpop.f32.mrb[205].mxu0 }
 0xda5   :  { %v11445_v15 = vpop.f32.mrb[206].mxu0 }
 0xda6   :  { %v11446_v38 = vpop.f32.mrb[207].mxu0 }
 0xdab   :  { %v11608_v50 = vpop.f32.mrb[208].mxu0 }
 0xdac   :  { %v11715_v5 = vadd.f32 %v11608_v50, %v11495_v53  ;;  %v11610_v31 = vpop.f32.mrb[209].mxu0 }
 0xdad   :  { %v11716_v42 = vadd.f32 %v11610_v31, %v11496_v6  ;;  %v11612_v30 = vpop.f32.mrb[210].mxu0 }
 0xdae   :  { %v11728_v4 = vadd.f32 %v11726_v7, %v11715_v5  ;;  %v11613_v46 = vpop.f32.mrb[211].mxu0 }
 0xdaf   :  { %v11729_v49 = vadd.f32 %v11726_v7, %v11716_v42 }
 0xdb0   :  { %11734 = vst [vmem:[%s16799_s4] sm:$0xff] %v11728_v4 }
 0xdb1   :  { %11735 = vst [vmem:[%s16799_s4 + $0x8] sm:$0xff] %v11729_v49 }
 0xdb3   :  { %v11616_v55 = vpop.f32.mrb[212].mxu0 }
 0xdb4   :  { %v11617_v39 = vpop.f32.mrb[213].mxu0 }
 0xdb5   :  { %v11618_v51 = vpop.f32.mrb[214].mxu0 }
 0xdb6   :  { %v11619_v41 = vpop.f32.mrb[215].mxu0 }
 0xdbb   :  { %v11702_v1 = vpop.f32.mrb[216].mxu0 }
 0xdbc   :  { %v11719_v24 = vadd.f32 %v11702_v1, %v11499_v0  ;;  %v11704_v36 = vpop.f32.mrb[217].mxu0 }
 0xdbd   :  { %v11720_v29 = vadd.f32 %v11704_v36, %v11500_v43  ;;  %v11706_v60 = vpop.f32.mrb[218].mxu0 }
 0xdbe   :  { %v11732_v34 = vadd.f32 %v11726_v7, %v11719_v24  ;;  %v11707_v52 = vpop.f32.mrb[219].mxu0 }
 0xdbf   :  { %v11733_v57 = vadd.f32 %v11726_v7, %v11720_v29 }
 0xdc0   :  { %11738 = vst [vmem:[%s16799_s4 + $0x20] sm:$0xff] %v11732_v34 }
 0xdc1   :  { %11739 = vst [vmem:[%s16799_s4 + $0x28] sm:$0xff] %v11733_v57 }
 0xdc3   :  { %v11710_v59 = vpop.f32.mrb[220].mxu0 }
 0xdc4   :  { %v11711_v13 = vpop.f32.mrb[221].mxu0 }
 0xdc5   :  { %v11712_v47 = vpop.f32.mrb[222].mxu0 }
 0xdc6   :  { %v11713_v63 = vpop.f32.mrb[223].mxu0 }

</bundles_post_ra>
